<compile_context>
chip_gen: v6e
topology: v6e:2x2x1
jax: 0.10.0
libtpu: 0.0.40
codegen_flags: <defaults>
</compile_context>

<pallas_src>
import math
from functools import partial

import jax
import jax.numpy as jnp
from jax.experimental import pallas as pl
from jax.experimental.pallas import tpu as pltpu

# ----------------------------- static model config -----------------------------
IMG = int(224 * 0.75)             # 168
PATCH = 24
GRID = IMG // PATCH               # 7
NUM_PATCHES = GRID * GRID         # 49
IN_C = 3
EMBED = 64                        # embedding_dim (patchembed hard-codes 64)
HEADS = 8
HEAD_DIM = EMBED // HEADS         # 8
MLP_HIDDEN = int(EMBED * 4.0)     # 256
SEQ = NUM_PATCHES + 1             # 50 (cls token + patches)
SEQ_PAD = 56                      # 50 padded up to a multiple of 8 sublanes
PATCH_DIM = IN_C * PATCH * PATCH  # 1728
NUM_BLOCKS = 3


# ----------------------------- in-kernel helpers -----------------------------
def _layernorm(x, w, b, eps):
    mu = jnp.mean(x, axis=-1, keepdims=True)
    var = jnp.mean(jnp.square(x - mu), axis=-1, keepdims=True)
    return (x - mu) * jax.lax.rsqrt(var + eps) * w + b


def _head_sums(x):
    # x: (rows, EMBED) -> (rows, HEADS); sum within each head's HEAD_DIM lane group (VPU/XLU).
    cols = [jnp.sum(x[:, h * HEAD_DIM:(h + 1) * HEAD_DIM], axis=-1, keepdims=True)
            for h in range(HEADS)]
    return jnp.concatenate(cols, axis=-1)


def _head_expand(a):
    # a: (rows, HEADS) -> (rows, EMBED); repeat each head weight HEAD_DIM times along lanes.
    rows = a.shape[0]
    cols = [jnp.broadcast_to(a[:, h:h + 1], (rows, HEAD_DIM)) for h in range(HEADS)]
    return jnp.concatenate(cols, axis=-1)


def _run_block(h, wqkv, bqkv, wo, bo, ln1w, ln1b, ln2w, ln2b, w1, b1, w2, b2):
    # h: (L*SEQ_PAD, EMBED); attention mixes over the L (image batch) axis per token row.
    rows = h.shape[0]
    L = rows // SEQ_PAD
    n = SEQ_PAD
    scale = 1.0 / math.sqrt(HEAD_DIM)

    hn = _layernorm(h, ln1w, ln1b, 1e-5)
    qkv = jnp.dot(hn, wqkv, preferred_element_type=jnp.float32) + bqkv      # (rows, 3E)
    q = qkv[:, :EMBED] * scale
    k = qkv[:, EMBED:2 * EMBED]
    v = qkv[:, 2 * EMBED:]

    q_l = [q[l * n:(l + 1) * n] for l in range(L)]
    k_l = [k[l * n:(l + 1) * n] for l in range(L)]
    v_l = [v[l * n:(l + 1) * n] for l in range(L)]

    attn_rows = []
    for l in range(L):
        s = [_head_sums(q_l[l] * k_l[m]) for m in range(L)]                 # (n, HEADS) each
        smax = s[0]
        for m in range(1, L):
            smax = jnp.maximum(smax, s[m])
        e = [jnp.exp(sm - smax) for sm in s]
        denom = e[0]
        for m in range(1, L):
            denom = denom + e[m]
        inv = pl.reciprocal(denom, approx=True)
        out_l = _head_expand(e[0] * inv) * v_l[0]
        for m in range(1, L):
            out_l = out_l + _head_expand(e[m] * inv) * v_l[m]
        attn_rows.append(out_l)
    attn = attn_rows[0] if L == 1 else jnp.concatenate(attn_rows, axis=0)   # (rows, E)

    proj = jnp.dot(attn, wo, preferred_element_type=jnp.float32) + bo
    feat1 = proj + h
    hn2 = _layernorm(feat1, ln2w, ln2b, 1e-5)
    # TODO(synk): tanh-approx GELU instead of exact erf GELU.
    m1 = jax.nn.gelu(jnp.dot(hn2, w1, preferred_element_type=jnp.float32) + b1,
                     approximate=True)
    m2 = jnp.dot(m1, w2, preferred_element_type=jnp.float32) + b2
    return m2 + feat1


# ----------------------------- kernels -----------------------------
def _patch_embed_kernel(p_ref, w_ref, b_ref, g_ref, beta_ref, o_ref):
    # p_ref: (B*49, 1728), w_ref: (1728, 64)
    y = jnp.dot(p_ref[...], w_ref[...], preferred_element_type=jnp.float32) + b_ref[...]
    o_ref[...] = _layernorm(y, g_ref[...], beta_ref[...], 1e-6)


def _encoder_kernel(x_ref,
                    wqkv_ref, bqkv_ref, wo_ref, bo_ref,
                    ln1w_ref, ln1b_ref, ln2w_ref, ln2b_ref,
                    w1_ref, b1_ref, w2_ref, b2_ref,
                    flnw_ref, flnb_ref,
                    rw1_ref, rb1_ref, bng_ref, bnb_ref, bnm_ref, bnv_ref,
                    rw2_ref, rb2_ref,
                    attn_ref, ratio_ref):
    i = pl.program_id(0)
    L = ratio_ref.shape[0]

    # attn_ref has a constant block index over the grid -> VMEM-resident accumulator.
    @pl.when(i == 0)
    def _():
        attn_ref[...] = x_ref[...]

    h = attn_ref[...]
    h_new = _run_block(h,
                       wqkv_ref[0], bqkv_ref[0], wo_ref[0], bo_ref[0],
                       ln1w_ref[0], ln1b_ref[0], ln2w_ref[0], ln2b_ref[0],
                       w1_ref[0], b1_ref[0], w2_ref[0], b2_ref[0])

    last = pl.num_programs(0) - 1

    @pl.when(i < last)
    def _():
        attn_ref[...] = h_new

    @pl.when(i == last)
    def _():
        # final LayerNorm (eps=1e-6) + classification ("ratio") head, fused into the tail.
        out = _layernorm(h_new, flnw_ref[...], flnb_ref[...], 1e-6)
        attn_ref[...] = out
        if L > 1:
            cls_rows = jnp.concatenate(
                [out[l * SEQ_PAD:l * SEQ_PAD + 1, :] for l in range(L)], axis=0)  # (L, E)
        else:
            cls_rows = out[0:1, :]
        z = jnp.dot(cls_rows, rw1_ref[...], preferred_element_type=jnp.float32) + rb1_ref[...]
        z = (z - bnm_ref[...]) * jax.lax.rsqrt(bnv_ref[...] + 1e-5) * bng_ref[...] + bnb_ref[...]
        z = jnp.maximum(z, 0.0)
        r = jnp.dot(z, rw2_ref[...], preferred_element_type=jnp.float32) + rb2_ref[...]
        ratio_ref[...] = (jnp.tanh(r) + 1.0) * 0.5


# ----------------------------- wrappers -----------------------------
def patch_embed(patches2d, w, b, g, beta):
    M = patches2d.shape[0]
    return pl.pallas_call(
        _patch_embed_kernel,
        out_shape=jax.ShapeDtypeStruct((M, EMBED), jnp.float32),
        grid=(1,),
        in_specs=[
            pl.BlockSpec((M, PATCH_DIM), lambda i: (0, 0)),
            pl.BlockSpec((PATCH_DIM, EMBED), lambda i: (0, 0)),
            pl.BlockSpec((1, EMBED), lambda i: (0, 0)),
            pl.BlockSpec((1, EMBED), lambda i: (0, 0)),
            pl.BlockSpec((1, EMBED), lambda i: (0, 0)),
        ],
        out_specs=pl.BlockSpec((M, EMBED), lambda i: (0, 0)),
        compiler_params=pltpu.CompilerParams(dimension_semantics=("arbitrary",)),
    )(patches2d, w, b, g, beta)


def fused_encoder(h_flat, p):
    R = h_flat.shape[0]
    B = R // SEQ_PAD
    stacked = [p["blk_wqkv"], p["blk_bqkv"], p["blk_wo"], p["blk_bo"],
               p["blk_ln1w"], p["blk_ln1b"], p["blk_ln2w"], p["blk_ln2b"],
               p["blk_w1"], p["blk_b1"], p["blk_w2"], p["blk_b2"]]
    tail = [p["final_ln_w"], p["final_ln_b"],
            p["ratio_w1"], p["ratio_b1"],
            p["bn_g"], p["bn_b"], p["bn_m"], p["bn_v"],
            p["ratio_w2"], p["ratio_b2"]]

    in_specs = [pl.BlockSpec((R, EMBED), lambda i: (0, 0))]
    in_specs += [pl.BlockSpec((1,) + a.shape[1:], lambda i: (i, 0, 0)) for a in stacked]
    in_specs += [pl.BlockSpec(a.shape, lambda i: (0, 0)) for a in tail]

    return pl.pallas_call(
        _encoder_kernel,
        out_shape=(jax.ShapeDtypeStruct((R, EMBED), jnp.float32),
                   jax.ShapeDtypeStruct((B, 1), jnp.float32)),
        grid=(NUM_BLOCKS,),
        in_specs=in_specs,
        out_specs=(pl.BlockSpec((R, EMBED), lambda i: (0, 0)),
                   pl.BlockSpec((B, 1), lambda i: (0, 0))),
        compiler_params=pltpu.CompilerParams(dimension_semantics=("arbitrary",)),
    )(h_flat, *stacked, *tail)


# ----------------------------- parameter init (deterministic, synthetic) -----------------------------
def init_params(key):
    keys = iter(jax.random.split(key, 64))

    def nrm(shape, std):
        return std * jax.random.normal(next(keys), shape, jnp.float32)

    p = {}
    fan_out = EMBED * PATCH * PATCH
    p["conv_w"] = nrm((EMBED, IN_C, PATCH, PATCH), math.sqrt(2.0 / fan_out))  # kaiming fan_out
    p["conv_b"] = jnp.zeros((1, EMBED), jnp.float32)
    p["pe_ln_w"] = jnp.ones((1, EMBED), jnp.float32)
    p["pe_ln_b"] = jnp.zeros((1, EMBED), jnp.float32)
    p["cls_token"] = nrm((1, 1, EMBED), 0.02)
    p["pos_embed"] = nrm((1, SEQ, EMBED), 0.02)

    wqkv, bqkv, wo, bo = [], [], [], []
    ln1w, ln1b, ln2w, ln2b = [], [], [], []
    w1, b1, w2, b2 = [], [], [], []
    for _ in range(NUM_BLOCKS):
        a = math.sqrt(6.0 / (EMBED + 3 * EMBED))
        in_proj_w = jax.random.uniform(next(keys), (3 * EMBED, EMBED), jnp.float32, -a, a)
        wqkv.append(in_proj_w.T)                                   # (64, 192): q | k | v columns
        bqkv.append(jnp.zeros((1, 3 * EMBED), jnp.float32))
        wo.append(nrm((EMBED, EMBED), 0.01).T)
        bo.append(jnp.zeros((1, EMBED), jnp.float32))
        ln1w.append(jnp.ones((1, EMBED), jnp.float32))
        ln1b.append(jnp.zeros((1, EMBED), jnp.float32))
        ln2w.append(jnp.ones((1, EMBED), jnp.float32))
        ln2b.append(jnp.zeros((1, EMBED), jnp.float32))
        w1.append(nrm((MLP_HIDDEN, EMBED), 0.01).T)
        b1.append(jnp.zeros((1, MLP_HIDDEN), jnp.float32))
        w2.append(nrm((EMBED, MLP_HIDDEN), 0.01).T)
        b2.append(jnp.zeros((1, EMBED), jnp.float32))

    p["blk_wqkv"] = jnp.stack(wqkv)      # (3, 64, 192)
    p["blk_bqkv"] = jnp.stack(bqkv)      # (3, 1, 192)
    p["blk_wo"] = jnp.stack(wo)          # (3, 64, 64)
    p["blk_bo"] = jnp.stack(bo)          # (3, 1, 64)
    p["blk_ln1w"] = jnp.stack(ln1w)      # (3, 1, 64)
    p["blk_ln1b"] = jnp.stack(ln1b)
    p["blk_ln2w"] = jnp.stack(ln2w)
    p["blk_ln2b"] = jnp.stack(ln2b)
    p["blk_w1"] = jnp.stack(w1)          # (3, 64, 256)
    p["blk_b1"] = jnp.stack(b1)          # (3, 1, 256)
    p["blk_w2"] = jnp.stack(w2)          # (3, 256, 64)
    p["blk_b2"] = jnp.stack(b2)          # (3, 1, 64)

    p["final_ln_w"] = jnp.ones((1, EMBED), jnp.float32)
    p["final_ln_b"] = jnp.zeros((1, EMBED), jnp.float32)

    p["ratio_w1"] = nrm((16, EMBED), 0.01).T
    p["ratio_b1"] = jnp.zeros((1, 16), jnp.float32)
    p["bn_g"] = jnp.ones((1, 16), jnp.float32)
    p["bn_b"] = jnp.zeros((1, 16), jnp.float32)
    p["bn_m"] = jnp.zeros((1, 16), jnp.float32)
    p["bn_v"] = jnp.ones((1, 16), jnp.float32)
    p["ratio_w2"] = nrm((1, 16), 0.01).T
    p["ratio_b2"] = jnp.zeros((1, 1), jnp.float32)
    return p


# ----------------------------- forward -----------------------------
def dct_detection_forward(img, p):
    B = img.shape[0]
    # patchify NCHW -> (B*num_patches, C*PATCH*PATCH) in (c, kh, kw) order, matching
    # the Conv2d(kernel=stride=PATCH) weight layout (XLA glue; matmul is in Pallas).
    x = img.reshape(B, IN_C, GRID, PATCH, GRID, PATCH)
    x = x.transpose(0, 2, 4, 1, 3, 5).reshape(B * NUM_PATCHES, PATCH_DIM)
    conv_w2d = p["conv_w"].reshape(EMBED, PATCH_DIM).T                    # (1728, 64)
    tokens = patch_embed(x, conv_w2d, p["conv_b"], p["pe_ln_w"], p["pe_ln_b"])
    tokens = tokens.reshape(B, NUM_PATCHES, EMBED)                        # (B, 49, 64)

    # cls token + positional embedding, pad token axis 50 -> 56 for sublane alignment (glue)
    cls = jnp.broadcast_to(p["cls_token"], (B, 1, EMBED))
    h = jnp.concatenate([cls, tokens], axis=1) + p["pos_embed"]           # (B, 50, 64)
    h = jnp.pad(h, ((0, 0), (0, SEQ_PAD - SEQ), (0, 0)))                  # (B, 56, 64)
    h_flat = h.reshape(B * SEQ_PAD, EMBED)

    # fused: 3 encoder blocks + final LayerNorm + ratio head in one pallas_call
    attn_flat, cls_ratio = fused_encoder(h_flat, p)
    attention_output = attn_flat.reshape(B, SEQ_PAD, EMBED)[:, :SEQ, :]   # (B, 50, 64)
    return attention_output, cls_ratio


if __name__ == "__main__":
    key = jax.random.PRNGKey(0)
    pkey, xkey = jax.random.split(key)
    params = init_params(pkey)
    img = jax.random.normal(xkey, (2, IN_C, IMG, IMG), jnp.float32)       # (2, 3, 168, 168)

    fwd = jax.jit(partial(dct_detection_forward, p=params))
    attn_out, cls_ratio = fwd(img)
    jax.block_until_ready(attn_out)
    jax.block_until_ready(cls_ratio)

    assert attn_out.shape == (2, SEQ, EMBED)
    assert cls_ratio.shape == (2, 1)
    assert bool(jnp.all(jnp.isfinite(attn_out)))
    assert bool(jnp.all(jnp.isfinite(cls_ratio)))
    assert bool(jnp.all((cls_ratio >= 0.0) & (cls_ratio <= 1.0)))
    print("KERNEL_OK")
</pallas_src>

<mosaic_0001>
module attributes {stable_mosaic.version = 11 : i64} {
  func.func @_patch_embed_kernel(%arg0: i32, %arg1: memref<98x1728xf32, #tpu.memory_space<vmem>>, %arg2: memref<1728x64xf32, #tpu.memory_space<vmem>>, %arg3: memref<1x64xf32, #tpu.memory_space<vmem>>, %arg4: memref<1x64xf32, #tpu.memory_space<vmem>>, %arg5: memref<1x64xf32, #tpu.memory_space<vmem>>, %arg6: memref<98x64xf32, #tpu.memory_space<vmem>>) attributes {dimension_semantics = [#tpu.dimension_semantics<arbitrary>], iteration_bounds = array<i64: 1>, scalar_prefetch = 0 : i64, scratch_operands = 0 : i64, tpu.core_type = #tpu.core_type<tc>, window_params = [{pipeline_mode = #tpu.pipeline_mode<synchronous>, transform_indices = @transform_0, window_bounds = array<i64: 98, 1728>}, {pipeline_mode = #tpu.pipeline_mode<synchronous>, transform_indices = @transform_1, window_bounds = array<i64: 1728, 64>}, {pipeline_mode = #tpu.pipeline_mode<synchronous>, transform_indices = @transform_2, window_bounds = array<i64: 1, 64>}, {pipeline_mode = #tpu.pipeline_mode<synchronous>, transform_indices = @transform_3, window_bounds = array<i64: 1, 64>}, {pipeline_mode = #tpu.pipeline_mode<synchronous>, transform_indices = @transform_4, window_bounds = array<i64: 1, 64>}, {pipeline_mode = #tpu.pipeline_mode<synchronous>, transform_indices = @transform_5, window_bounds = array<i64: 98, 64>}]} {
    %c0 = arith.constant 0 : index
    %c0_0 = arith.constant 0 : index
    %0 = vector.load %arg1[%c0, %c0_0] : memref<98x1728xf32, #tpu.memory_space<vmem>>, vector<98x1728xf32>
    %c0_1 = arith.constant 0 : index
    %c0_2 = arith.constant 0 : index
    %1 = vector.load %arg2[%c0_1, %c0_2] : memref<1728x64xf32, #tpu.memory_space<vmem>>, vector<1728x64xf32>
    %cst = arith.constant dense<0.000000e+00> : vector<98x64xf32>
    %2 = tpu.matmul %0, %1, %cst {dimension_numbers = #tpu.dot_dimension_numbers<[1], [0], [0], [1], [0, 0, 1, 1], [], []>} : vector<98x1728xf32>, vector<1728x64xf32>, vector<98x64xf32> -> vector<98x64xf32>
    %c0_3 = arith.constant 0 : index
    %c0_4 = arith.constant 0 : index
    %3 = vector.load %arg3[%c0_3, %c0_4] : memref<1x64xf32, #tpu.memory_space<vmem>>, vector<1x64xf32>
    %4 = vector.broadcast %3 : vector<1x64xf32> to vector<98x64xf32>
    %5 = arith.addf %2, %4 : vector<98x64xf32>
    %c0_5 = arith.constant 0 : index
    %c0_6 = arith.constant 0 : index
    %6 = vector.load %arg4[%c0_5, %c0_6] : memref<1x64xf32, #tpu.memory_space<vmem>>, vector<1x64xf32>
    %c0_7 = arith.constant 0 : index
    %c0_8 = arith.constant 0 : index
    %7 = vector.load %arg5[%c0_7, %c0_8] : memref<1x64xf32, #tpu.memory_space<vmem>>, vector<1x64xf32>
    %cst_9 = arith.constant dense<0.000000e+00> : vector<98xf32>
    %8 = vector.multi_reduction <add>, %5, %cst_9 [1] : vector<98x64xf32> to vector<98xf32>
    %9 = vector.shape_cast %8 : vector<98xf32> to vector<98x1xf32>
    %cst_10 = arith.constant 6.400000e+01 : f32
    %10 = vector.broadcast %cst_10 : f32 to vector<98x1xf32>
    %11 = arith.divf %9, %10 : vector<98x1xf32>
    %12 = vector.broadcast %11 : vector<98x1xf32> to vector<98x64xf32>
    %13 = arith.subf %5, %12 : vector<98x64xf32>
    %14 = arith.mulf %13, %13 : vector<98x64xf32>
    %cst_11 = arith.constant dense<0.000000e+00> : vector<98xf32>
    %15 = vector.multi_reduction <add>, %14, %cst_11 [1] : vector<98x64xf32> to vector<98xf32>
    %16 = vector.shape_cast %15 : vector<98xf32> to vector<98x1xf32>
    %cst_12 = arith.constant 6.400000e+01 : f32
    %17 = vector.broadcast %cst_12 : f32 to vector<98x1xf32>
    %18 = arith.divf %16, %17 : vector<98x1xf32>
    %19 = vector.broadcast %11 : vector<98x1xf32> to vector<98x64xf32>
    %20 = arith.subf %5, %19 : vector<98x64xf32>
    %cst_13 = arith.constant 9.99999997E-7 : f32
    %21 = vector.broadcast %cst_13 : f32 to vector<98x1xf32>
    %22 = arith.addf %18, %21 : vector<98x1xf32>
    %23 = math.rsqrt %22 : vector<98x1xf32>
    %24 = vector.broadcast %23 : vector<98x1xf32> to vector<98x64xf32>
    %25 = arith.mulf %20, %24 : vector<98x64xf32>
    %26 = vector.broadcast %6 : vector<1x64xf32> to vector<98x64xf32>
    %27 = arith.mulf %25, %26 : vector<98x64xf32>
    %28 = vector.broadcast %7 : vector<1x64xf32> to vector<98x64xf32>
    %29 = arith.addf %27, %28 : vector<98x64xf32>
    %c0_14 = arith.constant 0 : index
    %c0_15 = arith.constant 0 : index
    %30 = vector.load %arg6[%c0_14, %c0_15] : memref<98x64xf32, #tpu.memory_space<vmem>>, vector<98x64xf32>
    tpu.vector_store %arg6[%c0_14, %c0_15], %29 {strides = array<i32>} : memref<98x64xf32, #tpu.memory_space<vmem>>, vector<98x64xf32>,
    return
  }
  func.func @transform_0(%arg0: i32) -> (i32, i32) {
    %c0_i32 = arith.constant 0 : i32
    %c0_i32_0 = arith.constant 0 : i32
    %c0_i32_1 = arith.constant 0 : i32
    return %c0_i32, %c0_i32_0 : i32, i32
  }
  func.func @transform_1(%arg0: i32) -> (i32, i32) {
    %c0_i32 = arith.constant 0 : i32
    %c0_i32_0 = arith.constant 0 : i32
    %c0_i32_1 = arith.constant 0 : i32
    return %c0_i32, %c0_i32_0 : i32, i32
  }
  func.func @transform_2(%arg0: i32) -> (i32, i32) {
    %c0_i32 = arith.constant 0 : i32
    %c0_i32_0 = arith.constant 0 : i32
    %c0_i32_1 = arith.constant 0 : i32
    return %c0_i32, %c0_i32_0 : i32, i32
  }
  func.func @transform_3(%arg0: i32) -> (i32, i32) {
    %c0_i32 = arith.constant 0 : i32
    %c0_i32_0 = arith.constant 0 : i32
    %c0_i32_1 = arith.constant 0 : i32
    return %c0_i32, %c0_i32_0 : i32, i32
  }
  func.func @transform_4(%arg0: i32) -> (i32, i32) {
    %c0_i32 = arith.constant 0 : i32
    %c0_i32_0 = arith.constant 0 : i32
    %c0_i32_1 = arith.constant 0 : i32
    return %c0_i32, %c0_i32_0 : i32, i32
  }
  func.func @transform_5(%arg0: i32) -> (i32, i32) {
    %c0_i32 = arith.constant 0 : i32
    %c0_i32_0 = arith.constant 0 : i32
    %c0_i32_1 = arith.constant 0 : i32
    return %c0_i32, %c0_i32_0 : i32, i32
  }
}

module attributes {stable_mosaic.version = 11 : i64} {
  func.func @_encoder_kernel(%arg0: i32, %arg1: memref<112x64xf32, #tpu.memory_space<vmem>>, %arg2: memref<1x64x192xf32, #tpu.memory_space<vmem>>, %arg3: memref<1x1x192xf32, #tpu.memory_space<vmem>>, %arg4: memref<1x64x64xf32, #tpu.memory_space<vmem>>, %arg5: memref<1x1x64xf32, #tpu.memory_space<vmem>>, %arg6: memref<1x1x64xf32, #tpu.memory_space<vmem>>, %arg7: memref<1x1x64xf32, #tpu.memory_space<vmem>>, %arg8: memref<1x1x64xf32, #tpu.memory_space<vmem>>, %arg9: memref<1x1x64xf32, #tpu.memory_space<vmem>>, %arg10: memref<1x64x256xf32, #tpu.memory_space<vmem>>, %arg11: memref<1x1x256xf32, #tpu.memory_space<vmem>>, %arg12: memref<1x256x64xf32, #tpu.memory_space<vmem>>, %arg13: memref<1x1x64xf32, #tpu.memory_space<vmem>>, %arg14: memref<1x64xf32, #tpu.memory_space<vmem>>, %arg15: memref<1x64xf32, #tpu.memory_space<vmem>>, %arg16: memref<64x16xf32, #tpu.memory_space<vmem>>, %arg17: memref<1x16xf32, #tpu.memory_space<vmem>>, %arg18: memref<1x16xf32, #tpu.memory_space<vmem>>, %arg19: memref<1x16xf32, #tpu.memory_space<vmem>>, %arg20: memref<1x16xf32, #tpu.memory_space<vmem>>, %arg21: memref<1x16xf32, #tpu.memory_space<vmem>>, %arg22: memref<16x1xf32, #tpu.memory_space<vmem>>, %arg23: memref<1x1xf32, #tpu.memory_space<vmem>>, %arg24: memref<112x64xf32, #tpu.memory_space<vmem>>, %arg25: memref<2x1xf32, #tpu.memory_space<vmem>>) attributes {dimension_semantics = [#tpu.dimension_semantics<arbitrary>], iteration_bounds = array<i64: 3>, scalar_prefetch = 0 : i64, scratch_operands = 0 : i64, tpu.core_type = #tpu.core_type<tc>, window_params = [{pipeline_mode = #tpu.pipeline_mode<synchronous>, transform_indices = @transform_0, window_bounds = array<i64: 112, 64>}, {transform_indices = @transform_1, window_bounds = array<i64: 1, 64, 192>}, {transform_indices = @transform_2, window_bounds = array<i64: 1, 1, 192>}, {transform_indices = @transform_3, window_bounds = array<i64: 1, 64, 64>}, {transform_indices = @transform_4, window_bounds = array<i64: 1, 1, 64>}, {transform_indices = @transform_5, window_bounds = array<i64: 1, 1, 64>}, {transform_indices = @transform_6, window_bounds = array<i64: 1, 1, 64>}, {transform_indices = @transform_7, window_bounds = array<i64: 1, 1, 64>}, {transform_indices = @transform_8, window_bounds = array<i64: 1, 1, 64>}, {transform_indices = @transform_9, window_bounds = array<i64: 1, 64, 256>}, {transform_indices = @transform_10, window_bounds = array<i64: 1, 1, 256>}, {transform_indices = @transform_11, window_bounds = array<i64: 1, 256, 64>}, {transform_indices = @transform_12, window_bounds = array<i64: 1, 1, 64>}, {pipeline_mode = #tpu.pipeline_mode<synchronous>, transform_indices = @transform_13, window_bounds = array<i64: 1, 64>}, {pipeline_mode = #tpu.pipeline_mode<synchronous>, transform_indices = @transform_14, window_bounds = array<i64: 1, 64>}, {pipeline_mode = #tpu.pipeline_mode<synchronous>, transform_indices = @transform_15, window_bounds = array<i64: 64, 16>}, {pipeline_mode = #tpu.pipeline_mode<synchronous>, transform_indices = @transform_16, window_bounds = array<i64: 1, 16>}, {pipeline_mode = #tpu.pipeline_mode<synchronous>, transform_indices = @transform_17, window_bounds = array<i64: 1, 16>}, {pipeline_mode = #tpu.pipeline_mode<synchronous>, transform_indices = @transform_18, window_bounds = array<i64: 1, 16>}, {pipeline_mode = #tpu.pipeline_mode<synchronous>, transform_indices = @transform_19, window_bounds = array<i64: 1, 16>}, {pipeline_mode = #tpu.pipeline_mode<synchronous>, transform_indices = @transform_20, window_bounds = array<i64: 1, 16>}, {pipeline_mode = #tpu.pipeline_mode<synchronous>, transform_indices = @transform_21, window_bounds = array<i64: 16, 1>}, {pipeline_mode = #tpu.pipeline_mode<synchronous>, transform_indices = @transform_22, window_bounds = array<i64: 1, 1>}, {pipeline_mode = #tpu.pipeline_mode<synchronous>, transform_indices = @transform_23, window_bounds = array<i64: 112, 64>}, {pipeline_mode = #tpu.pipeline_mode<synchronous>, transform_indices = @transform_24, window_bounds = array<i64: 2, 1>}]} {
    %c0_i32 = arith.constant 0 : i32
    %0 = arith.cmpi eq, %arg0, %c0_i32 : i32
    %1 = arith.extui %0 : i1 to i32
    %c0_i32_0 = arith.constant 0 : i32
    %2 = arith.cmpi ne, %1, %c0_i32_0 : i32
    scf.if %2 {
      %c0_91 = arith.constant 0 : index
      %c0_92 = arith.constant 0 : index
      %345 = vector.load %arg1[%c0_91, %c0_92] : memref<112x64xf32, #tpu.memory_space<vmem>>, vector<112x64xf32>
      %c0_93 = arith.constant 0 : index
      %c0_94 = arith.constant 0 : index
      %346 = vector.load %arg24[%c0_93, %c0_94] : memref<112x64xf32, #tpu.memory_space<vmem>>, vector<112x64xf32>
      tpu.vector_store %arg24[%c0_93, %c0_94], %345 {strides = array<i32>} : memref<112x64xf32, #tpu.memory_space<vmem>>, vector<112x64xf32>,
    } else {
    }
    %c0 = arith.constant 0 : index
    %c0_1 = arith.constant 0 : index
    %3 = vector.load %arg24[%c0, %c0_1] : memref<112x64xf32, #tpu.memory_space<vmem>>, vector<112x64xf32>
    %c0_2 = arith.constant 0 : index
    %c0_3 = arith.constant 0 : index
    %c0_4 = arith.constant 0 : index
    %4 = vector.load %arg2[%c0_2, %c0_3, %c0_4] : memref<1x64x192xf32, #tpu.memory_space<vmem>>, vector<1x64x192xf32>
    %5 = vector.shape_cast %4 : vector<1x64x192xf32> to vector<64x192xf32>
    %c0_5 = arith.constant 0 : index
    %c0_6 = arith.constant 0 : index
    %c0_7 = arith.constant 0 : index
    %6 = vector.load %arg3[%c0_5, %c0_6, %c0_7] : memref<1x1x192xf32, #tpu.memory_space<vmem>>, vector<1x1x192xf32>
    %7 = vector.shape_cast %6 : vector<1x1x192xf32> to vector<1x192xf32>
    %c0_8 = arith.constant 0 : index
    %c0_9 = arith.constant 0 : index
    %c0_10 = arith.constant 0 : index
    %8 = vector.load %arg4[%c0_8, %c0_9, %c0_10] : memref<1x64x64xf32, #tpu.memory_space<vmem>>, vector<1x64x64xf32>
    %9 = vector.shape_cast %8 : vector<1x64x64xf32> to vector<64x64xf32>
    %c0_11 = arith.constant 0 : index
    %c0_12 = arith.constant 0 : index
    %c0_13 = arith.constant 0 : index
    %10 = vector.load %arg5[%c0_11, %c0_12, %c0_13] : memref<1x1x64xf32, #tpu.memory_space<vmem>>, vector<1x1x64xf32>
    %11 = vector.shape_cast %10 : vector<1x1x64xf32> to vector<1x64xf32>
    %c0_14 = arith.constant 0 : index
    %c0_15 = arith.constant 0 : index
    %c0_16 = arith.constant 0 : index
    %12 = vector.load %arg6[%c0_14, %c0_15, %c0_16] : memref<1x1x64xf32, #tpu.memory_space<vmem>>, vector<1x1x64xf32>
    %13 = vector.shape_cast %12 : vector<1x1x64xf32> to vector<1x64xf32>
    %c0_17 = arith.constant 0 : index
    %c0_18 = arith.constant 0 : index
    %c0_19 = arith.constant 0 : index
    %14 = vector.load %arg7[%c0_17, %c0_18, %c0_19] : memref<1x1x64xf32, #tpu.memory_space<vmem>>, vector<1x1x64xf32>
    %15 = vector.shape_cast %14 : vector<1x1x64xf32> to vector<1x64xf32>
    %c0_20 = arith.constant 0 : index
    %c0_21 = arith.constant 0 : index
    %c0_22 = arith.constant 0 : index
    %16 = vector.load %arg8[%c0_20, %c0_21, %c0_22] : memref<1x1x64xf32, #tpu.memory_space<vmem>>, vector<1x1x64xf32>
    %17 = vector.shape_cast %16 : vector<1x1x64xf32> to vector<1x64xf32>
    %c0_23 = arith.constant 0 : index
    %c0_24 = arith.constant 0 : index
    %c0_25 = arith.constant 0 : index
    %18 = vector.load %arg9[%c0_23, %c0_24, %c0_25] : memref<1x1x64xf32, #tpu.memory_space<vmem>>, vector<1x1x64xf32>
    %19 = vector.shape_cast %18 : vector<1x1x64xf32> to vector<1x64xf32>
    %c0_26 = arith.constant 0 : index
    %c0_27 = arith.constant 0 : index
    %c0_28 = arith.constant 0 : index
    %20 = vector.load %arg10[%c0_26, %c0_27, %c0_28] : memref<1x64x256xf32, #tpu.memory_space<vmem>>, vector<1x64x256xf32>
    %21 = vector.shape_cast %20 : vector<1x64x256xf32> to vector<64x256xf32>
    %c0_29 = arith.constant 0 : index
    %c0_30 = arith.constant 0 : index
    %c0_31 = arith.constant 0 : index
    %22 = vector.load %arg11[%c0_29, %c0_30, %c0_31] : memref<1x1x256xf32, #tpu.memory_space<vmem>>, vector<1x1x256xf32>
    %23 = vector.shape_cast %22 : vector<1x1x256xf32> to vector<1x256xf32>
    %c0_32 = arith.constant 0 : index
    %c0_33 = arith.constant 0 : index
    %c0_34 = arith.constant 0 : index
    %24 = vector.load %arg12[%c0_32, %c0_33, %c0_34] : memref<1x256x64xf32, #tpu.memory_space<vmem>>, vector<1x256x64xf32>
    %25 = vector.shape_cast %24 : vector<1x256x64xf32> to vector<256x64xf32>
    %c0_35 = arith.constant 0 : index
    %c0_36 = arith.constant 0 : index
    %c0_37 = arith.constant 0 : index
    %26 = vector.load %arg13[%c0_35, %c0_36, %c0_37] : memref<1x1x64xf32, #tpu.memory_space<vmem>>, vector<1x1x64xf32>
    %27 = vector.shape_cast %26 : vector<1x1x64xf32> to vector<1x64xf32>
    %cst = arith.constant dense<0.000000e+00> : vector<112xf32>
    %28 = vector.multi_reduction <add>, %3, %cst [1] : vector<112x64xf32> to vector<112xf32>
    %29 = vector.shape_cast %28 : vector<112xf32> to vector<112x1xf32>
    %cst_38 = arith.constant 6.400000e+01 : f32
    %30 = vector.broadcast %cst_38 : f32 to vector<112x1xf32>
    %31 = arith.divf %29, %30 : vector<112x1xf32>
    %32 = vector.broadcast %31 : vector<112x1xf32> to vector<112x64xf32>
    %33 = arith.subf %3, %32 : vector<112x64xf32>
    %34 = arith.mulf %33, %33 : vector<112x64xf32>
    %cst_39 = arith.constant dense<0.000000e+00> : vector<112xf32>
    %35 = vector.multi_reduction <add>, %34, %cst_39 [1] : vector<112x64xf32> to vector<112xf32>
    %36 = vector.shape_cast %35 : vector<112xf32> to vector<112x1xf32>
    %cst_40 = arith.constant 6.400000e+01 : f32
    %37 = vector.broadcast %cst_40 : f32 to vector<112x1xf32>
    %38 = arith.divf %36, %37 : vector<112x1xf32>
    %39 = vector.broadcast %31 : vector<112x1xf32> to vector<112x64xf32>
    %40 = arith.subf %3, %39 : vector<112x64xf32>
    %cst_41 = arith.constant 9.99999974E-6 : f32
    %41 = vector.broadcast %cst_41 : f32 to vector<112x1xf32>
    %42 = arith.addf %38, %41 : vector<112x1xf32>
    %43 = math.rsqrt %42 : vector<112x1xf32>
    %44 = vector.broadcast %43 : vector<112x1xf32> to vector<112x64xf32>
    %45 = arith.mulf %40, %44 : vector<112x64xf32>
    %46 = vector.broadcast %13 : vector<1x64xf32> to vector<112x64xf32>
    %47 = arith.mulf %45, %46 : vector<112x64xf32>
    %48 = vector.broadcast %15 : vector<1x64xf32> to vector<112x64xf32>
    %49 = arith.addf %47, %48 : vector<112x64xf32>
    %cst_42 = arith.constant dense<0.000000e+00> : vector<112x192xf32>
    %50 = tpu.matmul %49, %5, %cst_42 {dimension_numbers = #tpu.dot_dimension_numbers<[1], [0], [0], [1], [0, 0, 1, 1], [], []>} : vector<112x64xf32>, vector<64x192xf32>, vector<112x192xf32> -> vector<112x192xf32>
    %51 = vector.broadcast %7 : vector<1x192xf32> to vector<112x192xf32>
    %52 = arith.addf %50, %51 : vector<112x192xf32>
    %53 = vector.extract_strided_slice %52 {offsets = [0, 0], sizes = [112, 64], strides = [1, 1]} : vector<112x192xf32> to vector<112x64xf32>
    %cst_43 = arith.constant 0.353553385 : f32
    %54 = vector.broadcast %cst_43 : f32 to vector<112x64xf32>
    %55 = arith.mulf %53, %54 : vector<112x64xf32>
    %56 = vector.extract_strided_slice %52 {offsets = [0, 64], sizes = [112, 64], strides = [1, 1]} : vector<112x192xf32> to vector<112x64xf32>
    %57 = vector.extract_strided_slice %52 {offsets = [0, 128], sizes = [112, 64], strides = [1, 1]} : vector<112x192xf32> to vector<112x64xf32>
    %58 = vector.extract_strided_slice %55 {offsets = [0, 0], sizes = [56, 64], strides = [1, 1]} : vector<112x64xf32> to vector<56x64xf32>
    %59 = vector.extract_strided_slice %55 {offsets = [56, 0], sizes = [56, 64], strides = [1, 1]} : vector<112x64xf32> to vector<56x64xf32>
    %60 = vector.extract_strided_slice %56 {offsets = [0, 0], sizes = [56, 64], strides = [1, 1]} : vector<112x64xf32> to vector<56x64xf32>
    %61 = vector.extract_strided_slice %56 {offsets = [56, 0], sizes = [56, 64], strides = [1, 1]} : vector<112x64xf32> to vector<56x64xf32>
    %62 = vector.extract_strided_slice %57 {offsets = [0, 0], sizes = [56, 64], strides = [1, 1]} : vector<112x64xf32> to vector<56x64xf32>
    %63 = vector.extract_strided_slice %57 {offsets = [56, 0], sizes = [56, 64], strides = [1, 1]} : vector<112x64xf32> to vector<56x64xf32>
    %64 = arith.mulf %58, %60 : vector<56x64xf32>
    %65 = vector.extract_strided_slice %64 {offsets = [0, 0], sizes = [56, 8], strides = [1, 1]} : vector<56x64xf32> to vector<56x8xf32>
    %cst_44 = arith.constant dense<0.000000e+00> : vector<56xf32>
    %66 = vector.multi_reduction <add>, %65, %cst_44 [1] : vector<56x8xf32> to vector<56xf32>
    %67 = vector.shape_cast %66 : vector<56xf32> to vector<56x1xf32>
    %68 = vector.extract_strided_slice %64 {offsets = [0, 8], sizes = [56, 8], strides = [1, 1]} : vector<56x64xf32> to vector<56x8xf32>
    %cst_45 = arith.constant dense<0.000000e+00> : vector<56xf32>
    %69 = vector.multi_reduction <add>, %68, %cst_45 [1] : vector<56x8xf32> to vector<56xf32>
    %70 = vector.shape_cast %69 : vector<56xf32> to vector<56x1xf32>
    %71 = vector.extract_strided_slice %64 {offsets = [0, 16], sizes = [56, 8], strides = [1, 1]} : vector<56x64xf32> to vector<56x8xf32>
    %cst_46 = arith.constant dense<0.000000e+00> : vector<56xf32>
    %72 = vector.multi_reduction <add>, %71, %cst_46 [1] : vector<56x8xf32> to vector<56xf32>
    %73 = vector.shape_cast %72 : vector<56xf32> to vector<56x1xf32>
    %74 = vector.extract_strided_slice %64 {offsets = [0, 24], sizes = [56, 8], strides = [1, 1]} : vector<56x64xf32> to vector<56x8xf32>
    %cst_47 = arith.constant dense<0.000000e+00> : vector<56xf32>
    %75 = vector.multi_reduction <add>, %74, %cst_47 [1] : vector<56x8xf32> to vector<56xf32>
    %76 = vector.shape_cast %75 : vector<56xf32> to vector<56x1xf32>
    %77 = vector.extract_strided_slice %64 {offsets = [0, 32], sizes = [56, 8], strides = [1, 1]} : vector<56x64xf32> to vector<56x8xf32>
    %cst_48 = arith.constant dense<0.000000e+00> : vector<56xf32>
    %78 = vector.multi_reduction <add>, %77, %cst_48 [1] : vector<56x8xf32> to vector<56xf32>
    %79 = vector.shape_cast %78 : vector<56xf32> to vector<56x1xf32>
    %80 = vector.extract_strided_slice %64 {offsets = [0, 40], sizes = [56, 8], strides = [1, 1]} : vector<56x64xf32> to vector<56x8xf32>
    %cst_49 = arith.constant dense<0.000000e+00> : vector<56xf32>
    %81 = vector.multi_reduction <add>, %80, %cst_49 [1] : vector<56x8xf32> to vector<56xf32>
    %82 = vector.shape_cast %81 : vector<56xf32> to vector<56x1xf32>
    %83 = vector.extract_strided_slice %64 {offsets = [0, 48], sizes = [56, 8], strides = [1, 1]} : vector<56x64xf32> to vector<56x8xf32>
    %cst_50 = arith.constant dense<0.000000e+00> : vector<56xf32>
    %84 = vector.multi_reduction <add>, %83, %cst_50 [1] : vector<56x8xf32> to vector<56xf32>
    %85 = vector.shape_cast %84 : vector<56xf32> to vector<56x1xf32>
    %86 = vector.extract_strided_slice %64 {offsets = [0, 56], sizes = [56, 8], strides = [1, 1]} : vector<56x64xf32> to vector<56x8xf32>
    %cst_51 = arith.constant dense<0.000000e+00> : vector<56xf32>
    %87 = vector.multi_reduction <add>, %86, %cst_51 [1] : vector<56x8xf32> to vector<56xf32>
    %88 = vector.shape_cast %87 : vector<56xf32> to vector<56x1xf32>
    %89 = tpu.concatenate %67, %70, %73, %76, %79, %82, %85, %88 in 1 : vector<56x1xf32>, vector<56x1xf32>, vector<56x1xf32>, vector<56x1xf32>, vector<56x1xf32>, vector<56x1xf32>, vector<56x1xf32>, vector<56x1xf32> -> vector<56x8xf32>
    %90 = arith.mulf %58, %61 : vector<56x64xf32>
    %91 = vector.extract_strided_slice %90 {offsets = [0, 0], sizes = [56, 8], strides = [1, 1]} : vector<56x64xf32> to vector<56x8xf32>
    %cst_52 = arith.constant dense<0.000000e+00> : vector<56xf32>
    %92 = vector.multi_reduction <add>, %91, %cst_52 [1] : vector<56x8xf32> to vector<56xf32>
    %93 = vector.shape_cast %92 : vector<56xf32> to vector<56x1xf32>
    %94 = vector.extract_strided_slice %90 {offsets = [0, 8], sizes = [56, 8], strides = [1, 1]} : vector<56x64xf32> to vector<56x8xf32>
    %cst_53 = arith.constant dense<0.000000e+00> : vector<56xf32>
    %95 = vector.multi_reduction <add>, %94, %cst_53 [1] : vector<56x8xf32> to vector<56xf32>
    %96 = vector.shape_cast %95 : vector<56xf32> to vector<56x1xf32>
    %97 = vector.extract_strided_slice %90 {offsets = [0, 16], sizes = [56, 8], strides = [1, 1]} : vector<56x64xf32> to vector<56x8xf32>
    %cst_54 = arith.constant dense<0.000000e+00> : vector<56xf32>
    %98 = vector.multi_reduction <add>, %97, %cst_54 [1] : vector<56x8xf32> to vector<56xf32>
    %99 = vector.shape_cast %98 : vector<56xf32> to vector<56x1xf32>
    %100 = vector.extract_strided_slice %90 {offsets = [0, 24], sizes = [56, 8], strides = [1, 1]} : vector<56x64xf32> to vector<56x8xf32>
    %cst_55 = arith.constant dense<0.000000e+00> : vector<56xf32>
    %101 = vector.multi_reduction <add>, %100, %cst_55 [1] : vector<56x8xf32> to vector<56xf32>
    %102 = vector.shape_cast %101 : vector<56xf32> to vector<56x1xf32>
    %103 = vector.extract_strided_slice %90 {offsets = [0, 32], sizes = [56, 8], strides = [1, 1]} : vector<56x64xf32> to vector<56x8xf32>
    %cst_56 = arith.constant dense<0.000000e+00> : vector<56xf32>
    %104 = vector.multi_reduction <add>, %103, %cst_56 [1] : vector<56x8xf32> to vector<56xf32>
    %105 = vector.shape_cast %104 : vector<56xf32> to vector<56x1xf32>
    %106 = vector.extract_strided_slice %90 {offsets = [0, 40], sizes = [56, 8], strides = [1, 1]} : vector<56x64xf32> to vector<56x8xf32>
    %cst_57 = arith.constant dense<0.000000e+00> : vector<56xf32>
    %107 = vector.multi_reduction <add>, %106, %cst_57 [1] : vector<56x8xf32> to vector<56xf32>
    %108 = vector.shape_cast %107 : vector<56xf32> to vector<56x1xf32>
    %109 = vector.extract_strided_slice %90 {offsets = [0, 48], sizes = [56, 8], strides = [1, 1]} : vector<56x64xf32> to vector<56x8xf32>
    %cst_58 = arith.constant dense<0.000000e+00> : vector<56xf32>
    %110 = vector.multi_reduction <add>, %109, %cst_58 [1] : vector<56x8xf32> to vector<56xf32>
    %111 = vector.shape_cast %110 : vector<56xf32> to vector<56x1xf32>
    %112 = vector.extract_strided_slice %90 {offsets = [0, 56], sizes = [56, 8], strides = [1, 1]} : vector<56x64xf32> to vector<56x8xf32>
    %cst_59 = arith.constant dense<0.000000e+00> : vector<56xf32>
    %113 = vector.multi_reduction <add>, %112, %cst_59 [1] : vector<56x8xf32> to vector<56xf32>
    %114 = vector.shape_cast %113 : vector<56xf32> to vector<56x1xf32>
    %115 = tpu.concatenate %93, %96, %99, %102, %105, %108, %111, %114 in 1 : vector<56x1xf32>, vector<56x1xf32>, vector<56x1xf32>, vector<56x1xf32>, vector<56x1xf32>, vector<56x1xf32>, vector<56x1xf32>, vector<56x1xf32> -> vector<56x8xf32>
    %116 = arith.maximumf %89, %115 : vector<56x8xf32>
    %117 = arith.subf %89, %116 : vector<56x8xf32>
    %118 = math.exp %117 : vector<56x8xf32>
    %119 = arith.subf %115, %116 : vector<56x8xf32>
    %120 = math.exp %119 : vector<56x8xf32>
    %121 = arith.addf %118, %120 : vector<56x8xf32>
    %122 = tpu.reciprocal %121 {approx = true} : vector<56x8xf32> -> vector<56x8xf32>
    %123 = arith.mulf %118, %122 : vector<56x8xf32>
    %124 = vector.extract_strided_slice %123 {offsets = [0, 0], sizes = [56, 1], strides = [1, 1]} : vector<56x8xf32> to vector<56x1xf32>
    %125 = vector.shape_cast %124 : vector<56x1xf32> to vector<56x1xf32>
    %126 = vector.broadcast %125 : vector<56x1xf32> to vector<56x8xf32>
    %127 = vector.extract_strided_slice %123 {offsets = [0, 1], sizes = [56, 1], strides = [1, 1]} : vector<56x8xf32> to vector<56x1xf32>
    %128 = vector.shape_cast %127 : vector<56x1xf32> to vector<56x1xf32>
    %129 = vector.broadcast %128 : vector<56x1xf32> to vector<56x8xf32>
    %130 = vector.extract_strided_slice %123 {offsets = [0, 2], sizes = [56, 1], strides = [1, 1]} : vector<56x8xf32> to vector<56x1xf32>
    %131 = vector.shape_cast %130 : vector<56x1xf32> to vector<56x1xf32>
    %132 = vector.broadcast %131 : vector<56x1xf32> to vector<56x8xf32>
    %133 = vector.extract_strided_slice %123 {offsets = [0, 3], sizes = [56, 1], strides = [1, 1]} : vector<56x8xf32> to vector<56x1xf32>
    %134 = vector.shape_cast %133 : vector<56x1xf32> to vector<56x1xf32>
    %135 = vector.broadcast %134 : vector<56x1xf32> to vector<56x8xf32>
    %136 = vector.extract_strided_slice %123 {offsets = [0, 4], sizes = [56, 1], strides = [1, 1]} : vector<56x8xf32> to vector<56x1xf32>
    %137 = vector.shape_cast %136 : vector<56x1xf32> to vector<56x1xf32>
    %138 = vector.broadcast %137 : vector<56x1xf32> to vector<56x8xf32>
    %139 = vector.extract_strided_slice %123 {offsets = [0, 5], sizes = [56, 1], strides = [1, 1]} : vector<56x8xf32> to vector<56x1xf32>
    %140 = vector.shape_cast %139 : vector<56x1xf32> to vector<56x1xf32>
    %141 = vector.broadcast %140 : vector<56x1xf32> to vector<56x8xf32>
    %142 = vector.extract_strided_slice %123 {offsets = [0, 6], sizes = [56, 1], strides = [1, 1]} : vector<56x8xf32> to vector<56x1xf32>
    %143 = vector.shape_cast %142 : vector<56x1xf32> to vector<56x1xf32>
    %144 = vector.broadcast %143 : vector<56x1xf32> to vector<56x8xf32>
    %145 = vector.extract_strided_slice %123 {offsets = [0, 7], sizes = [56, 1], strides = [1, 1]} : vector<56x8xf32> to vector<56x1xf32>
    %146 = vector.shape_cast %145 : vector<56x1xf32> to vector<56x1xf32>
    %147 = vector.broadcast %146 : vector<56x1xf32> to vector<56x8xf32>
    %148 = tpu.concatenate %126, %129, %132, %135, %138, %141, %144, %147 in 1 : vector<56x8xf32>, vector<56x8xf32>, vector<56x8xf32>, vector<56x8xf32>, vector<56x8xf32>, vector<56x8xf32>, vector<56x8xf32>, vector<56x8xf32> -> vector<56x64xf32>
    %149 = arith.mulf %148, %62 : vector<56x64xf32>
    %150 = arith.mulf %120, %122 : vector<56x8xf32>
    %151 = vector.extract_strided_slice %150 {offsets = [0, 0], sizes = [56, 1], strides = [1, 1]} : vector<56x8xf32> to vector<56x1xf32>
    %152 = vector.shape_cast %151 : vector<56x1xf32> to vector<56x1xf32>
    %153 = vector.broadcast %152 : vector<56x1xf32> to vector<56x8xf32>
    %154 = vector.extract_strided_slice %150 {offsets = [0, 1], sizes = [56, 1], strides = [1, 1]} : vector<56x8xf32> to vector<56x1xf32>
    %155 = vector.shape_cast %154 : vector<56x1xf32> to vector<56x1xf32>
    %156 = vector.broadcast %155 : vector<56x1xf32> to vector<56x8xf32>
    %157 = vector.extract_strided_slice %150 {offsets = [0, 2], sizes = [56, 1], strides = [1, 1]} : vector<56x8xf32> to vector<56x1xf32>
    %158 = vector.shape_cast %157 : vector<56x1xf32> to vector<56x1xf32>
    %159 = vector.broadcast %158 : vector<56x1xf32> to vector<56x8xf32>
    %160 = vector.extract_strided_slice %150 {offsets = [0, 3], sizes = [56, 1], strides = [1, 1]} : vector<56x8xf32> to vector<56x1xf32>
    %161 = vector.shape_cast %160 : vector<56x1xf32> to vector<56x1xf32>
    %162 = vector.broadcast %161 : vector<56x1xf32> to vector<56x8xf32>
    %163 = vector.extract_strided_slice %150 {offsets = [0, 4], sizes = [56, 1], strides = [1, 1]} : vector<56x8xf32> to vector<56x1xf32>
    %164 = vector.shape_cast %163 : vector<56x1xf32> to vector<56x1xf32>
    %165 = vector.broadcast %164 : vector<56x1xf32> to vector<56x8xf32>
    %166 = vector.extract_strided_slice %150 {offsets = [0, 5], sizes = [56, 1], strides = [1, 1]} : vector<56x8xf32> to vector<56x1xf32>
    %167 = vector.shape_cast %166 : vector<56x1xf32> to vector<56x1xf32>
    %168 = vector.broadcast %167 : vector<56x1xf32> to vector<56x8xf32>
    %169 = vector.extract_strided_slice %150 {offsets = [0, 6], sizes = [56, 1], strides = [1, 1]} : vector<56x8xf32> to vector<56x1xf32>
    %170 = vector.shape_cast %169 : vector<56x1xf32> to vector<56x1xf32>
    %171 = vector.broadcast %170 : vector<56x1xf32> to vector<56x8xf32>
    %172 = vector.extract_strided_slice %150 {offsets = [0, 7], sizes = [56, 1], strides = [1, 1]} : vector<56x8xf32> to vector<56x1xf32>
    %173 = vector.shape_cast %172 : vector<56x1xf32> to vector<56x1xf32>
    %174 = vector.broadcast %173 : vector<56x1xf32> to vector<56x8xf32>
    %175 = tpu.concatenate %153, %156, %159, %162, %165, %168, %171, %174 in 1 : vector<56x8xf32>, vector<56x8xf32>, vector<56x8xf32>, vector<56x8xf32>, vector<56x8xf32>, vector<56x8xf32>, vector<56x8xf32>, vector<56x8xf32> -> vector<56x64xf32>
    %176 = arith.mulf %175, %63 : vector<56x64xf32>
    %177 = arith.addf %149, %176 : vector<56x64xf32>
    %178 = arith.mulf %59, %60 : vector<56x64xf32>
    %179 = vector.extract_strided_slice %178 {offsets = [0, 0], sizes = [56, 8], strides = [1, 1]} : vector<56x64xf32> to vector<56x8xf32>
    %cst_60 = arith.constant dense<0.000000e+00> : vector<56xf32>
    %180 = vector.multi_reduction <add>, %179, %cst_60 [1] : vector<56x8xf32> to vector<56xf32>
    %181 = vector.shape_cast %180 : vector<56xf32> to vector<56x1xf32>
    %182 = vector.extract_strided_slice %178 {offsets = [0, 8], sizes = [56, 8], strides = [1, 1]} : vector<56x64xf32> to vector<56x8xf32>
    %cst_61 = arith.constant dense<0.000000e+00> : vector<56xf32>
    %183 = vector.multi_reduction <add>, %182, %cst_61 [1] : vector<56x8xf32> to vector<56xf32>
    %184 = vector.shape_cast %183 : vector<56xf32> to vector<56x1xf32>
    %185 = vector.extract_strided_slice %178 {offsets = [0, 16], sizes = [56, 8], strides = [1, 1]} : vector<56x64xf32> to vector<56x8xf32>
    %cst_62 = arith.constant dense<0.000000e+00> : vector<56xf32>
    %186 = vector.multi_reduction <add>, %185, %cst_62 [1] : vector<56x8xf32> to vector<56xf32>
    %187 = vector.shape_cast %186 : vector<56xf32> to vector<56x1xf32>
    %188 = vector.extract_strided_slice %178 {offsets = [0, 24], sizes = [56, 8], strides = [1, 1]} : vector<56x64xf32> to vector<56x8xf32>
    %cst_63 = arith.constant dense<0.000000e+00> : vector<56xf32>
    %189 = vector.multi_reduction <add>, %188, %cst_63 [1] : vector<56x8xf32> to vector<56xf32>
    %190 = vector.shape_cast %189 : vector<56xf32> to vector<56x1xf32>
    %191 = vector.extract_strided_slice %178 {offsets = [0, 32], sizes = [56, 8], strides = [1, 1]} : vector<56x64xf32> to vector<56x8xf32>
    %cst_64 = arith.constant dense<0.000000e+00> : vector<56xf32>
    %192 = vector.multi_reduction <add>, %191, %cst_64 [1] : vector<56x8xf32> to vector<56xf32>
    %193 = vector.shape_cast %192 : vector<56xf32> to vector<56x1xf32>
    %194 = vector.extract_strided_slice %178 {offsets = [0, 40], sizes = [56, 8], strides = [1, 1]} : vector<56x64xf32> to vector<56x8xf32>
    %cst_65 = arith.constant dense<0.000000e+00> : vector<56xf32>
    %195 = vector.multi_reduction <add>, %194, %cst_65 [1] : vector<56x8xf32> to vector<56xf32>
    %196 = vector.shape_cast %195 : vector<56xf32> to vector<56x1xf32>
    %197 = vector.extract_strided_slice %178 {offsets = [0, 48], sizes = [56, 8], strides = [1, 1]} : vector<56x64xf32> to vector<56x8xf32>
    %cst_66 = arith.constant dense<0.000000e+00> : vector<56xf32>
    %198 = vector.multi_reduction <add>, %197, %cst_66 [1] : vector<56x8xf32> to vector<56xf32>
    %199 = vector.shape_cast %198 : vector<56xf32> to vector<56x1xf32>
    %200 = vector.extract_strided_slice %178 {offsets = [0, 56], sizes = [56, 8], strides = [1, 1]} : vector<56x64xf32> to vector<56x8xf32>
    %cst_67 = arith.constant dense<0.000000e+00> : vector<56xf32>
    %201 = vector.multi_reduction <add>, %200, %cst_67 [1] : vector<56x8xf32> to vector<56xf32>
    %202 = vector.shape_cast %201 : vector<56xf32> to vector<56x1xf32>
    %203 = tpu.concatenate %181, %184, %187, %190, %193, %196, %199, %202 in 1 : vector<56x1xf32>, vector<56x1xf32>, vector<56x1xf32>, vector<56x1xf32>, vector<56x1xf32>, vector<56x1xf32>, vector<56x1xf32>, vector<56x1xf32> -> vector<56x8xf32>
    %204 = arith.mulf %59, %61 : vector<56x64xf32>
    %205 = vector.extract_strided_slice %204 {offsets = [0, 0], sizes = [56, 8], strides = [1, 1]} : vector<56x64xf32> to vector<56x8xf32>
    %cst_68 = arith.constant dense<0.000000e+00> : vector<56xf32>
    %206 = vector.multi_reduction <add>, %205, %cst_68 [1] : vector<56x8xf32> to vector<56xf32>
    %207 = vector.shape_cast %206 : vector<56xf32> to vector<56x1xf32>
    %208 = vector.extract_strided_slice %204 {offsets = [0, 8], sizes = [56, 8], strides = [1, 1]} : vector<56x64xf32> to vector<56x8xf32>
    %cst_69 = arith.constant dense<0.000000e+00> : vector<56xf32>
    %209 = vector.multi_reduction <add>, %208, %cst_69 [1] : vector<56x8xf32> to vector<56xf32>
    %210 = vector.shape_cast %209 : vector<56xf32> to vector<56x1xf32>
    %211 = vector.extract_strided_slice %204 {offsets = [0, 16], sizes = [56, 8], strides = [1, 1]} : vector<56x64xf32> to vector<56x8xf32>
    %cst_70 = arith.constant dense<0.000000e+00> : vector<56xf32>
    %212 = vector.multi_reduction <add>, %211, %cst_70 [1] : vector<56x8xf32> to vector<56xf32>
    %213 = vector.shape_cast %212 : vector<56xf32> to vector<56x1xf32>
    %214 = vector.extract_strided_slice %204 {offsets = [0, 24], sizes = [56, 8], strides = [1, 1]} : vector<56x64xf32> to vector<56x8xf32>
    %cst_71 = arith.constant dense<0.000000e+00> : vector<56xf32>
    %215 = vector.multi_reduction <add>, %214, %cst_71 [1] : vector<56x8xf32> to vector<56xf32>
    %216 = vector.shape_cast %215 : vector<56xf32> to vector<56x1xf32>
    %217 = vector.extract_strided_slice %204 {offsets = [0, 32], sizes = [56, 8], strides = [1, 1]} : vector<56x64xf32> to vector<56x8xf32>
    %cst_72 = arith.constant dense<0.000000e+00> : vector<56xf32>
    %218 = vector.multi_reduction <add>, %217, %cst_72 [1] : vector<56x8xf32> to vector<56xf32>
    %219 = vector.shape_cast %218 : vector<56xf32> to vector<56x1xf32>
    %220 = vector.extract_strided_slice %204 {offsets = [0, 40], sizes = [56, 8], strides = [1, 1]} : vector<56x64xf32> to vector<56x8xf32>
    %cst_73 = arith.constant dense<0.000000e+00> : vector<56xf32>
    %221 = vector.multi_reduction <add>, %220, %cst_73 [1] : vector<56x8xf32> to vector<56xf32>
    %222 = vector.shape_cast %221 : vector<56xf32> to vector<56x1xf32>
    %223 = vector.extract_strided_slice %204 {offsets = [0, 48], sizes = [56, 8], strides = [1, 1]} : vector<56x64xf32> to vector<56x8xf32>
    %cst_74 = arith.constant dense<0.000000e+00> : vector<56xf32>
    %224 = vector.multi_reduction <add>, %223, %cst_74 [1] : vector<56x8xf32> to vector<56xf32>
    %225 = vector.shape_cast %224 : vector<56xf32> to vector<56x1xf32>
    %226 = vector.extract_strided_slice %204 {offsets = [0, 56], sizes = [56, 8], strides = [1, 1]} : vector<56x64xf32> to vector<56x8xf32>
    %cst_75 = arith.constant dense<0.000000e+00> : vector<56xf32>
    %227 = vector.multi_reduction <add>, %226, %cst_75 [1] : vector<56x8xf32> to vector<56xf32>
    %228 = vector.shape_cast %227 : vector<56xf32> to vector<56x1xf32>
    %229 = tpu.concatenate %207, %210, %213, %216, %219, %222, %225, %228 in 1 : vector<56x1xf32>, vector<56x1xf32>, vector<56x1xf32>, vector<56x1xf32>, vector<56x1xf32>, vector<56x1xf32>, vector<56x1xf32>, vector<56x1xf32> -> vector<56x8xf32>
    %230 = arith.maximumf %203, %229 : vector<56x8xf32>
    %231 = arith.subf %203, %230 : vector<56x8xf32>
    %232 = math.exp %231 : vector<56x8xf32>
    %233 = arith.subf %229, %230 : vector<56x8xf32>
    %234 = math.exp %233 : vector<56x8xf32>
    %235 = arith.addf %232, %234 : vector<56x8xf32>
    %236 = tpu.reciprocal %235 {approx = true} : vector<56x8xf32> -> vector<56x8xf32>
    %237 = arith.mulf %232, %236 : vector<56x8xf32>
    %238 = vector.extract_strided_slice %237 {offsets = [0, 0], sizes = [56, 1], strides = [1, 1]} : vector<56x8xf32> to vector<56x1xf32>
    %239 = vector.shape_cast %238 : vector<56x1xf32> to vector<56x1xf32>
    %240 = vector.broadcast %239 : vector<56x1xf32> to vector<56x8xf32>
    %241 = vector.extract_strided_slice %237 {offsets = [0, 1], sizes = [56, 1], strides = [1, 1]} : vector<56x8xf32> to vector<56x1xf32>
    %242 = vector.shape_cast %241 : vector<56x1xf32> to vector<56x1xf32>
    %243 = vector.broadcast %242 : vector<56x1xf32> to vector<56x8xf32>
    %244 = vector.extract_strided_slice %237 {offsets = [0, 2], sizes = [56, 1], strides = [1, 1]} : vector<56x8xf32> to vector<56x1xf32>
    %245 = vector.shape_cast %244 : vector<56x1xf32> to vector<56x1xf32>
    %246 = vector.broadcast %245 : vector<56x1xf32> to vector<56x8xf32>
    %247 = vector.extract_strided_slice %237 {offsets = [0, 3], sizes = [56, 1], strides = [1, 1]} : vector<56x8xf32> to vector<56x1xf32>
    %248 = vector.shape_cast %247 : vector<56x1xf32> to vector<56x1xf32>
    %249 = vector.broadcast %248 : vector<56x1xf32> to vector<56x8xf32>
    %250 = vector.extract_strided_slice %237 {offsets = [0, 4], sizes = [56, 1], strides = [1, 1]} : vector<56x8xf32> to vector<56x1xf32>
    %251 = vector.shape_cast %250 : vector<56x1xf32> to vector<56x1xf32>
    %252 = vector.broadcast %251 : vector<56x1xf32> to vector<56x8xf32>
    %253 = vector.extract_strided_slice %237 {offsets = [0, 5], sizes = [56, 1], strides = [1, 1]} : vector<56x8xf32> to vector<56x1xf32>
    %254 = vector.shape_cast %253 : vector<56x1xf32> to vector<56x1xf32>
    %255 = vector.broadcast %254 : vector<56x1xf32> to vector<56x8xf32>
    %256 = vector.extract_strided_slice %237 {offsets = [0, 6], sizes = [56, 1], strides = [1, 1]} : vector<56x8xf32> to vector<56x1xf32>
    %257 = vector.shape_cast %256 : vector<56x1xf32> to vector<56x1xf32>
    %258 = vector.broadcast %257 : vector<56x1xf32> to vector<56x8xf32>
    %259 = vector.extract_strided_slice %237 {offsets = [0, 7], sizes = [56, 1], strides = [1, 1]} : vector<56x8xf32> to vector<56x1xf32>
    %260 = vector.shape_cast %259 : vector<56x1xf32> to vector<56x1xf32>
    %261 = vector.broadcast %260 : vector<56x1xf32> to vector<56x8xf32>
    %262 = tpu.concatenate %240, %243, %246, %249, %252, %255, %258, %261 in 1 : vector<56x8xf32>, vector<56x8xf32>, vector<56x8xf32>, vector<56x8xf32>, vector<56x8xf32>, vector<56x8xf32>, vector<56x8xf32>, vector<56x8xf32> -> vector<56x64xf32>
    %263 = arith.mulf %262, %62 : vector<56x64xf32>
    %264 = arith.mulf %234, %236 : vector<56x8xf32>
    %265 = vector.extract_strided_slice %264 {offsets = [0, 0], sizes = [56, 1], strides = [1, 1]} : vector<56x8xf32> to vector<56x1xf32>
    %266 = vector.shape_cast %265 : vector<56x1xf32> to vector<56x1xf32>
    %267 = vector.broadcast %266 : vector<56x1xf32> to vector<56x8xf32>
    %268 = vector.extract_strided_slice %264 {offsets = [0, 1], sizes = [56, 1], strides = [1, 1]} : vector<56x8xf32> to vector<56x1xf32>
    %269 = vector.shape_cast %268 : vector<56x1xf32> to vector<56x1xf32>
    %270 = vector.broadcast %269 : vector<56x1xf32> to vector<56x8xf32>
    %271 = vector.extract_strided_slice %264 {offsets = [0, 2], sizes = [56, 1], strides = [1, 1]} : vector<56x8xf32> to vector<56x1xf32>
    %272 = vector.shape_cast %271 : vector<56x1xf32> to vector<56x1xf32>
    %273 = vector.broadcast %272 : vector<56x1xf32> to vector<56x8xf32>
    %274 = vector.extract_strided_slice %264 {offsets = [0, 3], sizes = [56, 1], strides = [1, 1]} : vector<56x8xf32> to vector<56x1xf32>
    %275 = vector.shape_cast %274 : vector<56x1xf32> to vector<56x1xf32>
    %276 = vector.broadcast %275 : vector<56x1xf32> to vector<56x8xf32>
    %277 = vector.extract_strided_slice %264 {offsets = [0, 4], sizes = [56, 1], strides = [1, 1]} : vector<56x8xf32> to vector<56x1xf32>
    %278 = vector.shape_cast %277 : vector<56x1xf32> to vector<56x1xf32>
    %279 = vector.broadcast %278 : vector<56x1xf32> to vector<56x8xf32>
    %280 = vector.extract_strided_slice %264 {offsets = [0, 5], sizes = [56, 1], strides = [1, 1]} : vector<56x8xf32> to vector<56x1xf32>
    %281 = vector.shape_cast %280 : vector<56x1xf32> to vector<56x1xf32>
    %282 = vector.broadcast %281 : vector<56x1xf32> to vector<56x8xf32>
    %283 = vector.extract_strided_slice %264 {offsets = [0, 6], sizes = [56, 1], strides = [1, 1]} : vector<56x8xf32> to vector<56x1xf32>
    %284 = vector.shape_cast %283 : vector<56x1xf32> to vector<56x1xf32>
    %285 = vector.broadcast %284 : vector<56x1xf32> to vector<56x8xf32>
    %286 = vector.extract_strided_slice %264 {offsets = [0, 7], sizes = [56, 1], strides = [1, 1]} : vector<56x8xf32> to vector<56x1xf32>
    %287 = vector.shape_cast %286 : vector<56x1xf32> to vector<56x1xf32>
    %288 = vector.broadcast %287 : vector<56x1xf32> to vector<56x8xf32>
    %289 = tpu.concatenate %267, %270, %273, %276, %279, %282, %285, %288 in 1 : vector<56x8xf32>, vector<56x8xf32>, vector<56x8xf32>, vector<56x8xf32>, vector<56x8xf32>, vector<56x8xf32>, vector<56x8xf32>, vector<56x8xf32> -> vector<56x64xf32>
    %290 = arith.mulf %289, %63 : vector<56x64xf32>
    %291 = arith.addf %263, %290 : vector<56x64xf32>
    %292 = tpu.concatenate %177, %291 in 0 : vector<56x64xf32>, vector<56x64xf32> -> vector<112x64xf32>
    %cst_76 = arith.constant dense<0.000000e+00> : vector<112x64xf32>
    %293 = tpu.matmul %292, %9, %cst_76 {dimension_numbers = #tpu.dot_dimension_numbers<[1], [0], [0], [1], [0, 0, 1, 1], [], []>} : vector<112x64xf32>, vector<64x64xf32>, vector<112x64xf32> -> vector<112x64xf32>
    %294 = vector.broadcast %11 : vector<1x64xf32> to vector<112x64xf32>
    %295 = arith.addf %293, %294 : vector<112x64xf32>
    %296 = arith.addf %295, %3 : vector<112x64xf32>
    %cst_77 = arith.constant dense<0.000000e+00> : vector<112xf32>
    %297 = vector.multi_reduction <add>, %296, %cst_77 [1] : vector<112x64xf32> to vector<112xf32>
    %298 = vector.shape_cast %297 : vector<112xf32> to vector<112x1xf32>
    %cst_78 = arith.constant 6.400000e+01 : f32
    %299 = vector.broadcast %cst_78 : f32 to vector<112x1xf32>
    %300 = arith.divf %298, %299 : vector<112x1xf32>
    %301 = vector.broadcast %300 : vector<112x1xf32> to vector<112x64xf32>
    %302 = arith.subf %296, %301 : vector<112x64xf32>
    %303 = arith.mulf %302, %302 : vector<112x64xf32>
    %cst_79 = arith.constant dense<0.000000e+00> : vector<112xf32>
    %304 = vector.multi_reduction <add>, %303, %cst_79 [1] : vector<112x64xf32> to vector<112xf32>
    %305 = vector.shape_cast %304 : vector<112xf32> to vector<112x1xf32>
    %cst_80 = arith.constant 6.400000e+01 : f32
    %306 = vector.broadcast %cst_80 : f32 to vector<112x1xf32>
    %307 = arith.divf %305, %306 : vector<112x1xf32>
    %308 = vector.broadcast %300 : vector<112x1xf32> to vector<112x64xf32>
    %309 = arith.subf %296, %308 : vector<112x64xf32>
    %cst_81 = arith.constant 9.99999974E-6 : f32
    %310 = vector.broadcast %cst_81 : f32 to vector<112x1xf32>
    %311 = arith.addf %307, %310 : vector<112x1xf32>
    %312 = math.rsqrt %311 : vector<112x1xf32>
    %313 = vector.broadcast %312 : vector<112x1xf32> to vector<112x64xf32>
    %314 = arith.mulf %309, %313 : vector<112x64xf32>
    %315 = vector.broadcast %17 : vector<1x64xf32> to vector<112x64xf32>
    %316 = arith.mulf %314, %315 : vector<112x64xf32>
    %317 = vector.broadcast %19 : vector<1x64xf32> to vector<112x64xf32>
    %318 = arith.addf %316, %317 : vector<112x64xf32>
    %cst_82 = arith.constant dense<0.000000e+00> : vector<112x256xf32>
    %319 = tpu.matmul %318, %21, %cst_82 {dimension_numbers = #tpu.dot_dimension_numbers<[1], [0], [0], [1], [0, 0, 1, 1], [], []>} : vector<112x64xf32>, vector<64x256xf32>, vector<112x256xf32> -> vector<112x256xf32>
    %320 = vector.broadcast %23 : vector<1x256xf32> to vector<112x256xf32>
    %321 = arith.addf %319, %320 : vector<112x256xf32>
    %322 = arith.mulf %321, %321 : vector<112x256xf32>
    %323 = arith.mulf %321, %322 : vector<112x256xf32>
    %cst_83 = arith.constant 4.471500e-02 : f32
    %324 = vector.broadcast %cst_83 : f32 to vector<112x256xf32>
    %325 = arith.mulf %324, %323 : vector<112x256xf32>
    %326 = arith.addf %321, %325 : vector<112x256xf32>
    %cst_84 = arith.constant 0.797884583 : f32
    %327 = vector.broadcast %cst_84 : f32 to vector<112x256xf32>
    %328 = arith.mulf %327, %326 : vector<112x256xf32>
    %329 = math.tanh %328 : vector<112x256xf32>
    %cst_85 = arith.constant 1.000000e+00 : f32
    %330 = vector.broadcast %cst_85 : f32 to vector<112x256xf32>
    %331 = arith.addf %330, %329 : vector<112x256xf32>
    %cst_86 = arith.constant 5.000000e-01 : f32
    %332 = vector.broadcast %cst_86 : f32 to vector<112x256xf32>
    %333 = arith.mulf %332, %331 : vector<112x256xf32>
    %334 = arith.mulf %321, %333 : vector<112x256xf32>
    %cst_87 = arith.constant dense<0.000000e+00> : vector<112x64xf32>
    %335 = tpu.matmul %334, %25, %cst_87 {dimension_numbers = #tpu.dot_dimension_numbers<[1], [0], [0], [1], [0, 0, 1, 1], [], []>} : vector<112x256xf32>, vector<256x64xf32>, vector<112x64xf32> -> vector<112x64xf32>
    %336 = vector.broadcast %27 : vector<1x64xf32> to vector<112x64xf32>
    %337 = arith.addf %335, %336 : vector<112x64xf32>
    %338 = arith.addf %337, %296 : vector<112x64xf32>
    %c2_i32 = arith.constant 2 : i32
    %339 = arith.cmpi slt, %arg0, %c2_i32 : i32
    %340 = arith.extui %339 : i1 to i32
    %c0_i32_88 = arith.constant 0 : i32
    %341 = arith.cmpi ne, %340, %c0_i32_88 : i32
    scf.if %341 {
      %c0_91 = arith.constant 0 : index
      %c0_92 = arith.constant 0 : index
      %345 = vector.load %arg24[%c0_91, %c0_92] : memref<112x64xf32, #tpu.memory_space<vmem>>, vector<112x64xf32>
      tpu.vector_store %arg24[%c0_91, %c0_92], %338 {strides = array<i32>} : memref<112x64xf32, #tpu.memory_space<vmem>>, vector<112x64xf32>,
    } else {
    }
    %c2_i32_89 = arith.constant 2 : i32
    %342 = arith.cmpi eq, %arg0, %c2_i32_89 : i32
    %343 = arith.extui %342 : i1 to i32
    %c0_i32_90 = arith.constant 0 : i32
    %344 = arith.cmpi ne, %343, %c0_i32_90 : i32
    scf.if %344 {
      %c0_91 = arith.constant 0 : index
      %c0_92 = arith.constant 0 : index
      %345 = vector.load %arg14[%c0_91, %c0_92] : memref<1x64xf32, #tpu.memory_space<vmem>>, vector<1x64xf32>
      %c0_93 = arith.constant 0 : index
      %c0_94 = arith.constant 0 : index
      %346 = vector.load %arg15[%c0_93, %c0_94] : memref<1x64xf32, #tpu.memory_space<vmem>>, vector<1x64xf32>
      %cst_95 = arith.constant dense<0.000000e+00> : vector<112xf32>
      %347 = vector.multi_reduction <add>, %338, %cst_95 [1] : vector<112x64xf32> to vector<112xf32>
      %348 = vector.shape_cast %347 : vector<112xf32> to vector<112x1xf32>
      %cst_96 = arith.constant 6.400000e+01 : f32
      %349 = vector.broadcast %cst_96 : f32 to vector<112x1xf32>
      %350 = arith.divf %348, %349 : vector<112x1xf32>
      %351 = vector.broadcast %350 : vector<112x1xf32> to vector<112x64xf32>
      %352 = arith.subf %338, %351 : vector<112x64xf32>
      %353 = arith.mulf %352, %352 : vector<112x64xf32>
      %cst_97 = arith.constant dense<0.000000e+00> : vector<112xf32>
      %354 = vector.multi_reduction <add>, %353, %cst_97 [1] : vector<112x64xf32> to vector<112xf32>
      %355 = vector.shape_cast %354 : vector<112xf32> to vector<112x1xf32>
      %cst_98 = arith.constant 6.400000e+01 : f32
      %356 = vector.broadcast %cst_98 : f32 to vector<112x1xf32>
      %357 = arith.divf %355, %356 : vector<112x1xf32>
      %358 = vector.broadcast %350 : vector<112x1xf32> to vector<112x64xf32>
      %359 = arith.subf %338, %358 : vector<112x64xf32>
      %cst_99 = arith.constant 9.99999997E-7 : f32
      %360 = vector.broadcast %cst_99 : f32 to vector<112x1xf32>
      %361 = arith.addf %357, %360 : vector<112x1xf32>
      %362 = math.rsqrt %361 : vector<112x1xf32>
      %363 = vector.broadcast %362 : vector<112x1xf32> to vector<112x64xf32>
      %364 = arith.mulf %359, %363 : vector<112x64xf32>
      %365 = vector.broadcast %345 : vector<1x64xf32> to vector<112x64xf32>
      %366 = arith.mulf %364, %365 : vector<112x64xf32>
      %367 = vector.broadcast %346 : vector<1x64xf32> to vector<112x64xf32>
      %368 = arith.addf %366, %367 : vector<112x64xf32>
      %c0_100 = arith.constant 0 : index
      %c0_101 = arith.constant 0 : index
      %369 = vector.load %arg24[%c0_100, %c0_101] : memref<112x64xf32, #tpu.memory_space<vmem>>, vector<112x64xf32>
      tpu.vector_store %arg24[%c0_100, %c0_101], %368 {strides = array<i32>} : memref<112x64xf32, #tpu.memory_space<vmem>>, vector<112x64xf32>,
      %370 = vector.extract_strided_slice %368 {offsets = [0, 0], sizes = [1, 64], strides = [1, 1]} : vector<112x64xf32> to vector<1x64xf32>
      %371 = vector.extract_strided_slice %368 {offsets = [56, 0], sizes = [1, 64], strides = [1, 1]} : vector<112x64xf32> to vector<1x64xf32>
      %372 = tpu.concatenate %370, %371 in 0 : vector<1x64xf32>, vector<1x64xf32> -> vector<2x64xf32>
      %c0_102 = arith.constant 0 : index
      %c0_103 = arith.constant 0 : index
      %373 = vector.load %arg16[%c0_102, %c0_103] : memref<64x16xf32, #tpu.memory_space<vmem>>, vector<64x16xf32>
      %cst_104 = arith.constant dense<0.000000e+00> : vector<2x16xf32>
      %374 = tpu.matmul %372, %373, %cst_104 {dimension_numbers = #tpu.dot_dimension_numbers<[1], [0], [0], [1], [0, 0, 1, 1], [], []>} : vector<2x64xf32>, vector<64x16xf32>, vector<2x16xf32> -> vector<2x16xf32>
      %c0_105 = arith.constant 0 : index
      %c0_106 = arith.constant 0 : index
      %375 = vector.load %arg17[%c0_105, %c0_106] : memref<1x16xf32, #tpu.memory_space<vmem>>, vector<1x16xf32>
      %376 = vector.broadcast %375 : vector<1x16xf32> to vector<2x16xf32>
      %377 = arith.addf %374, %376 : vector<2x16xf32>
      %c0_107 = arith.constant 0 : index
      %c0_108 = arith.constant 0 : index
      %378 = vector.load %arg20[%c0_107, %c0_108] : memref<1x16xf32, #tpu.memory_space<vmem>>, vector<1x16xf32>
      %379 = vector.broadcast %378 : vector<1x16xf32> to vector<2x16xf32>
      %380 = arith.subf %377, %379 : vector<2x16xf32>
      %c0_109 = arith.constant 0 : index
      %c0_110 = arith.constant 0 : index
      %381 = vector.load %arg21[%c0_109, %c0_110] : memref<1x16xf32, #tpu.memory_space<vmem>>, vector<1x16xf32>
      %cst_111 = arith.constant 9.99999974E-6 : f32
      %382 = vector.broadcast %cst_111 : f32 to vector<1x16xf32>
      %383 = arith.addf %381, %382 : vector<1x16xf32>
      %384 = math.rsqrt %383 : vector<1x16xf32>
      %385 = vector.broadcast %384 : vector<1x16xf32> to vector<2x16xf32>
      %386 = arith.mulf %380, %385 : vector<2x16xf32>
      %c0_112 = arith.constant 0 : index
      %c0_113 = arith.constant 0 : index
      %387 = vector.load %arg18[%c0_112, %c0_113] : memref<1x16xf32, #tpu.memory_space<vmem>>, vector<1x16xf32>
      %388 = vector.broadcast %387 : vector<1x16xf32> to vector<2x16xf32>
      %389 = arith.mulf %386, %388 : vector<2x16xf32>
      %c0_114 = arith.constant 0 : index
      %c0_115 = arith.constant 0 : index
      %390 = vector.load %arg19[%c0_114, %c0_115] : memref<1x16xf32, #tpu.memory_space<vmem>>, vector<1x16xf32>
      %391 = vector.broadcast %390 : vector<1x16xf32> to vector<2x16xf32>
      %392 = arith.addf %389, %391 : vector<2x16xf32>
      %cst_116 = arith.constant 0.000000e+00 : f32
      %393 = vector.broadcast %cst_116 : f32 to vector<2x16xf32>
      %394 = arith.maximumf %392, %393 : vector<2x16xf32>
      %c0_117 = arith.constant 0 : index
      %c0_118 = arith.constant 0 : index
      %395 = vector.load %arg22[%c0_117, %c0_118] : memref<16x1xf32, #tpu.memory_space<vmem>>, vector<16x1xf32>
      %cst_119 = arith.constant dense<0.000000e+00> : vector<2x1xf32>
      %396 = tpu.matmul %394, %395, %cst_119 {dimension_numbers = #tpu.dot_dimension_numbers<[1], [0], [0], [1], [0, 0, 1, 1], [], []>} : vector<2x16xf32>, vector<16x1xf32>, vector<2x1xf32> -> vector<2x1xf32>
      %c0_120 = arith.constant 0 : index
      %c0_121 = arith.constant 0 : index
      %397 = vector.load %arg23[%c0_120, %c0_121] : memref<1x1xf32, #tpu.memory_space<vmem>>, vector<1x1xf32>
      %398 = vector.broadcast %397 : vector<1x1xf32> to vector<2x1xf32>
      %399 = arith.addf %396, %398 : vector<2x1xf32>
      %400 = math.tanh %399 : vector<2x1xf32>
      %cst_122 = arith.constant 1.000000e+00 : f32
      %401 = vector.broadcast %cst_122 : f32 to vector<2x1xf32>
      %402 = arith.addf %400, %401 : vector<2x1xf32>
      %cst_123 = arith.constant 5.000000e-01 : f32
      %403 = vector.broadcast %cst_123 : f32 to vector<2x1xf32>
      %404 = arith.mulf %402, %403 : vector<2x1xf32>
      %c0_124 = arith.constant 0 : index
      %c0_125 = arith.constant 0 : index
      %405 = vector.load %arg25[%c0_124, %c0_125] : memref<2x1xf32, #tpu.memory_space<vmem>>, vector<2x1xf32>
      tpu.vector_store %arg25[%c0_124, %c0_125], %404 {strides = array<i32>} : memref<2x1xf32, #tpu.memory_space<vmem>>, vector<2x1xf32>,
    } else {
    }
    return
  }
  func.func @transform_0(%arg0: i32) -> (i32, i32) {
    %c0_i32 = arith.constant 0 : i32
    %c0_i32_0 = arith.constant 0 : i32
    %c0_i32_1 = arith.constant 0 : i32
    return %c0_i32, %c0_i32_0 : i32, i32
  }
  func.func @transform_1(%arg0: i32) -> (i32, i32, i32) {
    %c0_i32 = arith.constant 0 : i32
    %c0_i32_0 = arith.constant 0 : i32
    %c0_i32_1 = arith.constant 0 : i32
    return %arg0, %c0_i32, %c0_i32_0 : i32, i32, i32
  }
  func.func @transform_2(%arg0: i32) -> (i32, i32, i32) {
    %c0_i32 = arith.constant 0 : i32
    %c0_i32_0 = arith.constant 0 : i32
    %c0_i32_1 = arith.constant 0 : i32
    return %arg0, %c0_i32, %c0_i32_0 : i32, i32, i32
  }
  func.func @transform_3(%arg0: i32) -> (i32, i32, i32) {
    %c0_i32 = arith.constant 0 : i32
    %c0_i32_0 = arith.constant 0 : i32
    %c0_i32_1 = arith.constant 0 : i32
    return %arg0, %c0_i32, %c0_i32_0 : i32, i32, i32
  }
  func.func @transform_4(%arg0: i32) -> (i32, i32, i32) {
    %c0_i32 = arith.constant 0 : i32
    %c0_i32_0 = arith.constant 0 : i32
    %c0_i32_1 = arith.constant 0 : i32
    return %arg0, %c0_i32, %c0_i32_0 : i32, i32, i32
  }
  func.func @transform_5(%arg0: i32) -> (i32, i32, i32) {
    %c0_i32 = arith.constant 0 : i32
    %c0_i32_0 = arith.constant 0 : i32
    %c0_i32_1 = arith.constant 0 : i32
    return %arg0, %c0_i32, %c0_i32_0 : i32, i32, i32
  }
  func.func @transform_6(%arg0: i32) -> (i32, i32, i32) {
    %c0_i32 = arith.constant 0 : i32
    %c0_i32_0 = arith.constant 0 : i32
    %c0_i32_1 = arith.constant 0 : i32
    return %arg0, %c0_i32, %c0_i32_0 : i32, i32, i32
  }
  func.func @transform_7(%arg0: i32) -> (i32, i32, i32) {
    %c0_i32 = arith.constant 0 : i32
    %c0_i32_0 = arith.constant 0 : i32
    %c0_i32_1 = arith.constant 0 : i32
    return %arg0, %c0_i32, %c0_i32_0 : i32, i32, i32
  }
  func.func @transform_8(%arg0: i32) -> (i32, i32, i32) {
    %c0_i32 = arith.constant 0 : i32
    %c0_i32_0 = arith.constant 0 : i32
    %c0_i32_1 = arith.constant 0 : i32
    return %arg0, %c0_i32, %c0_i32_0 : i32, i32, i32
  }
  func.func @transform_9(%arg0: i32) -> (i32, i32, i32) {
    %c0_i32 = arith.constant 0 : i32
    %c0_i32_0 = arith.constant 0 : i32
    %c0_i32_1 = arith.constant 0 : i32
    return %arg0, %c0_i32, %c0_i32_0 : i32, i32, i32
  }
  func.func @transform_10(%arg0: i32) -> (i32, i32, i32) {
    %c0_i32 = arith.constant 0 : i32
    %c0_i32_0 = arith.constant 0 : i32
    %c0_i32_1 = arith.constant 0 : i32
    return %arg0, %c0_i32, %c0_i32_0 : i32, i32, i32
  }
  func.func @transform_11(%arg0: i32) -> (i32, i32, i32) {
    %c0_i32 = arith.constant 0 : i32
    %c0_i32_0 = arith.constant 0 : i32
    %c0_i32_1 = arith.constant 0 : i32
    return %arg0, %c0_i32, %c0_i32_0 : i32, i32, i32
  }
  func.func @transform_12(%arg0: i32) -> (i32, i32, i32) {
    %c0_i32 = arith.constant 0 : i32
    %c0_i32_0 = arith.constant 0 : i32
    %c0_i32_1 = arith.constant 0 : i32
    return %arg0, %c0_i32, %c0_i32_0 : i32, i32, i32
  }
  func.func @transform_13(%arg0: i32) -> (i32, i32) {
    %c0_i32 = arith.constant 0 : i32
    %c0_i32_0 = arith.constant 0 : i32
    %c0_i32_1 = arith.constant 0 : i32
    return %c0_i32, %c0_i32_0 : i32, i32
  }
  func.func @transform_14(%arg0: i32) -> (i32, i32) {
    %c0_i32 = arith.constant 0 : i32
    %c0_i32_0 = arith.constant 0 : i32
    %c0_i32_1 = arith.constant 0 : i32
    return %c0_i32, %c0_i32_0 : i32, i32
  }
  func.func @transform_15(%arg0: i32) -> (i32, i32) {
    %c0_i32 = arith.constant 0 : i32
    %c0_i32_0 = arith.constant 0 : i32
    %c0_i32_1 = arith.constant 0 : i32
    return %c0_i32, %c0_i32_0 : i32, i32
  }
  func.func @transform_16(%arg0: i32) -> (i32, i32) {
    %c0_i32 = arith.constant 0 : i32
    %c0_i32_0 = arith.constant 0 : i32
    %c0_i32_1 = arith.constant 0 : i32
    return %c0_i32, %c0_i32_0 : i32, i32
  }
  func.func @transform_17(%arg0: i32) -> (i32, i32) {
    %c0_i32 = arith.constant 0 : i32
    %c0_i32_0 = arith.constant 0 : i32
    %c0_i32_1 = arith.constant 0 : i32
    return %c0_i32, %c0_i32_0 : i32, i32
  }
  func.func @transform_18(%arg0: i32) -> (i32, i32) {
    %c0_i32 = arith.constant 0 : i32
    %c0_i32_0 = arith.constant 0 : i32
    %c0_i32_1 = arith.constant 0 : i32
    return %c0_i32, %c0_i32_0 : i32, i32
  }
  func.func @transform_19(%arg0: i32) -> (i32, i32) {
    %c0_i32 = arith.constant 0 : i32
    %c0_i32_0 = arith.constant 0 : i32
    %c0_i32_1 = arith.constant 0 : i32
    return %c0_i32, %c0_i32_0 : i32, i32
  }
  func.func @transform_20(%arg0: i32) -> (i32, i32) {
    %c0_i32 = arith.constant 0 : i32
    %c0_i32_0 = arith.constant 0 : i32
    %c0_i32_1 = arith.constant 0 : i32
    return %c0_i32, %c0_i32_0 : i32, i32
  }
  func.func @transform_21(%arg0: i32) -> (i32, i32) {
    %c0_i32 = arith.constant 0 : i32
    %c0_i32_0 = arith.constant 0 : i32
    %c0_i32_1 = arith.constant 0 : i32
    return %c0_i32, %c0_i32_0 : i32, i32
  }
  func.func @transform_22(%arg0: i32) -> (i32, i32) {
    %c0_i32 = arith.constant 0 : i32
    %c0_i32_0 = arith.constant 0 : i32
    %c0_i32_1 = arith.constant 0 : i32
    return %c0_i32, %c0_i32_0 : i32, i32
  }
  func.func @transform_23(%arg0: i32) -> (i32, i32) {
    %c0_i32 = arith.constant 0 : i32
    %c0_i32_0 = arith.constant 0 : i32
    %c0_i32_1 = arith.constant 0 : i32
    return %c0_i32, %c0_i32_0 : i32, i32
  }
  func.func @transform_24(%arg0: i32) -> (i32, i32) {
    %c0_i32 = arith.constant 0 : i32
    %c0_i32_0 = arith.constant 0 : i32
    %c0_i32_1 = arith.constant 0 : i32
    return %c0_i32, %c0_i32_0 : i32, i32
  }
}

</mosaic_0001>

<bundles_post_ra>
// kernel: dct_detection_forward.2
= control target key start
LH: loop header
LB: loop body
LE: loop exit
PB: predicated region body
PF: predicated region fallthrough
CT: control target
= control target key end

     0   :  { %vm425_vm0 = vcmask 523264   ;;  %vm1413_vm1 = vcmask 517120   ;;  %s3808_s1 = inlined_call_operand.vmem [shape: f32[1728,64], index: 1, kind: input, shape index: {}]   ;;  %s3809_s0 = inlined_call_operand.vmem [shape: f32[98,1728], index: 0, kind: input, shape index: {}]   ;;  %s3810_s2 = inlined_call_operand.vmem [shape: f32[1,64], index: 2, kind: input, shape index: {}, may-alias: {2,4}]   ;;  %s3811_s3 = inlined_call_operand.vmem [shape: f32[1,64], index: 3, kind: input, shape index: {}]   ;;  %s3812_s4 = inlined_call_operand.vmem [shape: f32[1,64], index: 4, kind: input, shape index: {}, may-alias: {2,4}]   ;;  %s3813_s5 = inlined_call_operand.vmem [shape: f32[98,64], index: 5, kind: output, shape index: {}]  }
   0x1   :  { %v233_v0 = vld [vmem:[%s3808_s1 + $0xf8] sm:$0xff]  ;;  %v232_v4 = vld [vmem:[%s3808_s1 + $0xf0] sm:$0xff]  ;;  %v231_v8 = vld [vmem:[%s3808_s1 + $0xe8] sm:$0xff] }
   0x2   :  { %v265_v1 = vld [vmem:[%s3808_s1 + $0x1f8] sm:$0xff]  ;;  %1619 = vmatprep.subr.mxu0 %v233_v0  ;;  %v264_v5 = vld [vmem:[%s3808_s1 + $0x1f0] sm:$0xff]  ;;  %v263_v9 = vld [vmem:[%s3808_s1 + $0x1e8] sm:$0xff] }
   0x3   :  { %v217_v2 = vld [vmem:[%s3808_s1 + $0x78] sm:$0xff]  ;;  %1690 = vmatprep.subr.mxu1 %v265_v1  ;;  %v216_v6 = vld [vmem:[%s3808_s1 + $0x70] sm:$0xff]  ;;  %v215_v10 = vld [vmem:[%s3808_s1 + $0x68] sm:$0xff] }
   0x4   :  { %v249_v3 = vld [vmem:[%s3808_s1 + $0x178] sm:$0xff]  ;;  %1620 = vmatpush3.msra.mxu0 %v217_v2  ;;  %v248_v7 = vld [vmem:[%s3808_s1 + $0x170] sm:$0xff]  ;;  %v247_v11 = vld [vmem:[%s3808_s1 + $0x168] sm:$0xff] }
   0x5   :  { %1691 = vmatpush3.msra.mxu1 %v249_v3  ;;  %1621 = vmatprep.subr.mxu0 %v232_v4  ;;  %v230_v12 = vld [vmem:[%s3808_s1 + $0xe0] sm:$0xff]  ;;  %v229_v16 = vld [vmem:[%s3808_s1 + $0xd8] sm:$0xff]  ;;  %v228_v20 = vld [vmem:[%s3808_s1 + $0xd0] sm:$0xff] }
   0x6   :  { %1692 = vmatprep.subr.mxu1 %v264_v5  ;;  %1622 = vmatpush3.msra.mxu0 %v216_v6  ;;  %v262_v13 = vld [vmem:[%s3808_s1 + $0x1e0] sm:$0xff]  ;;  %v261_v17 = vld [vmem:[%s3808_s1 + $0x1d8] sm:$0xff]  ;;  %v260_v21 = vld [vmem:[%s3808_s1 + $0x1d0] sm:$0xff] }
   0x7   :  { %1693 = vmatpush3.msra.mxu1 %v248_v7  ;;  %1623 = vmatprep.subr.mxu0 %v231_v8  ;;  %v214_v14 = vld [vmem:[%s3808_s1 + $0x60] sm:$0xff]  ;;  %v213_v18 = vld [vmem:[%s3808_s1 + $0x58] sm:$0xff]  ;;  %v212_v22 = vld [vmem:[%s3808_s1 + $0x50] sm:$0xff] }
   0x8   :  { %1694 = vmatprep.subr.mxu1 %v263_v9  ;;  %v246_v15 = vld [vmem:[%s3808_s1 + $0x160] sm:$0xff]  ;;  %1624 = vmatpush3.msra.mxu0 %v215_v10  ;;  %v245_v19 = vld [vmem:[%s3808_s1 + $0x158] sm:$0xff]  ;;  %v244_v23 = vld [vmem:[%s3808_s1 + $0x150] sm:$0xff] }
   0x9   :  { %1695 = vmatpush3.msra.mxu1 %v247_v11  ;;  %1625 = vmatprep.subr.mxu0 %v230_v12  ;;  %v227_v24 = vld [vmem:[%s3808_s1 + $0xc8] sm:$0xff]  ;;  %v226_v28 = vld [vmem:[%s3808_s1 + $0xc0] sm:$0xff]  ;;  %v225_v32 = vld [vmem:[%s3808_s1 + $0xb8] sm:$0xff] }
   0xa   :  { %1696 = vmatprep.subr.mxu1 %v262_v13  ;;  %1626 = vmatpush3.msra.mxu0 %v214_v14  ;;  %v259_v25 = vld [vmem:[%s3808_s1 + $0x1c8] sm:$0xff]  ;;  %v258_v29 = vld [vmem:[%s3808_s1 + $0x1c0] sm:$0xff]  ;;  %v257_v33 = vld [vmem:[%s3808_s1 + $0x1b8] sm:$0xff] }
   0xb   :  { %1697 = vmatpush3.msra.mxu1 %v246_v15  ;;  %1627 = vmatprep.subr.mxu0 %v229_v16  ;;  %v211_v26 = vld [vmem:[%s3808_s1 + $0x48] sm:$0xff]  ;;  %v210_v30 = vld [vmem:[%s3808_s1 + $0x40] sm:$0xff]  ;;  %v209_v34 = vld [vmem:[%s3808_s1 + $0x38] sm:$0xff] }
   0xc   :  { %1698 = vmatprep.subr.mxu1 %v261_v17  ;;  %1628 = vmatpush3.msra.mxu0 %v213_v18  ;;  %v243_v27 = vld [vmem:[%s3808_s1 + $0x148] sm:$0xff]  ;;  %v242_v31 = vld [vmem:[%s3808_s1 + $0x140] sm:$0xff]  ;;  %v241_v35 = vld [vmem:[%s3808_s1 + $0x138] sm:$0xff] }
   0xd   :  { %1699 = vmatpush3.msra.mxu1 %v245_v19  ;;  %1629 = vmatprep.subr.mxu0 %v228_v20  ;;  %v224_v36 = vld [vmem:[%s3808_s1 + $0xb0] sm:$0xff]  ;;  %v223_v40 = vld [vmem:[%s3808_s1 + $0xa8] sm:$0xff]  ;;  %v222_v44 = vld [vmem:[%s3808_s1 + $0xa0] sm:$0xff] }
   0xe   :  { %1700 = vmatprep.subr.mxu1 %v260_v21  ;;  %1630 = vmatpush3.msra.mxu0 %v212_v22  ;;  %v256_v37 = vld [vmem:[%s3808_s1 + $0x1b0] sm:$0xff]  ;;  %v255_v41 = vld [vmem:[%s3808_s1 + $0x1a8] sm:$0xff]  ;;  %v254_v45 = vld [vmem:[%s3808_s1 + $0x1a0] sm:$0xff] }
   0xf   :  { %1701 = vmatpush3.msra.mxu1 %v244_v23  ;;  %1631 = vmatprep.subr.mxu0 %v227_v24  ;;  %v208_v38 = vld [vmem:[%s3808_s1 + $0x30] sm:$0xff]  ;;  %v207_v42 = vld [vmem:[%s3808_s1 + $0x28] sm:$0xff]  ;;  %v206_v46 = vld [vmem:[%s3808_s1 + $0x20] sm:$0xff] }
  0x10   :  { %1702 = vmatprep.subr.mxu1 %v259_v25  ;;  %1632 = vmatpush3.msra.mxu0 %v211_v26  ;;  %v240_v39 = vld [vmem:[%s3808_s1 + $0x130] sm:$0xff]  ;;  %v239_v43 = vld [vmem:[%s3808_s1 + $0x128] sm:$0xff]  ;;  %v238_v47 = vld [vmem:[%s3808_s1 + $0x120] sm:$0xff] }
  0x11   :  { %1703 = vmatpush3.msra.mxu1 %v243_v27  ;;  %1633 = vmatprep.subr.mxu0 %v226_v28  ;;  %v221_v48 = vld [vmem:[%s3808_s1 + $0x98] sm:$0xff]  ;;  %v220_v52 = vld [vmem:[%s3808_s1 + $0x90] sm:$0xff]  ;;  %v219_v56 = vld [vmem:[%s3808_s1 + $0x88] sm:$0xff] }
  0x12   :  { %1704 = vmatprep.subr.mxu1 %v258_v29  ;;  %1634 = vmatpush3.msra.mxu0 %v210_v30  ;;  %v253_v49 = vld [vmem:[%s3808_s1 + $0x198] sm:$0xff]  ;;  %v252_v53 = vld [vmem:[%s3808_s1 + $0x190] sm:$0xff]  ;;  %v251_v57 = vld [vmem:[%s3808_s1 + $0x188] sm:$0xff] }
  0x13   :  { %1705 = vmatpush3.msra.mxu1 %v242_v31  ;;  %1635 = vmatprep.subr.mxu0 %v225_v32  ;;  %v205_v50 = vld [vmem:[%s3808_s1 + $0x18] sm:$0xff]  ;;  %v204_v54 = vld [vmem:[%s3808_s1 + $0x10] sm:$0xff]  ;;  %v203_v58 = vld [vmem:[%s3808_s1 + $0x8] sm:$0xff] }
  0x14   :  { %1706 = vmatprep.subr.mxu1 %v257_v33  ;;  %1636 = vmatpush3.msra.mxu0 %v209_v34  ;;  %v237_v51 = vld [vmem:[%s3808_s1 + $0x118] sm:$0xff]  ;;  %v236_v55 = vld [vmem:[%s3808_s1 + $0x110] sm:$0xff]  ;;  %v235_v59 = vld [vmem:[%s3808_s1 + $0x108] sm:$0xff] }
  0x15   :  { %1707 = vmatpush3.msra.mxu1 %v241_v35  ;;  %1637 = vmatprep.subr.mxu0 %v224_v36  ;;  %v218_v60 = vld [vmem:[%s3808_s1 + $0x80] sm:$0xff]  ;;  %v21_v63 = vld [vmem:[%s3809_s0 + $0x8] sm:$0xff]  ;;  %v23_v1 = vld [vmem:[%s3809_s0 + $0x18] sm:$0xff] }
  0x16   :  { %1708 = vmatprep.subr.mxu1 %v256_v37  ;;  %1638 = vmatpush3.msra.mxu0 %v208_v38  ;;  %v250_v61 = vld [vmem:[%s3808_s1 + $0x180] sm:$0xff]  ;;  %v22_v3 = vld [vmem:[%s3809_s0 + $0x10] sm:$0xff]  ;;  %v297_v4 = vld [vmem:[%s3808_s1 + $0x2f8] sm:$0xff] }
  0x17   :  { %1709 = vmatpush3.msra.mxu1 %v240_v39  ;;  %1639 = vmatprep.subr.mxu0 %v223_v40  ;;  %v202_v62 = vld [vmem:[%s3808_s1] sm:$0xff]  ;;  %v35_v5 = vld [vmem:[%s3809_s0 + $0x78] sm:$0xff]  ;;  %v37_v7 = vld [vmem:[%s3809_s0 + $0x88] sm:$0xff] }
  0x18   :  { %1710 = vmatprep.subr.mxu1 %v255_v41  ;;  %1640 = vmatpush3.msra.mxu0 %v207_v42  ;;  %v234_v0 = vld [vmem:[%s3808_s1 + $0x100] sm:$0xff]  ;;  %v281_v6 = vld [vmem:[%s3808_s1 + $0x278] sm:$0xff]  ;;  %v296_v8 = vld [vmem:[%s3808_s1 + $0x2f0] sm:$0xff] }
  0x19   :  { %1711 = vmatpush3.msra.mxu1 %v239_v43  ;;  %1641 = vmatprep.subr.mxu0 %v222_v44  ;;  %v20_v2 = vld [vmem:[%s3809_s0] sm:$0xff]  ;;  %v329_v9 = vld [vmem:[%s3808_s1 + $0x3f8] sm:$0xff]  ;;  %v34_v10 = vld [vmem:[%s3809_s0 + $0x70] sm:$0xff] }
  0x1a   :  { %1712 = vmatprep.subr.mxu1 %v254_v45  ;;  %1642 = vmatpush3.msra.mxu0 %v206_v46  ;;  %v36_v11 = vld [vmem:[%s3809_s0 + $0x80] sm:$0xff]  ;;  %v280_v12 = vld [vmem:[%s3808_s1 + $0x270] sm:$0xff]  ;;  %v313_v13 = vld [vmem:[%s3808_s1 + $0x378] sm:$0xff] }
  0x1b   :  { %1713 = vmatpush3.msra.mxu1 %v238_v47  ;;  %1643 = vmatprep.subr.mxu0 %v221_v48  ;;  %v49_v14 = vld [vmem:[%s3809_s0 + $0xe8] sm:$0xff]  ;;  %v51_v15 = vld [vmem:[%s3809_s0 + $0xf8] sm:$0xff]  ;;  %v328_v17 = vld [vmem:[%s3808_s1 + $0x3f0] sm:$0xff] }
  0x1c   :  { %1714 = vmatprep.subr.mxu1 %v253_v49  ;;  %1644 = vmatpush3.msra.mxu0 %v205_v50  ;;  %v295_v16 = vld [vmem:[%s3808_s1 + $0x2e8] sm:$0xff]  ;;  %v48_v18 = vld [vmem:[%s3809_s0 + $0xe0] sm:$0xff]  ;;  %v50_v19 = vld [vmem:[%s3809_s0 + $0xf0] sm:$0xff] }
  0x1d   :  { %1715 = vmatpush3.msra.mxu1 %v237_v51  ;;  %1645 = vmatprep.subr.mxu0 %v220_v52  ;;  %v279_v20 = vld [vmem:[%s3808_s1 + $0x268] sm:$0xff]  ;;  %v312_v21 = vld [vmem:[%s3808_s1 + $0x370] sm:$0xff]  ;;  %v294_v22 = vld [vmem:[%s3808_s1 + $0x2e0] sm:$0xff] }
  0x1e   :  { %1716 = vmatprep.subr.mxu1 %v252_v53  ;;  %1646 = vmatpush3.msra.mxu0 %v204_v54  ;;  %v63_v23 = vld [vmem:[%s3809_s0 + $0x158] sm:$0xff]  ;;  %v65_v24 = vld [vmem:[%s3809_s0 + $0x168] sm:$0xff]  ;;  %v278_v25 = vld [vmem:[%s3808_s1 + $0x260] sm:$0xff] }
  0x1f   :  { %1717 = vmatpush3.msra.mxu1 %v236_v55  ;;  %1647 = vmatprep.subr.mxu0 %v219_v56  ;;  %v327_v26 = vld [vmem:[%s3808_s1 + $0x3e8] sm:$0xff]  ;;  %v62_v27 = vld [vmem:[%s3809_s0 + $0x150] sm:$0xff]  ;;  %v64_v28 = vld [vmem:[%s3809_s0 + $0x160] sm:$0xff] }
  0x20   :  { %1718 = vmatprep.subr.mxu1 %v251_v57  ;;  %1648 = vmatpush3.msra.mxu0 %v203_v58  ;;  %v293_v29 = vld [vmem:[%s3808_s1 + $0x2d8] sm:$0xff]  ;;  %v311_v30 = vld [vmem:[%s3808_s1 + $0x368] sm:$0xff]  ;;  %v326_v32 = vld [vmem:[%s3808_s1 + $0x3e0] sm:$0xff] }
  0x21   :  { %1719 = vmatpush3.msra.mxu1 %v235_v59  ;;  %1649 = vmatprep.subr.mxu0 %v218_v60  ;;  %v277_v31 = vld [vmem:[%s3808_s1 + $0x258] sm:$0xff]  ;;  %v77_v33 = vld [vmem:[%s3809_s0 + $0x1c8] sm:$0xff]  ;;  %v310_v35 = vld [vmem:[%s3808_s1 + $0x360] sm:$0xff] }
  0x22   :  { %1720 = vmatprep.subr.mxu1 %v250_v61  ;;  %1650 = vmatpush3.msra.mxu0 %v202_v62  ;;  %v79_v34 = vld [vmem:[%s3809_s0 + $0x1d8] sm:$0xff]  ;;  %v76_v36 = vld [vmem:[%s3809_s0 + $0x1c0] sm:$0xff]  ;;  %v78_v37 = vld [vmem:[%s3809_s0 + $0x1d0] sm:$0xff] }
  0x23   :  { %529 = vmatprep.mubr.f32.mxu0 %v21_v63  ;;  %1721 = vmatpush3.msra.mxu1 %v234_v0  ;;  %v292_v38 = vld [vmem:[%s3808_s1 + $0x2d0] sm:$0xff]  ;;  %v325_v39 = vld [vmem:[%s3808_s1 + $0x3d8] sm:$0xff]  ;;  %v93_v43 = vld [vmem:[%s3809_s0 + $0x248] sm:$0xff] }
  0x24   :  { %659 = vmatprep.mubr.f32.mxu1 %v23_v1  ;;  %530 = vmatmul.mubr.f32.vlgmr.msra.gmra.mxu0 %v20_v2  ;;  %v276_v40 = vld [vmem:[%s3808_s1 + $0x250] sm:$0xff]  ;;  %v309_v41 = vld [vmem:[%s3808_s1 + $0x358] sm:$0xff]  ;;  %v92_v45 = vld [vmem:[%s3809_s0 + $0x240] sm:$0xff] }
  0x25   :  { %660 = vmatmul.mubr.f32.vlgmr.msra.gmra.mxu1 %v22_v3  ;;  %1761 = vmatprep.subr.mxu0 %v297_v4  ;;  %v91_v42 = vld [vmem:[%s3809_s0 + $0x238] sm:$0xff]  ;;  %v90_v44 = vld [vmem:[%s3809_s0 + $0x230] sm:$0xff]  ;;  %v291_v46 = vld [vmem:[%s3808_s1 + $0x2c8] sm:$0xff] }
  0x26   :  { %534 = vmatprep.mubr.f32.mxu0 %v35_v5  ;;  %1762 = vmatpush3.msra.mxu0 %v281_v6  ;;  %v324_v47 = vld [vmem:[%s3808_s1 + $0x3d0] sm:$0xff]  ;;  %v275_v48 = vld [vmem:[%s3808_s1 + $0x248] sm:$0xff]  ;;  %v107_v51 = vld [vmem:[%s3809_s0 + $0x2b8] sm:$0xff] }
  0x27   :  { %664 = vmatprep.mubr.f32.mxu1 %v37_v7  ;;  %1763 = vmatprep.subr.mxu0 %v296_v8  ;;  %v308_v49 = vld [vmem:[%s3808_s1 + $0x350] sm:$0xff]  ;;  %v105_v50 = vld [vmem:[%s3809_s0 + $0x2a8] sm:$0xff]  ;;  %v290_v52 = vld [vmem:[%s3808_s1 + $0x2c0] sm:$0xff] }
  0x28   :  { %1832 = vmatprep.subr.mxu1 %v329_v9  ;;  %535 = vmatmul.mubr.f32.gmra.mxu0 %v34_v10  ;;  %v104_v53 = vld [vmem:[%s3809_s0 + $0x2a0] sm:$0xff]  ;;  %v106_v54 = vld [vmem:[%s3809_s0 + $0x2b0] sm:$0xff]  ;;  %v323_v56 = vld [vmem:[%s3808_s1 + $0x3c8] sm:$0xff] }
  0x29   :  { %665 = vmatmul.mubr.f32.gmra.mxu1 %v36_v11  ;;  %1764 = vmatpush3.msra.mxu0 %v280_v12  ;;  %v274_v55 = vld [vmem:[%s3808_s1 + $0x240] sm:$0xff]  ;;  %v289_v57 = vld [vmem:[%s3808_s1 + $0x2b8] sm:$0xff]  ;;  %v307_v58 = vld [vmem:[%s3808_s1 + $0x348] sm:$0xff] }
  0x2a   :  { %1833 = vmatpush3.msra.mxu1 %v313_v13  ;;  %539 = vmatprep.mubr.f32.mxu0 %v49_v14  ;;  %v119_v59 = vld [vmem:[%s3809_s0 + $0x318] sm:$0xff]  ;;  %v121_v60 = vld [vmem:[%s3809_s0 + $0x328] sm:$0xff]  ;;  %v322_v62 = vld [vmem:[%s3808_s1 + $0x3c0] sm:$0xff] }
  0x2b   :  { %669 = vmatprep.mubr.f32.mxu1 %v51_v15  ;;  %1765 = vmatprep.subr.mxu0 %v295_v16  ;;  %v273_v61 = vld [vmem:[%s3808_s1 + $0x238] sm:$0xff]  ;;  %v118_v63 = vld [vmem:[%s3809_s0 + $0x310] sm:$0xff]  ;;  %v120_v0 = vld [vmem:[%s3809_s0 + $0x320] sm:$0xff] }
  0x2c   :  { %1834 = vmatprep.subr.mxu1 %v328_v17  ;;  %540 = vmatmul.mubr.f32.gmra.mxu0 %v48_v18  ;;  %v288_v1 = vld [vmem:[%s3808_s1 + $0x2b0] sm:$0xff]  ;;  %v306_v2 = vld [vmem:[%s3808_s1 + $0x340] sm:$0xff]  ;;  %v133_v3 = vld [vmem:[%s3809_s0 + $0x388] sm:$0xff] }
  0x2d   :  { %670 = vmatmul.mubr.f32.gmra.mxu1 %v50_v19  ;;  %1766 = vmatpush3.msra.mxu0 %v279_v20  ;;  %v321_v4 = vld [vmem:[%s3808_s1 + $0x3b8] sm:$0xff]  ;;  %v272_v6 = vld [vmem:[%s3808_s1 + $0x230] sm:$0xff]  ;;  %v132_v8 = vld [vmem:[%s3809_s0 + $0x380] sm:$0xff] }
  0x2e   :  { %1835 = vmatpush3.msra.mxu1 %v312_v21  ;;  %1767 = vmatprep.subr.mxu0 %v294_v22  ;;  %v135_v5 = vld [vmem:[%s3809_s0 + $0x398] sm:$0xff]  ;;  %v134_v9 = vld [vmem:[%s3809_s0 + $0x390] sm:$0xff]  ;;  %v287_v10 = vld [vmem:[%s3808_s1 + $0x2a8] sm:$0xff] }
  0x2f   :  { %544 = vmatprep.mubr.f32.mxu0 %v63_v23  ;;  %674 = vmatprep.mubr.f32.mxu1 %v65_v24  ;;  %v305_v7 = vld [vmem:[%s3808_s1 + $0x338] sm:$0xff]  ;;  %v320_v11 = vld [vmem:[%s3808_s1 + $0x3b0] sm:$0xff]  ;;  %v271_v12 = vld [vmem:[%s3808_s1 + $0x228] sm:$0xff] }
  0x30   :  { %1768 = vmatpush3.msra.mxu0 %v278_v25  ;;  %1836 = vmatprep.subr.mxu1 %v327_v26  ;;  %v147_v13 = vld [vmem:[%s3809_s0 + $0x3f8] sm:$0xff]  ;;  %v149_v14 = vld [vmem:[%s3809_s0 + $0x408] sm:$0xff]  ;;  %v304_v15 = vld [vmem:[%s3808_s1 + $0x330] sm:$0xff] }
  0x31   :  { %545 = vmatmul.mubr.f32.gmra.mxu0 %v62_v27  ;;  %675 = vmatmul.mubr.f32.gmra.mxu1 %v64_v28  ;;  %v146_v16 = vld [vmem:[%s3809_s0 + $0x3f0] sm:$0xff]  ;;  %v148_v17 = vld [vmem:[%s3809_s0 + $0x400] sm:$0xff]  ;;  %v319_v19 = vld [vmem:[%s3808_s1 + $0x3a8] sm:$0xff] }
  0x32   :  { %1769 = vmatprep.subr.mxu0 %v293_v29  ;;  %1837 = vmatpush3.msra.mxu1 %v311_v30  ;;  %v286_v18 = vld [vmem:[%s3808_s1 + $0x2a0] sm:$0xff]  ;;  %v303_v21 = vld [vmem:[%s3808_s1 + $0x328] sm:$0xff]  ;;  %v163_v23 = vld [vmem:[%s3809_s0 + $0x478] sm:$0xff] }
  0x33   :  { %1770 = vmatpush3.msra.mxu0 %v277_v31  ;;  %1838 = vmatprep.subr.mxu1 %v326_v32  ;;  %v270_v20 = vld [vmem:[%s3808_s1 + $0x220] sm:$0xff]  ;;  %v161_v22 = vld [vmem:[%s3809_s0 + $0x468] sm:$0xff]  ;;  %v285_v24 = vld [vmem:[%s3808_s1 + $0x298] sm:$0xff] }
  0x34   :  { %549 = vmatprep.mubr.f32.mxu0 %v77_v33  ;;  %679 = vmatprep.mubr.f32.mxu1 %v79_v34  ;;  %v160_v25 = vld [vmem:[%s3809_s0 + $0x460] sm:$0xff]  ;;  %v162_v26 = vld [vmem:[%s3809_s0 + $0x470] sm:$0xff]  ;;  %v269_v27 = vld [vmem:[%s3808_s1 + $0x218] sm:$0xff] }
  0x35   :  { %1839 = vmatpush3.msra.mxu1 %v310_v35  ;;  %550 = vmatmul.mubr.f32.gmra.mxu0 %v76_v36  ;;  %v318_v28 = vld [vmem:[%s3808_s1 + $0x3a0] sm:$0xff]  ;;  %v175_v29 = vld [vmem:[%s3809_s0 + $0x4d8] sm:$0xff]  ;;  %v177_v31 = vld [vmem:[%s3809_s0 + $0x4e8] sm:$0xff] }
  0x36   :  { %680 = vmatmul.mubr.f32.gmra.mxu1 %v78_v37  ;;  %1771 = vmatprep.subr.mxu0 %v292_v38  ;;  %v302_v30 = vld [vmem:[%s3808_s1 + $0x320] sm:$0xff]  ;;  %v284_v32 = vld [vmem:[%s3808_s1 + $0x290] sm:$0xff]  ;;  %v317_v33 = vld [vmem:[%s3808_s1 + $0x398] sm:$0xff] }
  0x37   :  { %1840 = vmatprep.subr.mxu1 %v325_v39  ;;  %1772 = vmatpush3.msra.mxu0 %v276_v40  ;;  %v174_v34 = vld [vmem:[%s3809_s0 + $0x4d0] sm:$0xff]  ;;  %v176_v35 = vld [vmem:[%s3809_s0 + $0x4e0] sm:$0xff]  ;;  %v301_v37 = vld [vmem:[%s3808_s1 + $0x318] sm:$0xff] }
  0x38   :  { %1841 = vmatpush3.msra.mxu1 %v309_v41  ;;  %554 = vmatprep.mubr.f32.mxu0 %v91_v42  ;;  %v268_v36 = vld [vmem:[%s3808_s1 + $0x210] sm:$0xff]  ;;  %v283_v38 = vld [vmem:[%s3808_s1 + $0x288] sm:$0xff]  ;;  %v191_v41 = vld [vmem:[%s3809_s0 + $0x558] sm:$0x3] }
  0x39   :  { %684 = vmatprep.mubr.f32.mxu1 %v93_v43  ;;  %555 = vmatmul.mubr.f32.gmra.mxu0 %v90_v44  ;;  %v316_v39 = vld [vmem:[%s3808_s1 + $0x390] sm:$0xff]  ;;  %v189_v40 = vld [vmem:[%s3809_s0 + $0x548] sm:$0x3]  ;;  %v188_v44 = vld [vmem:[%s3809_s0 + $0x540] sm:$0x3] }
  0x3a   :  { %685 = vmatmul.mubr.f32.gmra.mxu1 %v92_v45  ;;  %1773 = vmatprep.subr.mxu0 %v291_v46  ;;  %v267_v42 = vld [vmem:[%s3808_s1 + $0x208] sm:$0xff]  ;;  %v300_v43 = vld [vmem:[%s3808_s1 + $0x310] sm:$0xff] }
  0x3b   :  { %1842 = vmatprep.subr.mxu1 %v324_v47  ;;  %1774 = vmatpush3.msra.mxu0 %v275_v48  ;;  %v190_v45 = vld [vmem:[%s3809_s0 + $0x550] sm:$0x3]  ;;  %v315_v46 = vld [vmem:[%s3808_s1 + $0x388] sm:$0xff]  ;;  %v282_v47 = vld [vmem:[%s3808_s1 + $0x280] sm:$0xff] }
  0x3c   :  { %1843 = vmatpush3.msra.mxu1 %v308_v49  ;;  %559 = vmatprep.mubr.f32.mxu0 %v105_v50  ;;  %v299_v48 = vld [vmem:[%s3808_s1 + $0x308] sm:$0xff]  ;;  %v266_v49 = vld [vmem:[%s3808_s1 + $0x200] sm:$0xff] }
  0x3d   :  { %689 = vmatprep.mubr.f32.mxu1 %v107_v51  ;;  %1775 = vmatprep.subr.mxu0 %v290_v52  ;;  %v314_v50 = vld [vmem:[%s3808_s1 + $0x380] sm:$0xff]  ;;  %v25_v51 = vld [vmem:[%s3809_s0 + $0x28] sm:$0xff] }
  0x3e   :  { %560 = vmatmul.mubr.f32.gmra.mxu0 %v104_v53  ;;  %690 = vmatmul.mubr.f32.gmra.mxu1 %v106_v54  ;;  %v298_v52 = vld [vmem:[%s3808_s1 + $0x300] sm:$0xff]  ;;  %v27_v53 = vld [vmem:[%s3809_s0 + $0x38] sm:$0xff] }
  0x3f   :  { %1776 = vmatpush3.msra.mxu0 %v274_v55  ;;  %1844 = vmatprep.subr.mxu1 %v323_v56  ;;  %v24_v54 = vld [vmem:[%s3809_s0 + $0x20] sm:$0xff]  ;;  %v26_v55 = vld [vmem:[%s3809_s0 + $0x30] sm:$0xff]  ;;  %v361_v56 = vld [vmem:[%s3808_s1 + $0x4f8] sm:$0xff] }
  0x40   :  { %1777 = vmatprep.subr.mxu0 %v289_v57  ;;  %1845 = vmatpush3.msra.mxu1 %v307_v58  ;;  %v39_v57 = vld [vmem:[%s3809_s0 + $0x98] sm:$0xff] }
  0x41   :  { %564 = vmatprep.mubr.f32.mxu0 %v119_v59  ;;  %694 = vmatprep.mubr.f32.mxu1 %v121_v60  ;;  %v345_v58 = vld [vmem:[%s3808_s1 + $0x478] sm:$0xff]  ;;  %v41_v59 = vld [vmem:[%s3809_s0 + $0xa8] sm:$0xff]  ;;  %v360_v60 = vld [vmem:[%s3808_s1 + $0x4f0] sm:$0xff] }
  0x42   :  { %1778 = vmatpush3.msra.mxu0 %v273_v61  ;;  %1846 = vmatprep.subr.mxu1 %v322_v62  ;;  %v393_v61 = vld [vmem:[%s3808_s1 + $0x5f8] sm:$0xff]  ;;  %v38_v62 = vld [vmem:[%s3809_s0 + $0x90] sm:$0xff] }
  0x43   :  { %565 = vmatmul.mubr.f32.gmra.mxu0 %v118_v63  ;;  %695 = vmatmul.mubr.f32.gmra.mxu1 %v120_v0  ;;  %v40_v63 = vld [vmem:[%s3809_s0 + $0xa0] sm:$0xff]  ;;  %v344_v0 = vld [vmem:[%s3808_s1 + $0x470] sm:$0xff] }
  0x44   :  { %1779 = vmatprep.subr.mxu0 %v288_v1  ;;  %1847 = vmatpush3.msra.mxu1 %v306_v2  ;;  %v377_v1 = vld [vmem:[%s3808_s1 + $0x578] sm:$0xff]  ;;  %v53_v2 = vld [vmem:[%s3809_s0 + $0x108] sm:$0xff] }
  0x45   :  { %569 = vmatprep.mubr.f32.mxu0 %v133_v3  ;;  %1848 = vmatprep.subr.mxu1 %v321_v4  ;;  %v55_v3 = vld [vmem:[%s3809_s0 + $0x118] sm:$0xff]  ;;  %v359_v4 = vld [vmem:[%s3808_s1 + $0x4e8] sm:$0xff] }
  0x46   :  { %699 = vmatprep.mubr.f32.mxu1 %v135_v5  ;;  %1780 = vmatpush3.msra.mxu0 %v272_v6  ;;  %v392_v5 = vld [vmem:[%s3808_s1 + $0x5f0] sm:$0xff]  ;;  %v52_v6 = vld [vmem:[%s3809_s0 + $0x100] sm:$0xff] }
  0x47   :  { %1849 = vmatpush3.msra.mxu1 %v305_v7  ;;  %570 = vmatmul.mubr.f32.gmra.mxu0 %v132_v8  ;;  %v54_v7 = vld [vmem:[%s3809_s0 + $0x110] sm:$0xff]  ;;  %v343_v8 = vld [vmem:[%s3808_s1 + $0x468] sm:$0xff] }
  0x48   :  { %700 = vmatmul.mubr.f32.gmra.mxu1 %v134_v9  ;;  %1781 = vmatprep.subr.mxu0 %v287_v10  ;;  %v376_v9 = vld [vmem:[%s3808_s1 + $0x570] sm:$0xff]  ;;  %v358_v10 = vld [vmem:[%s3808_s1 + $0x4e0] sm:$0xff] }
  0x49   :  { %1850 = vmatprep.subr.mxu1 %v320_v11  ;;  %1782 = vmatpush3.msra.mxu0 %v271_v12  ;;  %v67_v11 = vld [vmem:[%s3809_s0 + $0x178] sm:$0xff]  ;;  %v69_v12 = vld [vmem:[%s3809_s0 + $0x188] sm:$0xff] }
  0x4a   :  { %574 = vmatprep.mubr.f32.mxu0 %v147_v13  ;;  %704 = vmatprep.mubr.f32.mxu1 %v149_v14  ;;  %v342_v13 = vld [vmem:[%s3808_s1 + $0x460] sm:$0xff]  ;;  %v391_v14 = vld [vmem:[%s3808_s1 + $0x5e8] sm:$0xff] }
  0x4b   :  { %1851 = vmatpush3.msra.mxu1 %v304_v15  ;;  %575 = vmatmul.mubr.f32.gmra.mxu0 %v146_v16  ;;  %v66_v15 = vld [vmem:[%s3809_s0 + $0x170] sm:$0xff]  ;;  %v68_v16 = vld [vmem:[%s3809_s0 + $0x180] sm:$0xff] }
  0x4c   :  { %705 = vmatmul.mubr.f32.gmra.mxu1 %v148_v17  ;;  %1783 = vmatprep.subr.mxu0 %v286_v18  ;;  %v357_v17 = vld [vmem:[%s3808_s1 + $0x4d8] sm:$0xff]  ;;  %v375_v18 = vld [vmem:[%s3808_s1 + $0x568] sm:$0xff] }
  0x4d   :  { %1852 = vmatprep.subr.mxu1 %v319_v19  ;;  %1784 = vmatpush3.msra.mxu0 %v270_v20  ;;  %v341_v19 = vld [vmem:[%s3808_s1 + $0x458] sm:$0xff]  ;;  %v390_v20 = vld [vmem:[%s3808_s1 + $0x5e0] sm:$0xff] }
  0x4e   :  { %1853 = vmatpush3.msra.mxu1 %v303_v21  ;;  %579 = vmatprep.mubr.f32.mxu0 %v161_v22  ;;  %v81_v21 = vld [vmem:[%s3809_s0 + $0x1e8] sm:$0xff]  ;;  %v83_v22 = vld [vmem:[%s3809_s0 + $0x1f8] sm:$0xff] }
  0x4f   :  { %709 = vmatprep.mubr.f32.mxu1 %v163_v23  ;;  %1785 = vmatprep.subr.mxu0 %v285_v24  ;;  %v374_v23 = vld [vmem:[%s3808_s1 + $0x560] sm:$0xff] }
  0x50   :  { %580 = vmatmul.mubr.f32.gmra.mxu0 %v160_v25  ;;  %710 = vmatmul.mubr.f32.gmra.mxu1 %v162_v26  ;;  %v80_v24 = vld [vmem:[%s3809_s0 + $0x1e0] sm:$0xff]  ;;  %v82_v25 = vld [vmem:[%s3809_s0 + $0x1f0] sm:$0xff] }
  0x51   :  { %1786 = vmatpush3.msra.mxu0 %v269_v27  ;;  %1854 = vmatprep.subr.mxu1 %v318_v28  ;;  %v356_v26 = vld [vmem:[%s3808_s1 + $0x4d0] sm:$0xff]  ;;  %v389_v27 = vld [vmem:[%s3808_s1 + $0x5d8] sm:$0xff] }
  0x52   :  { %584 = vmatprep.mubr.f32.mxu0 %v175_v29  ;;  %1855 = vmatpush3.msra.mxu1 %v302_v30  ;;  %v340_v28 = vld [vmem:[%s3808_s1 + $0x450] sm:$0xff]  ;;  %v373_v29 = vld [vmem:[%s3808_s1 + $0x558] sm:$0xff] }
  0x53   :  { %714 = vmatprep.mubr.f32.mxu1 %v177_v31  ;;  %1787 = vmatprep.subr.mxu0 %v284_v32  ;;  %v95_v30 = vld [vmem:[%s3809_s0 + $0x258] sm:$0xff]  ;;  %v97_v31 = vld [vmem:[%s3809_s0 + $0x268] sm:$0xff]  ;;  %v94_v32 = vld [vmem:[%s3809_s0 + $0x250] sm:$0xff] }
  0x54   :  { %1856 = vmatprep.subr.mxu1 %v317_v33  ;;  %585 = vmatmul.mubr.f32.gmra.mxu0 %v174_v34  ;;  %v96_v33 = vld [vmem:[%s3809_s0 + $0x260] sm:$0xff]  ;;  %v355_v34 = vld [vmem:[%s3808_s1 + $0x4c8] sm:$0xff] }
  0x55   :  { %715 = vmatmul.mubr.f32.gmra.mxu1 %v176_v35  ;;  %1788 = vmatpush3.msra.mxu0 %v268_v36  ;;  %v388_v35 = vld [vmem:[%s3808_s1 + $0x5d0] sm:$0xff]  ;;  %v339_v36 = vld [vmem:[%s3808_s1 + $0x448] sm:$0xff] }
  0x56   :  { %1857 = vmatpush3.msra.mxu1 %v301_v37  ;;  %1789 = vmatprep.subr.mxu0 %v283_v38  ;;  %v372_v37 = vld [vmem:[%s3808_s1 + $0x550] sm:$0xff]  ;;  %v109_v38 = vld [vmem:[%s3809_s0 + $0x2c8] sm:$0xff] }
  0x57   :  { %1858 = vmatprep.subr.mxu1 %v316_v39  ;;  %589 = vmatprep.mubr.f32.mxu0 %v189_v40  ;;  %v111_v39 = vld [vmem:[%s3809_s0 + $0x2d8] sm:$0xff]  ;;  %v354_v40 = vld [vmem:[%s3808_s1 + $0x4c0] sm:$0xff] }
  0x58   :  { %719 = vmatprep.mubr.f32.mxu1 %v191_v41  ;;  %1790 = vmatpush3.msra.mxu0 %v267_v42  ;;  %v108_v41 = vld [vmem:[%s3809_s0 + $0x2c0] sm:$0xff]  ;;  %v110_v42 = vld [vmem:[%s3809_s0 + $0x2d0] sm:$0xff] }
  0x59   :  { %1859 = vmatpush3.msra.mxu1 %v300_v43  ;;  %590 = vmatmul.mubr.f32.gmra.mxu0 %v188_v44  ;;  %v338_v43 = vld [vmem:[%s3808_s1 + $0x440] sm:$0xff]  ;;  %v387_v44 = vld [vmem:[%s3808_s1 + $0x5c8] sm:$0xff] }
  0x5a   :  { %720 = vmatmul.mubr.f32.gmra.mxu1 %v190_v45  ;;  %1860 = vmatprep.subr.mxu1 %v315_v46  ;;  %v353_v45 = vld [vmem:[%s3808_s1 + $0x4b8] sm:$0xff]  ;;  %v371_v46 = vld [vmem:[%s3808_s1 + $0x548] sm:$0xff] }
  0x5b   :  { %1791 = vmatprep.subr.mxu0 %v282_v47  ;;  %1861 = vmatpush3.msra.mxu1 %v299_v48  ;;  %v123_v47 = vld [vmem:[%s3809_s0 + $0x338] sm:$0xff]  ;;  %v125_v48 = vld [vmem:[%s3809_s0 + $0x348] sm:$0xff] }
  0x5c   :  { %1792 = vmatpush3.msra.mxu0 %v266_v49  ;;  %1862 = vmatprep.subr.mxu1 %v314_v50  ;;  %v337_v49 = vld [vmem:[%s3808_s1 + $0x438] sm:$0xff]  ;;  %v386_v50 = vld [vmem:[%s3808_s1 + $0x5c0] sm:$0xff] }
  0x5d   :  { %789 = vmatprep.mubr.f32.mxu0 %v25_v51  ;;  %1863 = vmatpush3.msra.mxu1 %v298_v52  ;;  %v122_v51 = vld [vmem:[%s3809_s0 + $0x330] sm:$0xff]  ;;  %v124_v52 = vld [vmem:[%s3809_s0 + $0x340] sm:$0xff] }
  0x5e   :  { %919 = vmatprep.mubr.f32.mxu1 %v27_v53  ;;  %790 = vmatmul.mubr.f32.vlgmr.msra.gmra.mxu0 %v24_v54  ;;  %v352_v53 = vld [vmem:[%s3808_s1 + $0x4b0] sm:$0xff]  ;;  %v370_v54 = vld [vmem:[%s3808_s1 + $0x540] sm:$0xff] }
  0x5f   :  { %920 = vmatmul.mubr.f32.vlgmr.msra.gmra.mxu1 %v26_v55  ;;  %1903 = vmatprep.subr.mxu0 %v361_v56  ;;  %v137_v55 = vld [vmem:[%s3809_s0 + $0x3a8] sm:$0xff]  ;;  %v385_v56 = vld [vmem:[%s3808_s1 + $0x5b8] sm:$0xff] }
  0x60   :  { %794 = vmatprep.mubr.f32.mxu0 %v39_v57  ;;  %1904 = vmatpush3.msra.mxu0 %v345_v58  ;;  %v139_v57 = vld [vmem:[%s3809_s0 + $0x3b8] sm:$0xff]  ;;  %v336_v58 = vld [vmem:[%s3808_s1 + $0x430] sm:$0xff] }
  0x61   :  { %924 = vmatprep.mubr.f32.mxu1 %v41_v59  ;;  %1905 = vmatprep.subr.mxu0 %v360_v60  ;;  %v369_v59 = vld [vmem:[%s3808_s1 + $0x538] sm:$0xff]  ;;  %v136_v60 = vld [vmem:[%s3809_s0 + $0x3a0] sm:$0xff] }
  0x62   :  { %1974 = vmatprep.subr.mxu1 %v393_v61  ;;  %795 = vmatmul.mubr.f32.gmra.mxu0 %v38_v62  ;;  %v138_v61 = vld [vmem:[%s3809_s0 + $0x3b0] sm:$0xff]  ;;  %v351_v62 = vld [vmem:[%s3808_s1 + $0x4a8] sm:$0xff] }
  0x63   :  { %925 = vmatmul.mubr.f32.gmra.mxu1 %v40_v63  ;;  %1906 = vmatpush3.msra.mxu0 %v344_v0  ;;  %v384_v63 = vld [vmem:[%s3808_s1 + $0x5b0] sm:$0xff]  ;;  %v335_v0 = vld [vmem:[%s3808_s1 + $0x428] sm:$0xff] }
  0x64   :  { %1975 = vmatpush3.msra.mxu1 %v377_v1  ;;  %799 = vmatprep.mubr.f32.mxu0 %v53_v2  ;;  %v151_v1 = vld [vmem:[%s3809_s0 + $0x418] sm:$0xff]  ;;  %v153_v2 = vld [vmem:[%s3809_s0 + $0x428] sm:$0xff] }
  0x65   :  { %929 = vmatprep.mubr.f32.mxu1 %v55_v3  ;;  %1907 = vmatprep.subr.mxu0 %v359_v4  ;;  %v368_v3 = vld [vmem:[%s3808_s1 + $0x530] sm:$0xff] }
  0x66   :  { %1976 = vmatprep.subr.mxu1 %v392_v5  ;;  %800 = vmatmul.mubr.f32.gmra.mxu0 %v52_v6  ;;  %v150_v4 = vld [vmem:[%s3809_s0 + $0x410] sm:$0xff]  ;;  %v152_v5 = vld [vmem:[%s3809_s0 + $0x420] sm:$0xff] }
  0x67   :  { %930 = vmatmul.mubr.f32.gmra.mxu1 %v54_v7  ;;  %1908 = vmatpush3.msra.mxu0 %v343_v8  ;;  %v350_v6 = vld [vmem:[%s3808_s1 + $0x4a0] sm:$0xff]  ;;  %v383_v7 = vld [vmem:[%s3808_s1 + $0x5a8] sm:$0xff] }
  0x68   :  { %1977 = vmatpush3.msra.mxu1 %v376_v9  ;;  %1909 = vmatprep.subr.mxu0 %v358_v10  ;;  %v334_v8 = vld [vmem:[%s3808_s1 + $0x420] sm:$0xff]  ;;  %v367_v9 = vld [vmem:[%s3808_s1 + $0x528] sm:$0xff] }
  0x69   :  { %804 = vmatprep.mubr.f32.mxu0 %v67_v11  ;;  %934 = vmatprep.mubr.f32.mxu1 %v69_v12  ;;  %v165_v10 = vld [vmem:[%s3809_s0 + $0x488] sm:$0xff]  ;;  %v167_v11 = vld [vmem:[%s3809_s0 + $0x498] sm:$0xff] }
  0x6a   :  { %1910 = vmatpush3.msra.mxu0 %v342_v13  ;;  %1978 = vmatprep.subr.mxu1 %v391_v14  ;;  %v349_v12 = vld [vmem:[%s3808_s1 + $0x498] sm:$0xff]  ;;  %v164_v13 = vld [vmem:[%s3809_s0 + $0x480] sm:$0xff]  ;;  %v166_v14 = vld [vmem:[%s3809_s0 + $0x490] sm:$0xff] }
  0x6b   :  { %805 = vmatmul.mubr.f32.gmra.mxu0 %v66_v15  ;;  %935 = vmatmul.mubr.f32.gmra.mxu1 %v68_v16  ;;  %v333_v15 = vld [vmem:[%s3808_s1 + $0x418] sm:$0xff]  ;;  %v382_v16 = vld [vmem:[%s3808_s1 + $0x5a0] sm:$0xff] }
  0x6c   :  { %1911 = vmatprep.subr.mxu0 %v357_v17  ;;  %1979 = vmatpush3.msra.mxu1 %v375_v18  ;;  %v179_v17 = vld [vmem:[%s3809_s0 + $0x4f8] sm:$0xff]  ;;  %v366_v18 = vld [vmem:[%s3808_s1 + $0x520] sm:$0xff] }
  0x6d   :  { %1912 = vmatpush3.msra.mxu0 %v341_v19  ;;  %1980 = vmatprep.subr.mxu1 %v390_v20  ;;  %v181_v19 = vld [vmem:[%s3809_s0 + $0x508] sm:$0xff]  ;;  %v348_v20 = vld [vmem:[%s3808_s1 + $0x490] sm:$0xff] }
  0x6e   :  { %809 = vmatprep.mubr.f32.mxu0 %v81_v21  ;;  %939 = vmatprep.mubr.f32.mxu1 %v83_v22  ;;  %v381_v21 = vld [vmem:[%s3808_s1 + $0x598] sm:$0xff]  ;;  %v178_v22 = vld [vmem:[%s3809_s0 + $0x4f0] sm:$0xff] }
  0x6f   :  { %1981 = vmatpush3.msra.mxu1 %v374_v23  ;;  %810 = vmatmul.mubr.f32.gmra.mxu0 %v80_v24  ;;  %v180_v23 = vld [vmem:[%s3809_s0 + $0x500] sm:$0xff]  ;;  %v332_v24 = vld [vmem:[%s3808_s1 + $0x410] sm:$0xff] }
  0x70   :  { %940 = vmatmul.mubr.f32.gmra.mxu1 %v82_v25  ;;  %1913 = vmatprep.subr.mxu0 %v356_v26  ;;  %v365_v25 = vld [vmem:[%s3808_s1 + $0x518] sm:$0xff]  ;;  %v347_v26 = vld [vmem:[%s3808_s1 + $0x488] sm:$0xff] }
  0x71   :  { %1982 = vmatprep.subr.mxu1 %v389_v27  ;;  %1914 = vmatpush3.msra.mxu0 %v340_v28  ;;  %v380_v27 = vld [vmem:[%s3808_s1 + $0x590] sm:$0xff]  ;;  %v193_v28 = vld [vmem:[%s3809_s0 + $0x568] sm:$0x3] }
  0x72   :  { %1983 = vmatpush3.msra.mxu1 %v373_v29  ;;  %814 = vmatprep.mubr.f32.mxu0 %v95_v30  ;;  %v195_v29 = vld [vmem:[%s3809_s0 + $0x578] sm:$0x3]  ;;  %v331_v30 = vld [vmem:[%s3808_s1 + $0x408] sm:$0xff] }
  0x73   :  { %944 = vmatprep.mubr.f32.mxu1 %v97_v31  ;;  %815 = vmatmul.mubr.f32.gmra.mxu0 %v94_v32  ;;  %v364_v31 = vld [vmem:[%s3808_s1 + $0x510] sm:$0xff]  ;;  %v192_v32 = vld [vmem:[%s3809_s0 + $0x560] sm:$0x3] }
  0x74   :  { %945 = vmatmul.mubr.f32.gmra.mxu1 %v96_v33  ;;  %1915 = vmatprep.subr.mxu0 %v355_v34  ;;  %v194_v33 = vld [vmem:[%s3809_s0 + $0x570] sm:$0x3]  ;;  %v379_v34 = vld [vmem:[%s3808_s1 + $0x588] sm:$0xff] }
  0x75   :  { %1984 = vmatprep.subr.mxu1 %v388_v35  ;;  %1916 = vmatpush3.msra.mxu0 %v339_v36  ;;  %v346_v35 = vld [vmem:[%s3808_s1 + $0x480] sm:$0xff]  ;;  %v363_v36 = vld [vmem:[%s3808_s1 + $0x508] sm:$0xff] }
  0x76   :  { %1985 = vmatpush3.msra.mxu1 %v372_v37  ;;  %819 = vmatprep.mubr.f32.mxu0 %v109_v38  ;;  %v330_v37 = vld [vmem:[%s3808_s1 + $0x400] sm:$0xff] }
  0x77   :  { %949 = vmatprep.mubr.f32.mxu1 %v111_v39  ;;  %1917 = vmatprep.subr.mxu0 %v354_v40  ;;  %v378_v38 = vld [vmem:[%s3808_s1 + $0x580] sm:$0xff]  ;;  %v29_v39 = vld [vmem:[%s3809_s0 + $0x48] sm:$0xff] }
  0x78   :  { %820 = vmatmul.mubr.f32.gmra.mxu0 %v108_v41  ;;  %950 = vmatmul.mubr.f32.gmra.mxu1 %v110_v42  ;;  %v362_v40 = vld [vmem:[%s3808_s1 + $0x500] sm:$0xff]  ;;  %v31_v41 = vld [vmem:[%s3809_s0 + $0x58] sm:$0xff] }
  0x79   :  { %1918 = vmatpush3.msra.mxu0 %v338_v43  ;;  %1986 = vmatprep.subr.mxu1 %v387_v44  ;;  %v28_v42 = vld [vmem:[%s3809_s0 + $0x40] sm:$0xff]  ;;  %v30_v43 = vld [vmem:[%s3809_s0 + $0x50] sm:$0xff]  ;;  %v43_v44 = vld [vmem:[%s3809_s0 + $0xb8] sm:$0xff] }
  0x7a   :  { %1919 = vmatprep.subr.mxu0 %v353_v45  ;;  %1987 = vmatpush3.msra.mxu1 %v371_v46  ;;  %v409_v45 = vld [vmem:[%s3808_s1 + $0x678] sm:$0xff]  ;;  %v45_v46 = vld [vmem:[%s3809_s0 + $0xc8] sm:$0xff] }
  0x7b   :  { %824 = vmatprep.mubr.f32.mxu0 %v123_v47  ;;  %954 = vmatprep.mubr.f32.mxu1 %v125_v48  ;;  %v2120_v47 = vmov 0.0   ;;  %v42_v48 = vld [vmem:[%s3809_s0 + $0xb0] sm:$0xff] }
  0x7c   :  { %1920 = vmatpush3.msra.mxu0 %v337_v49  ;;  %1988 = vmatprep.subr.mxu1 %v386_v50  ;;  %v44_v49 = vld [vmem:[%s3809_s0 + $0xc0] sm:$0xff]  ;;  %v408_v50 = vld [vmem:[%s3808_s1 + $0x670] sm:$0xff] }
  0x7d   :  { %825 = vmatmul.mubr.f32.gmra.mxu0 %v122_v51  ;;  %955 = vmatmul.mubr.f32.gmra.mxu1 %v124_v52  ;;  %v407_v51 = vld [vmem:[%s3808_s1 + $0x668] sm:$0xff] }
  0x7e   :  { %1921 = vmatprep.subr.mxu0 %v352_v53  ;;  %1989 = vmatpush3.msra.mxu1 %v370_v54  ;;  %v57_v52 = vld [vmem:[%s3809_s0 + $0x128] sm:$0xff]  ;;  %v59_v53 = vld [vmem:[%s3809_s0 + $0x138] sm:$0xff]  ;;  %v56_v54 = vld [vmem:[%s3809_s0 + $0x120] sm:$0xff] }
  0x7f   :  { %829 = vmatprep.mubr.f32.mxu0 %v137_v55  ;;  %1990 = vmatprep.subr.mxu1 %v385_v56  ;;  %v58_v55 = vld [vmem:[%s3809_s0 + $0x130] sm:$0xff]  ;;  %v406_v56 = vld [vmem:[%s3808_s1 + $0x660] sm:$0xff] }
  0x80   :  { %959 = vmatprep.mubr.f32.mxu1 %v139_v57  ;;  %1922 = vmatpush3.msra.mxu0 %v336_v58  ;;  %v405_v57 = vld [vmem:[%s3808_s1 + $0x658] sm:$0xff] }
  0x81   :  { %1991 = vmatpush3.msra.mxu1 %v369_v59  ;;  %830 = vmatmul.mubr.f32.gmra.mxu0 %v136_v60  ;;  %v71_v58 = vld [vmem:[%s3809_s0 + $0x198] sm:$0xff]  ;;  %v73_v59 = vld [vmem:[%s3809_s0 + $0x1a8] sm:$0xff]  ;;  %v70_v60 = vld [vmem:[%s3809_s0 + $0x190] sm:$0xff] }
  0x82   :  { %960 = vmatmul.mubr.f32.gmra.mxu1 %v138_v61  ;;  %1923 = vmatprep.subr.mxu0 %v351_v62  ;;  %v72_v61 = vld [vmem:[%s3809_s0 + $0x1a0] sm:$0xff]  ;;  %v404_v62 = vld [vmem:[%s3808_s1 + $0x650] sm:$0xff] }
  0x83   :  { %1992 = vmatprep.subr.mxu1 %v384_v63  ;;  %1924 = vmatpush3.msra.mxu0 %v335_v0  ;;  %v403_v63 = vld [vmem:[%s3808_s1 + $0x648] sm:$0xff] }
  0x84   :  { %834 = vmatprep.mubr.f32.mxu0 %v151_v1  ;;  %964 = vmatprep.mubr.f32.mxu1 %v153_v2  ;;  %v85_v0 = vld [vmem:[%s3809_s0 + $0x208] sm:$0xff]  ;;  %v87_v1 = vld [vmem:[%s3809_s0 + $0x218] sm:$0xff]  ;;  %v84_v2 = vld [vmem:[%s3809_s0 + $0x200] sm:$0xff] }
  0x85   :  { %1993 = vmatpush3.msra.mxu1 %v368_v3  ;;  %835 = vmatmul.mubr.f32.gmra.mxu0 %v150_v4  ;;  %v86_v3 = vld [vmem:[%s3809_s0 + $0x210] sm:$0xff]  ;;  %v402_v4 = vld [vmem:[%s3808_s1 + $0x640] sm:$0xff] }
  0x86   :  { %965 = vmatmul.mubr.f32.gmra.mxu1 %v152_v5  ;;  %1925 = vmatprep.subr.mxu0 %v350_v6  ;;  %v99_v5 = vld [vmem:[%s3809_s0 + $0x278] sm:$0xff]  ;;  %v101_v6 = vld [vmem:[%s3809_s0 + $0x288] sm:$0xff] }
  0x87   :  { %1994 = vmatprep.subr.mxu1 %v383_v7  ;;  %1926 = vmatpush3.msra.mxu0 %v334_v8  ;;  %v401_v7 = vld [vmem:[%s3808_s1 + $0x638] sm:$0xff]  ;;  %v98_v8 = vld [vmem:[%s3809_s0 + $0x270] sm:$0xff] }
  0x88   :  { %1995 = vmatpush3.msra.mxu1 %v367_v9  ;;  %839 = vmatprep.mubr.f32.mxu0 %v165_v10  ;;  %v100_v9 = vld [vmem:[%s3809_s0 + $0x280] sm:$0xff]  ;;  %v400_v10 = vld [vmem:[%s3808_s1 + $0x630] sm:$0xff] }
  0x89   :  { %969 = vmatprep.mubr.f32.mxu1 %v167_v11  ;;  %1927 = vmatprep.subr.mxu0 %v349_v12  ;;  %v113_v11 = vld [vmem:[%s3809_s0 + $0x2e8] sm:$0xff]  ;;  %v115_v12 = vld [vmem:[%s3809_s0 + $0x2f8] sm:$0xff] }
  0x8a   :  { %840 = vmatmul.mubr.f32.gmra.mxu0 %v164_v13  ;;  %970 = vmatmul.mubr.f32.gmra.mxu1 %v166_v14  ;;  %v399_v13 = vld [vmem:[%s3808_s1 + $0x628] sm:$0xff]  ;;  %v112_v14 = vld [vmem:[%s3809_s0 + $0x2e0] sm:$0xff] }
  0x8b   :  { %1928 = vmatpush3.msra.mxu0 %v333_v15  ;;  %1996 = vmatprep.subr.mxu1 %v382_v16  ;;  %v114_v15 = vld [vmem:[%s3809_s0 + $0x2f0] sm:$0xff]  ;;  %v398_v16 = vld [vmem:[%s3808_s1 + $0x620] sm:$0xff] }
  0x8c   :  { %844 = vmatprep.mubr.f32.mxu0 %v179_v17  ;;  %1997 = vmatpush3.msra.mxu1 %v366_v18  ;;  %v127_v17 = vld [vmem:[%s3809_s0 + $0x358] sm:$0xff]  ;;  %v129_v18 = vld [vmem:[%s3809_s0 + $0x368] sm:$0xff] }
  0x8d   :  { %974 = vmatprep.mubr.f32.mxu1 %v181_v19  ;;  %1929 = vmatprep.subr.mxu0 %v348_v20  ;;  %v397_v19 = vld [vmem:[%s3808_s1 + $0x618] sm:$0xff]  ;;  %v126_v20 = vld [vmem:[%s3809_s0 + $0x350] sm:$0xff] }
  0x8e   :  { %1998 = vmatprep.subr.mxu1 %v381_v21  ;;  %845 = vmatmul.mubr.f32.gmra.mxu0 %v178_v22  ;;  %v128_v21 = vld [vmem:[%s3809_s0 + $0x360] sm:$0xff]  ;;  %v396_v22 = vld [vmem:[%s3808_s1 + $0x610] sm:$0xff] }
  0x8f   :  { %975 = vmatmul.mubr.f32.gmra.mxu1 %v180_v23  ;;  %1930 = vmatpush3.msra.mxu0 %v332_v24  ;;  %v141_v23 = vld [vmem:[%s3809_s0 + $0x3c8] sm:$0xff]  ;;  %v143_v24 = vld [vmem:[%s3809_s0 + $0x3d8] sm:$0xff] }
  0x90   :  { %1999 = vmatpush3.msra.mxu1 %v365_v25  ;;  %1931 = vmatprep.subr.mxu0 %v347_v26  ;;  %v140_v25 = vld [vmem:[%s3809_s0 + $0x3c0] sm:$0xff]  ;;  %v142_v26 = vld [vmem:[%s3809_s0 + $0x3d0] sm:$0xff] }
  0x91   :  { %2000 = vmatprep.subr.mxu1 %v380_v27  ;;  %849 = vmatprep.mubr.f32.mxu0 %v193_v28  ;;  %v395_v27 = vld [vmem:[%s3808_s1 + $0x608] sm:$0xff]  ;;  %v394_v28 = vld [vmem:[%s3808_s1 + $0x600] sm:$0xff] }
  0x92   :  { %979 = vmatprep.mubr.f32.mxu1 %v195_v29  ;;  %1932 = vmatpush3.msra.mxu0 %v331_v30  ;;  %v155_v29 = vld [vmem:[%s3809_s0 + $0x438] sm:$0xff]  ;;  %v157_v30 = vld [vmem:[%s3809_s0 + $0x448] sm:$0xff] }
  0x93   :  { %2001 = vmatpush3.msra.mxu1 %v364_v31  ;;  %850 = vmatmul.mubr.f32.gmra.mxu0 %v192_v32  ;;  %v154_v31 = vld [vmem:[%s3809_s0 + $0x430] sm:$0xff]  ;;  %v156_v32 = vld [vmem:[%s3809_s0 + $0x440] sm:$0xff] }
  0x94   :  { %980 = vmatmul.mubr.f32.gmra.mxu1 %v194_v33  ;;  %2002 = vmatprep.subr.mxu1 %v379_v34  ;;  %v417_v33 = vld [vmem:[%s3808_s1 + $0x6b8] sm:$0xff]  ;;  %v416_v34 = vld [vmem:[%s3808_s1 + $0x6b0] sm:$0xff] }
  0x95   :  { %1933 = vmatprep.subr.mxu0 %v346_v35  ;;  %2003 = vmatpush3.msra.mxu1 %v363_v36  ;;  %v169_v35 = vld [vmem:[%s3809_s0 + $0x4a8] sm:$0xff]  ;;  %v171_v36 = vld [vmem:[%s3809_s0 + $0x4b8] sm:$0xff] }
  0x96   :  { %1934 = vmatpush3.msra.mxu0 %v330_v37  ;;  %2004 = vmatprep.subr.mxu1 %v378_v38  ;;  %v168_v37 = vld [vmem:[%s3809_s0 + $0x4a0] sm:$0xff]  ;;  %v170_v38 = vld [vmem:[%s3809_s0 + $0x4b0] sm:$0xff] }
  0x97   :  { %1049 = vmatprep.mubr.f32.mxu0 %v29_v39  ;;  %2005 = vmatpush3.msra.mxu1 %v362_v40  ;;  %v415_v39 = vld [vmem:[%s3808_s1 + $0x6a8] sm:$0xff]  ;;  %v183_v40 = vld [vmem:[%s3809_s0 + $0x518] sm:$0xff] }
  0x98   :  { %1179 = vmatprep.mubr.f32.mxu1 %v31_v41  ;;  %1050 = vmatmul.mubr.f32.vlgmr.msra.gmra.mxu0 %v28_v42  ;;  %v185_v41 = vld [vmem:[%s3809_s0 + $0x528] sm:$0xff]  ;;  %v414_v42 = vld [vmem:[%s3808_s1 + $0x6a0] sm:$0xff] }
  0x99   :  { %1180 = vmatmul.mubr.f32.vlgmr.msra.gmra.mxu1 %v30_v43  ;;  %1245 = vmatprep.subr.mxu0 %v2120_v47  ;;  %v182_v43 = vld [vmem:[%s3809_s0 + $0x510] sm:$0xff] }
  0x9a   :  { %1054 = vmatprep.mubr.f32.mxu0 %v43_v44  ;;  %1246 = vmatpush1.msra.mxu0 %v409_v45  ;;  %v184_v44 = vld [vmem:[%s3809_s0 + $0x520] sm:$0xff] }
  0x9b   :  { %1184 = vmatprep.mubr.f32.mxu1 %v45_v46  ;;  %1247 = vmatprep.subr.mxu0 %v2120_v47  ;;  %v197_v46 = vld [vmem:[%s3809_s0 + $0x588] sm:$0x3] }
  0x9c   :  { %2045 = vmatprep.subr.mxu1 %v2120_v47  ;;  %1055 = vmatmul.mubr.f32.gmra.mxu0 %v42_v48  ;;  %v199_v48 = vld [vmem:[%s3809_s0 + $0x598] sm:$0x3] }
  0x9d   :  { %1185 = vmatmul.mubr.f32.gmra.mxu1 %v44_v49  ;;  %1248 = vmatpush1.msra.mxu0 %v408_v50  ;;  %v412_v49 = vld [vmem:[%s3808_s1 + $0x690] sm:$0xff] }
  0x9e   :  { %2069 = vmatpush1.msra.mxu1 %v409_v45  ;;  %1249 = vmatprep.subr.mxu0 %v2120_v47  ;;  %v413_v45 = vld [vmem:[%s3808_s1 + $0x698] sm:$0xff] }
  0x9f   :  { %2046 = vmatprep.subr.mxu1 %v2120_v47  ;;  %1250 = vmatpush1.msra.mxu0 %v407_v51 }
  0xa0   :  { %1059 = vmatprep.mubr.f32.mxu0 %v57_v52  ;;  %1189 = vmatprep.mubr.f32.mxu1 %v59_v53  ;;  %v411_v52 = vld [vmem:[%s3808_s1 + $0x688] sm:$0xff]  ;;  %v410_v53 = vld [vmem:[%s3808_s1 + $0x680] sm:$0xff] }
  0xa1   :  { %2070 = vmatpush1.msra.mxu1 %v408_v50  ;;  %1251 = vmatprep.subr.mxu0 %v2120_v47  ;;  %v196_v50 = vld [vmem:[%s3809_s0 + $0x580] sm:$0x3] }
  0xa2   :  { %1060 = vmatmul.mubr.f32.gmra.mxu0 %v56_v54  ;;  %1190 = vmatmul.mubr.f32.gmra.mxu1 %v58_v55  ;;  %v33_v54 = vld [vmem:[%s3809_s0 + $0x68] sm:$0xff]  ;;  %v131_v55 = vld [vmem:[%s3809_s0 + $0x378] sm:$0xff] }
  0xa3   :  { %2047 = vmatprep.subr.mxu1 %v2120_v47  ;;  %1252 = vmatpush1.msra.mxu0 %v406_v56 }
  0xa4   :  { %2071 = vmatpush1.msra.mxu1 %v407_v51  ;;  %1253 = vmatprep.subr.mxu0 %v2120_v47  ;;  %v198_v51 = vld [vmem:[%s3809_s0 + $0x590] sm:$0x3] }
  0xa5   :  { %2048 = vmatprep.subr.mxu1 %v2120_v47  ;;  %1254 = vmatpush1.msra.mxu0 %v405_v57 }
  0xa6   :  { %1064 = vmatprep.mubr.f32.mxu0 %v71_v58  ;;  %1194 = vmatprep.mubr.f32.mxu1 %v73_v59  ;;  %v47_v58 = vld [vmem:[%s3809_s0 + $0xd8] sm:$0xff]  ;;  %v145_v59 = vld [vmem:[%s3809_s0 + $0x3e8] sm:$0xff] }
  0xa7   :  { %2072 = vmatpush1.msra.mxu1 %v406_v56  ;;  %1255 = vmatprep.subr.mxu0 %v2120_v47  ;;  %v32_v56 = vld [vmem:[%s3809_s0 + $0x60] sm:$0xff] }
  0xa8   :  { %1065 = vmatmul.mubr.f32.gmra.mxu0 %v70_v60  ;;  %1195 = vmatmul.mubr.f32.gmra.mxu1 %v72_v61  ;;  %v144_v60 = vld [vmem:[%s3809_s0 + $0x3e0] sm:$0xff]  ;;  %v61_v61 = vld [vmem:[%s3809_s0 + $0x148] sm:$0xff] }
  0xa9   :  { %2049 = vmatprep.subr.mxu1 %v2120_v47  ;;  %1256 = vmatpush1.msra.mxu0 %v404_v62 }
  0xaa   :  { %2073 = vmatpush1.msra.mxu1 %v405_v57  ;;  %1257 = vmatprep.subr.mxu0 %v2120_v47  ;;  %v130_v57 = vld [vmem:[%s3809_s0 + $0x370] sm:$0xff] }
  0xab   :  { %2050 = vmatprep.subr.mxu1 %v2120_v47  ;;  %1258 = vmatpush1.msra.mxu0 %v403_v63 }
  0xac   :  { %1069 = vmatprep.mubr.f32.mxu0 %v85_v0  ;;  %1199 = vmatprep.mubr.f32.mxu1 %v87_v1  ;;  %v3352_v1 = vld [vmem:[%s3810_s2] ss:$0 sm:$0xff] }
  0xad   :  { %2074 = vmatpush1.msra.mxu1 %v404_v62  ;;  %1070 = vmatmul.mubr.f32.gmra.mxu0 %v84_v2  ;;  %v159_v62 = vld [vmem:[%s3809_s0 + $0x458] sm:$0xff] }
  0xae   :  { %1200 = vmatmul.mubr.f32.gmra.mxu1 %v86_v3  ;;  %2051 = vmatprep.subr.mxu1 %v2120_v47 }
  0xaf   :  { %1259 = vmatprep.subr.mxu0 %v2120_v47  ;;  %2075 = vmatpush1.msra.mxu1 %v403_v63 }
  0xb0   :  { %1260 = vmatpush1.msra.mxu0 %v402_v4  ;;  %2052 = vmatprep.subr.mxu1 %v2120_v47 }
  0xb1   :  { %1261 = vmatprep.subr.mxu0 %v2120_v47  ;;  %1074 = vmatprep.mubr.f32.mxu0 %v99_v5  ;;  %v158_v5 = vld [vmem:[%s3809_s0 + $0x450] sm:$0xff] }
  0xb2   :  { %1204 = vmatprep.mubr.f32.mxu1 %v101_v6  ;;  %2076 = vmatpush1.msra.mxu1 %v402_v4  ;;  %v60_v4 = vld [vmem:[%s3809_s0 + $0x140] sm:$0xff] }
  0xb3   :  { %1262 = vmatpush1.msra.mxu0 %v401_v7  ;;  %1205 = vmatmul.mubr.f32.gmra.mxu1 %v100_v9  ;;  %v173_v9 = vld [vmem:[%s3809_s0 + $0x4c8] sm:$0xff] }
  0xb4   :  { %1075 = vmatmul.mubr.f32.gmra.mxu0 %v98_v8  ;;  %2053 = vmatprep.subr.mxu1 %v2120_v47  ;;  %v75_v8 = vld [vmem:[%s3809_s0 + $0x1b8] sm:$0xff] }
  0xb5   :  { %1263 = vmatprep.subr.mxu0 %v2120_v47  ;;  %2077 = vmatpush1.msra.mxu1 %v401_v7 }
  0xb6   :  { %1264 = vmatpush1.msra.mxu0 %v400_v10  ;;  %2054 = vmatprep.subr.mxu1 %v2120_v47 }
  0xb7   :  { %1265 = vmatprep.subr.mxu0 %v2120_v47  ;;  %1079 = vmatprep.mubr.f32.mxu0 %v113_v11 }
  0xb8   :  { %1209 = vmatprep.mubr.f32.mxu1 %v115_v12  ;;  %2078 = vmatpush1.msra.mxu1 %v400_v10 }
  0xb9   :  { %1266 = vmatpush1.msra.mxu0 %v399_v13  ;;  %1210 = vmatmul.mubr.f32.gmra.mxu1 %v114_v15  ;;  %v74_v15 = vld [vmem:[%s3809_s0 + $0x1b0] sm:$0xff] }
  0xba   :  { %1080 = vmatmul.mubr.f32.gmra.mxu0 %v112_v14  ;;  %2055 = vmatprep.subr.mxu1 %v2120_v47 }
  0xbb   :  { %1267 = vmatprep.subr.mxu0 %v2120_v47  ;;  %2079 = vmatpush1.msra.mxu1 %v399_v13 }
  0xbc   :  { %1268 = vmatpush1.msra.mxu0 %v398_v16  ;;  %2056 = vmatprep.subr.mxu1 %v2120_v47 }
  0xbd   :  { %1269 = vmatprep.subr.mxu0 %v2120_v47  ;;  %1084 = vmatprep.mubr.f32.mxu0 %v127_v17 }
  0xbe   :  { %1214 = vmatprep.mubr.f32.mxu1 %v129_v18  ;;  %2080 = vmatpush1.msra.mxu1 %v398_v16  ;;  %v172_v16 = vld [vmem:[%s3809_s0 + $0x4c0] sm:$0xff] }
  0xbf   :  { %1270 = vmatpush1.msra.mxu0 %v397_v19  ;;  %1215 = vmatmul.mubr.f32.gmra.mxu1 %v128_v21  ;;  %v187_v21 = vld [vmem:[%s3809_s0 + $0x538] sm:$0xff] }
  0xc0   :  { %1085 = vmatmul.mubr.f32.gmra.mxu0 %v126_v20  ;;  %2057 = vmatprep.subr.mxu1 %v2120_v47  ;;  %v89_v20 = vld [vmem:[%s3809_s0 + $0x228] sm:$0xff] }
  0xc1   :  { %1271 = vmatprep.subr.mxu0 %v2120_v47  ;;  %2081 = vmatpush1.msra.mxu1 %v397_v19 }
  0xc2   :  { %1272 = vmatpush1.msra.mxu0 %v396_v22  ;;  %2058 = vmatprep.subr.mxu1 %v2120_v47 }
  0xc3   :  { %1089 = vmatprep.mubr.f32.mxu0 %v141_v23  ;;  %1219 = vmatprep.mubr.f32.mxu1 %v143_v24 }
  0xc4   :  { %2082 = vmatpush1.msra.mxu1 %v396_v22  ;;  %1273 = vmatprep.subr.mxu0 %v2120_v47 }
  0xc5   :  { %1090 = vmatmul.mubr.f32.gmra.mxu0 %v140_v25  ;;  %1220 = vmatmul.mubr.f32.gmra.mxu1 %v142_v26 }
  0xc6   :  { %2059 = vmatprep.subr.mxu1 %v2120_v47  ;;  %1274 = vmatpush1.msra.mxu0 %v395_v27 }
  0xc7   :  { %2083 = vmatpush1.msra.mxu1 %v395_v27  ;;  %1275 = vmatprep.subr.mxu0 %v2120_v47  ;;  %v88_v27 = vld [vmem:[%s3809_s0 + $0x220] sm:$0xff] }
  0xc8   :  { %2060 = vmatprep.subr.mxu1 %v2120_v47  ;;  %1276 = vmatpush1.msra.mxu0 %v394_v28 }
  0xc9   :  { %1094 = vmatprep.mubr.f32.mxu0 %v155_v29  ;;  %1224 = vmatprep.mubr.f32.mxu1 %v157_v30 }
  0xca   :  { %2084 = vmatpush1.msra.mxu1 %v394_v28  ;;  %1293 = vmatprep.subr.mxu0 %v2120_v47  ;;  %v186_v28 = vld [vmem:[%s3809_s0 + $0x530] sm:$0xff] }
  0xcb   :  { %1095 = vmatmul.mubr.f32.gmra.mxu0 %v154_v31  ;;  %1225 = vmatmul.mubr.f32.gmra.mxu1 %v156_v32  ;;  %v103_v32 = vld [vmem:[%s3809_s0 + $0x298] sm:$0xff] }
  0xcc   :  { %2061 = vmatprep.subr.mxu1 %v2120_v47  ;;  %1294 = vmatpush2.msra.mxu0 %v417_v33 }
  0xcd   :  { %2085 = vmatpush2.msra.mxu1 %v417_v33  ;;  %1295 = vmatprep.subr.mxu0 %v2120_v47  ;;  %v201_v33 = vld [vmem:[%s3809_s0 + $0x5a8] sm:$0x3] }
  0xce   :  { %2062 = vmatprep.subr.mxu1 %v2120_v47  ;;  %1296 = vmatpush2.msra.mxu0 %v416_v34 }
  0xcf   :  { %1099 = vmatprep.mubr.f32.mxu0 %v169_v35  ;;  %1229 = vmatprep.mubr.f32.mxu1 %v171_v36 }
  0xd0   :  { %2086 = vmatpush2.msra.mxu1 %v416_v34  ;;  %1297 = vmatprep.subr.mxu0 %v2120_v47 }
  0xd1   :  { %1100 = vmatmul.mubr.f32.gmra.mxu0 %v168_v37  ;;  %1230 = vmatmul.mubr.f32.gmra.mxu1 %v170_v38  ;;  %v102_v38 = vld [vmem:[%s3809_s0 + $0x290] sm:$0xff] }
  0xd2   :  { %2063 = vmatprep.subr.mxu1 %v2120_v47  ;;  %1298 = vmatpush2.msra.mxu0 %v415_v39 }
  0xd3   :  { %2087 = vmatpush2.msra.mxu1 %v415_v39  ;;  %1299 = vmatprep.subr.mxu0 %v2120_v47  ;;  %v200_v39 = vld [vmem:[%s3809_s0 + $0x5a0] sm:$0x3] }
  0xd4   :  { %2064 = vmatprep.subr.mxu1 %v2120_v47  ;;  %1104 = vmatprep.mubr.f32.mxu0 %v183_v40 }
  0xd5   :  { %1234 = vmatprep.mubr.f32.mxu1 %v185_v41  ;;  %1300 = vmatpush2.msra.mxu0 %v414_v42 }
  0xd6   :  { %2088 = vmatpush2.msra.mxu1 %v414_v42  ;;  %1105 = vmatmul.mubr.f32.gmra.mxu0 %v182_v43  ;;  %v117_v43 = vld [vmem:[%s3809_s0 + $0x308] sm:$0xff] }
  0xd7   :  { %1235 = vmatmul.mubr.f32.gmra.mxu1 %v184_v44  ;;  %1301 = vmatprep.subr.mxu0 %v2120_v47 }
  0xd8   :  { %2065 = vmatprep.subr.mxu1 %v2120_v47  ;;  %1302 = vmatpush2.msra.mxu0 %v413_v45 }
  0xd9   :  { %2089 = vmatpush2.msra.mxu1 %v413_v45  ;;  %1303 = vmatprep.subr.mxu0 %v2120_v47 }
  0xda   :  { %2066 = vmatprep.subr.mxu1 %v2120_v47  ;;  %1109 = vmatprep.mubr.f32.mxu0 %v197_v46 }
  0xdb   :  { %1239 = vmatprep.mubr.f32.mxu1 %v199_v48  ;;  %1304 = vmatpush2.msra.mxu0 %v412_v49 }
  0xdc   :  { %2090 = vmatpush2.msra.mxu1 %v412_v49  ;;  %1110 = vmatmul.mubr.f32.gmra.mxu0 %v196_v50  ;;  %v116_v49 = vld [vmem:[%s3809_s0 + $0x300] sm:$0xff] }
  0xdd   :  { %1240 = vmatmul.mubr.f32.gmra.mxu1 %v198_v51  ;;  %1305 = vmatprep.subr.mxu0 %v2120_v47 }
  0xde   :  { %2067 = vmatprep.subr.mxu1 %v2120_v47  ;;  %1306 = vmatpush2.msra.mxu0 %v411_v52 }
  0xdf   :  { %2091 = vmatpush2.msra.mxu1 %v411_v52  ;;  %1307 = vmatprep.subr.mxu0 %v2120_v47 }
  0xe0   :  { %2068 = vmatprep.subr.mxu1 %v2120_v47  ;;  %1308 = vmatpush2.msra.mxu0 %v410_v53  ;;  %v46_v47 = vld [vmem:[%s3809_s0 + $0xd0] sm:$0xff] }
  0xe1   :  { %2092 = vmatpush2.msra.mxu1 %v410_v53  ;;  %1604 = vmatprep.mubr.msk.f32.mxu0 %vm425_vm0, %v33_v54 }
  0xe2   :  { %1611 = vmatprep.mubr.msk.f32.mxu1 %vm425_vm0, %v131_v55  ;;  %1310 = vmatmul.mubr.f32.vlgmr.msra.gmra.mxu0 %v32_v56 }
  0xe3   :  { %1345 = vmatmul.mubr.f32.vlgmr.msra.gmra.mxu1 %v130_v57  ;;  %1605 = vmatprep.mubr.msk.f32.mxu0 %vm425_vm0, %v47_v58 }
  0xe4   :  { %1612 = vmatprep.mubr.msk.f32.mxu1 %vm425_vm0, %v145_v59  ;;  %v1651_v63 = vpop.f32.mrf.mxu0 }
  0xe5   :  { %v1722_v0 = vpop.f32.mrf.mxu1 }
  0xe6   :  { %1315 = vmatmul.mubr.f32.gmra.mxu0 %v46_v47  ;;  %v1652_v2 = vpop.f32.mrf.mxu0 }
  0xe7   :  { %1350 = vmatmul.mubr.f32.gmra.mxu1 %v144_v60  ;;  %v1723_v3 = vpop.f32.mrf.mxu1  ;;  %1606 = vmatprep.mubr.msk.f32.mxu0 %vm425_vm0, %v61_v61  ;;  %v1653_v6 = vadd.f32 %v1652_v2, %v1651_v63 }
  0xe8   :  { %1613 = vmatprep.mubr.msk.f32.mxu1 %vm425_vm0, %v159_v62  ;;  %v1724_v7 = vadd.f32 %v1723_v3, %v1722_v0  ;;  %v1654_v10 = vpop.f32.mrf.mxu0 }
  0xe9   :  { %v1725_v11 = vpop.f32.mrf.mxu1  ;;  %v532_v12 = vadd.f32 %v1653_v6, %v3352_v1 }
  0xea   :  { %1320 = vmatmul.mubr.f32.gmra.mxu0 %v60_v4  ;;  %v1655_v13 = vpop.f32.mrf.mxu0 }
  0xeb   :  { %1355 = vmatmul.mubr.f32.gmra.mxu1 %v158_v5  ;;  %v1726_v14 = vpop.f32.mrf.mxu1  ;;  %1607 = vmatprep.mubr.msk.f32.mxu0 %vm425_vm0, %v75_v8  ;;  %v3377_v17 = vadd.f32 %v1724_v7, %v532_v12  ;;  %v1656_v18 = vadd.f32 %v1655_v13, %v1654_v10 }
  0xec   :  { %1614 = vmatprep.mubr.msk.f32.mxu1 %vm425_vm0, %v173_v9  ;;  %v1727_v19 = vadd.f32 %v1726_v14, %v1725_v11  ;;  %v1657_v22 = vpop.f32.mrf.mxu0 }
  0xed   :  { %v1728_v23 = vpop.f32.mrf.mxu1  ;;  %v537_v24 = vadd.f32 %v1656_v18, %v3352_v1 }
  0xee   :  { %1325 = vmatmul.mubr.f32.gmra.mxu0 %v74_v15  ;;  %v1658_v25 = vpop.f32.mrf.mxu0 }
  0xef   :  { %1360 = vmatmul.mubr.f32.gmra.mxu1 %v172_v16  ;;  %v1729_v26 = vpop.f32.mrf.mxu1  ;;  %1608 = vmatprep.mubr.msk.f32.mxu0 %vm425_vm0, %v89_v20  ;;  %v3394_v29 = vadd.f32 %v1727_v19, %v537_v24  ;;  %v1659_v30 = vadd.f32 %v1658_v25, %v1657_v22 }
  0xf0   :  { %1615 = vmatprep.mubr.msk.f32.mxu1 %vm425_vm0, %v187_v21  ;;  %v1730_v31 = vadd.f32 %v1729_v26, %v1728_v23 }
  0xf1   :  { %v1660_v34 = vpop.f32.mrf.mxu0  ;;  %v542_v35 = vadd.f32 %v1659_v30, %v3352_v1  ;;  %v1731_v36 = vpop.f32.mrf.mxu1 }
  0xf2   :  { %1330 = vmatmul.mubr.f32.gmra.mxu0 %v88_v27 }
  0xf3   :  { %1365 = vmatmul.mubr.f32.gmra.mxu1 %v186_v28  ;;  %v1661_v37 = vpop.f32.mrf.mxu0  ;;  %1609 = vmatprep.mubr.msk.f32.mxu0 %vm425_vm0, %v103_v32  ;;  %v3411_v40 = vadd.f32 %v1730_v31, %v542_v35  ;;  %v1732_v42 = vpop.f32.mrf.mxu1 }
  0xf4   :  { %1616 = vmatprep.mubr.msk.f32.mxu1 %vm425_vm0, %v201_v33  ;;  %v1662_v41 = vadd.f32 %v1661_v37, %v1660_v34  ;;  %v1733_v44 = vadd.f32 %v1732_v42, %v1731_v36 }
  0xf5   :  { %v1663_v46 = vpop.f32.mrf.mxu0 }
  0xf6   :  { %v547_v45 = vadd.f32 %v1662_v41, %v3352_v1  ;;  %v1734_v48 = vpop.f32.mrf.mxu1  ;;  %1335 = vmatmul.mubr.f32.gmra.mxu0 %v102_v38 }
  0xf7   :  { %1370 = vmatmul.mubr.f32.gmra.mxu1 %v200_v39  ;;  %1610 = vmatprep.mubr.msk.f32.mxu0 %vm425_vm0, %v117_v43  ;;  %v1664_v51 = vpop.f32.mrf.mxu0 }
  0xf8   :  { %v3421_v50 = vadd.f32 %v1733_v44, %v547_v45  ;;  %v1735_v52 = vpop.f32.mrf.mxu1  ;;  %v1665_v53 = vadd.f32 %v1664_v51, %v1663_v46 }
  0xf9   :  { %v1736_v54 = vadd.f32 %v1735_v52, %v1734_v48  ;;  %v1666_v55 = vpop.f32.mrf.mxu0 }
  0xfa   :  { %v1737_v56 = vpop.f32.mrf.mxu1  ;;  %1340 = vmatmul.mubr.f32.gmra.mxu0 %v116_v49  ;;  %v552_v57 = vadd.f32 %v1665_v53, %v3352_v1 }
  0xfb   :  { %v1667_v58 = vpop.f32.mrf.mxu0 }
  0xfc   :  { %v1738_v59 = vpop.f32.mrf.mxu1  ;;  %v3424_v47 = vadd.f32 %v1736_v54, %v552_v57  ;;  %v1668_v60 = vadd.f32 %v1667_v58, %v1666_v55 }
  0xfd   :  { %v1739_v61 = vadd.f32 %v1738_v59, %v1737_v56 }
  0xfe   :  { %v1669_v62 = vpop.f32.mrf.mxu0  ;;  %v557_v63 = vadd.f32 %v1668_v60, %v3352_v1  ;;  %v1740_v0 = vpop.f32.mrf.mxu1 }
 0x100   :  { %v1670_v2 = vpop.f32.mrf.mxu0  ;;  %v3427_v3 = vadd.f32 %v1739_v61, %v557_v63  ;;  %v1741_v5 = vpop.f32.mrf.mxu1 }
 0x101   :  { %v1671_v4 = vadd.f32 %v1670_v2, %v1669_v62  ;;  %v1742_v6 = vadd.f32 %v1741_v5, %v1740_v0 }
 0x103   :  { %v562_v7 = vadd.f32 %v1671_v4, %v3352_v1  ;;  %v1672_v8 = vpop.f32.mrf.mxu0  ;;  %v1743_v9 = vpop.f32.mrf.mxu1 }
 0x105   :  { %v3430_v10 = vadd.f32 %v1742_v6, %v562_v7  ;;  %v1673_v11 = vpop.f32.mrf.mxu0  ;;  %v1744_v13 = vpop.f32.mrf.mxu1 }
 0x106   :  { %v1674_v12 = vadd.f32 %v1673_v11, %v1672_v8  ;;  %v1745_v14 = vadd.f32 %v1744_v13, %v1743_v9 }
 0x107   :  { %v1675_v16 = vpop.f32.mrf.mxu0 }
 0x108   :  { %v567_v15 = vadd.f32 %v1674_v12, %v3352_v1  ;;  %v1746_v18 = vpop.f32.mrf.mxu1 }
 0x109   :  { %v1676_v20 = vpop.f32.mrf.mxu0 }
 0x10a   :  { %v3433_v19 = vadd.f32 %v1745_v14, %v567_v15  ;;  %v1747_v21 = vpop.f32.mrf.mxu1  ;;  %v1677_v22 = vadd.f32 %v1676_v20, %v1675_v16 }
 0x10b   :  { %v1748_v23 = vadd.f32 %v1747_v21, %v1746_v18  ;;  %v1678_v24 = vpop.f32.mrf.mxu0 }
 0x10c   :  { %v1749_v25 = vpop.f32.mrf.mxu1  ;;  %v572_v26 = vadd.f32 %v1677_v22, %v3352_v1 }
 0x10d   :  { %v1679_v27 = vpop.f32.mrf.mxu0 }
 0x10e   :  { %v1750_v28 = vpop.f32.mrf.mxu1  ;;  %v3436_v30 = vadd.f32 %v1748_v23, %v572_v26  ;;  %v1680_v31 = vadd.f32 %v1679_v27, %v1678_v24 }
 0x10f   :  { %v1751_v32 = vadd.f32 %v1750_v28, %v1749_v25 }
 0x110   :  { %v1681_v33 = vpop.f32.mrf.mxu0  ;;  %v577_v34 = vadd.f32 %v1680_v31, %v3352_v1  ;;  %v1752_v35 = vpop.f32.mrf.mxu1 }
 0x112   :  { %v1682_v36 = vpop.f32.mrf.mxu0  ;;  %v3439_v37 = vadd.f32 %v1751_v32, %v577_v34  ;;  %v1753_v39 = vpop.f32.mrf.mxu1 }
 0x113   :  { %v1683_v38 = vadd.f32 %v1682_v36, %v1681_v33  ;;  %v1754_v41 = vadd.f32 %v1753_v39, %v1752_v35 }
 0x114   :  { %v1684_v43 = vpop.f32.mrf.mxu0 }
 0x115   :  { %v582_v42 = vadd.f32 %v1683_v38, %v3352_v1  ;;  %v1755_v44 = vpop.f32.mrf.mxu1 }
 0x116   :  { %v1685_v46 = vpop.f32.mrf.mxu0 }
 0x117   :  { %v3442_v45 = vadd.f32 %v1754_v41, %v582_v42  ;;  %v1756_v48 = vpop.f32.mrf.mxu1  ;;  %v1686_v49 = vadd.f32 %v1685_v46, %v1684_v43 }
 0x118   :  { %v1757_v51 = vadd.f32 %v1756_v48, %v1755_v44 }
 0x119   :  { %v587_v52 = vadd.f32 %v1686_v49, %v3352_v1  ;;  %v1687_v53 = vpop.f32.mrf.mxu0 }
 0x11a   :  { %v1758_v54 = vpop.f32.mrf.mxu1 }
 0x11b   :  { %v3445_v55 = vadd.f32 %v1757_v51, %v587_v52  ;;  %v1688_v56 = vpop.f32.mrf.mxu0 }
 0x11c   :  { %v1759_v57 = vpop.f32.mrf.mxu1  ;;  %v1689_v58 = vadd.f32 %v1688_v56, %v1687_v53 }
 0x11d   :  { %v1760_v59 = vadd.f32 %v1759_v57, %v1758_v54 }
 0x11e   :  { %v592_v60 = vadd.f32 %v1689_v58, %v3352_v1  ;;  %v1793_v61 = vpop.f32.mrf.mxu0 }
 0x11f   :  { %v1864_v62 = vpop.f32.mrf.mxu1 }
 0x120   :  { %v3448_v63 = vadd.f32 %v1760_v59, %v592_v60  ;;  %v1794_v0 = vpop.f32.mrf.mxu0 }
 0x121   :  { %v1865_v2 = vpop.f32.mrf.mxu1  ;;  %v1795_v4 = vadd.f32 %v1794_v0, %v1793_v61 }
 0x122   :  { %v1866_v5 = vadd.f32 %v1865_v2, %v1864_v62  ;;  %v1796_v6 = vpop.f32.mrf.mxu0 }
 0x123   :  { %v1867_v7 = vpop.f32.mrf.mxu1  ;;  %v792_v8 = vadd.f32 %v1795_v4, %v3377_v17 }
 0x124   :  { %v1797_v9 = vpop.f32.mrf.mxu0 }
 0x125   :  { %v1868_v11 = vpop.f32.mrf.mxu1  ;;  %v3451_v12 = vadd.f32 %v1866_v5, %v792_v8  ;;  %v1798_v13 = vadd.f32 %v1797_v9, %v1796_v6 }
 0x126   :  { %v1869_v14 = vadd.f32 %v1868_v11, %v1867_v7  ;;  %v1799_v15 = vpop.f32.mrf.mxu0 }
 0x127   :  { %v1870_v1 = vpop.f32.mrf.mxu1  ;;  %v797_v16 = vadd.f32 %v1798_v13, %v3394_v29 }
 0x128   :  { %v1800_v18 = vpop.f32.mrf.mxu0 }
 0x129   :  { %v1871_v20 = vpop.f32.mrf.mxu1  ;;  %v3454_v21 = vadd.f32 %v1869_v14, %v797_v16  ;;  %v1801_v22 = vadd.f32 %v1800_v18, %v1799_v15 }
 0x12a   :  { %v1872_v23 = vadd.f32 %v1871_v20, %v1870_v1 }
 0x12b   :  { %v1802_v24 = vpop.f32.mrf.mxu0  ;;  %v802_v25 = vadd.f32 %v1801_v22, %v3411_v40  ;;  %v1873_v17 = vpop.f32.mrf.mxu1 }
 0x12d   :  { %v1803_v26 = vpop.f32.mrf.mxu0  ;;  %v3457_v27 = vadd.f32 %v1872_v23, %v802_v25  ;;  %v1874_v31 = vpop.f32.mrf.mxu1 }
 0x12e   :  { %v1804_v28 = vadd.f32 %v1803_v26, %v1802_v24  ;;  %v1875_v32 = vadd.f32 %v1874_v31, %v1873_v17 }
 0x12f   :  { %v1805_v34 = vpop.f32.mrf.mxu0 }
 0x130   :  { %v807_v33 = vadd.f32 %v1804_v28, %v3421_v50  ;;  %v1876_v29 = vpop.f32.mrf.mxu1 }
 0x131   :  { %v1806_v36 = vpop.f32.mrf.mxu0 }
 0x132   :  { %v3460_v35 = vadd.f32 %v1875_v32, %v807_v33  ;;  %v1877_v38 = vpop.f32.mrf.mxu1  ;;  %v1807_v39 = vadd.f32 %v1806_v36, %v1805_v34 }
 0x133   :  { %v1878_v41 = vadd.f32 %v1877_v38, %v1876_v29  ;;  %v1808_v42 = vpop.f32.mrf.mxu0 }
 0x134   :  { %v1879_v43 = vpop.f32.mrf.mxu1  ;;  %v812_v40 = vadd.f32 %v1807_v39, %v3424_v47 }
 0x135   :  { %v1809_v44 = vpop.f32.mrf.mxu0 }
 0x136   :  { %v1880_v46 = vpop.f32.mrf.mxu1  ;;  %v3463_v48 = vadd.f32 %v1878_v41, %v812_v40  ;;  %v1810_v49 = vadd.f32 %v1809_v44, %v1808_v42 }
 0x137   :  { %v1881_v51 = vadd.f32 %v1880_v46, %v1879_v43 }
 0x138   :  { %v1811_v52 = vpop.f32.mrf.mxu0  ;;  %v817_v50 = vadd.f32 %v1810_v49, %v3427_v3  ;;  %v1882_v53 = vpop.f32.mrf.mxu1 }
 0x13a   :  { %v1812_v54 = vpop.f32.mrf.mxu0  ;;  %v3466_v56 = vadd.f32 %v1881_v51, %v817_v50  ;;  %v1883_v58 = vpop.f32.mrf.mxu1 }
 0x13b   :  { %v1813_v57 = vadd.f32 %v1812_v54, %v1811_v52  ;;  %v1884_v59 = vadd.f32 %v1883_v58, %v1882_v53 }
 0x13d   :  { %v822_v60 = vadd.f32 %v1813_v57, %v3430_v10  ;;  %v1814_v61 = vpop.f32.mrf.mxu0  ;;  %v1885_v47 = vpop.f32.mrf.mxu1 }
 0x13f   :  { %v3469_v62 = vadd.f32 %v1884_v59, %v822_v60  ;;  %v1815_v0 = vpop.f32.mrf.mxu0  ;;  %v1886_v4 = vpop.f32.mrf.mxu1 }
 0x140   :  { %v1816_v2 = vadd.f32 %v1815_v0, %v1814_v61  ;;  %v1887_v5 = vadd.f32 %v1886_v4, %v1885_v47 }
 0x141   :  { %3814 = vst [vmem:[#allocation2_spill] sm:$0xff] %v3469_v62  ;;  %v1817_v3 = vpop.f32.mrf.mxu0 }
 0x142   :  { %v827_v6 = vadd.f32 %v1816_v2, %v3433_v19  ;;  %v1888_v7 = vpop.f32.mrf.mxu1 }
 0x143   :  { %v1818_v9 = vpop.f32.mrf.mxu0 }
 0x144   :  { %v3472_v8 = vadd.f32 %v1887_v5, %v827_v6  ;;  %v1889_v11 = vpop.f32.mrf.mxu1  ;;  %v1819_v13 = vadd.f32 %v1818_v9, %v1817_v3 }
 0x145   :  { %v1890_v14 = vadd.f32 %v1889_v11, %v1888_v7  ;;  %v1820_v15 = vpop.f32.mrf.mxu0 }
 0x146   :  { %v1891_v10 = vpop.f32.mrf.mxu1  ;;  %v832_v1 = vadd.f32 %v1819_v13, %v3436_v30 }
 0x147   :  { %v1821_v16 = vpop.f32.mrf.mxu0 }
 0x148   :  { %v1892_v18 = vpop.f32.mrf.mxu1  ;;  %v3475_v20 = vadd.f32 %v1890_v14, %v832_v1  ;;  %v1822_v22 = vadd.f32 %v1821_v16, %v1820_v15 }
 0x149   :  { %v1893_v23 = vadd.f32 %v1892_v18, %v1891_v10 }
 0x14a   :  { %v1823_v24 = vpop.f32.mrf.mxu0  ;;  %v837_v19 = vadd.f32 %v1822_v22, %v3439_v37  ;;  %v1894_v25 = vpop.f32.mrf.mxu1 }
 0x14c   :  { %v1824_v17 = vpop.f32.mrf.mxu0  ;;  %v3478_v26 = vadd.f32 %v1893_v23, %v837_v19  ;;  %v1895_v31 = vpop.f32.mrf.mxu1 }
 0x14d   :  { %v1825_v28 = vadd.f32 %v1824_v17, %v1823_v24  ;;  %v1896_v32 = vadd.f32 %v1895_v31, %v1894_v25 }
 0x14e   :  { %v1826_v34 = vpop.f32.mrf.mxu0 }
 0x14f   :  { %v842_v33 = vadd.f32 %v1825_v28, %v3442_v45  ;;  %v1897_v30 = vpop.f32.mrf.mxu1 }
 0x150   :  { %v1827_v36 = vpop.f32.mrf.mxu0 }
 0x151   :  { %v3481_v29 = vadd.f32 %v1896_v32, %v842_v33  ;;  %v1898_v38 = vpop.f32.mrf.mxu1  ;;  %v1828_v39 = vadd.f32 %v1827_v36, %v1826_v34 }
 0x152   :  { %v1899_v41 = vadd.f32 %v1898_v38, %v1897_v30 }
 0x153   :  { %v847_v42 = vadd.f32 %v1828_v39, %v3445_v55  ;;  %v1829_v37 = vpop.f32.mrf.mxu0 }
 0x154   :  { %v1900_v43 = vpop.f32.mrf.mxu1 }
 0x155   :  { %v3484_v40 = vadd.f32 %v1899_v41, %v847_v42  ;;  %v1830_v44 = vpop.f32.mrf.mxu0 }
 0x156   :  { %v1901_v46 = vpop.f32.mrf.mxu1  ;;  %v1831_v49 = vadd.f32 %v1830_v44, %v1829_v37 }
 0x157   :  { %3815 = vst [vmem:[#allocation3_spill] sm:$0xff] %v3484_v40  ;;  %v1902_v51 = vadd.f32 %v1901_v46, %v1900_v43 }
 0x158   :  { %v852_v45 = vadd.f32 %v1831_v49, %v3448_v63  ;;  %v1935_v52 = vpop.f32.mrf.mxu0 }
 0x159   :  { %v2006_v50 = vpop.f32.mrf.mxu1 }
 0x15a   :  { %v3487_v53 = vadd.f32 %v1902_v51, %v852_v45  ;;  %v1936_v54 = vpop.f32.mrf.mxu0 }
 0x15b   :  { %v2007_v57 = vpop.f32.mrf.mxu1  ;;  %v1937_v49 = vadd.f32 %v1936_v54, %v1935_v52 }
 0x15c   :  { %3816 = vst [vmem:[#allocation4_spill] sm:$0xff] %v3487_v53  ;;  %v1938_v58 = vpop.f32.mrf.mxu0  ;;  %v2008_v45 = vadd.f32 %v2007_v57, %v2006_v50 }
 0x15d   :  { %v2009_v59 = vpop.f32.mrf.mxu1 }
 0x15e   :  { %v1939_v60 = vpop.f32.mrf.mxu0 }
 0x15f   :  { %v2010_v55 = vpop.f32.mrf.mxu1  ;;  %v1940_v62 = vadd.f32 %v1939_v60, %v1938_v58 }
 0x160   :  { %v2011_v54 = vadd.f32 %v2010_v55, %v2009_v59 }
 0x161   :  { %v1057_v52 = vadd.f32 %v1940_v62, %v3454_v21 }
 0x162   :  { %v1941_v61 = vpop.f32.mrf.mxu0  ;;  %v3489_v47 = vpop.f32.mrf.mxu1 }
 0x163   :  { %v1187_v62 = vadd.f32 %v2011_v54, %v1057_v52 }
 0x164   :  { %v1942_v0 = vpop.f32.mrf.mxu0  ;;  %v2013_v2 = vpop.f32.mrf.mxu1 }
 0x168   :  { %v3491_v4 = vpop.f32.mrf.mxu0  ;;  %v3493_v5 = vpop.f32.mrf.mxu1 }
 0x16a   :  { %v3495_v63 = vpop.f32.mrf.mxu0  ;;  %v3497_v6 = vpop.f32.mrf.mxu1 }
 0x16d   :  { %v3499_v3 = vpop.f32.mrf.mxu0 }
 0x16e   :  { %v3501_v7 = vpop.f32.mrf.mxu1 }
 0x16f   :  { %v3503_v9 = vpop.f32.mrf.mxu0 }
 0x170   :  { %v3505_v11 = vpop.f32.mrf.mxu1 }
 0x173   :  { %v3509_v14 = vpop.f32.mrf.mxu1 }
 0x174   :  { %v3507_v13 = vpop.f32.mrf.mxu0  ;;  %3817 = vst [vmem:[#allocation5_spill] sm:$0xff] %v3509_v14  ;;  %v1943_v14 = vadd.f32 %v1942_v0, %v1941_v61 }
 0x175   :  { %v3513_v10 = vpop.f32.mrf.mxu1 }
 0x176   :  { %v3511_v15 = vpop.f32.mrf.mxu0  ;;  %3818 = vst [vmem:[#allocation6_spill] sm:$0xff] %v3513_v10 }
 0x179   :  { %v3517_v16 = vpop.f32.mrf.mxu1 }
 0x17a   :  { %v3515_v1 = vpop.f32.mrf.mxu0  ;;  %3820 = vst [vmem:[#allocation8_spill] sm:$0xff] %v3517_v16  ;;  %v1052_v16 = vadd.f32 %v1937_v49, %v3451_v12 }
 0x17b   :  { %3819 = vst [vmem:[#allocation7_spill] sm:$0xff] %v3515_v1  ;;  %v3521_v22 = vpop.f32.mrf.mxu1 }
 0x17c   :  { %v3519_v18 = vpop.f32.mrf.mxu0  ;;  %3822 = vst [vmem:[#allocation10_spill] sm:$0xff] %v3521_v22  ;;  %v1182_v50 = vadd.f32 %v2008_v45, %v1052_v16  ;;  %v1949_v16 = vadd.f32 %v3503_v9, %v3499_v3 }
 0x17d   :  { %3821 = vst [vmem:[#allocation9_spill] sm:$0xff] %v3519_v18 }
 0x17f   :  { %v2027_v24 = vpop.f32.mrf.mxu1 }
 0x180   :  { %v1956_v23 = vpop.f32.mrf.mxu0 }
 0x181   :  { %v2028_v25 = vpop.f32.mrf.mxu1 }
 0x182   :  { %v1957_v19 = vpop.f32.mrf.mxu0  ;;  %v2029_v18 = vadd.f32 %v2028_v25, %v2027_v24  ;;  %v1062_v24 = vadd.f32 %v1943_v14, %v3457_v27  ;;  %v2014_v25 = vadd.f32 %v2013_v2, %v3489_v47 }
 0x183   :  { %v1958_v51 = vadd.f32 %v1957_v19, %v1956_v23 }
 0x185   :  { %v1959_v17 = vpop.f32.mrf.mxu0  ;;  %v2030_v28 = vpop.f32.mrf.mxu1  ;;  %v1087_v40 = vadd.f32 %v1958_v51, %v3472_v8  ;;  %v3826_v51 = vld [vmem:[#allocation6_spill] sm:$0xff] }
 0x187   :  { %v1960_v31 = vpop.f32.mrf.mxu0  ;;  %v2031_v32 = vpop.f32.mrf.mxu1  ;;  %v1217_v57 = vadd.f32 %v2029_v18, %v1087_v40 }
 0x188   :  { %v1961_v10 = vadd.f32 %v1960_v31, %v1959_v17  ;;  %v2032_v23 = vadd.f32 %v2031_v32, %v2030_v28  ;;  %v1192_v17 = vadd.f32 %v2014_v25, %v1062_v24 }
 0x18a   :  { %v1092_v12 = vadd.f32 %v1961_v10, %v3475_v20  ;;  %v1946_v20 = vadd.f32 %v3495_v63, %v3491_v4 }
 0x18b   :  { %v1962_v33 = vpop.f32.mrf.mxu0  ;;  %v2033_v34 = vpop.f32.mrf.mxu1 }
 0x18c   :  { %v1222_v14 = vadd.f32 %v2032_v23, %v1092_v12  ;;  %v3828_v23 = vld [vmem:[#allocation9_spill] sm:$0xff] }
 0x18d   :  { %v1963_v30 = vpop.f32.mrf.mxu0  ;;  %v2034_v36 = vpop.f32.mrf.mxu1 }
 0x18e   :  { %v1964_v58 = vadd.f32 %v1963_v30, %v1962_v33  ;;  %v2035_v47 = vadd.f32 %v2034_v36, %v2033_v34  ;;  %v1067_v33 = vadd.f32 %v1946_v20, %v3460_v35  ;;  %v2017_v34 = vadd.f32 %v3497_v6, %v3493_v5 }
 0x18f   :  { %v1072_v30 = vadd.f32 %v1949_v16, %v3463_v48  ;;  %v1952_v36 = vadd.f32 %v3511_v15, %v3507_v13  ;;  %v3825_v15 = vld [vmem:[#allocation5_spill] sm:$0xff] }
 0x190   :  { %v1097_v27 = vadd.f32 %v1964_v58, %v3478_v26  ;;  %v2023_v45 = vadd.f32 %v3826_v51, %v3825_v15 }
 0x191   :  { %v1965_v38 = vpop.f32.mrf.mxu0  ;;  %v2036_v39 = vpop.f32.mrf.mxu1  ;;  %v1077_v13 = vadd.f32 %v1952_v36, %v3466_v56  ;;  %v3829_v56 = vld [vmem:[#allocation3_spill] sm:$0xff] }
 0x192   :  { %v1227_v9 = vadd.f32 %v2035_v47, %v1097_v27  ;;  %v3832_v27 = vld [vmem:[#allocation8_spill] sm:$0xff]  ;;  %v3833_v47 = vld [vmem:[#allocation10_spill] sm:$0xff] }
 0x193   :  { %v1966_v41 = vpop.f32.mrf.mxu0  ;;  %v2037_v42 = vpop.f32.mrf.mxu1  ;;  %v1207_v20 = vadd.f32 %v2023_v45, %v1077_v13 }
 0x194   :  { %v1967_v21 = vadd.f32 %v1966_v41, %v1965_v38  ;;  %v2038_v31 = vadd.f32 %v2037_v42, %v2036_v39 }
 0x196   :  { %v3523_v37 = vpop.f32.mrf.mxu0  ;;  %v1102_v28 = vadd.f32 %v1967_v21, %v3481_v29  ;;  %v2020_v29 = vadd.f32 %v3505_v11, %v3501_v7  ;;  %v1197_v7 = vadd.f32 %v2017_v34, %v1067_v33 }
 0x197   :  { %v3525_v43 = vpop.f32.mrf.mxu1 }
 0x198   :  { %3823 = vst [vmem:[#allocation11_spill] sm:$0xff] %v3525_v43  ;;  %v3527_v44 = vpop.f32.mrf.mxu0  ;;  %v1232_v42 = vadd.f32 %v2038_v31, %v1102_v28 }
 0x199   :  { %v3529_v46 = vpop.f32.mrf.mxu1  ;;  %v1970_v48 = vadd.f32 %v3527_v44, %v3523_v37 }
 0x19b   :  { %v1107_v25 = vadd.f32 %v1970_v48, %v3829_v56 }
 0x19c   :  { %v3531_v53 = vpop.f32.mrf.mxu0 }
 0x19d   :  { %v3533_v22 = vpop.f32.mrf.mxu1 }
 0x19e   :  { %3824 = vst [vmem:[#allocation12_spill] sm:$0xff] %v3533_v22  ;;  %v3537_v1 = vpop.f32.mrf.mxu0 }
 0x19f   :  { %v3539_v43 = vpop.f32.mrf.mxu1  ;;  %v1973_v21 = vadd.f32 %v3537_v1, %v3531_v53  ;;  %v3834_v53 = vld [vmem:[#allocation4_spill] sm:$0xff] }
 0x1a1   :  { %v1112_v1 = vadd.f32 %v1973_v21, %v3834_v53 }
 0x1a2   :  { %v1311_v19 = vpop.f32.mrf.mxu0 }
 0x1a3   :  { %v1346_v22 = vpop.f32.mrf.mxu1  ;;  %v3543_v60 = vadd.f32 %v1311_v19, %v1182_v50  ;;  %v1202_v50 = vadd.f32 %v2020_v29, %v1072_v30 }
 0x1a4   :  { %v3545_v8 = vadd.f32 %v1346_v22, %v1217_v57  ;;  %v1313_v61 = vpop.f32.mrf.mxu0  ;;  %v3827_v57 = vld [vmem:[#allocation7_spill] sm:$0xff] }
 0x1a5   :  { %v1348_v0 = vpop.f32.mrf.mxu1  ;;  %v1377_v59 = vsel %vm425_vm0, %v3543_v60, 0.0  ;;  %v1955_v19 = vadd.f32 %v3828_v23, %v3827_v57  ;;  %v3830_v61 = vld [vmem:[#allocation11_spill] sm:$0xff] }
 0x1a6   :  { %v1398_v40 = vsel %vm425_vm0, %v3545_v8, 0.0  ;;  %v1316_v55 = vpop.f32.mrf.mxu0  ;;  %1378 = vadd.xlane.f32.xlu0 %v1377_v59  ;;  %v2041_v0 = vadd.f32 %v3529_v46, %v3830_v61 }
 0x1a7   :  { %v1351_v10 = vpop.f32.mrf.mxu1  ;;  %1399 = vadd.xlane.f32.xlu1 %v1398_v40  ;;  %v3556_v2 = vadd.f32 %v1316_v55, %v1187_v62  ;;  %v3831_v55 = vld [vmem:[#allocation2_spill] sm:$0xff] }
 0x1a8   :  { %v1318_v18 = vpop.f32.mrf.mxu0  ;;  %v3561_v4 = vadd.f32 %v1351_v10, %v1222_v14  ;;  %v1082_v10 = vadd.f32 %v1955_v19, %v3831_v55  ;;  %v2026_v14 = vadd.f32 %v3833_v47, %v3832_v27  ;;  %v1237_v31 = vadd.f32 %v2041_v0, %v1107_v25 }
 0x1a9   :  { %v1353_v22 = vpop.f32.mrf.mxu1  ;;  %v1380_v63 = vsel %vm425_vm0, %v3556_v2, 0.0 }
 0x1aa   :  { %v1321_v32 = vpop.f32.mrf.mxu0  ;;  %1381 = vadd.xlane.f32.xlu0 %v1380_v63  ;;  %v1401_v5 = vsel %vm425_vm0, %v3561_v4, 0.0  ;;  %v1212_v34 = vadd.f32 %v2026_v14, %v1082_v10 }
 0x1ab   :  { %v1356_v26 = vpop.f32.mrf.mxu1  ;;  %v3568_v3 = vadd.f32 %v1321_v32, %v1192_v17  ;;  %v3835_v17 = vld [vmem:[#allocation12_spill] sm:$0xff] }
 0x1ac   :  { %v1323_v38 = vpop.f32.mrf.mxu0  ;;  %v3575_v41 = vadd.f32 %v1356_v26, %v1227_v9  ;;  %v2044_v28 = vadd.f32 %v3539_v43, %v3835_v17 }
 0x1ad   :  { %v1358_v39 = vpop.f32.mrf.mxu1  ;;  %v1383_v35 = vsel %vm425_vm0, %v3568_v3, 0.0 }
 0x1ae   :  { %v1326_v6 = vpop.f32.mrf.mxu0  ;;  %1384 = vadd.xlane.f32.xlu1 %v1383_v35  ;;  %1402 = vadd.xlane.f32.xlu0 %v1401_v5  ;;  %v1404_v58 = vsel %vm425_vm0, %v3575_v41, 0.0  ;;  %v1242_v29 = vadd.f32 %v2044_v28, %v1112_v1 }
 0x1af   :  { %v1361_v49 = vpop.f32.mrf.mxu1  ;;  %v3590_v12 = vadd.f32 %v1326_v6, %v1197_v7 }
 0x1b0   :  { %v3583_v11 = vadd.f32 %v1361_v49, %v1232_v42  ;;  %v1328_v52 = vpop.f32.mrf.mxu0 }
 0x1b1   :  { %v1363_v54 = vpop.f32.mrf.mxu1  ;;  %v1386_v16 = vsel %vm425_vm0, %v3590_v12, 0.0 }
 0x1b2   :  { %v1407_v37 = vsel %vm425_vm0, %v3583_v11, 0.0  ;;  %v1331_v44 = vpop.f32.mrf.mxu0  ;;  %1405 = vadd.xlane.f32.xlu1 %v1404_v58 }
 0x1b3   :  { %v1366_v24 = vpop.f32.mrf.mxu1  ;;  %1408 = vadd.xlane.f32.xlu0 %v1407_v37  ;;  %v3601_v62 = vadd.f32 %v1331_v44, %v1202_v50 }
 0x1b4   :  { %v1333_v40 = vpop.f32.mrf.mxu0  ;;  %v3615_v33 = vadd.f32 %v1366_v24, %v1237_v31 }
 0x1b5   :  { %v1368_v59 = vpop.f32.mrf.mxu1  ;;  %v1389_v18 = vsel %vm425_vm0, %v3601_v62, 0.0 }
 0x1b6   :  { %v1336_v46 = vpop.f32.mrf.mxu0  ;;  %1387 = vadd.xlane.f32.xlu1 %v1386_v16  ;;  %v1410_v43 = vsel %vm425_vm0, %v3615_v33, 0.0 }
 0x1b7   :  { %v1371_v22 = vpop.f32.mrf.mxu1  ;;  %1390 = vadd.xlane.f32.xlu0 %v1389_v18  ;;  %v3613_v63 = vadd.f32 %v1336_v46, %v1207_v20 }
 0x1b8   :  { %v1338_v32 = vpop.f32.mrf.mxu0  ;;  %v3621_v39 = vadd.f32 %v1371_v22, %v1242_v29 }
 0x1b9   :  { %v1373_v26 = vpop.f32.mrf.mxu1  ;;  %v1392_v9 = vsel %vm425_vm0, %v3613_v63, 0.0 }
 0x1ba   :  { %v1341_v30 = vpop.f32.mrf.mxu0  ;;  %1393 = vadd.xlane.f32.xlu1 %v1392_v9  ;;  %v1414_v35 = vsel %vm1413_vm1, %v3621_v39, 0.0 }
 0x1bb   :  { %v3619_v36 = vadd.f32 %v1341_v30, %v1212_v34 }
 0x1bc   :  { %v1343_v38 = vpop.f32.mrf.mxu0 }
 0x1bd   :  { %v1395_v42 = vsel %vm425_vm0, %v3619_v36, 0.0 }
 0x1be   :  { %1411 = vadd.xlane.f32.xlu1 %v1410_v43  ;;  %1396 = vadd.xlane.f32.xlu0 %v1395_v42 }
 0x1c2   :  { %1415 = vadd.xlane.f32.xlu0 %v1414_v35 }
 0x22f   :  { %v1379_v6 = vpop.xlane.xlu0 %1378 }
 0x230   :  { %v1400_v5 = vpop.xlane.xlu1 %1399  ;;  %v1418_v48 = vmul.f32 0.015625, %v1379_v6 }
 0x231   :  { %v1425_v49 = vmul.f32 0.015625, %v1400_v5 }
 0x232   :  { %v3633_v13 = vsub.f32 %v3543_v60, %v1418_v48 }
 0x233   :  { %v3630_v7 = vsub.f32 %v3545_v8, %v1425_v49  ;;  %v1382_v15 = vpop.xlane.xlu0 %1381 }
 0x234   :  { %v1419_v51 = vmul.f32 0.015625, %v1382_v15  ;;  %v1444_v52 = vmul.f32 %v3633_v13, %v3633_v13 }
 0x235   :  { %v1451_v45 = vmul.f32 %v3630_v7, %v3630_v7 }
 0x236   :  { %v3640_v54 = vsub.f32 %v3556_v2, %v1419_v51  ;;  %v1457_v57 = vsel %vm425_vm0, %v1444_v52, 0.0 }
 0x237   :  { %v1478_v50 = vsel %vm425_vm0, %v1451_v45, 0.0  ;;  %v1385_v8 = vpop.xlane.xlu1 %1384  ;;  %1458 = vadd.xlane.f32.xlu1 %v1457_v57  ;;  %v1403_v60 = vpop.xlane.xlu0 %1402 }
 0x238   :  { %1479 = vadd.xlane.f32.xlu0 %v1478_v50  ;;  %v1420_v23 = vmul.f32 0.015625, %v1385_v8  ;;  %v1426_v19 = vmul.f32 0.015625, %v1403_v60  ;;  %v1445_v58 = vmul.f32 %v3640_v54, %v3640_v54 }
 0x23a   :  { %v3647_v37 = vsub.f32 %v3568_v3, %v1420_v23  ;;  %v3650_v44 = vsub.f32 %v3561_v4, %v1426_v19  ;;  %v1460_v2 = vsel %vm425_vm0, %v1445_v58, 0.0 }
 0x23b   :  { %v1406_v24 = vpop.xlane.xlu1 %1405 }
 0x23c   :  { %1461 = vadd.xlane.f32.xlu0 %v1460_v2  ;;  %v1409_v56 = vpop.xlane.xlu0 %1408  ;;  %v1427_v25 = vmul.f32 0.015625, %v1406_v24  ;;  %v1452_v0 = vmul.f32 %v3650_v44, %v3650_v44  ;;  %v1446_v21 = vmul.f32 %v3647_v37, %v3647_v37 }
 0x23d   :  { %v1428_v61 = vmul.f32 0.015625, %v1409_v56 }
 0x23e   :  { %v3658_v40 = vsub.f32 %v3575_v41, %v1427_v25  ;;  %v1481_v4 = vsel %vm425_vm0, %v1452_v0, 0.0  ;;  %v1463_v47 = vsel %vm425_vm0, %v1446_v21, 0.0 }
 0x23f   :  { %v3661_v3 = vsub.f32 %v3583_v11, %v1428_v61  ;;  %v1388_v59 = vpop.xlane.xlu1 %1387  ;;  %1482 = vadd.xlane.f32.xlu1 %v1481_v4 }
 0x240   :  { %v1391_v20 = vpop.xlane.xlu0 %1390  ;;  %v1421_v55 = vmul.f32 0.015625, %v1388_v59  ;;  %v1453_v27 = vmul.f32 %v3658_v40, %v3658_v40 }
 0x241   :  { %v1422_v10 = vmul.f32 0.015625, %v1391_v20  ;;  %v1454_v16 = vmul.f32 %v3661_v3, %v3661_v3  ;;  %v3710_v20 = vld [vmem:[%s3811_s3] ss:$0 sm:$0xff] }
 0x242   :  { %v3668_v14 = vsub.f32 %v3590_v12, %v1421_v55  ;;  %v1484_v11 = vsel %vm425_vm0, %v1453_v27, 0.0 }
 0x243   :  { %v3671_v41 = vsub.f32 %v3601_v62, %v1422_v10  ;;  %v1394_v18 = vpop.xlane.xlu1 %1393  ;;  %1485 = vadd.xlane.f32.xlu0 %v1484_v11  ;;  %1464 = vadd.xlane.f32.xlu1 %v1463_v47  ;;  %v1487_v62 = vsel %vm425_vm0, %v1454_v16, 0.0  ;;  %v3716_v11 = vld [vmem:[%s3812_s4] ss:$0 sm:$0xff] }
 0x244   :  { %v1423_v46 = vmul.f32 0.015625, %v1394_v18  ;;  %v1447_v22 = vmul.f32 %v3668_v14, %v3668_v14 }
 0x245   :  { %v1448_v1 = vmul.f32 %v3671_v41, %v3671_v41 }
 0x246   :  { %v3679_v53 = vsub.f32 %v3613_v63, %v1423_v46  ;;  %v1466_v12 = vsel %vm425_vm0, %v1447_v22, 0.0 }
 0x247   :  { %v1412_v17 = vpop.xlane.xlu1 %1411  ;;  %1467 = vadd.xlane.f32.xlu0 %v1466_v12  ;;  %1488 = vadd.xlane.f32.xlu1 %v1487_v62  ;;  %v1397_v28 = vpop.xlane.xlu0 %1396  ;;  %v1469_v30 = vsel %vm425_vm0, %v1448_v1, 0.0 }
 0x248   :  { %v1429_v31 = vmul.f32 0.015625, %v1412_v17  ;;  %v1424_v32 = vmul.f32 0.015625, %v1397_v28  ;;  %v1449_v26 = vmul.f32 %v3679_v53, %v3679_v53 }
 0x24a   :  { %v3688_v34 = vsub.f32 %v3615_v33, %v1429_v31  ;;  %v3691_v63 = vsub.f32 %v3619_v36, %v1424_v32  ;;  %v1472_v9 = vsel %vm425_vm0, %v1449_v26, 0.0 }
 0x24b   :  { %1473 = vadd.xlane.f32.xlu0 %v1472_v9  ;;  %1470 = vadd.xlane.f32.xlu1 %v1469_v30  ;;  %v1416_v29 = vpop.xlane.xlu0 %1415 }
 0x24c   :  { %v1430_v38 = vmul.f32 0.015625, %v1416_v29  ;;  %v1455_v43 = vmul.f32 %v3688_v34, %v3688_v34  ;;  %v1450_v42 = vmul.f32 %v3691_v63, %v3691_v63 }
 0x24e   :  { %v3700_v33 = vsub.f32 %v3621_v39, %v1430_v38  ;;  %v1490_v36 = vsel %vm425_vm0, %v1455_v43, 0.0  ;;  %v1475_v35 = vsel %vm425_vm0, %v1450_v42, 0.0 }
 0x24f   :  { %1491 = vadd.xlane.f32.xlu0 %v1490_v36  ;;  %1476 = vadd.xlane.f32.xlu1 %v1475_v35 }
 0x250   :  { %v1456_v5 = vmul.f32 %v3700_v33, %v3700_v33 }
 0x252   :  { %v1493_v6 = vsel %vm1413_vm1, %v1456_v5, 0.0 }
 0x253   :  { %1494 = vadd.xlane.f32.xlu1 %v1493_v6 }
 0x2c0   :  { %v1459_v49 = vpop.xlane.xlu1 %1458 }
 0x2c1   :  { %v1480_v48 = vpop.xlane.xlu0 %1479  ;;  %v1496_v15 = vmul.f32 0.015625, %v1459_v49 }
 0x2c2   :  { %v1503_v51 = vmul.f32 0.015625, %v1480_v48 }
 0x2c3   :  { %v1509_v45 = vadd.f32 1e-06, %v1496_v15 }
 0x2c4   :  { %v1516_v52 = vadd.f32 1e-06, %v1503_v51 }
 0x2c5   :  { %v1462_v39 = vpop.xlane.xlu0 %1461  ;;  %2094 = vrsqrt.f32 %v1509_v45 }
 0x2c6   :  { %v1497_v50 = vmul.f32 0.015625, %v1462_v39  ;;  %2096 = vrsqrt.f32 %v1516_v52 }
 0x2c8   :  { %v1510_v57 = vadd.f32 1e-06, %v1497_v50  ;;  %v1483_v8 = vpop.xlane.xlu1 %1482 }
 0x2c9   :  { %v1504_v60 = vmul.f32 0.015625, %v1483_v8 }
 0x2ca   :  { %2098 = vrsqrt.f32 %v1510_v57 }
 0x2cb   :  { %v1517_v23 = vadd.f32 1e-06, %v1504_v60 }
 0x2cc   :  { %v1465_v19 = vpop.xlane.xlu1 %1464  ;;  %v1486_v58 = vpop.xlane.xlu0 %1485 }
 0x2cd   :  { %2100 = vrsqrt.f32 %v1517_v23  ;;  %v1498_v2 = vmul.f32 0.015625, %v1465_v19  ;;  %v1505_v24 = vmul.f32 0.015625, %v1486_v58 }
 0x2cf   :  { %v1511_v56 = vadd.f32 1e-06, %v1498_v2  ;;  %v1518_v25 = vadd.f32 1e-06, %v1505_v24 }
 0x2d0   :  { %v1489_v61 = vpop.xlane.xlu1 %1488  ;;  %v1468_v0 = vpop.xlane.xlu0 %1467 }
 0x2d1   :  { %2102 = vrsqrt.f32 %v1511_v56  ;;  %v1506_v21 = vmul.f32 0.015625, %v1489_v61  ;;  %v1499_v4 = vmul.f32 0.015625, %v1468_v0 }
 0x2d2   :  { %v2095_v59 = vpop.eup %2094  ;;  %2104 = vrsqrt.f32 %v1518_v25 }
 0x2d3   :  { %v2097_v55 = vpop.eup %2096  ;;  %v1535_v10 = vmul.f32 %v2095_v59, %v3633_v13  ;;  %v1519_v27 = vadd.f32 1e-06, %v1506_v21  ;;  %v1512_v47 = vadd.f32 1e-06, %v1499_v4 }
 0x2d4   :  { %v1542_v16 = vmul.f32 %v2097_v55, %v3630_v7  ;;  %v1471_v18 = vpop.xlane.xlu1 %1470  ;;  %v1474_v46 = vpop.xlane.xlu0 %1473 }
 0x2d5   :  { %v1554_v22 = vmul.f32 %v3710_v20, %v1535_v10  ;;  %2106 = vrsqrt.f32 %v1519_v27  ;;  %v1500_v12 = vmul.f32 0.015625, %v1471_v18  ;;  %v1501_v62 = vmul.f32 0.015625, %v1474_v46 }
 0x2d6   :  { %v1561_v17 = vmul.f32 %v3710_v20, %v1542_v16  ;;  %2108 = vrsqrt.f32 %v1512_v47 }
 0x2d7   :  { %v2099_v1 = vpop.eup %2098  ;;  %v1573_v13 = vadd.f32 %v3716_v11, %v1554_v22  ;;  %v1513_v31 = vadd.f32 1e-06, %v1500_v12  ;;  %v1514_v32 = vadd.f32 1e-06, %v1501_v62 }
 0x2d8   :  { %v1536_v28 = vmul.f32 %v2099_v1, %v3640_v54  ;;  %v1580_v26 = vadd.f32 %v3716_v11, %v1561_v17  ;;  %v1477_v7 = vpop.xlane.xlu1 %1476  ;;  %v1492_v9 = vpop.xlane.xlu0 %1491 }
 0x2d9   :  { %1586 = vst.msk [vmem:[%s3813_s5] sm:$0xff] %vm425_vm0, %v1573_v13  ;;  %2110 = vrsqrt.f32 %v1513_v31  ;;  %v1502_v29 = vmul.f32 0.015625, %v1477_v7  ;;  %v1507_v38 = vmul.f32 0.015625, %v1492_v9 }
 0x2da   :  { %v1555_v30 = vmul.f32 %v3710_v20, %v1536_v28  ;;  %v2101_v43 = vpop.eup %2100  ;;  %1593 = vst.msk [vmem:[%s3813_s5 + $0x38] sm:$0xff] %vm425_vm0, %v1580_v26  ;;  %2112 = vrsqrt.f32 %v1514_v32 }
 0x2db   :  { %v1543_v42 = vmul.f32 %v2101_v43, %v3650_v44  ;;  %v1515_v36 = vadd.f32 1e-06, %v1502_v29  ;;  %v1520_v35 = vadd.f32 1e-06, %v1507_v38 }
 0x2dc   :  { %v1574_v54 = vadd.f32 %v3716_v11, %v1555_v30  ;;  %v1495_v5 = vpop.xlane.xlu1 %1494 }
 0x2dd   :  { %v1562_v6 = vmul.f32 %v3710_v20, %v1543_v42  ;;  %2114 = vrsqrt.f32 %v1515_v36  ;;  %v1508_v49 = vmul.f32 0.015625, %v1495_v5 }
 0x2de   :  { %1587 = vst.msk [vmem:[%s3813_s5 + $0x8] sm:$0xff] %vm425_vm0, %v1574_v54  ;;  %v2103_v48 = vpop.eup %2102  ;;  %2116 = vrsqrt.f32 %v1520_v35 }
 0x2df   :  { %v2105_v15 = vpop.eup %2104  ;;  %v1581_v51 = vadd.f32 %v3716_v11, %v1562_v6  ;;  %v1537_v45 = vmul.f32 %v2103_v48, %v3647_v37  ;;  %v1521_v44 = vadd.f32 1e-06, %v1508_v49 }
 0x2e0   :  { %v1544_v52 = vmul.f32 %v2105_v15, %v3658_v40 }
 0x2e1   :  { %1594 = vst.msk [vmem:[%s3813_s5 + $0x40] sm:$0xff] %vm425_vm0, %v1581_v51  ;;  %v1556_v39 = vmul.f32 %v3710_v20, %v1537_v45  ;;  %2118 = vrsqrt.f32 %v1521_v44 }
 0x2e2   :  { %v2107_v50 = vpop.eup %2106  ;;  %v1563_v57 = vmul.f32 %v3710_v20, %v1544_v52 }
 0x2e3   :  { %v2109_v8 = vpop.eup %2108  ;;  %v1575_v60 = vadd.f32 %v3716_v11, %v1556_v39  ;;  %v1545_v23 = vmul.f32 %v2107_v50, %v3661_v3 }
 0x2e4   :  { %v1582_v37 = vadd.f32 %v3716_v11, %v1563_v57  ;;  %v1538_v40 = vmul.f32 %v2109_v8, %v3668_v14 }
 0x2e5   :  { %1588 = vst.msk [vmem:[%s3813_s5 + $0x10] sm:$0xff] %vm425_vm0, %v1575_v60  ;;  %v1564_v19 = vmul.f32 %v3710_v20, %v1545_v23 }
 0x2e6   :  { %v2111_v58 = vpop.eup %2110  ;;  %1595 = vst.msk [vmem:[%s3813_s5 + $0x48] sm:$0xff] %vm425_vm0, %v1582_v37  ;;  %v1557_v2 = vmul.f32 %v3710_v20, %v1538_v40 }
 0x2e7   :  { %v2113_v3 = vpop.eup %2112  ;;  %v1583_v24 = vadd.f32 %v3716_v11, %v1564_v19  ;;  %v1539_v14 = vmul.f32 %v2111_v58, %v3671_v41 }
 0x2e8   :  { %v1576_v56 = vadd.f32 %v3716_v11, %v1557_v2  ;;  %v1540_v25 = vmul.f32 %v2113_v3, %v3679_v53 }
 0x2e9   :  { %1596 = vst.msk [vmem:[%s3813_s5 + $0x50] sm:$0xff] %vm425_vm0, %v1583_v24  ;;  %v1558_v61 = vmul.f32 %v3710_v20, %v1539_v14 }
 0x2ea   :  { %v2115_v0 = vpop.eup %2114  ;;  %1589 = vst.msk [vmem:[%s3813_s5 + $0x18] sm:$0xff] %vm425_vm0, %v1576_v56  ;;  %v1559_v21 = vmul.f32 %v3710_v20, %v1540_v25 }
 0x2eb   :  { %v2117_v41 = vpop.eup %2116  ;;  %v1577_v4 = vadd.f32 %v3716_v11, %v1558_v61  ;;  %v1541_v53 = vmul.f32 %v2115_v0, %v3691_v63 }
 0x2ec   :  { %v1578_v59 = vadd.f32 %v3716_v11, %v1559_v21  ;;  %v1546_v55 = vmul.f32 %v2117_v41, %v3688_v34 }
 0x2ed   :  { %1590 = vst.msk [vmem:[%s3813_s5 + $0x20] sm:$0xff] %vm425_vm0, %v1577_v4  ;;  %v1560_v10 = vmul.f32 %v3710_v20, %v1541_v53 }
 0x2ee   :  { %v2119_v27 = vpop.eup %2118  ;;  %1591 = vst.msk [vmem:[%s3813_s5 + $0x28] sm:$0xff] %vm425_vm0, %v1578_v59  ;;  %v1565_v47 = vmul.f32 %v3710_v20, %v1546_v55 }
 0x2ef   :  { %v1579_v63 = vadd.f32 %v3716_v11, %v1560_v10  ;;  %v1547_v16 = vmul.f32 %v2119_v27, %v3700_v33 }
 0x2f0   :  { %v1584_v34 = vadd.f32 %v3716_v11, %v1565_v47 }
 0x2f1   :  { %1592 = vst.msk [vmem:[%s3813_s5 + $0x30] sm:$0xff] %vm425_vm0, %v1579_v63  ;;  %v1566_v18 = vmul.f32 %v3710_v20, %v1547_v16 }
 0x2f2   :  { %1597 = vst.msk [vmem:[%s3813_s5 + $0x58] sm:$0xff] %vm425_vm0, %v1584_v34 }
 0x2f3   :  { %v1585_v46 = vadd.f32 %v3716_v11, %v1566_v18 }
 0x2f5   :  { %1598 = vst.msk [vmem:[%s3813_s5 + $0x60] sm:$0x3] %vm1413_vm1, %v1585_v46 }

// kernel: dct_detection_forward.3
= control target key start
LH: loop header
LB: loop body
LE: loop exit
PB: predicated region body
PF: predicated region fallthrough
CT: control target
= control target key end

     0   :  { %s6805_s27 = smov 0   ;;  %s11277_s0 = inlined_call_operand.vmem [shape: f32[112,64], index: 0, kind: input, shape index: {}]   ;;  %s11278_s1 = inlined_call_operand.vmem [shape: f32[3,64,192], index: 1, kind: input, shape index: {}]   ;;  %s11279_s2 = inlined_call_operand.vmem [shape: f32[3,1,192], index: 2, kind: input, shape index: {}]   ;;  %s11280_s3 = inlined_call_operand.vmem [shape: f32[3,64,64], index: 3, kind: input, shape index: {}]   ;;  %s11281_s4 = inlined_call_operand.vmem [shape: f32[3,1,64], index: 4, kind: input, shape index: {}, may-alias: {4,6,8,12}]   ;;  %s11282_s5 = inlined_call_operand.vmem [shape: f32[3,1,64], index: 5, kind: input, shape index: {}, may-alias: {5,7}]   ;;  %s11283_s6 = inlined_call_operand.vmem [shape: f32[3,1,64], index: 6, kind: input, shape index: {}, may-alias: {4,6,8,12}]   ;;  %s11284_s7 = inlined_call_operand.vmem [shape: f32[3,1,64], index: 7, kind: input, shape index: {}, may-alias: {5,7}]   ;;  %s11285_s8 = inlined_call_operand.vmem [shape: f32[3,1,64], index: 8, kind: input, shape index: {}, may-alias: {4,6,8,12}]   ;;  %s11286_s9 = inlined_call_operand.vmem [shape: f32[3,64,256], index: 9, kind: input, shape index: {}]   ;;  %s11287_s10 = inlined_call_operand.vmem [shape: f32[3,1,256], index: 10, kind: input, shape index: {}]   ;;  %s11288_s11 = inlined_call_operand.vmem [shape: f32[3,256,64], index: 11, kind: input, shape index: {}]   ;;  %s11289_s12 = inlined_call_operand.vmem [shape: f32[3,1,64], index: 12, kind: input, shape index: {}, may-alias: {4,6,8,12}]   ;;  %s11290_s13 = inlined_call_operand.vmem [shape: f32[1,64], index: 13, kind: input, shape index: {}]   ;;  %s11291_s14 = inlined_call_operand.vmem [shape: f32[1,64], index: 14, kind: input, shape index: {}]   ;;  %s11292_s15 = inlined_call_operand.vmem [shape: f32[64,16], index: 15, kind: input, shape index: {}]   ;;  %s11293_s16 = inlined_call_operand.vmem [shape: f32[1,16], index: 16, kind: input, shape index: {}, may-alias: {16,18,19}]   ;;  %s11294_s17 = inlined_call_operand.vmem [shape: f32[1,16], index: 17, kind: input, shape index: {}, may-alias: {17,20}]   ;;  %s11295_s18 = inlined_call_operand.vmem [shape: f32[1,16], index: 18, kind: input, shape index: {}, may-alias: {16,18,19}]   ;;  %s11296_s19 = inlined_call_operand.vmem [shape: f32[1,16], index: 19, kind: input, shape index: {}, may-alias: {16,18,19}]   ;;  %s11297_s20 = inlined_call_operand.vmem [shape: f32[1,16], index: 20, kind: input, shape index: {}, may-alias: {17,20}]   ;;  %s11298_s21 = inlined_call_operand.vmem [shape: f32[16,1], index: 21, kind: input, shape index: {}]   ;;  %s11299_s22 = inlined_call_operand.<no memory space> [shape: f32[1,1], index: 22, kind: input, shape index: {}]   ;;  %s11300_s23 = inlined_call_operand.vmem [shape: f32[112,64], index: 23, kind: output, shape index: {0}]   ;;  %s11301_s24 = inlined_call_operand.vmem [shape: f32[2,1], index: 24, kind: output, shape index: {1}]  }
   0x1   :  { %11354 = sst [smem:[#allocation104_spill]] %s11277_s0  ;;  %v30_v0 = vstv %s11299_s22 }
   0x2   :  { %11355 = sst [smem:[#allocation105_spill]] %s11278_s1  ;;  %31 = vst [vmem:[#allocation2] sm:$0x1] %v30_v0 }
   0x3   :  { %11356 = sst [smem:[#allocation106_spill]] %s11279_s2 }
   0x4   :  { %11357 = sst [smem:[#allocation107_spill]] %s11280_s3 }
   0x5   :  { %11358 = sst [smem:[#allocation108_spill]] %s11281_s4 }
   0x6   :  { %11359 = sst [smem:[#allocation109_spill]] %s11282_s5 }
   0x7   :  { %11360 = sst [smem:[#allocation110_spill]] %s11283_s6 }
   0x8   :  { %11361 = sst [smem:[#allocation111_spill]] %s11284_s7 }
   0x9   :  { %11362 = sst [smem:[#allocation112_spill]] %s11285_s8 }
   0xa   :  { %11363 = sst [smem:[#allocation113_spill]] %s11290_s13 }
   0xb   :  { %11364 = sst [smem:[#allocation114_spill]] %s11291_s14 }
   0xc   :  { %11365 = sst [smem:[#allocation115_spill]] %s11292_s15 }
   0xd   :  { %11366 = sst [smem:[#allocation116_spill]] %s11293_s16 }
   0xe   :  { %11367 = sst [smem:[#allocation117_spill]] %s11294_s17 }
   0xf   :  { %11368 = sst [smem:[#allocation118_spill]] %s11295_s18 }
  0x10   :  { %11369 = sst [smem:[#allocation119_spill]] %s11296_s19 }
  0x11   :  { %11370 = sst [smem:[#allocation120_spill]] %s11297_s20 }
  0x12   :  { %11371 = sst [smem:[#allocation121_spill]] %s11298_s21 }
  0x13   :  { %11372 = sst [smem:[#allocation122_spill]] %s11301_s24 }
  0x14 LB: > { %11373 = sst [smem:[#allocation3_spill]] %s6656_s27  ;;  %s6811_s28 = sadd.s32 4294967295, %s6656_s27   ;;  %s6656_s27 = sphi %s6805_s27, %s37_s27  }
  0x15   : > { %p6020_p0 = scmp.ge.s32.totalorder %s6656_s27, 1  ;;  %p753_p1 = scmp.lt.s32.totalorder %s6656_s27, 4 }
  0x17   : > { %p754_p2 = pnand %p6020_p0, %p753_p1 }
  0x19   : > { %757 = sbr.rel (%p754_p2) target bundleno = 5662 (0x161e), region = 112 }
  0x1e   : > { %p855_p3 = scmp.lt.s32.totalorder %s6811_s28, 2  ;;  %s11374_s7 = sld [smem:[#allocation105_spill]] }
  0x1f   : > { %s11376_s8 = sld [smem:[#allocation106_spill]]  ;;  %p6031_p4 = scmp.ne.s32.totalorder %s6811_s28, 0 }
  0x20   : > { %s6817_s22 = scalar_select %p855_p3, %s6811_s28, 2 }
  0x21   : > { %s11379_s19 = sld [smem:[#allocation107_spill]] }
  0x22   : > { %s6093_s6 = sshll.u32 %s6817_s22, 7  ;;  %s6023_s2 = sshll.u32 %s6817_s22, 1 }
  0x23   : > { %s6094_s1 = sshll.u32 %s6817_s22, 6  ;;  %s11380_s29 = sld [smem:[#allocation109_spill]] }
  0x24   : > { %s6824_s30 = scalar_lea.vmem %s11374_s7, %s6093_s6  ;;  %s11381_s13 = sld [smem:[#allocation110_spill]] }
  0x25   : > { %11375 = sst [smem:[#allocation4_spill]] %s6824_s30  ;;  %s6829_s4 = scalar_lea.vmem %s11376_s8, %s6023_s2 }
  0x26   : > { %11377 = sst [smem:[#allocation5_spill]] %s6829_s4  ;;  %s6860_s18 = scalar_lea.vmem %s11286_s9, %s6093_s6 }
  0x27   : > { %s6839_s16 = scalar_lea.vmem %s11379_s19, %s6094_s1  ;;  %s11382_s15 = sld [smem:[#allocation111_spill]] }
  0x28   : > { %s11383_s27 = sld [smem:[#allocation112_spill]]  ;;  %s6865_s21 = scalar_lea.vmem %s11287_s10, %s6023_s2 }
  0x29   : > { %s874_s0 = scalar_lea.vmem %s11380_s29, %s6817_s22  ;;  %s6096_s14 = sshll.u32 %s6817_s22, 8 }
  0x2a   : > { %s877_s3 = scalar_lea.vmem %s11381_s13, %s6817_s22  ;;  %s6871_s29 = scalar_lea.vmem %s11288_s11, %s6096_s14 }
  0x2b   : > { %s900_s30 = scalar_lea.vmem %s11289_s12, %s6817_s22  ;;  %904 = sbr.rel (%p6031_p4) target bundleno = 58 (0x3a), region = 116 }
  0x2c   : > { %s11384_s25 = sld [smem:[#allocation104_spill]] (!%p6031_p4) }
  0x2d   : > { %s880_s4 = scalar_lea.vmem %s11382_s15, %s6817_s22 }
  0x2e   : > { %s883_s26 = scalar_lea.vmem %s11383_s27, %s6817_s22 }
  0x30   : > { %vm919_vm0 = vcmask 523264  }
  0x32   : > { %v905_v1 = vld [vmem:[%s11384_s25] sm:$0xff]  ;;  %v906_v2 = vld [vmem:[%s11384_s25 + $0x8] sm:$0xff]  ;;  %v907_v3 = vld [vmem:[%s11384_s25 + $0x10] sm:$0xff] }
  0x33   : > { %920 = vst.msk [vmem:[%s11300_s23] sm:$0xff] %vm919_vm0, %v905_v1  ;;  %921 = vst.msk [vmem:[%s11300_s23 + $0x8] sm:$0xff] %vm919_vm0, %v906_v2  ;;  %v908_v4 = vld [vmem:[%s11384_s25 + $0x18] sm:$0xff]  ;;  %v909_v5 = vld [vmem:[%s11384_s25 + $0x20] sm:$0xff] }
  0x34   : > { %922 = vst.msk [vmem:[%s11300_s23 + $0x10] sm:$0xff] %vm919_vm0, %v907_v3  ;;  %v910_v6 = vld [vmem:[%s11384_s25 + $0x28] sm:$0xff]  ;;  %923 = vst.msk [vmem:[%s11300_s23 + $0x18] sm:$0xff] %vm919_vm0, %v908_v4  ;;  %v911_v7 = vld [vmem:[%s11384_s25 + $0x30] sm:$0xff] }
  0x35   : > { %924 = vst.msk [vmem:[%s11300_s23 + $0x20] sm:$0xff] %vm919_vm0, %v909_v5  ;;  %925 = vst.msk [vmem:[%s11300_s23 + $0x28] sm:$0xff] %vm919_vm0, %v910_v6  ;;  %v912_v8 = vld [vmem:[%s11384_s25 + $0x38] sm:$0xff]  ;;  %v913_v9 = vld [vmem:[%s11384_s25 + $0x40] sm:$0xff] }
  0x36   : > { %926 = vst.msk [vmem:[%s11300_s23 + $0x30] sm:$0xff] %vm919_vm0, %v911_v7  ;;  %927 = vst.msk [vmem:[%s11300_s23 + $0x38] sm:$0xff] %vm919_vm0, %v912_v8  ;;  %v914_v10 = vld [vmem:[%s11384_s25 + $0x48] sm:$0xff]  ;;  %v915_v11 = vld [vmem:[%s11384_s25 + $0x50] sm:$0xff] }
  0x37   : > { %928 = vst.msk [vmem:[%s11300_s23 + $0x40] sm:$0xff] %vm919_vm0, %v913_v9  ;;  %v916_v12 = vld [vmem:[%s11384_s25 + $0x58] sm:$0xff]  ;;  %929 = vst.msk [vmem:[%s11300_s23 + $0x48] sm:$0xff] %vm919_vm0, %v914_v10  ;;  %v917_v13 = vld [vmem:[%s11384_s25 + $0x60] sm:$0xff] }
  0x38   : > { %930 = vst.msk [vmem:[%s11300_s23 + $0x50] sm:$0xff] %vm919_vm0, %v915_v11  ;;  %931 = vst.msk [vmem:[%s11300_s23 + $0x58] sm:$0xff] %vm919_vm0, %v916_v12  ;;  %v918_v14 = vld [vmem:[%s11384_s25 + $0x68] sm:$0xff] }
  0x39   : > { %932 = vst.msk [vmem:[%s11300_s23 + $0x60] sm:$0xff] %vm919_vm0, %v917_v13  ;;  %933 = vst.msk [vmem:[%s11300_s23 + $0x68] sm:$0xff] %vm919_vm0, %v918_v14 }
  0x3a PF: > { %v934_v15 = vld [vmem:[%s11300_s23] sm:$0xff]  ;;  %vm1028_vm1 = vcmask 523264   ;;  %v935_v17 = vld [vmem:[%s11300_s23 + $0x8] sm:$0xff]  ;;  %s11385_s24 = sld [smem:[#allocation4_spill]]  ;;  %vm1503_vm2 = vcmask 64512   ;;  %s6660_s19 = smov 120  }
  0x3b   : > { %v936_v16 = vld [vmem:[%s11300_s23 + $0x10] sm:$0xff]  ;;  %v1029_v18 = vsel %vm1028_vm1, %v934_v15, 0.0  ;;  %v937_v20 = vld [vmem:[%s11300_s23 + $0x18] sm:$0xff]  ;;  %v1032_v21 = vsel %vm1028_vm1, %v935_v17, 0.0  ;;  %s6661_s20 = smov 112   ;;  %s6662_s14 = smov 104  }
  0x3c   : > { %v1035_v19 = vsel %vm1028_vm1, %v936_v16, 0.0  ;;  %1030 = vadd.xlane.f32.xlu0 %v1029_v18  ;;  %v1038_v22 = vsel %vm1028_vm1, %v937_v20, 0.0  ;;  %v938_v23 = vld [vmem:[%s11300_s23 + $0x20] sm:$0xff]  ;;  %v939_v24 = vld [vmem:[%s11300_s23 + $0x28] sm:$0xff]  ;;  %s6663_s13 = smov 96   ;;  %s6664_s1 = smov 88  }
  0x3d   : > { %1036 = vadd.xlane.f32.xlu1 %v1035_v19  ;;  %v1041_v25 = vsel %vm1028_vm1, %v938_v23, 0.0  ;;  %v1044_v26 = vsel %vm1028_vm1, %v939_v24, 0.0  ;;  %v940_v27 = vld [vmem:[%s11300_s23 + $0x30] sm:$0xff]  ;;  %v941_v28 = vld [vmem:[%s11300_s23 + $0x38] sm:$0xff]  ;;  %s6665_s15 = smov 80   ;;  %s6666_s7 = smov 72  }
  0x3e   : > { %v1047_v29 = vsel %vm1028_vm1, %v940_v27, 0.0  ;;  %v1050_v30 = vsel %vm1028_vm1, %v941_v28, 0.0  ;;  %v7011_v31 = vld [vmem:[%s11300_s23 + $0x40] sm:$0xff]  ;;  %v7016_v32 = vld [vmem:[%s11300_s23 + $0x48] sm:$0xff]  ;;  %vm1826_vm3 = vcmask 7168   ;;  %vm1834_vm4 = vcmask 15360  }
  0x3f   : > { %v1053_v33 = vsel %vm1028_vm1, %v7011_v31, 0.0  ;;  %v1056_v34 = vsel %vm1028_vm1, %v7016_v32, 0.0  ;;  %v7025_v35 = vld [vmem:[%s11300_s23 + $0x50] sm:$0xff]  ;;  %v7030_v36 = vld [vmem:[%s11300_s23 + $0x58] sm:$0xff]  ;;  %vm1842_vm5 = vcmask 23552   ;;  %vm1850_vm6 = vcmask 31744  }
  0x40   : > { %1033 = vadd.xlane.f32.xlu0 %v1032_v21  ;;  %v1059_v37 = vsel %vm1028_vm1, %v7025_v35, 0.0  ;;  %v1062_v38 = vsel %vm1028_vm1, %v7030_v36, 0.0  ;;  %v7039_v39 = vld [vmem:[%s11300_s23 + $0x60] sm:$0xff]  ;;  %v7044_v40 = vld [vmem:[%s11300_s23 + $0x68] sm:$0xff]  ;;  %vm1858_vm7 = vcmask 39936   ;;  %vm1866_vm8 = vcmask 48128  }
  0x41   : > { %1039 = vadd.xlane.f32.xlu1 %v1038_v22  ;;  %v1065_v41 = vsel %vm1028_vm1, %v7039_v39, 0.0  ;;  %v1068_v42 = vsel %vm1028_vm1, %v7044_v40, 0.0  ;;  %vm1874_vm9 = vcmask 56320   ;;  %vm2596_vm10 = vcmask 130048   ;;  %s11855_s6 = sld [smem:[#allocation108_spill]]  ;;  %p6080_p5 = scmp.ge.s32.totalorder %s6811_s28, 2 }
  0x42   : > { %vm2604_vm11 = vcmask 195584   ;;  %vm2612_vm12 = vcmask 261120   ;;  %vm2620_vm13 = vcmask 326656   ;;  %vm2628_vm14 = vcmask 392192  }
  0x43   : > { %vm2636_vm15 = vcmask 457728  }
  0x44   : > { %1042 = vadd.xlane.f32.xlu0 %v1041_v25 }
  0x45   : > { %1045 = vadd.xlane.f32.xlu1 %v1044_v26 }
  0x47   : > { %s11856_s2 = scalar_lea.vmem %s11855_s6, %s6817_s22 }
  0x48   : > { %1048 = vadd.xlane.f32.xlu0 %v1047_v29 }
  0x49   : > { %1051 = vadd.xlane.f32.xlu1 %v1050_v30 }
  0x4c   : > { %1054 = vadd.xlane.f32.xlu0 %v1053_v33 }
  0x4d   : > { %1057 = vadd.xlane.f32.xlu1 %v1056_v34 }
  0x50   : > { %1060 = vadd.xlane.f32.xlu0 %v1059_v37 }
  0x51   : > { %1063 = vadd.xlane.f32.xlu1 %v1062_v38 }
  0x54   : > { %1066 = vadd.xlane.f32.xlu0 %v1065_v41 }
  0x55   : > { %1069 = vadd.xlane.f32.xlu1 %v1068_v42 }
  0xc5   : > { %v1031_v43 = vpop.xlane.xlu0 %1030 }
  0xc6   : > { %v1037_v44 = vpop.xlane.xlu1 %1036  ;;  %v1072_v45 = vmul.f32 0.015625, %v1031_v43  ;;  %v963_v43 = vld [vmem:[%s11385_s24 + $0x78] sm:$0xff] }
  0xc7   : > { %v1074_v46 = vmul.f32 0.015625, %v1037_v44  ;;  %1321 = vmatprep.subr.mxu0 %v963_v43  ;;  %v7156_v43 = vld [vmem:[%s877_s3] ss:$0 sm:$0xff]  ;;  %s6659_s3 = smov 64  }
  0xc8   : > { %v7050_v47 = vsub.f32 %v934_v15, %v1072_v45 }
  0xc9   : > { %v7052_v48 = vsub.f32 %v936_v16, %v1074_v46  ;;  %v1034_v49 = vpop.xlane.xlu0 %1033 }
  0xca   : > { %v1040_v50 = vpop.xlane.xlu1 %1039  ;;  %v1073_v51 = vmul.f32 0.015625, %v1034_v49  ;;  %v1100_v53 = vmul.f32 %v7050_v47, %v7050_v47  ;;  %v962_v49 = vld [vmem:[%s11385_s24 + $0x70] sm:$0xff] }
  0xcb   : > { %v1075_v52 = vmul.f32 0.015625, %v1040_v50  ;;  %v1102_v54 = vmul.f32 %v7052_v48, %v7052_v48  ;;  %v961_v50 = vld [vmem:[%s11385_s24 + $0x68] sm:$0xff]  ;;  %1322 = vmatpush1.msra.mxu0 %v962_v49 }
  0xcc   : > { %v7058_v55 = vsub.f32 %v935_v17, %v1073_v51  ;;  %v1114_v57 = vsel %vm1028_vm1, %v1100_v53, 0.0  ;;  %1323 = vmatprep.subr.mxu0 %v961_v50  ;;  %v959_v53 = vld [vmem:[%s11385_s24 + $0x58] sm:$0xff] }
  0xcd   : > { %v7060_v56 = vsub.f32 %v937_v20, %v1075_v52  ;;  %1115 = vadd.xlane.f32.xlu0 %v1114_v57  ;;  %v1043_v58 = vpop.xlane.xlu0 %1042  ;;  %v1120_v60 = vsel %vm1028_vm1, %v1102_v54, 0.0  ;;  %v958_v57 = vld [vmem:[%s11385_s24 + $0x50] sm:$0xff] }
  0xce   : > { %v1046_v59 = vpop.xlane.xlu1 %1045  ;;  %v1076_v61 = vmul.f32 0.015625, %v1043_v58  ;;  %v1101_v63 = vmul.f32 %v7058_v55, %v7058_v55  ;;  %v957_v58 = vld [vmem:[%s11385_s24 + $0x48] sm:$0xff] }
  0xcf   : > { %v1077_v62 = vmul.f32 0.015625, %v1046_v59  ;;  %v1103_v0 = vmul.f32 %v7060_v56, %v7060_v56 }
  0xd0   : > { %v7068_v1 = vsub.f32 %v938_v23, %v1076_v61  ;;  %v1117_v3 = vsel %vm1028_vm1, %v1101_v63, 0.0  ;;  %v955_v61 = vld [vmem:[%s11385_s24 + $0x38] sm:$0xff]  ;;  %v953_v63 = vld [vmem:[%s11385_s24 + $0x28] sm:$0xff] }
  0xd1   : > { %v7070_v2 = vsub.f32 %v939_v24, %v1077_v62  ;;  %1121 = vadd.xlane.f32.xlu0 %v1120_v60  ;;  %1118 = vadd.xlane.f32.xlu1 %v1117_v3  ;;  %v1049_v4 = vpop.xlane.xlu0 %1048  ;;  %v1123_v6 = vsel %vm1028_vm1, %v1103_v0, 0.0  ;;  %v956_v60 = vld [vmem:[%s11385_s24 + $0x40] sm:$0xff]  ;;  %v954_v62 = vld [vmem:[%s11385_s24 + $0x30] sm:$0xff]  ;;  %v951_v3 = vld [vmem:[%s11385_s24 + $0x18] sm:$0xff] }
  0xd2   : > { %v1052_v5 = vpop.xlane.xlu1 %1051  ;;  %v1078_v7 = vmul.f32 0.015625, %v1049_v4  ;;  %v1104_v9 = vmul.f32 %v7068_v1, %v7068_v1  ;;  %v952_v0 = vld [vmem:[%s11385_s24 + $0x20] sm:$0xff]  ;;  %v950_v4 = vld [vmem:[%s11385_s24 + $0x10] sm:$0xff] }
  0xd3   : > { %v1079_v8 = vmul.f32 0.015625, %v1052_v5  ;;  %v1105_v10 = vmul.f32 %v7070_v2, %v7070_v2  ;;  %v949_v5 = vld [vmem:[%s11385_s24 + $0x8] sm:$0xff] }
  0xd4   : > { %v7078_v11 = vsub.f32 %v940_v27, %v1078_v7  ;;  %v1126_v13 = vsel %vm1028_vm1, %v1104_v9, 0.0  ;;  %v11308_v7 = vmov 0.0  }
  0xd5   : > { %v7080_v12 = vsub.f32 %v941_v28, %v1079_v8  ;;  %1124 = vadd.xlane.f32.xlu1 %v1123_v6  ;;  %1127 = vadd.xlane.f32.xlu0 %v1126_v13  ;;  %v1055_v14 = vpop.xlane.xlu0 %1054  ;;  %v1129_v16 = vsel %vm1028_vm1, %v1105_v10, 0.0  ;;  %v948_v6 = vld [vmem:[%s11385_s24] sm:$0xff] }
  0xd6   : > { %v1058_v15 = vpop.xlane.xlu1 %1057  ;;  %v1080_v17 = vmul.f32 0.015625, %v1055_v14  ;;  %v1106_v19 = vmul.f32 %v7078_v11, %v7078_v11  ;;  %1369 = vmatprep.mubr.f32.mxu0 %v11308_v7 }
  0xd7   : > { %v1081_v18 = vmul.f32 0.015625, %v1058_v15  ;;  %v1107_v20 = vmul.f32 %v7080_v12, %v7080_v12 }
  0xd8   : > { %v7089_v21 = vsub.f32 %v7011_v31, %v1080_v17  ;;  %v1132_v23 = vsel %vm1028_vm1, %v1106_v19, 0.0 }
  0xd9   : > { %v7092_v22 = vsub.f32 %v7016_v32, %v1081_v18  ;;  %1130 = vadd.xlane.f32.xlu1 %v1129_v16  ;;  %1133 = vadd.xlane.f32.xlu0 %v1132_v23  ;;  %v1061_v24 = vpop.xlane.xlu0 %1060  ;;  %v1135_v26 = vsel %vm1028_vm1, %v1107_v20, 0.0 }
  0xda   : > { %v1064_v25 = vpop.xlane.xlu1 %1063  ;;  %v1082_v27 = vmul.f32 0.015625, %v1061_v24  ;;  %v1108_v29 = vmul.f32 %v7089_v21, %v7089_v21 }
  0xdb   : > { %v1083_v28 = vmul.f32 0.015625, %v1064_v25  ;;  %v1109_v30 = vmul.f32 %v7092_v22, %v7092_v22 }
  0xdc   : > { %v7101_v31 = vsub.f32 %v7025_v35, %v1082_v27  ;;  %v1138_v33 = vsel %vm1028_vm1, %v1108_v29, 0.0 }
  0xdd   : > { %v7104_v32 = vsub.f32 %v7030_v36, %v1083_v28  ;;  %1136 = vadd.xlane.f32.xlu1 %v1135_v26  ;;  %1139 = vadd.xlane.f32.xlu0 %v1138_v33  ;;  %v1067_v34 = vpop.xlane.xlu0 %1066  ;;  %v1141_v38 = vsel %vm1028_vm1, %v1109_v30, 0.0 }
  0xde   : > { %v1070_v37 = vpop.xlane.xlu1 %1069  ;;  %v1084_v41 = vmul.f32 0.015625, %v1067_v34  ;;  %v1110_v35 = vmul.f32 %v7101_v31, %v7101_v31 }
  0xdf   : > { %v1085_v42 = vmul.f32 0.015625, %v1070_v37  ;;  %v1111_v36 = vmul.f32 %v7104_v32, %v7104_v32 }
  0xe0   : > { %v7114_v44 = vsub.f32 %v7039_v39, %v1084_v41  ;;  %v1144_v46 = vsel %vm1028_vm1, %v1110_v35, 0.0  ;;  %v7148_v41 = vld [vmem:[%s874_s0] ss:$0 sm:$0xff]  ;;  %s11388_s0 = sld [smem:[#allocation5_spill]] }
  0xe1   : > { %v7117_v45 = vsub.f32 %v7044_v40, %v1085_v42  ;;  %1142 = vadd.xlane.f32.xlu1 %v1141_v38  ;;  %1145 = vadd.xlane.f32.xlu0 %v1144_v46  ;;  %v1147_v51 = vsel %vm1028_vm1, %v1111_v36, 0.0  ;;  %v960_v40 = vld [vmem:[%s11385_s24 + $0x60] sm:$0xff] }
  0xe2   : > { %v1112_v52 = vmul.f32 %v7114_v44, %v7114_v44  ;;  %1324 = vmatpush1.msra.mxu0 %v960_v40 }
  0xe3   : > { %v1113_v39 = vmul.f32 %v7117_v45, %v7117_v45  ;;  %1325 = vmatprep.subr.mxu0 %v959_v53 }
  0xe4   : > { %v1150_v54 = vsel %vm1028_vm1, %v1112_v52, 0.0  ;;  %1326 = vmatpush1.msra.mxu0 %v958_v57 }
  0xe5   : > { %1148 = vadd.xlane.f32.xlu1 %v1147_v51  ;;  %1151 = vadd.xlane.f32.xlu0 %v1150_v54  ;;  %v1153_v59 = vsel %vm1028_vm1, %v1113_v39, 0.0 }
  0xe6   : > { %1327 = vmatprep.subr.mxu0 %v957_v58 }
  0xe7   : > { %1328 = vmatpush1.msra.mxu0 %v956_v60 }
  0xe8   : > { %1329 = vmatprep.subr.mxu0 %v955_v61 }
  0xe9   : > { %1154 = vadd.xlane.f32.xlu1 %v1153_v59  ;;  %1330 = vmatpush1.msra.mxu0 %v954_v62 }
  0xea   : > { %1331 = vmatprep.subr.mxu0 %v953_v63 }
  0xeb   : > { %1332 = vmatpush1.msra.mxu0 %v952_v0 }
  0xec   : > { %1333 = vmatprep.subr.mxu0 %v951_v3 }
  0xed   : > { %1334 = vmatpush1.msra.mxu0 %v950_v4 }
  0xee   : > { %1335 = vmatprep.subr.mxu0 %v949_v5 }
  0xef   : > { %1336 = vmatpush1.msra.mxu0 %v948_v6 }
 0x156   : > { %v1116_v8 = vpop.xlane.xlu0 %1115 }
 0x157   : > { %v1156_v9 = vmul.f32 0.015625, %v1116_v8 }
 0x159   : > { %v1170_v10 = vadd.f32 1e-05, %v1156_v9 }
 0x15a   : > { %v1119_v13 = vpop.xlane.xlu1 %1118  ;;  %v1122_v14 = vpop.xlane.xlu0 %1121 }
 0x15b   : > { %6407 = vrsqrt.f32 %v1170_v10  ;;  %v1157_v15 = vmul.f32 0.015625, %v1119_v13  ;;  %v1158_v16 = vmul.f32 0.015625, %v1122_v14 }
 0x15d   : > { %v1171_v17 = vadd.f32 1e-05, %v1157_v15  ;;  %v1172_v18 = vadd.f32 1e-05, %v1158_v16 }
 0x15e   : > { %v1125_v19 = vpop.xlane.xlu1 %1124  ;;  %v1128_v20 = vpop.xlane.xlu0 %1127 }
 0x15f   : > { %6409 = vrsqrt.f32 %v1171_v17  ;;  %v1159_v23 = vmul.f32 0.015625, %v1125_v19  ;;  %v1160_v24 = vmul.f32 0.015625, %v1128_v20 }
 0x160   : > { %6411 = vrsqrt.f32 %v1172_v18 }
 0x161   : > { %v1173_v25 = vadd.f32 1e-05, %v1159_v23  ;;  %v1174_v26 = vadd.f32 1e-05, %v1160_v24 }
 0x162   : > { %v1131_v27 = vpop.xlane.xlu1 %1130  ;;  %v1134_v28 = vpop.xlane.xlu0 %1133 }
 0x163   : > { %6413 = vrsqrt.f32 %v1173_v25  ;;  %v1161_v29 = vmul.f32 0.015625, %v1131_v27  ;;  %v1162_v33 = vmul.f32 0.015625, %v1134_v28 }
 0x164   : > { %6415 = vrsqrt.f32 %v1174_v26 }
 0x165   : > { %v1175_v30 = vadd.f32 1e-05, %v1161_v29  ;;  %v1176_v42 = vadd.f32 1e-05, %v1162_v33 }
 0x166   : > { %v1137_v34 = vpop.xlane.xlu1 %1136  ;;  %v1140_v35 = vpop.xlane.xlu0 %1139 }
 0x167   : > { %v1163_v38 = vmul.f32 0.015625, %v1137_v34  ;;  %6417 = vrsqrt.f32 %v1175_v30  ;;  %v1164_v51 = vmul.f32 0.015625, %v1140_v35 }
 0x168   : > { %v6408_v37 = vpop.eup %6407  ;;  %6419 = vrsqrt.f32 %v1176_v42 }
 0x169   : > { %v1198_v36 = vmul.f32 %v6408_v37, %v7050_v47  ;;  %v1177_v50 = vadd.f32 1e-05, %v1163_v38  ;;  %v1178_v58 = vadd.f32 1e-05, %v1164_v51 }
 0x16a   : > { %v1143_v53 = vpop.xlane.xlu1 %1142  ;;  %v1146_v60 = vpop.xlane.xlu0 %1145 }
 0x16b   : > { %v1218_v46 = vmul.f32 %v7148_v41, %v1198_v36  ;;  %6421 = vrsqrt.f32 %v1177_v50  ;;  %v1165_v59 = vmul.f32 0.015625, %v1143_v53 }
 0x16c   : > { %v6410_v49 = vpop.eup %6409  ;;  %6423 = vrsqrt.f32 %v1178_v58 }
 0x16d   : > { %v6412_v52 = vpop.eup %6411  ;;  %v1238_v39 = vadd.f32 %v7156_v43, %v1218_v46  ;;  %v1199_v40 = vmul.f32 %v6410_v49, %v7058_v55  ;;  %v1179_v0 = vadd.f32 1e-05, %v1165_v59  ;;  %v1253_v59 = vlaneseq }
 0x16e   : > { %v1200_v47 = vmul.f32 %v6412_v52, %v7052_v48  ;;  %v1166_v48 = vmul.f32 0.015625, %v1146_v60  ;;  %v1149_v3 = vpop.xlane.xlu1 %1148  ;;  %v1152_v10 = vpop.xlane.xlu0 %1151 }
 0x16f   : > { %6034 = vmatmul.mubr.msk.f32.vlgmr.msra.gmra.mxu0 %vm1028_vm1, %v1238_v39  ;;  %v1219_v54 = vmul.f32 %v7148_v41, %v1199_v40  ;;  %6425 = vrsqrt.f32 %v1179_v0  ;;  %v7226_v60 = vshrl.u32 %v1253_v59, 7 }
 0x170   : > { %v6414_v57 = vpop.eup %6413  ;;  %1375 = vmatprep.mubr.f32.mxu0 %v11308_v7  ;;  %v1220_v62 = vmul.f32 %v7148_v41, %v1200_v47  ;;  %v1180_v9 = vadd.f32 1e-05, %v1166_v48 }
 0x171   : > { %v1239_v61 = vadd.f32 %v7156_v43, %v1219_v54  ;;  %v1201_v55 = vmul.f32 %v6414_v57, %v7060_v56  ;;  %v6416_v63 = vpop.eup %6415  ;;  %v1167_v56 = vmul.f32 0.015625, %v1149_v3  ;;  %11389 = vst [vmem:[#allocation6_spill] sm:$0xff] %v7226_v60 }
 0x172   : > { %v1240_v4 = vadd.f32 %v7156_v43, %v1220_v62  ;;  %v1202_v6 = vmul.f32 %v6416_v63, %v7068_v1  ;;  %v1168_v1 = vmul.f32 0.015625, %v1152_v10  ;;  %6427 = vrsqrt.f32 %v1180_v9  ;;  %v1155_v24 = vpop.xlane.xlu1 %1154 }
 0x173   : > { %6035 = vmatmul.mubr.msk.f32.gmra.mxu0 %vm1028_vm1, %v1239_v61  ;;  %v1221_v5 = vmul.f32 %v7148_v41, %v1201_v55  ;;  %v1181_v17 = vadd.f32 1e-05, %v1167_v56  ;;  %v1169_v26 = vmul.f32 0.015625, %v1155_v24  ;;  %v964_v61 = vld [vmem:[%s11388_s0] sm:$0x3] }
 0x174   : > { %1381 = vmatprep.mubr.f32.mxu0 %v11308_v7  ;;  %v6418_v8 = vpop.eup %6417  ;;  %v1222_v14 = vmul.f32 %v7148_v41, %v1202_v6 }
 0x175   : > { %v1241_v13 = vadd.f32 %v7156_v43, %v1221_v5  ;;  %v1203_v15 = vmul.f32 %v6418_v8, %v7070_v2  ;;  %v6420_v16 = vpop.eup %6419  ;;  %6429 = vrsqrt.f32 %v1181_v17  ;;  %v1182_v2 = vadd.f32 1e-05, %v1168_v1 }
 0x176   : > { %v1242_v19 = vadd.f32 %v7156_v43, %v1222_v14  ;;  %v1204_v23 = vmul.f32 %v6420_v16, %v7078_v11  ;;  %v1183_v11 = vadd.f32 1e-05, %v1169_v26 }
 0x177   : > { %6036 = vmatmul.mubr.msk.f32.gmra.mxu0 %vm1028_vm1, %v1240_v4  ;;  %v1223_v20 = vmul.f32 %v7148_v41, %v1203_v15  ;;  %6431 = vrsqrt.f32 %v1182_v2 }
 0x178   : > { %1387 = vmatprep.mubr.f32.mxu0 %v11308_v7  ;;  %v6422_v18 = vpop.eup %6421  ;;  %v1224_v28 = vmul.f32 %v7148_v41, %v1204_v23  ;;  %6433 = vrsqrt.f32 %v1183_v11 }
 0x179   : > { %v6424_v25 = vpop.eup %6423  ;;  %v1243_v27 = vadd.f32 %v7156_v43, %v1223_v20  ;;  %v1205_v29 = vmul.f32 %v6422_v18, %v7080_v12 }
 0x17a   : > { %v1244_v30 = vadd.f32 %v7156_v43, %v1224_v28  ;;  %v1206_v34 = vmul.f32 %v6424_v25, %v7089_v21 }
 0x17b   : > { %6037 = vmatmul.mubr.msk.f32.gmra.mxu0 %vm1028_vm1, %v1241_v13  ;;  %v1225_v33 = vmul.f32 %v7148_v41, %v1205_v29 }
 0x17c   : > { %1393 = vmatprep.mubr.f32.mxu0 %v11308_v7  ;;  %v6426_v37 = vpop.eup %6425  ;;  %v1226_v38 = vmul.f32 %v7148_v41, %v1206_v34 }
 0x17d   : > { %v1245_v12 = vadd.f32 %v7156_v43, %v1225_v33  ;;  %v1207_v42 = vmul.f32 %v6426_v37, %v7092_v22 }
 0x17e   : > { %v1246_v21 = vadd.f32 %v7156_v43, %v1226_v38 }
 0x17f   : > { %6038 = vmatmul.mubr.msk.f32.gmra.mxu0 %vm1028_vm1, %v1242_v19  ;;  %v6428_v35 = vpop.eup %6427  ;;  %v1227_v46 = vmul.f32 %v7148_v41, %v1207_v42 }
 0x180   : > { %1399 = vmatprep.mubr.f32.mxu0 %v11308_v7  ;;  %v1208_v49 = vmul.f32 %v6428_v35, %v7101_v31 }
 0x181   : > { %v1247_v51 = vadd.f32 %v7156_v43, %v1227_v46 }
 0x182   : > { %v6430_v36 = vpop.eup %6429  ;;  %v1228_v22 = vmul.f32 %v7148_v41, %v1208_v49 }
 0x183   : > { %6039 = vmatmul.mubr.msk.f32.gmra.mxu0 %vm1028_vm1, %v1243_v27  ;;  %v1209_v52 = vmul.f32 %v6430_v36, %v7104_v32 }
 0x184   : > { %1405 = vmatprep.mubr.f32.mxu0 %v11308_v7  ;;  %v6432_v50 = vpop.eup %6431  ;;  %v1248_v39 = vadd.f32 %v7156_v43, %v1228_v22 }
 0x185   : > { %v1229_v40 = vmul.f32 %v7148_v41, %v1209_v52  ;;  %v1210_v31 = vmul.f32 %v6432_v50, %v7114_v44  ;;  %v6434_v53 = vpop.eup %6433 }
 0x186   : > { %v1211_v54 = vmul.f32 %v6434_v53, %v7117_v45  ;;  %v7229_v45 = vsub.s32 0, %v7226_v60 }
 0x187   : > { %6040 = vmatmul.mubr.msk.f32.gmra.mxu0 %vm1028_vm1, %v1244_v30  ;;  %v1249_v47 = vadd.f32 %v7156_v43, %v1229_v40  ;;  %v1230_v32 = vmul.f32 %v7148_v41, %v1210_v31 }
 0x188   : > { %1411 = vmatprep.mubr.f32.mxu0 %v11308_v7  ;;  %v1231_v44 = vmul.f32 %v7148_v41, %v1211_v54  ;;  %11390 = vst [vmem:[#allocation7_spill] sm:$0xff] %v7229_v45  ;;  %v1256_v62 = vrot.slane %v964_v61, %v7229_v45 }
 0x189   : > { %v1250_v57 = vadd.f32 %v7156_v43, %v1230_v32 }
 0x18a   : > { %v1251_v58 = vadd.f32 %v7156_v43, %v1231_v44 }
 0x18b   : > { %6041 = vmatmul.mubr.msk.f32.gmra.mxu0 %vm1028_vm1, %v1245_v12 }
 0x18c   : > { %1417 = vmatprep.mubr.f32.mxu0 %v11308_v7 }
 0x18f   : > { %6042 = vmatmul.mubr.msk.f32.gmra.mxu0 %vm1028_vm1, %v1246_v21 }
 0x190   : > { %1423 = vmatprep.mubr.f32.mxu0 %v11308_v7 }
 0x193   : > { %6043 = vmatmul.mubr.msk.f32.gmra.mxu0 %vm1028_vm1, %v1247_v51 }
 0x194   : > { %1429 = vmatprep.mubr.f32.mxu0 %v11308_v7 }
 0x197   : > { %6044 = vmatmul.mubr.msk.f32.gmra.mxu0 %vm1028_vm1, %v1248_v39 }
 0x198   : > { %1435 = vmatprep.mubr.f32.mxu0 %v11308_v7 }
 0x19b   : > { %6045 = vmatmul.mubr.msk.f32.gmra.mxu0 %vm1028_vm1, %v1249_v47 }
 0x19c   : > { %1441 = vmatprep.mubr.f32.mxu0 %v11308_v7 }
 0x19f   : > { %6046 = vmatmul.mubr.msk.f32.gmra.mxu0 %vm1028_vm1, %v1250_v57 }
 0x1a0   : > { %1447 = vmatprep.mubr.f32.mxu0 %v11308_v7 }
 0x1a3   : > { %6047 = vmatmul.mubr.msk.f32.gmra.mxu0 %vm1028_vm1, %v1251_v58 }
 0x22f   : > { %v1371_v55 = vpop.f32.mrf.mxu0 }
 0x230   : > { %v1372_v63 = vadd.f32 %v1371_v55, %v1256_v62 }
 0x231   : > { %v7233_v41 = vpop.f32.mrf.mxu0 }
 0x232   : > { %11391 = vst [vmem:[#allocation8_spill] sm:$0xff] %v7233_v41  ;;  %1475 = vrot.lane.b32.xlu0 %v1372_v63, %s6659_s3  ;;  %v7312_v21 = vmul.f32 0.35355338, %v1372_v63 }
 0x233   : > { %v1377_v48 = vpop.f32.mrf.mxu0 }
 0x234   : > { %v7236_v43 = vadd.f32 %v1377_v48, %v1256_v62 }
 0x235   : > { %v7238_v0 = vpop.f32.mrf.mxu0 }
 0x236   : > { %11392 = vst [vmem:[#allocation9_spill] sm:$0xff] %v7238_v0  ;;  %1477 = vrot.lane.b32.xlu1 %v7236_v43, %s6659_s3  ;;  %v7326_v22 = vmul.f32 0.35355338, %v7236_v43 }
 0x237   : > { %v1383_v3 = vpop.f32.mrf.mxu0 }
 0x238   : > { %v7242_v4 = vadd.f32 %v1383_v3, %v1256_v62 }
 0x239   : > { %v7244_v5 = vpop.f32.mrf.mxu0 }
 0x23a   : > { %11393 = vst [vmem:[#allocation10_spill] sm:$0xff] %v7244_v5  ;;  %1479 = vrot.lane.b32.xlu1 %v7242_v4, %s6659_s3  ;;  %v7342_v40 = vmul.f32 0.35355338, %v7242_v4 }
 0x23b   : > { %v1389_v6 = vpop.f32.mrf.mxu0 }
 0x23c   : > { %v7248_v8 = vadd.f32 %v1389_v6, %v1256_v62 }
 0x23d   : > { %v7250_v9 = vpop.f32.mrf.mxu0 }
 0x23e   : > { %11394 = vst [vmem:[#allocation11_spill] sm:$0xff] %v7250_v9  ;;  %1481 = vrot.lane.b32.xlu1 %v7248_v8, %s6659_s3  ;;  %v7354_v32 = vmul.f32 0.35355338, %v7248_v8 }
 0x23f   : > { %v1395_v56 = vpop.f32.mrf.mxu0 }
 0x240   : > { %v7254_v10 = vadd.f32 %v1395_v56, %v1256_v62 }
 0x241   : > { %v7256_v13 = vpop.f32.mrf.mxu0 }
 0x242   : > { %11395 = vst [vmem:[#allocation12_spill] sm:$0xff] %v7256_v13  ;;  %1483 = vrot.lane.b32.xlu0 %v7254_v10, %s6659_s3  ;;  %v7369_v59 = vmul.f32 0.35355338, %v7254_v10 }
 0x243   : > { %v1401_v14 = vpop.f32.mrf.mxu0 }
 0x244   : > { %v7260_v15 = vadd.f32 %v1401_v14, %v1256_v62 }
 0x245   : > { %v7262_v16 = vpop.f32.mrf.mxu0 }
 0x246   : > { %11396 = vst [vmem:[#allocation13_spill] sm:$0xff] %v7262_v16  ;;  %1485 = vrot.lane.b32.xlu1 %v7260_v15, %s6659_s3  ;;  %v7388_v55 = vmul.f32 0.35355338, %v7260_v15 }
 0x247   : > { %v1407_v17 = vpop.f32.mrf.mxu0 }
 0x248   : > { %v7266_v1 = vadd.f32 %v1407_v17, %v1256_v62 }
 0x249   : > { %v7268_v18 = vpop.f32.mrf.mxu0 }
 0x24a   : > { %11397 = vst [vmem:[#allocation14_spill] sm:$0xff] %v7268_v18  ;;  %1487 = vrot.lane.b32.xlu0 %v7266_v1, %s6659_s3  ;;  %v7399_v4 = vmul.f32 0.35355338, %v7266_v1 }
 0x24b   : > { %v1413_v19 = vpop.f32.mrf.mxu0 }
 0x24c   : > { %v7272_v20 = vadd.f32 %v1413_v19, %v1256_v62 }
 0x24d   : > { %v7274_v23 = vpop.f32.mrf.mxu0 }
 0x24e   : > { %11398 = vst [vmem:[#allocation15_spill] sm:$0xff] %v7274_v23  ;;  %1889 = vrot.lane.b32.xlu0 %v7272_v20, %s6659_s3 }
 0x24f   : > { %v1419_v24 = vpop.f32.mrf.mxu0 }
 0x250   : > { %v7278_v2 = vadd.f32 %v1419_v24, %v1256_v62 }
 0x251   : > { %v7280_v25 = vpop.f32.mrf.mxu0 }
 0x252   : > { %11399 = vst [vmem:[#allocation16_spill] sm:$0xff] %v7278_v2  ;;  %11400 = vst [vmem:[#allocation17_spill] sm:$0xff] %v7280_v25  ;;  %1891 = vrot.lane.b32.xlu1 %v7278_v2, %s6659_s3 }
 0x253   : > { %v1425_v26 = vpop.f32.mrf.mxu0 }
 0x254   : > { %v7284_v27 = vadd.f32 %v1425_v26, %v1256_v62 }
 0x255   : > { %v7286_v28 = vpop.f32.mrf.mxu0 }
 0x256   : > { %11401 = vst [vmem:[#allocation18_spill] sm:$0xff] %v7286_v28  ;;  %1893 = vrot.lane.b32.xlu1 %v7284_v27, %s6659_s3 }
 0x257   : > { %v1431_v29 = vpop.f32.mrf.mxu0 }
 0x258   : > { %v7290_v11 = vadd.f32 %v1431_v29, %v1256_v62 }
 0x259   : > { %v7292_v30 = vpop.f32.mrf.mxu0 }
 0x25a   : > { %11402 = vst [vmem:[#allocation19_spill] sm:$0xff] %v7292_v30  ;;  %1895 = vrot.lane.b32.xlu1 %v7290_v11, %s6659_s3 }
 0x25b   : > { %v1437_v33 = vpop.f32.mrf.mxu0 }
 0x25c   : > { %v7296_v34 = vadd.f32 %v1437_v33, %v1256_v62 }
 0x25d   : > { %v7298_v37 = vpop.f32.mrf.mxu0 }
 0x25e   : > { %11403 = vst [vmem:[#allocation20_spill] sm:$0xff] %v7296_v34  ;;  %11404 = vst [vmem:[#allocation21_spill] sm:$0xff] %v7298_v37  ;;  %1897 = vrot.lane.b32.xlu0 %v7296_v34, %s6659_s3 }
 0x25f   : > { %v1443_v12 = vpop.f32.mrf.mxu0 }
 0x260   : > { %v7302_v38 = vadd.f32 %v1443_v12, %v1256_v62 }
 0x261   : > { %v7304_v42 = vpop.f32.mrf.mxu0 }
 0x262   : > { %11405 = vst [vmem:[#allocation22_spill] sm:$0xff] %v7304_v42  ;;  %1899 = vrot.lane.b32.xlu1 %v7302_v38, %s6659_s3 }
 0x263   : > { %v1449_v35 = vpop.f32.mrf.mxu0 }
 0x264   : > { %v7308_v36 = vadd.f32 %v1449_v35, %v1256_v62 }
 0x266   : > { %11406 = vst [vmem:[#allocation23_spill] sm:$0xff] %v7308_v36  ;;  %1901 = vrot.lane.b32.xlu0 %v7308_v36, %s6659_s3 }
 0x2a4   : > { %v7314_v46 = vpop.permute.xlu0 %1475 }
 0x2a5   : > { %v1496_v49 = vmul.f32 %v7314_v46, %v7312_v21 }
 0x2a7   : > { %1532 = vrot.lane.b32.xlu0 %v1496_v49, %s6660_s19  ;;  %v1504_v50 = vsel %vm1503_vm2, %v1496_v49, 0.0 }
 0x2a8   : > { %1505 = vadd.xlane.f32.xlu1 %v1504_v50  ;;  %v7323_v51 = vpop.permute.xlu1 %1477 }
 0x2a9   : > { %11407 = vst [vmem:[#allocation24_spill] sm:$0xff] %v7323_v51  ;;  %v1497_v52 = vmul.f32 %v7323_v51, %v7326_v22 }
 0x2ab   : > { %1574 = vrot.lane.b32.xlu0 %v1496_v49, %s6661_s20  ;;  %v1507_v53 = vsel %vm1503_vm2, %v1497_v52, 0.0 }
 0x2ac   : > { %v7339_v39 = vpop.permute.xlu1 %1479 }
 0x2ad   : > { %v1498_v31 = vmul.f32 %v7339_v39, %v7342_v40 }
 0x2af   : > { %1616 = vrot.lane.b32.xlu0 %v1496_v49, %s6662_s14  ;;  %v1510_v57 = vsel %vm1503_vm2, %v1498_v31, 0.0 }
 0x2b0   : > { %v7351_v47 = vpop.permute.xlu1 %1481 }
 0x2b1   : > { %v1499_v54 = vmul.f32 %v7351_v47, %v7354_v32 }
 0x2b3   : > { %1658 = vrot.lane.b32.xlu0 %v1496_v49, %s6663_s13  ;;  %v1513_v44 = vsel %vm1503_vm2, %v1499_v54, 0.0 }
 0x2b4   : > { %v7366_v58 = vpop.permute.xlu0 %1483 }
 0x2b5   : > { %11408 = vst [vmem:[#allocation25_spill] sm:$0xff] %v7366_v58  ;;  %v1500_v61 = vmul.f32 %v7366_v58, %v7369_v59 }
 0x2b7   : > { %1700 = vrot.lane.b32.xlu0 %v1496_v49, %s6664_s1  ;;  %v1516_v63 = vsel %vm1503_vm2, %v1500_v61, 0.0 }
 0x2b8   : > { %v7385_v62 = vpop.permute.xlu1 %1485 }
 0x2b9   : > { %1534 = vrot.lane.b32.xlu1 %v1497_v52, %s6660_s19  ;;  %v1501_v48 = vmul.f32 %v7385_v62, %v7388_v55 }
 0x2bb   : > { %1742 = vrot.lane.b32.xlu0 %v1496_v49, %s6665_s15  ;;  %v1519_v43 = vsel %vm1503_vm2, %v1501_v48, 0.0 }
 0x2bc   : > { %v7396_v3 = vpop.permute.xlu0 %1487 }
 0x2bd   : > { %1576 = vrot.lane.b32.xlu1 %v1497_v52, %s6661_s20  ;;  %11409 = vst [vmem:[#allocation26_spill] sm:$0xff] %v7396_v3  ;;  %v1502_v6 = vmul.f32 %v7396_v3, %v7399_v4 }
 0x2bf   : > { %1784 = vrot.lane.b32.xlu0 %v1496_v49, %s6666_s7  ;;  %v1522_v14 = vsel %vm1503_vm2, %v1502_v6, 0.0 }
 0x2c0   : > { %v7414_v8 = vpop.permute.xlu0 %1889 }
 0x2c1   : > { %1618 = vrot.lane.b32.xlu1 %v1497_v52, %s6662_s14  ;;  %11410 = vst [vmem:[#allocation27_spill] sm:$0xff] %v7414_v8  ;;  %v7419_v56 = vmul.f32 %v7414_v8, %v7312_v21 }
 0x2c3   : > { %v1917_v15 = vsel %vm1503_vm2, %v7419_v56, 0.0 }
 0x2c4   : > { %v7423_v10 = vpop.permute.xlu1 %1891 }
 0x2c5   : > { %1660 = vrot.lane.b32.xlu1 %v1497_v52, %s6663_s13  ;;  %11411 = vst [vmem:[#allocation28_spill] sm:$0xff] %v7423_v10  ;;  %v7432_v1 = vmul.f32 %v7423_v10, %v7326_v22 }
 0x2c7   : > { %v1920_v24 = vsel %vm1503_vm2, %v7432_v1, 0.0 }
 0x2c8   : > { %v7428_v17 = vpop.permute.xlu1 %1893 }
 0x2c9   : > { %1702 = vrot.lane.b32.xlu1 %v1497_v52, %s6664_s1  ;;  %11412 = vst [vmem:[#allocation29_spill] sm:$0xff] %v7428_v17  ;;  %v7436_v19 = vmul.f32 %v7428_v17, %v7342_v40 }
 0x2cb   : > { %v1923_v33 = vsel %vm1503_vm2, %v7436_v19, 0.0 }
 0x2cc   : > { %v7440_v26 = vpop.permute.xlu1 %1895 }
 0x2cd   : > { %1744 = vrot.lane.b32.xlu1 %v1497_v52, %s6665_s15  ;;  %11413 = vst [vmem:[#allocation30_spill] sm:$0xff] %v7440_v26  ;;  %v7444_v29 = vmul.f32 %v7440_v26, %v7354_v32 }
 0x2cf   : > { %v1926_v12 = vsel %vm1503_vm2, %v7444_v29, 0.0 }
 0x2d0   : > { %v7454_v35 = vpop.permute.xlu0 %1897 }
 0x2d1   : > { %1786 = vrot.lane.b32.xlu1 %v1497_v52, %s6666_s7  ;;  %11414 = vst [vmem:[#allocation31_spill] sm:$0xff] %v7454_v35  ;;  %v7466_v52 = vmul.f32 %v7454_v35, %v7369_v59 }
 0x2d4   : > { %v7458_v21 = vpop.permute.xlu1 %1899 }
 0x2d5   : > { %1536 = vrot.lane.b32.xlu1 %v1498_v31, %s6660_s19  ;;  %11415 = vst [vmem:[#allocation32_spill] sm:$0xff] %v7458_v21  ;;  %v7474_v59 = vmul.f32 %v7458_v21, %v7388_v55 }
 0x2d8   : > { %v7460_v49 = vpop.permute.xlu0 %1901 }
 0x2d9   : > { %1578 = vrot.lane.b32.xlu1 %v1498_v31, %s6661_s20  ;;  %11416 = vst [vmem:[#allocation33_spill] sm:$0xff] %v7460_v49  ;;  %v7488_v55 = vmul.f32 %v7460_v49, %v7399_v4 }
 0x2db   : > { %v1935_v28 = vsel %vm1503_vm2, %v7488_v55, 0.0 }
 0x2dd   : > { %1620 = vrot.lane.b32.xlu1 %v1498_v31, %s6662_s14 }
 0x2de   : > { %1508 = vadd.xlane.f32.xlu0 %v1507_v53 }
 0x2e1   : > { %1662 = vrot.lane.b32.xlu1 %v1498_v31, %s6663_s13 }
 0x2e2   : > { %1511 = vadd.xlane.f32.xlu0 %v1510_v57 }
 0x2e5   : > { %1704 = vrot.lane.b32.xlu1 %v1498_v31, %s6664_s1 }
 0x2e6   : > { %1514 = vadd.xlane.f32.xlu0 %v1513_v44 }
 0x2e9   : > { %1746 = vrot.lane.b32.xlu1 %v1498_v31, %s6665_s15 }
 0x2ed   : > { %1788 = vrot.lane.b32.xlu1 %v1498_v31, %s6666_s7 }
 0x2f1   : > { %1538 = vrot.lane.b32.xlu1 %v1499_v54, %s6660_s19 }
 0x2f5   : > { %1580 = vrot.lane.b32.xlu1 %v1499_v54, %s6661_s20 }
 0x2f9   : > { %1622 = vrot.lane.b32.xlu1 %v1499_v54, %s6662_s14 }
 0x2fc   : > { %1540 = vrot.lane.b32.xlu0 %v1500_v61, %s6660_s19 }
 0x2fd   : > { %1664 = vrot.lane.b32.xlu1 %v1499_v54, %s6663_s13 }
 0x300   : > { %1582 = vrot.lane.b32.xlu0 %v1500_v61, %s6661_s20 }
 0x301   : > { %1706 = vrot.lane.b32.xlu1 %v1499_v54, %s6664_s1 }
 0x304   : > { %1624 = vrot.lane.b32.xlu0 %v1500_v61, %s6662_s14 }
 0x305   : > { %1748 = vrot.lane.b32.xlu1 %v1499_v54, %s6665_s15 }
 0x308   : > { %1666 = vrot.lane.b32.xlu0 %v1500_v61, %s6663_s13 }
 0x309   : > { %1790 = vrot.lane.b32.xlu1 %v1499_v54, %s6666_s7 }
 0x30c   : > { %1708 = vrot.lane.b32.xlu0 %v1500_v61, %s6664_s1 }
 0x310   : > { %1750 = vrot.lane.b32.xlu0 %v1500_v61, %s6665_s15 }
 0x314   : > { %1792 = vrot.lane.b32.xlu0 %v1500_v61, %s6666_s7 }
 0x319   : > { %v1533_v22 = vpop.permute.xlu0 %1532 }
 0x31a   : > { %v1553_v37 = vsel %vm1503_vm2, %v1533_v22, 0.0 }
 0x31d   : > { %v1575_v31 = vpop.permute.xlu0 %1574 }
 0x31e   : > { %v1595_v60 = vsel %vm1503_vm2, %v1575_v31, 0.0 }
 0x321   : > { %v1617_v32 = vpop.permute.xlu0 %1616 }
 0x322   : > { %v1637_v49 = vsel %vm1503_vm2, %v1617_v32, 0.0 }
 0x325   : > { %v1659_v57 = vpop.permute.xlu0 %1658 }
 0x326   : > { %v1679_v22 = vsel %vm1503_vm2, %v1659_v57, 0.0 }
 0x329   : > { %v1701_v61 = vpop.permute.xlu0 %1700 }
 0x32d   : > { %1517 = vadd.xlane.f32.xlu1 %v1516_v63 }
 0x331   : > { %v7462_v50 = vpop.xlane.xlu1 %1505 }
 0x333   : > { %1520 = vadd.xlane.f32.xlu0 %v1519_v43  ;;  %v1743_v43 = vpop.permute.xlu0 %1742 }
 0x335   : > { %v1535_v40 = vpop.permute.xlu1 %1534 }
 0x336   : > { %v1556_v13 = vsel %vm1503_vm2, %v1535_v40, 0.0 }
 0x339   : > { %v1577_v53 = vpop.permute.xlu1 %1576 }
 0x33a   : > { %v1598_v21 = vsel %vm1503_vm2, %v1577_v53, 0.0 }
 0x33d   : > { %v1619_v54 = vpop.permute.xlu1 %1618 }
 0x33e   : > { %1542 = vrot.lane.b32.xlu1 %v1501_v48, %s6660_s19 }
 0x341   : > { %v1661_v44 = vpop.permute.xlu1 %1660 }
 0x342   : > { %1584 = vrot.lane.b32.xlu1 %v1501_v48, %s6661_s20 }
 0x345   : > { %v1703_v63 = vpop.permute.xlu1 %1702 }
 0x346   : > { %1626 = vrot.lane.b32.xlu1 %v1501_v48, %s6662_s14  ;;  %v1724_v31 = vsel %vm1503_vm2, %v1703_v63, 0.0 }
 0x349   : > { %1544 = vrot.lane.b32.xlu0 %v1502_v6, %s6660_s19 }
 0x34a   : > { %1668 = vrot.lane.b32.xlu1 %v1501_v48, %s6663_s13 }
 0x34d   : > { %1586 = vrot.lane.b32.xlu0 %v1502_v6, %s6661_s20 }
 0x34e   : > { %1710 = vrot.lane.b32.xlu1 %v1501_v48, %s6664_s1 }
 0x351   : > { %1628 = vrot.lane.b32.xlu0 %v1502_v6, %s6662_s14 }
 0x352   : > { %1752 = vrot.lane.b32.xlu1 %v1501_v48, %s6665_s15 }
 0x355   : > { %1670 = vrot.lane.b32.xlu0 %v1502_v6, %s6663_s13 }
 0x356   : > { %1794 = vrot.lane.b32.xlu1 %v1501_v48, %s6666_s7  ;;  %v1929_v48 = vsel %vm1503_vm2, %v7466_v52, 0.0 }
 0x359   : > { %1712 = vrot.lane.b32.xlu0 %v1502_v6, %s6664_s1 }
 0x35d   : > { %1754 = vrot.lane.b32.xlu0 %v1502_v6, %s6665_s15 }
 0x361   : > { %1796 = vrot.lane.b32.xlu0 %v1502_v6, %s6666_s7  ;;  %v1745_v6 = vpop.permute.xlu1 %1744 }
 0x365   : > { %1945 = vrot.lane.b32.xlu0 %v7419_v56, %s6660_s19 }
 0x37a   : > { %1523 = vadd.xlane.f32.xlu1 %v1522_v14  ;;  %v1932_v14 = vsel %vm1503_vm2, %v7474_v59, 0.0 }
 0x37e   : > { %1918 = vadd.xlane.f32.xlu1 %v1917_v15  ;;  %v1785_v15 = vpop.permute.xlu0 %1784 }
 0x37f   : > { %v1805_v57 = vsel %vm1503_vm2, %v1785_v15, 0.0 }
 0x384   : > { %1921 = vadd.xlane.f32.xlu0 %v1920_v24  ;;  %v1787_v24 = vpop.permute.xlu1 %1786 }
 0x388   : > { %1924 = vadd.xlane.f32.xlu0 %v1923_v33  ;;  %v7478_v33 = vpop.xlane.xlu0 %1508 }
 0x389   : > { %11417 = vst [vmem:[#allocation34_spill] sm:$0xff] %v7478_v33 }
 0x38c   : > { %1927 = vadd.xlane.f32.xlu0 %v1926_v12  ;;  %v1537_v12 = vpop.permute.xlu1 %1536  ;;  %v7480_v7 = vpop.xlane.xlu0 %1511 }
 0x38d   : > { %11418 = vst [vmem:[#allocation35_spill] sm:$0xff] %v7480_v7 }
 0x38f   : > { %1947 = vrot.lane.b32.xlu1 %v7432_v1, %s6660_s19 }
 0x390   : > { %v7484_v45 = vpop.xlane.xlu0 %1514 }
 0x391   : > { %11419 = vst [vmem:[#allocation36_spill] sm:$0xff] %v7484_v45 }
 0x393   : > { %1949 = vrot.lane.b32.xlu1 %v7436_v19, %s6660_s19 }
 0x394   : > { %v1541_v18 = vpop.permute.xlu0 %1540 }
 0x395   : > { %v1565_v63 = vsel %vm1503_vm2, %v1541_v18, 0.0 }
 0x397   : > { %1951 = vrot.lane.b32.xlu1 %v7444_v29, %s6660_s19 }
 0x398   : > { %v1583_v30 = vpop.permute.xlu0 %1582 }
 0x39c   : > { %v1625_v23 = vpop.permute.xlu0 %1624 }
 0x3a0   : > { %v1667_v9 = vpop.permute.xlu0 %1666 }
 0x3a2   : > { %1953 = vrot.lane.b32.xlu0 %v7466_v52, %s6660_s19 }
 0x3a4   : > { %v1709_v5 = vpop.permute.xlu0 %1708 }
 0x3a8   : > { %v1751_v0 = vpop.permute.xlu0 %1750 }
 0x3bb   : > { %1930 = vadd.xlane.f32.xlu1 %v1929_v48  ;;  %v1579_v48 = vpop.permute.xlu1 %1578 }
 0x3bc   : > { %v1601_v15 = vsel %vm1503_vm2, %v1579_v48, 0.0  ;;  %v1733_v48 = vsel %vm1503_vm2, %v1709_v5, 0.0 }
 0x3c1   : > { %1933 = vadd.xlane.f32.xlu0 %v1932_v14  ;;  %v7492_v14 = vpop.permute.xlu1 %1620 }
 0x3c5   : > { %v7494_v42 = vpop.permute.xlu1 %1662 }
 0x3c9   : > { %v7496_v16 = vpop.permute.xlu1 %1704 }
 0x3cc   : > { %1955 = vrot.lane.b32.xlu1 %v7474_v59, %s6660_s19 }
 0x3cd   : > { %v7498_v41 = vpop.permute.xlu1 %1746 }
 0x3d1   : > { %v7502_v4 = vpop.permute.xlu1 %1788 }
 0x3d2   : > { %v1811_v5 = vsel %vm1503_vm2, %v7502_v4, 0.0 }
 0x3d5   : > { %v7506_v25 = vpop.permute.xlu1 %1538 }
 0x3d7   : > { %1957 = vrot.lane.b32.xlu0 %v7488_v55, %s6660_s19 }
 0x3d9   : > { %v7511_v26 = vpop.permute.xlu1 %1580 }
 0x3f0   : > { %1936 = vadd.xlane.f32.xlu1 %v1935_v28  ;;  %v1793_v28 = vpop.permute.xlu0 %1792 }
 0x3f4   : > { %1554 = vadd.xlane.f32.xlu1 %v1553_v37  ;;  %v1640_v37 = vsel %vm1503_vm2, %v1619_v54, 0.0  ;;  %v7515_v40 = vpop.xlane.xlu0 %1520  ;;  %v1766_v54 = vsel %vm1503_vm2, %v1745_v6, 0.0 }
 0x3f5   : > { %11420 = vst [vmem:[#allocation37_spill] sm:$0xff] %v7515_v40 }
 0x3f6   : > { %1557 = vadd.xlane.f32.xlu0 %v1556_v13  ;;  %v1682_v13 = vsel %vm1503_vm2, %v1661_v44, 0.0 }
 0x3f8   : > { %1596 = vadd.xlane.f32.xlu1 %v1595_v60  ;;  %v7518_v60 = vpop.permute.xlu1 %1622  ;;  %v1545_v53 = vpop.permute.xlu0 %1544 }
 0x3fa   : > { %1599 = vadd.xlane.f32.xlu0 %v1598_v21  ;;  %v1721_v21 = vsel %vm1503_vm2, %v1701_v61, 0.0 }
 0x3fc   : > { %1638 = vadd.xlane.f32.xlu1 %v1637_v49  ;;  %v1763_v49 = vsel %vm1503_vm2, %v1743_v43, 0.0  ;;  %v7523_v32 = vpop.permute.xlu1 %1664  ;;  %v1587_v44 = vpop.permute.xlu0 %1586  ;;  %v1559_v43 = vsel %vm1503_vm2, %v1537_v12, 0.0  ;;  %v1691_v12 = vsel %vm1503_vm2, %v1667_v9, 0.0  ;;  %v1769_v9 = vsel %vm1503_vm2, %v7498_v41, 0.0 }
 0x3fe   : > { %1641 = vadd.xlane.f32.xlu0 %v1640_v37  ;;  %v1808_v37 = vsel %vm1503_vm2, %v1787_v24, 0.0 }
 0x400   : > { %1680 = vadd.xlane.f32.xlu1 %v1679_v22  ;;  %v7528_v61 = vpop.permute.xlu1 %1706  ;;  %v1629_v22 = vpop.permute.xlu0 %1628 }
 0x401   : > { %v1655_v4 = vsel %vm1503_vm2, %v1629_v22, 0.0 }
 0x402   : > { %1683 = vadd.xlane.f32.xlu0 %v1682_v13  ;;  %v1607_v13 = vsel %vm1503_vm2, %v1583_v30, 0.0  ;;  %v1685_v30 = vsel %vm1503_vm2, %v7494_v42, 0.0  ;;  %v1817_v42 = vsel %vm1503_vm2, %v1793_v28, 0.0  ;;  %v1604_v28 = vsel %vm1503_vm2, %v7511_v26, 0.0 }
 0x404   : > { %1722 = vadd.xlane.f32.xlu1 %v1721_v21  ;;  %v1749_v6 = vpop.permute.xlu1 %1748  ;;  %v1649_v21 = vsel %vm1503_vm2, %v1625_v23, 0.0  ;;  %v1671_v24 = vpop.permute.xlu0 %1670  ;;  %v1727_v23 = vsel %vm1503_vm2, %v7496_v16, 0.0  ;;  %v1571_v16 = vsel %vm1503_vm2, %v1545_v53, 0.0  ;;  %v1646_v53 = vsel %vm1503_vm2, %v7518_v60, 0.0 }
 0x406   : > { %1725 = vadd.xlane.f32.xlu0 %v1724_v31  ;;  %v1643_v31 = vsel %vm1503_vm2, %v7492_v14, 0.0  ;;  %v1775_v14 = vsel %vm1503_vm2, %v1751_v0, 0.0  ;;  %v1562_v0 = vsel %vm1503_vm2, %v7506_v25, 0.0  ;;  %v1697_v25 = vsel %vm1503_vm2, %v1671_v24, 0.0 }
 0x407   : > { %v1772_v24 = vsel %vm1503_vm2, %v1749_v6, 0.0 }
 0x408   : > { %1764 = vadd.xlane.f32.xlu1 %v1763_v49  ;;  %v1791_v18 = vpop.permute.xlu1 %1790 }
 0x40a   : > { %1767 = vadd.xlane.f32.xlu0 %v1766_v54  ;;  %v1713_v54 = vpop.permute.xlu0 %1712 }
 0x40b   : > { %v1739_v26 = vsel %vm1503_vm2, %v1713_v54, 0.0  ;;  %v1814_v54 = vsel %vm1503_vm2, %v1791_v18, 0.0 }
 0x40c   : > { %1806 = vadd.xlane.f32.xlu1 %v1805_v57  ;;  %v7540_v49 = vpop.xlane.xlu1 %1517 }
 0x40e   : > { %1809 = vadd.xlane.f32.xlu0 %v1808_v37  ;;  %v1755_v37 = vpop.permute.xlu0 %1754 }
 0x40f   : > { %v1781_v60 = vsel %vm1503_vm2, %v1755_v37, 0.0 }
 0x410   : > { %1566 = vadd.xlane.f32.xlu1 %v1565_v63  ;;  %v1543_v57 = vpop.permute.xlu1 %1542 }
 0x411   : > { %v1568_v37 = vsel %vm1503_vm2, %v1543_v57, 0.0 }
 0x412   : > { %1560 = vadd.xlane.f32.xlu0 %v1559_v43  ;;  %v1797_v43 = vpop.permute.xlu0 %1796 }
 0x414   : > { %1608 = vadd.xlane.f32.xlu1 %v1607_v13  ;;  %v1585_v63 = vpop.permute.xlu1 %1584  ;;  %v1613_v13 = vsel %vm1503_vm2, %v1587_v44, 0.0  ;;  %v1688_v44 = vsel %vm1503_vm2, %v7523_v32, 0.0  ;;  %v1823_v32 = vsel %vm1503_vm2, %v1797_v43, 0.0 }
 0x415   : > { %v1610_v43 = vsel %vm1503_vm2, %v1585_v63, 0.0 }
 0x416   : > { %1602 = vadd.xlane.f32.xlu0 %v1601_v15  ;;  %v1946_v15 = vpop.permute.xlu0 %1945 }
 0x418   : > { %1650 = vadd.xlane.f32.xlu1 %v1649_v21  ;;  %v1627_v41 = vpop.permute.xlu1 %1626 }
 0x41a   : > { %1644 = vadd.xlane.f32.xlu0 %v1643_v31  ;;  %v7558_v21 = vpop.xlane.xlu0 %1921 }
 0x41b   : > { %11421 = vst [vmem:[#allocation38_spill] sm:$0xff] %v7558_v21 }
 0x41c   : > { %1692 = vadd.xlane.f32.xlu1 %v1691_v12  ;;  %v1669_v31 = vpop.permute.xlu1 %1668 }
 0x41d   : > { %v1694_v57 = vsel %vm1503_vm2, %v1669_v31, 0.0 }
 0x41e   : > { %1686 = vadd.xlane.f32.xlu0 %v1685_v30  ;;  %v7565_v12 = vpop.xlane.xlu0 %1924  ;;  %v1730_v30 = vsel %vm1503_vm2, %v7528_v61, 0.0 }
 0x41f   : > { %11422 = vst [vmem:[#allocation39_spill] sm:$0xff] %v7565_v12 }
 0x420   : > { %1734 = vadd.xlane.f32.xlu1 %v1733_v48  ;;  %v1711_v22 = vpop.permute.xlu1 %1710 }
 0x422   : > { %1728 = vadd.xlane.f32.xlu0 %v1727_v23  ;;  %v7571_v48 = vpop.xlane.xlu0 %1927 }
 0x423   : > { %11423 = vst [vmem:[#allocation40_spill] sm:$0xff] %v7571_v48 }
 0x424   : > { %1776 = vadd.xlane.f32.xlu1 %v1775_v14  ;;  %v1753_v23 = vpop.permute.xlu1 %1752 }
 0x426   : > { %1770 = vadd.xlane.f32.xlu0 %v1769_v9  ;;  %v1954_v14 = vpop.permute.xlu0 %1953  ;;  %v1966_v9 = vsel %vm1503_vm2, %v1946_v15, 0.0 }
 0x427   : > { %v1978_v6 = vsel %vm1503_vm2, %v1954_v14, 0.0 }
 0x428   : > { %1818 = vadd.xlane.f32.xlu1 %v1817_v42  ;;  %v1795_v61 = vpop.permute.xlu1 %1794 }
 0x42a   : > { %1812 = vadd.xlane.f32.xlu0 %v1811_v5 }
 0x42c   : > { %1572 = vadd.xlane.f32.xlu1 %v1571_v16  ;;  %v7581_v5 = vpop.xlane.xlu1 %1523 }
 0x42e   : > { %1563 = vadd.xlane.f32.xlu0 %v1562_v0  ;;  %v1652_v0 = vsel %vm1503_vm2, %v1627_v41, 0.0 }
 0x430   : > { %1614 = vadd.xlane.f32.xlu1 %v1613_v13  ;;  %v7586_v13 = vpop.xlane.xlu1 %1918 }
 0x432   : > { %1605 = vadd.xlane.f32.xlu0 %v1604_v28  ;;  %v1736_v28 = vsel %vm1503_vm2, %v1711_v22, 0.0 }
 0x434   : > { %1656 = vadd.xlane.f32.xlu1 %v1655_v4  ;;  %v1948_v15 = vpop.permute.xlu1 %1947  ;;  %v1778_v4 = vsel %vm1503_vm2, %v1753_v23, 0.0 }
 0x435   : > { %v1969_v31 = vsel %vm1503_vm2, %v1948_v15, 0.0 }
 0x436   : > { %1647 = vadd.xlane.f32.xlu0 %v1646_v53  ;;  %v1820_v53 = vsel %vm1503_vm2, %v1795_v61, 0.0 }
 0x438   : > { %1698 = vadd.xlane.f32.xlu1 %v1697_v25  ;;  %v1950_v63 = vpop.permute.xlu1 %1949 }
 0x43a   : > { %1689 = vadd.xlane.f32.xlu0 %v1688_v44  ;;  %v1972_v44 = vsel %vm1503_vm2, %v1950_v63, 0.0 }
 0x43c   : > { %1740 = vadd.xlane.f32.xlu1 %v1739_v26  ;;  %v1952_v41 = vpop.permute.xlu1 %1951 }
 0x43d   : > { %v1975_v26 = vsel %vm1503_vm2, %v1952_v41, 0.0 }
 0x43e   : > { %1731 = vadd.xlane.f32.xlu0 %v1730_v30 }
 0x440   : > { %1782 = vadd.xlane.f32.xlu1 %v1781_v60 }
 0x442   : > { %1773 = vadd.xlane.f32.xlu0 %v1772_v24 }
 0x444   : > { %1824 = vadd.xlane.f32.xlu1 %v1823_v32  ;;  %v7597_v25 = vpop.xlane.xlu1 %1930 }
 0x446   : > { %1815 = vadd.xlane.f32.xlu0 %v1814_v54 }
 0x448   : > { %1967 = vadd.xlane.f32.xlu1 %v1966_v9  ;;  %v1956_v22 = vpop.permute.xlu1 %1955 }
 0x449   : > { %v1981_v30 = vsel %vm1503_vm2, %v1956_v22, 0.0 }
 0x44a   : > { %1569 = vadd.xlane.f32.xlu0 %v1568_v37  ;;  %v7578_v42 = vpop.xlane.xlu0 %1933 }
 0x44b   : > { %11424 = vst [vmem:[#allocation41_spill] sm:$0xff] %v7578_v42 }
 0x44c   : > { %1979 = vadd.xlane.f32.xlu1 %v1978_v6 }
 0x44e   : > { %1611 = vadd.xlane.f32.xlu0 %v1610_v43  ;;  %v1958_v18 = vpop.permute.xlu0 %1957 }
 0x44f   : > { %v1984_v16 = vsel %vm1503_vm2, %v1958_v18, 0.0 }
 0x450   : > { %1985 = vadd.xlane.f32.xlu1 %v1984_v16 }
 0x452   : > { %1653 = vadd.xlane.f32.xlu0 %v1652_v0 }
 0x456   : > { %1695 = vadd.xlane.f32.xlu0 %v1694_v57 }
 0x45a   : > { %1737 = vadd.xlane.f32.xlu0 %v1736_v28 }
 0x45e   : > { %1779 = vadd.xlane.f32.xlu0 %v1778_v4 }
 0x461   : > { %1989 = vrot.lane.b32.xlu1 %v7432_v1, %s6661_s20 }
 0x462   : > { %1821 = vadd.xlane.f32.xlu0 %v1820_v53 }
 0x465   : > { %1991 = vrot.lane.b32.xlu1 %v7436_v19, %s6661_s20 }
 0x466   : > { %1970 = vadd.xlane.f32.xlu0 %v1969_v31 }
 0x469   : > { %1993 = vrot.lane.b32.xlu1 %v7444_v29, %s6661_s20 }
 0x46a   : > { %1973 = vadd.xlane.f32.xlu0 %v1972_v44 }
 0x46d   : > { %1997 = vrot.lane.b32.xlu1 %v7474_v59, %s6661_s20 }
 0x46e   : > { %1976 = vadd.xlane.f32.xlu0 %v1975_v26 }
 0x472   : > { %1982 = vadd.xlane.f32.xlu0 %v1981_v30 }
 0x479   : > { %v7606_v60 = vpop.xlane.xlu1 %1936 }
 0x47d   : > { %v7608_v24 = vpop.xlane.xlu1 %1554 }
 0x47f   : > { %v7610_v23 = vpop.xlane.xlu0 %1557 }
 0x480   : > { %11425 = vst [vmem:[#allocation42_spill] sm:$0xff] %v7610_v23 }
 0x481   : > { %v7612_v32 = vpop.xlane.xlu1 %1596 }
 0x483   : > { %v7614_v54 = vpop.xlane.xlu0 %1599 }
 0x484   : > { %11426 = vst [vmem:[#allocation43_spill] sm:$0xff] %v7614_v54 }
 0x485   : > { %v7616_v14 = vpop.xlane.xlu1 %1638 }
 0x487   : > { %v7618_v9 = vpop.xlane.xlu0 %1641 }
 0x488   : > { %11427 = vst [vmem:[#allocation44_spill] sm:$0xff] %v7618_v9  ;;  %1987 = vrot.lane.b32.xlu0 %v7419_v56, %s6661_s20 }
 0x489   : > { %v7622_v61 = vpop.xlane.xlu1 %1680 }
 0x48b   : > { %v7624_v37 = vpop.xlane.xlu0 %1683 }
 0x48c   : > { %11428 = vst [vmem:[#allocation45_spill] sm:$0xff] %v7624_v37  ;;  %1995 = vrot.lane.b32.xlu0 %v7466_v52, %s6661_s20 }
 0x48d   : > { %v7628_v6 = vpop.xlane.xlu1 %1722 }
 0x48f   : > { %v7630_v43 = vpop.xlane.xlu0 %1725 }
 0x490   : > { %11429 = vst [vmem:[#allocation46_spill] sm:$0xff] %v7630_v43  ;;  %1999 = vrot.lane.b32.xlu0 %v7488_v55, %s6661_s20 }
 0x491   : > { %v7634_v18 = vpop.xlane.xlu1 %1764 }
 0x493   : > { %v7636_v16 = vpop.xlane.xlu0 %1767 }
 0x494   : > { %11430 = vst [vmem:[#allocation47_spill] sm:$0xff] %v7636_v16 }
 0x495   : > { %v7638_v0 = vpop.xlane.xlu1 %1806 }
 0x497   : > { %v7640_v57 = vpop.xlane.xlu0 %1809 }
 0x498   : > { %11431 = vst [vmem:[#allocation48_spill] sm:$0xff] %v7640_v57 }
 0x499   : > { %v7642_v15 = vpop.xlane.xlu1 %1566 }
 0x49b   : > { %v7644_v28 = vpop.xlane.xlu0 %1560 }
 0x49c   : > { %11432 = vst [vmem:[#allocation49_spill] sm:$0xff] %v7644_v28 }
 0x49d   : > { %v7646_v4 = vpop.xlane.xlu1 %1608 }
 0x49f   : > { %v7648_v63 = vpop.xlane.xlu0 %1602 }
 0x4a0   : > { %11433 = vst [vmem:[#allocation50_spill] sm:$0xff] %v7648_v63 }
 0x4a1   : > { %v7650_v53 = vpop.xlane.xlu1 %1650 }
 0x4a3   : > { %v7652_v41 = vpop.xlane.xlu0 %1644 }
 0x4a4   : > { %11434 = vst [vmem:[#allocation51_spill] sm:$0xff] %v7652_v41 }
 0x4a5   : > { %v7654_v31 = vpop.xlane.xlu1 %1692 }
 0x4a7   : > { %v7656_v44 = vpop.xlane.xlu0 %1686 }
 0x4a8   : > { %11435 = vst [vmem:[#allocation52_spill] sm:$0xff] %v7656_v44 }
 0x4a9   : > { %v7658_v26 = vpop.xlane.xlu1 %1734 }
 0x4ab   : > { %v7660_v22 = vpop.xlane.xlu0 %1728 }
 0x4ac   : > { %11436 = vst [vmem:[#allocation53_spill] sm:$0xff] %v7660_v22 }
 0x4ad   : > { %v7662_v30 = vpop.xlane.xlu1 %1776 }
 0x4af   : > { %v7664_v35 = vpop.xlane.xlu0 %1770 }
 0x4b0   : > { %11437 = vst [vmem:[#allocation54_spill] sm:$0xff] %v7664_v35 }
 0x4b1   : > { %v7666_v17 = vpop.xlane.xlu1 %1818 }
 0x4b3   : > { %v7668_v10 = vpop.xlane.xlu0 %1812 }
 0x4b4   : > { %11438 = vst [vmem:[#allocation55_spill] sm:$0xff] %v7668_v10 }
 0x4b5   : > { %v7670_v8 = vpop.xlane.xlu1 %1572 }
 0x4b7   : > { %v7672_v3 = vpop.xlane.xlu0 %1563 }
 0x4b8   : > { %11439 = vst [vmem:[#allocation56_spill] sm:$0xff] %v7672_v3 }
 0x4b9   : > { %v7674_v36 = vpop.xlane.xlu1 %1614 }
 0x4bb   : > { %v7676_v58 = vpop.xlane.xlu0 %1605 }
 0x4bc   : > { %11440 = vst [vmem:[#allocation57_spill] sm:$0xff] %v7676_v58 }
 0x4bd   : > { %v7678_v34 = vpop.xlane.xlu1 %1656 }
 0x4bf   : > { %v7680_v51 = vpop.xlane.xlu0 %1647 }
 0x4c0   : > { %11441 = vst [vmem:[#allocation58_spill] sm:$0xff] %v7680_v51 }
 0x4c1   : > { %v7682_v2 = vpop.xlane.xlu1 %1698 }
 0x4c3   : > { %v7684_v42 = vpop.xlane.xlu0 %1689 }
 0x4c4   : > { %11442 = vst [vmem:[#allocation59_spill] sm:$0xff] %v7684_v42 }
 0x4c5   : > { %v7686_v48 = vpop.xlane.xlu1 %1740 }
 0x4c7   : > { %v7688_v40 = vpop.xlane.xlu0 %1731 }
 0x4c8   : > { %11443 = vst [vmem:[#allocation60_spill] sm:$0xff] %v7688_v40 }
 0x4c9   : > { %v7690_v12 = vpop.xlane.xlu1 %1782 }
 0x4ca   : > { %11444 = vst [vmem:[#allocation61_spill] sm:$0xff] %v7690_v12 }
 0x4cb   : > { %v7692_v10 = vpop.xlane.xlu0 %1773 }
 0x4cc   : > { %11445 = vst [vmem:[#allocation62_spill] sm:$0xff] %v7692_v10 }
 0x4cd   : > { %v7694_v57 = vpop.xlane.xlu1 %1824 }
 0x4ce   : > { %11446 = vst [vmem:[#allocation63_spill] sm:$0xff] %v7694_v57 }
 0x4cf   : > { %v7696_v35 = vpop.xlane.xlu0 %1815 }
 0x4d0   : > { %11447 = vst [vmem:[#allocation64_spill] sm:$0xff] %v7696_v35 }
 0x4d1   : > { %v7698_v58 = vpop.xlane.xlu1 %1967 }
 0x4d3   : > { %v7700_v45 = vpop.xlane.xlu0 %1569 }
 0x4d4   : > { %11448 = vst [vmem:[#allocation65_spill] sm:$0xff] %v7700_v45 }
 0x4d5   : > { %v7702_v51 = vpop.xlane.xlu1 %1979 }
 0x4d7   : > { %v7704_v3 = vpop.xlane.xlu0 %1611 }
 0x4d8   : > { %11449 = vst [vmem:[#allocation66_spill] sm:$0xff] %v7704_v3 }
 0x4d9   : > { %v7706_v42 = vpop.xlane.xlu1 %1985 }
 0x4db   : > { %v7708_v22 = vpop.xlane.xlu0 %1653 }
 0x4dc   : > { %11450 = vst [vmem:[#allocation67_spill] sm:$0xff] %v7708_v22 }
 0x4dd   : > { %v1990_v40 = vpop.permute.xlu1 %1989 }
 0x4de   : > { %v2011_v16 = vsel %vm1503_vm2, %v1990_v40, 0.0 }
 0x4df   : > { %2012 = vadd.xlane.f32.xlu0 %v2011_v16  ;;  %v7711_v10 = vpop.xlane.xlu0 %1695 }
 0x4e0   : > { %11451 = vst [vmem:[#allocation68_spill] sm:$0xff] %v7711_v10 }
 0x4e1   : > { %v1992_v21 = vpop.permute.xlu1 %1991 }
 0x4e2   : > { %v2014_v35 = vsel %vm1503_vm2, %v1992_v21, 0.0 }
 0x4e3   : > { %2015 = vadd.xlane.f32.xlu0 %v2014_v35  ;;  %v7714_v44 = vpop.xlane.xlu0 %1737 }
 0x4e4   : > { %11452 = vst [vmem:[#allocation69_spill] sm:$0xff] %v7714_v44 }
 0x4e5   : > { %v1994_v45 = vpop.permute.xlu1 %1993 }
 0x4e6   : > { %v2017_v43 = vsel %vm1503_vm2, %v1994_v45, 0.0 }
 0x4e7   : > { %2018 = vadd.xlane.f32.xlu0 %v2017_v43  ;;  %v7717_v3 = vpop.xlane.xlu0 %1779 }
 0x4e8   : > { %11453 = vst [vmem:[#allocation70_spill] sm:$0xff] %v7717_v3 }
 0x4e9   : > { %v1998_v41 = vpop.permute.xlu1 %1997 }
 0x4ea   : > { %v2023_v22 = vsel %vm1503_vm2, %v1998_v41, 0.0 }
 0x4eb   : > { %2024 = vadd.xlane.f32.xlu0 %v2023_v22  ;;  %v7720_v40 = vpop.xlane.xlu0 %1821 }
 0x4ec   : > { %11454 = vst [vmem:[#allocation71_spill] sm:$0xff] %v7720_v40 }
 0x4ef   : > { %v7722_v16 = vpop.xlane.xlu0 %1970 }
 0x4f0   : > { %11455 = vst [vmem:[#allocation72_spill] sm:$0xff] %v7722_v16 }
 0x4f3   : > { %v7724_v10 = vpop.xlane.xlu0 %1973 }
 0x4f4   : > { %11456 = vst [vmem:[#allocation73_spill] sm:$0xff] %v7724_v10 }
 0x4f7   : > { %v7726_v21 = vpop.xlane.xlu0 %1976 }
 0x4f8   : > { %11457 = vst [vmem:[#allocation74_spill] sm:$0xff] %v7726_v21 }
 0x4fb   : > { %v7728_v35 = vpop.xlane.xlu0 %1982 }
 0x4fc   : > { %11458 = vst [vmem:[#allocation75_spill] sm:$0xff] %v7728_v35 }
 0x4ff   : > { %v1988_v44 = vpop.permute.xlu0 %1987 }
 0x500   : > { %v2008_v45 = vsel %vm1503_vm2, %v1988_v44, 0.0 }
 0x501   : > { %2029 = vrot.lane.b32.xlu0 %v7419_v56, %s6662_s14  ;;  %2009 = vadd.xlane.f32.xlu1 %v2008_v45 }
 0x503   : > { %v1996_v43 = vpop.permute.xlu0 %1995 }
 0x504   : > { %v2020_v41 = vsel %vm1503_vm2, %v1996_v43, 0.0 }
 0x505   : > { %2037 = vrot.lane.b32.xlu0 %v7466_v52, %s6662_s14  ;;  %2021 = vadd.xlane.f32.xlu1 %v2020_v41 }
 0x507   : > { %v2000_v22 = vpop.permute.xlu0 %1999 }
 0x508   : > { %v2026_v40 = vsel %vm1503_vm2, %v2000_v22, 0.0 }
 0x509   : > { %2041 = vrot.lane.b32.xlu0 %v7488_v55, %s6662_s14  ;;  %2027 = vadd.xlane.f32.xlu1 %v2026_v40 }
 0x51a   : > { %2031 = vrot.lane.b32.xlu1 %v7432_v1, %s6662_s14 }
 0x51e   : > { %2033 = vrot.lane.b32.xlu1 %v7436_v19, %s6662_s14 }
 0x522   : > { %2035 = vrot.lane.b32.xlu1 %v7444_v29, %s6662_s14 }
 0x526   : > { %2039 = vrot.lane.b32.xlu1 %v7474_v59, %s6662_s14 }
 0x568   : > { %v7747_v44 = vpop.xlane.xlu0 %2012 }
 0x569   : > { %11459 = vst [vmem:[#allocation76_spill] sm:$0xff] %v7747_v44 }
 0x56c   : > { %v7749_v45 = vpop.xlane.xlu0 %2015 }
 0x56d   : > { %11460 = vst [vmem:[#allocation77_spill] sm:$0xff] %v7749_v45 }
 0x570   : > { %v7751_v43 = vpop.xlane.xlu0 %2018 }
 0x571   : > { %11461 = vst [vmem:[#allocation78_spill] sm:$0xff] %v7751_v43 }
 0x574   : > { %v7753_v41 = vpop.xlane.xlu0 %2024 }
 0x575   : > { %11462 = vst [vmem:[#allocation79_spill] sm:$0xff] %v7753_v41 }
 0x578   : > { %v2030_v40 = vpop.permute.xlu0 %2029 }
 0x579   : > { %v2050_v22 = vsel %vm1503_vm2, %v2030_v40, 0.0 }
 0x57a   : > { %2051 = vadd.xlane.f32.xlu1 %v2050_v22 }
 0x57c   : > { %v2038_v3 = vpop.permute.xlu0 %2037 }
 0x57d   : > { %v2062_v35 = vsel %vm1503_vm2, %v2038_v3, 0.0 }
 0x57e   : > { %2063 = vadd.xlane.f32.xlu1 %v2062_v35 }
 0x580   : > { %v2042_v21 = vpop.permute.xlu0 %2041 }
 0x581   : > { %v2068_v10 = vsel %vm1503_vm2, %v2042_v21, 0.0 }
 0x582   : > { %2069 = vadd.xlane.f32.xlu1 %v2068_v10 }
 0x58a   : > { %v7758_v16 = vpop.xlane.xlu1 %2009 }
 0x58e   : > { %v7760_v44 = vpop.xlane.xlu1 %2021 }
 0x592   : > { %v7762_v45 = vpop.xlane.xlu1 %2027 }
 0x593   : > { %2073 = vrot.lane.b32.xlu1 %v7432_v1, %s6663_s13 }
 0x596   : > { %v2032_v41 = vpop.permute.xlu1 %2031 }
 0x597   : > { %2075 = vrot.lane.b32.xlu1 %v7436_v19, %s6663_s13  ;;  %v2053_v3 = vsel %vm1503_vm2, %v2032_v41, 0.0 }
 0x598   : > { %2054 = vadd.xlane.f32.xlu0 %v2053_v3 }
 0x59a   : > { %v2034_v35 = vpop.permute.xlu1 %2033 }
 0x59b   : > { %2077 = vrot.lane.b32.xlu1 %v7444_v29, %s6663_s13  ;;  %v2056_v10 = vsel %vm1503_vm2, %v2034_v35, 0.0 }
 0x59c   : > { %2057 = vadd.xlane.f32.xlu0 %v2056_v10 }
 0x59e   : > { %v2036_v21 = vpop.permute.xlu1 %2035 }
 0x59f   : > { %2081 = vrot.lane.b32.xlu1 %v7474_v59, %s6663_s13  ;;  %v2059_v40 = vsel %vm1503_vm2, %v2036_v21, 0.0 }
 0x5a0   : > { %2060 = vadd.xlane.f32.xlu0 %v2059_v40 }
 0x5a2   : > { %v2040_v22 = vpop.permute.xlu1 %2039 }
 0x5a3   : > { %v2065_v43 = vsel %vm1503_vm2, %v2040_v22, 0.0 }
 0x5a4   : > { %2066 = vadd.xlane.f32.xlu0 %v2065_v43 }
 0x5ba   : > { %2071 = vrot.lane.b32.xlu0 %v7419_v56, %s6663_s13 }
 0x5be   : > { %2079 = vrot.lane.b32.xlu0 %v7466_v52, %s6663_s13 }
 0x5c2   : > { %2083 = vrot.lane.b32.xlu0 %v7488_v55, %s6663_s13 }
 0x603   : > { %v7782_v41 = vpop.xlane.xlu1 %2051 }
 0x607   : > { %v7784_v3 = vpop.xlane.xlu1 %2063 }
 0x60b   : > { %v7786_v35 = vpop.xlane.xlu1 %2069 }
 0x60f   : > { %v2074_v10 = vpop.permute.xlu1 %2073 }
 0x610   : > { %v2095_v21 = vsel %vm1503_vm2, %v2074_v10, 0.0 }
 0x611   : > { %2096 = vadd.xlane.f32.xlu0 %v2095_v21 }
 0x613   : > { %v2076_v43 = vpop.permute.xlu1 %2075 }
 0x614   : > { %v2098_v40 = vsel %vm1503_vm2, %v2076_v43, 0.0 }
 0x615   : > { %2099 = vadd.xlane.f32.xlu0 %v2098_v40 }
 0x617   : > { %v2078_v22 = vpop.permute.xlu1 %2077 }
 0x618   : > { %v2101_v37 = vsel %vm1503_vm2, %v2078_v22, 0.0 }
 0x619   : > { %2102 = vadd.xlane.f32.xlu0 %v2101_v37 }
 0x61b   : > { %v2082_v63 = vpop.permute.xlu1 %2081 }
 0x61c   : > { %v2107_v9 = vsel %vm1503_vm2, %v2082_v63, 0.0 }
 0x61d   : > { %2108 = vadd.xlane.f32.xlu0 %v2107_v9 }
 0x621   : > { %v7792_v7 = vpop.xlane.xlu0 %2054 }
 0x622   : > { %11463 = vst [vmem:[#allocation80_spill] sm:$0xff] %v7792_v7 }
 0x625   : > { %v7794_v28 = vpop.xlane.xlu0 %2057 }
 0x626   : > { %11464 = vst [vmem:[#allocation81_spill] sm:$0xff] %v7794_v28 }
 0x629   : > { %v7796_v54 = vpop.xlane.xlu0 %2060 }
 0x62a   : > { %11465 = vst [vmem:[#allocation82_spill] sm:$0xff] %v7796_v54 }
 0x62d   : > { %v7798_v10 = vpop.xlane.xlu0 %2066 }
 0x62e   : > { %11466 = vst [vmem:[#allocation83_spill] sm:$0xff] %v7798_v10 }
 0x631   : > { %v2072_v21 = vpop.permute.xlu0 %2071 }
 0x632   : > { %v2092_v43 = vsel %vm1503_vm2, %v2072_v21, 0.0 }
 0x633   : > { %2113 = vrot.lane.b32.xlu0 %v7419_v56, %s6664_s1  ;;  %2093 = vadd.xlane.f32.xlu1 %v2092_v43 }
 0x635   : > { %v2080_v37 = vpop.permute.xlu0 %2079 }
 0x636   : > { %v2104_v40 = vsel %vm1503_vm2, %v2080_v37, 0.0 }
 0x637   : > { %2121 = vrot.lane.b32.xlu0 %v7466_v52, %s6664_s1  ;;  %2105 = vadd.xlane.f32.xlu1 %v2104_v40 }
 0x639   : > { %v2084_v9 = vpop.permute.xlu0 %2083 }
 0x63a   : > { %v2110_v63 = vsel %vm1503_vm2, %v2084_v9, 0.0 }
 0x63b   : > { %2125 = vrot.lane.b32.xlu0 %v7488_v55, %s6664_s1  ;;  %2111 = vadd.xlane.f32.xlu1 %v2110_v63 }
 0x64c   : > { %2115 = vrot.lane.b32.xlu1 %v7432_v1, %s6664_s1 }
 0x650   : > { %2117 = vrot.lane.b32.xlu1 %v7436_v19, %s6664_s1 }
 0x654   : > { %2119 = vrot.lane.b32.xlu1 %v7444_v29, %s6664_s1 }
 0x658   : > { %2123 = vrot.lane.b32.xlu1 %v7474_v59, %s6664_s1 }
 0x69a   : > { %v7817_v22 = vpop.xlane.xlu0 %2096 }
 0x69b   : > { %11467 = vst [vmem:[#allocation84_spill] sm:$0xff] %v7817_v22 }
 0x69e   : > { %v7819_v21 = vpop.xlane.xlu0 %2099 }
 0x69f   : > { %11468 = vst [vmem:[#allocation85_spill] sm:$0xff] %v7819_v21 }
 0x6a2   : > { %v7821_v43 = vpop.xlane.xlu0 %2102 }
 0x6a3   : > { %11469 = vst [vmem:[#allocation86_spill] sm:$0xff] %v7821_v43 }
 0x6a6   : > { %v7823_v37 = vpop.xlane.xlu0 %2108 }
 0x6a7   : > { %11470 = vst [vmem:[#allocation87_spill] sm:$0xff] %v7823_v37 }
 0x6aa   : > { %v2114_v40 = vpop.permute.xlu0 %2113 }
 0x6ab   : > { %v2134_v9 = vsel %vm1503_vm2, %v2114_v40, 0.0 }
 0x6ac   : > { %2135 = vadd.xlane.f32.xlu1 %v2134_v9 }
 0x6ae   : > { %v2122_v63 = vpop.permute.xlu0 %2121 }
 0x6af   : > { %v2146_v10 = vsel %vm1503_vm2, %v2122_v63, 0.0 }
 0x6b0   : > { %2147 = vadd.xlane.f32.xlu1 %v2146_v10 }
 0x6b2   : > { %v2126_v54 = vpop.permute.xlu0 %2125 }
 0x6b3   : > { %v2152_v28 = vsel %vm1503_vm2, %v2126_v54, 0.0 }
 0x6b4   : > { %2153 = vadd.xlane.f32.xlu1 %v2152_v28 }
 0x6bc   : > { %v7828_v7 = vpop.xlane.xlu1 %2093 }
 0x6c0   : > { %v7830_v22 = vpop.xlane.xlu1 %2105 }
 0x6c4   : > { %v7832_v21 = vpop.xlane.xlu1 %2111 }
 0x6c5   : > { %11471 = vst [vmem:[#allocation88_spill] sm:$0xff] %v7832_v21  ;;  %2157 = vrot.lane.b32.xlu1 %v7432_v1, %s6665_s15 }
 0x6c8   : > { %v2116_v37 = vpop.permute.xlu1 %2115 }
 0x6c9   : > { %2159 = vrot.lane.b32.xlu1 %v7436_v19, %s6665_s15  ;;  %v2137_v40 = vsel %vm1503_vm2, %v2116_v37, 0.0 }
 0x6ca   : > { %2138 = vadd.xlane.f32.xlu0 %v2137_v40 }
 0x6cc   : > { %v2118_v10 = vpop.permute.xlu1 %2117 }
 0x6cd   : > { %2161 = vrot.lane.b32.xlu1 %v7444_v29, %s6665_s15  ;;  %v2140_v54 = vsel %vm1503_vm2, %v2118_v10, 0.0 }
 0x6ce   : > { %2141 = vadd.xlane.f32.xlu0 %v2140_v54 }
 0x6d0   : > { %v2120_v28 = vpop.permute.xlu1 %2119 }
 0x6d1   : > { %2165 = vrot.lane.b32.xlu1 %v7474_v59, %s6665_s15  ;;  %v2143_v9 = vsel %vm1503_vm2, %v2120_v28, 0.0 }
 0x6d2   : > { %2144 = vadd.xlane.f32.xlu0 %v2143_v9 }
 0x6d4   : > { %v2124_v63 = vpop.permute.xlu1 %2123 }
 0x6d5   : > { %v2149_v43 = vsel %vm1503_vm2, %v2124_v63, 0.0 }
 0x6d6   : > { %2150 = vadd.xlane.f32.xlu0 %v2149_v43 }
 0x6ec   : > { %2155 = vrot.lane.b32.xlu0 %v7419_v56, %s6665_s15 }
 0x6f0   : > { %2163 = vrot.lane.b32.xlu0 %v7466_v52, %s6665_s15 }
 0x6f4   : > { %2167 = vrot.lane.b32.xlu0 %v7488_v55, %s6665_s15 }
 0x735   : > { %v7852_v37 = vpop.xlane.xlu1 %2135 }
 0x739   : > { %v7854_v40 = vpop.xlane.xlu1 %2147 }
 0x73d   : > { %v7856_v10 = vpop.xlane.xlu1 %2153 }
 0x73e   : > { %11472 = vst [vmem:[#allocation89_spill] sm:$0xff] %v7856_v10 }
 0x741   : > { %v2158_v54 = vpop.permute.xlu1 %2157 }
 0x742   : > { %v2179_v28 = vsel %vm1503_vm2, %v2158_v54, 0.0 }
 0x743   : > { %2180 = vadd.xlane.f32.xlu0 %v2179_v28 }
 0x745   : > { %v2160_v43 = vpop.permute.xlu1 %2159 }
 0x746   : > { %v2182_v9 = vsel %vm1503_vm2, %v2160_v43, 0.0 }
 0x747   : > { %2183 = vadd.xlane.f32.xlu0 %v2182_v9 }
 0x749   : > { %v2162_v63 = vpop.permute.xlu1 %2161 }
 0x74a   : > { %v2185_v33 = vsel %vm1503_vm2, %v2162_v63, 0.0 }
 0x74b   : > { %2186 = vadd.xlane.f32.xlu0 %v2185_v33 }
 0x74d   : > { %v2166_v23 = vpop.permute.xlu1 %2165 }
 0x74e   : > { %v2191_v57 = vsel %vm1503_vm2, %v2166_v23, 0.0 }
 0x74f   : > { %2192 = vadd.xlane.f32.xlu0 %v2191_v57 }
 0x753   : > { %v7862_v12 = vpop.xlane.xlu0 %2138 }
 0x757   : > { %v7864_v21 = vpop.xlane.xlu0 %2141 }
 0x75b   : > { %v7866_v10 = vpop.xlane.xlu0 %2144 }
 0x75f   : > { %v7868_v54 = vpop.xlane.xlu0 %2150 }
 0x760   : > { %11473 = vst [vmem:[#allocation90_spill] sm:$0xff] %v7868_v54 }
 0x763   : > { %v2156_v28 = vpop.permute.xlu0 %2155 }
 0x764   : > { %v2176_v43 = vsel %vm1503_vm2, %v2156_v28, 0.0 }
 0x765   : > { %2197 = vrot.lane.b32.xlu0 %v7419_v56, %s6666_s7  ;;  %2177 = vadd.xlane.f32.xlu1 %v2176_v43 }
 0x767   : > { %v2164_v33 = vpop.permute.xlu0 %2163 }
 0x768   : > { %v2188_v9 = vsel %vm1503_vm2, %v2164_v33, 0.0 }
 0x769   : > { %2205 = vrot.lane.b32.xlu0 %v7466_v52, %s6666_s7  ;;  %2189 = vadd.xlane.f32.xlu1 %v2188_v9 }
 0x76b   : > { %v2168_v23 = vpop.permute.xlu0 %2167 }
 0x76c   : > { %v2194_v57 = vsel %vm1503_vm2, %v2168_v23, 0.0 }
 0x76d   : > { %2209 = vrot.lane.b32.xlu0 %v7488_v55, %s6666_s7  ;;  %2195 = vadd.xlane.f32.xlu1 %v2194_v57 }
 0x77e   : > { %2199 = vrot.lane.b32.xlu1 %v7432_v1, %s6666_s7 }
 0x782   : > { %2201 = vrot.lane.b32.xlu1 %v7436_v19, %s6666_s7 }
 0x786   : > { %2203 = vrot.lane.b32.xlu1 %v7444_v29, %s6666_s7 }
 0x78a   : > { %2207 = vrot.lane.b32.xlu1 %v7474_v59, %s6666_s7 }
 0x7cc   : > { %v7887_v56 = vpop.xlane.xlu0 %2180 }
 0x7d0   : > { %v7889_v52 = vpop.xlane.xlu0 %2183 }
 0x7d4   : > { %v7891_v63 = vpop.xlane.xlu0 %2186 }
 0x7d5   : > { %11474 = vst [vmem:[#allocation91_spill] sm:$0xff] %v7891_v63 }
 0x7d8   : > { %v7893_v55 = vpop.xlane.xlu0 %2192 }
 0x7d9   : > { %11475 = vst [vmem:[#allocation92_spill] sm:$0xff] %v7893_v55 }
 0x7dc   : > { %v2198_v28 = vpop.permute.xlu0 %2197 }
 0x7dd   : > { %v2218_v1 = vsel %vm1503_vm2, %v2198_v28, 0.0 }
 0x7de   : > { %2219 = vadd.xlane.f32.xlu1 %v2218_v1 }
 0x7e0   : > { %v2206_v43 = vpop.permute.xlu0 %2205 }
 0x7e1   : > { %v2230_v19 = vsel %vm1503_vm2, %v2206_v43, 0.0 }
 0x7e2   : > { %2231 = vadd.xlane.f32.xlu1 %v2230_v19  ;;  %v7906_v19 = vmul.f32 0.35355338, %v7272_v20  ;;  %v7923_v20 = vmul.f32 0.35355338, %v7290_v11 }
 0x7e4   : > { %v2210_v29 = vpop.permute.xlu0 %2209 }
 0x7e5   : > { %v2236_v33 = vsel %vm1503_vm2, %v2210_v29, 0.0 }
 0x7e6   : > { %2237 = vadd.xlane.f32.xlu1 %v2236_v33  ;;  %v7910_v33 = vmul.f32 %v7314_v46, %v7906_v19  ;;  %v7927_v46 = vmul.f32 %v7351_v47, %v7923_v20  ;;  %v11338_v47 = vmov 0  }
 0x7e7   : > { %6327 = vset.pattern.permute.xlu1 %v11338_v47 }
 0x7ee   : > { %v2178_v59 = vpop.xlane.xlu1 %2177 }
 0x7f2   : > { %v7898_v9 = vpop.xlane.xlu1 %2189 }
 0x7f6   : > { %v7900_v23 = vpop.xlane.xlu1 %2195 }
 0x7fa   : > { %v2200_v57 = vpop.permute.xlu1 %2199 }
 0x7fb   : > { %v2221_v55 = vsel %vm1503_vm2, %v2200_v57, 0.0  ;;  %v2959_v57 = vsel %vm1503_vm2, %v7910_v33, 0.0 }
 0x7fc   : > { %2222 = vadd.xlane.f32.xlu0 %v2221_v55  ;;  %v7914_v55 = vmul.f32 0.35355338, %v7284_v27  ;;  %v7932_v27 = vmul.f32 0.35355338, %v7302_v38  ;;  %v1827_v38 = vsel %vm1826_vm3, %v7462_v50, %v7608_v24 }
 0x7fe   : > { %v2202_v54 = vpop.permute.xlu1 %2201 }
 0x7ff   : > { %v2224_v28 = vsel %vm1503_vm2, %v2202_v54, 0.0  ;;  %v7918_v54 = vmul.f32 %v7339_v39, %v7914_v55  ;;  %v7936_v39 = vmul.f32 %v7385_v62, %v7932_v27  ;;  %v1835_v62 = vsel %vm1834_vm4, %v1827_v38, %v7612_v32  ;;  %v11477_v38 = vld [vmem:[#allocation61_spill] sm:$0xff] }
 0x800   : > { %2225 = vadd.xlane.f32.xlu0 %v2224_v28  ;;  %v2968_v28 = vsel %vm1503_vm2, %v7927_v46, 0.0 }
 0x801   : > { %v2974_v11 = vsel %vm1503_vm2, %v7936_v39, 0.0 }
 0x802   : > { %v2204_v1 = vpop.permute.xlu1 %2203 }
 0x803   : > { %v2227_v43 = vsel %vm1503_vm2, %v2204_v1, 0.0  ;;  %v1843_v1 = vsel %vm1842_vm5, %v1835_v62, %v7616_v14 }
 0x804   : > { %2228 = vadd.xlane.f32.xlu0 %v2227_v43  ;;  %v2239_v43 = vsel %vm1826_vm3, %v7586_v13, %v7698_v58  ;;  %v1831_v58 = vsel %vm1826_vm3, %v7540_v49, %v7642_v15 }
 0x805   : > { %v2246_v50 = vsel %vm1834_vm4, %v2239_v43, %v7758_v16  ;;  %v1839_v16 = vsel %vm1834_vm4, %v1831_v58, %v7646_v4 }
 0x806   : > { %v2208_v29 = vpop.permute.xlu1 %2207  ;;  %v2253_v32 = vsel %vm1842_vm5, %v2246_v50, %v7782_v41  ;;  %v1847_v41 = vsel %vm1842_vm5, %v1839_v16, %v7650_v53  ;;  %v11479_v50 = vld [vmem:[#allocation63_spill] sm:$0xff] }
 0x807   : > { %v2233_v63 = vsel %vm1503_vm2, %v2208_v29, 0.0  ;;  %v1851_v29 = vsel %vm1850_vm6, %v1843_v1, %v7622_v61  ;;  %v2260_v13 = vsel %vm1850_vm6, %v2253_v32, %v7828_v7  ;;  %v1833_v7 = vsel %vm1826_vm3, %v7581_v5, %v7670_v8  ;;  %v11478_v1 = vld [vmem:[#allocation89_spill] sm:$0xff] }
 0x808   : > { %2234 = vadd.xlane.f32.xlu0 %v2233_v63  ;;  %v2965_v63 = vsel %vm1503_vm2, %v7918_v54, 0.0  ;;  %v1859_v24 = vsel %vm1858_vm7, %v1851_v29, %v7628_v6  ;;  %v2243_v6 = vsel %vm1826_vm3, %v7597_v25, %v7702_v51  ;;  %v1855_v4 = vsel %vm1850_vm6, %v1847_v41, %v7654_v31  ;;  %v11480_v41 = vld [vmem:[#allocation42_spill] sm:$0xff] }
 0x809   : > { %v1867_v14 = vsel %vm1866_vm8, %v1859_v24, %v7634_v18  ;;  %v2267_v18 = vsel %vm1858_vm7, %v2260_v13, %v7852_v37  ;;  %v2250_v49 = vsel %vm1834_vm4, %v2243_v6, %v7760_v44  ;;  %v1841_v51 = vsel %vm1834_vm4, %v1833_v7, %v7674_v36  ;;  %v11481_v7 = vld [vmem:[#allocation34_spill] sm:$0xff] }
 0x80a   : > { %v1875_v61 = vsel %vm1874_vm9, %v1867_v14, %v7638_v0  ;;  %v2274_v0 = vsel %vm1866_vm8, %v2267_v18, %v2178_v59  ;;  %v2257_v25 = vsel %vm1842_vm5, %v2250_v49, %v7784_v3  ;;  %v1863_v8 = vsel %vm1858_vm7, %v1855_v4, %v7658_v26 }
 0x80b   : > { %v1849_v5 = vsel %vm1842_vm5, %v1841_v51, %v7678_v34  ;;  %v2264_v44 = vsel %vm1850_vm6, %v2257_v25, %v7830_v22  ;;  %v1871_v31 = vsel %vm1866_vm8, %v1863_v8, %v7662_v30  ;;  %v2245_v3 = vsel %vm1826_vm3, %v7606_v60, %v7706_v42  ;;  %v11483_v51 = vld [vmem:[#allocation49_spill] sm:$0xff]  ;;  %v11484_v25 = vld [vmem:[#allocation35_spill] sm:$0xff]  ;;  %v11485_v8 = vld [vmem:[#allocation44_spill] sm:$0xff] }
 0x80c   : > { %2960 = vadd.xlane.f32.xlu0 %v2959_v57  ;;  %v1857_v36 = vsel %vm1850_vm6, %v1849_v5, %v7682_v2  ;;  %v2271_v26 = vsel %vm1858_vm7, %v2264_v44, %v7854_v40  ;;  %v2252_v34 = vsel %vm1834_vm4, %v2245_v3, %v7762_v45  ;;  %v1879_v30 = vsel %vm1874_vm9, %v1871_v31, %v7666_v17  ;;  %v11476_v40 = vld [vmem:[#allocation88_spill] sm:$0xff]  ;;  %v11486_v44 = vld [vmem:[#allocation50_spill] sm:$0xff] }
 0x80d   : > { %v2278_v22 = vsel %vm1866_vm8, %v2271_v26, %v7898_v9  ;;  %v1865_v2 = vsel %vm1858_vm7, %v1857_v36, %v7686_v48  ;;  %v2259_v42 = vsel %vm1842_vm5, %v2252_v34, %v7786_v35  ;;  %v1828_v49 = vsel %vm1826_vm3, %v11481_v7, %v11480_v41  ;;  %v11487_v36 = vld [vmem:[#allocation45_spill] sm:$0xff]  ;;  %v11488_v26 = vld [vmem:[#allocation51_spill] sm:$0xff]  ;;  %v11504_v41 = vld [vmem:[#allocation84_spill] sm:$0xff] }
 0x80e   : > { %v2266_v45 = vsel %vm1850_vm6, %v2259_v42, %v11476_v40  ;;  %v1873_v62 = vsel %vm1866_vm8, %v1865_v2, %v11477_v38  ;;  %v11491_v2 = vld [vmem:[#allocation72_spill] sm:$0xff]  ;;  %v11492_v42 = vld [vmem:[#allocation38_spill] sm:$0xff] }
 0x80f   : > { %v2273_v17 = vsel %vm1858_vm7, %v2266_v45, %v11478_v1  ;;  %v1881_v24 = vsel %vm1874_vm9, %v1873_v62, %v11479_v50  ;;  %v11493_v45 = vld [vmem:[#allocation47_spill] sm:$0xff]  ;;  %v11495_v38 = vld [vmem:[#allocation56_spill] sm:$0xff] }
 0x810   : > { %2966 = vadd.xlane.f32.xlu0 %v2965_v63  ;;  %v2280_v48 = vsel %vm1866_vm8, %v2273_v17, %v7900_v23  ;;  %v11496_v62 = vld [vmem:[#allocation36_spill] sm:$0xff] }
 0x811   : > { %v1830_v1 = vsel %vm1826_vm3, %v11496_v62, %v11495_v38  ;;  %v11497_v17 = vld [vmem:[#allocation76_spill] sm:$0xff]  ;;  %v11516_v62 = vld [vmem:[#allocation67_spill] sm:$0xff] }
 0x814   : > { %2969 = vadd.xlane.f32.xlu0 %v2968_v28 }
 0x818   : > { %2975 = vadd.xlane.f32.xlu0 %v2974_v11 }
 0x82e   : > { %2987 = vrot.lane.b32.xlu0 %v7910_v33, %s6660_s19 }
 0x832   : > { %2993 = vrot.lane.b32.xlu0 %v7927_v46, %s6660_s19 }
 0x836   : > { %2997 = vrot.lane.b32.xlu0 %v7936_v39, %s6660_s19 }
 0x867   : > { %v2220_v15 = vpop.xlane.xlu1 %2219 }
 0x868   : > { %v2281_v53 = vsel %vm1874_vm9, %v2274_v0, %v2220_v15  ;;  %v11482_v15 = vld [vmem:[#allocation43_spill] sm:$0xff] }
 0x869   : > { %v2288_v37 = vmax.f32 %v1875_v61, %v2281_v53  ;;  %v1836_v4 = vsel %vm1834_vm4, %v1828_v49, %v11482_v15  ;;  %v11505_v15 = vld [vmem:[#allocation59_spill] sm:$0xff] }
 0x86a   : > { %v1844_v5 = vsel %vm1842_vm5, %v1836_v4, %v11485_v8 }
 0x86b   : > { %v2295_v59 = vsub.f32 %v1875_v61, %v2288_v37  ;;  %v2316_v57 = vsub.f32 %v2281_v53, %v2288_v37  ;;  %v2232_v63 = vpop.xlane.xlu1 %2231  ;;  %v1829_v53 = vsel %vm1826_vm3, %v11484_v25, %v11483_v51  ;;  %v1852_v3 = vsel %vm1850_vm6, %v1844_v5, %v11487_v36  ;;  %v11506_v51 = vld [vmem:[#allocation73_spill] sm:$0xff]  ;;  %v11507_v25 = vld [vmem:[#allocation39_spill] sm:$0xff] }
 0x86c   : > { %v2285_v60 = vsel %vm1874_vm9, %v2278_v22, %v2232_v63  ;;  %v1837_v37 = vsel %vm1834_vm4, %v1829_v53, %v11486_v44  ;;  %v11490_v63 = vld [vmem:[#allocation52_spill] sm:$0xff]  ;;  %v2241_v53 = vsel %vm1826_vm3, %v11507_v25, %v11506_v51  ;;  %v11510_v36 = vld [vmem:[#allocation37_spill] sm:$0xff]  ;;  %v11524_v51 = vld [vmem:[#allocation86_spill] sm:$0xff] }
 0x86d   : > { %v2302_v28 = vmul.f32 1.442695, %v2295_v59  ;;  %v2323_v11 = vmul.f32 1.442695, %v2316_v57  ;;  %v2292_v9 = vmax.f32 %v1879_v30, %v2285_v60  ;;  %v1845_v34 = vsel %vm1842_vm5, %v1837_v37, %v11488_v26  ;;  %v11489_v59 = vld [vmem:[#allocation46_spill] sm:$0xff]  ;;  %v11508_v44 = vld [vmem:[#allocation60_spill] sm:$0xff] }
 0x86e   : > { %v1860_v57 = vsel %vm1858_vm7, %v1852_v3, %v11489_v59  ;;  %v11511_v26 = vld [vmem:[#allocation77_spill] sm:$0xff] }
 0x86f   : > { %6435 = vpow2.f32 %v2302_v28  ;;  %v2299_v43 = vsub.f32 %v1879_v30, %v2292_v9  ;;  %v2320_v35 = vsub.f32 %v2285_v60, %v2292_v9  ;;  %v2238_v29 = vpop.xlane.xlu1 %2237  ;;  %v1853_v30 = vsel %vm1850_vm6, %v1845_v34, %v11490_v63  ;;  %v11512_v63 = vld [vmem:[#allocation81_spill] sm:$0xff] }
 0x870   : > { %6437 = vpow2.f32 %v2323_v11  ;;  %v2287_v32 = vsel %vm1874_vm9, %v2280_v48, %v2238_v29  ;;  %v2240_v60 = vsel %vm1826_vm3, %v11492_v42, %v11491_v2  ;;  %v1868_v28 = vsel %vm1866_vm8, %v1860_v57, %v11493_v45  ;;  %v11494_v11 = vld [vmem:[#allocation53_spill] sm:$0xff]  ;;  %v11513_v42 = vld [vmem:[#allocation62_spill] sm:$0xff] }
 0x871   : > { %v2310_v14 = vmul.f32 1.442695, %v2299_v43  ;;  %v2331_v58 = vmul.f32 1.442695, %v2320_v35  ;;  %v2294_v13 = vmax.f32 %v1881_v24, %v2287_v32  ;;  %v1861_v9 = vsel %vm1858_vm7, %v1853_v30, %v11494_v11  ;;  %v11498_v43 = vld [vmem:[#allocation54_spill] sm:$0xff]  ;;  %v11499_v29 = vld [vmem:[#allocation57_spill] sm:$0xff] }
 0x872   : > { %v2247_v48 = vsel %vm1834_vm4, %v2240_v60, %v11497_v17  ;;  %v1869_v35 = vsel %vm1866_vm8, %v1861_v9, %v11498_v43  ;;  %v1838_v50 = vsel %vm1834_vm4, %v1830_v1, %v11499_v29  ;;  %v2248_v34 = vsel %vm1834_vm4, %v2241_v53, %v11511_v26  ;;  %v11514_v45 = vld [vmem:[#allocation66_spill] sm:$0xff]  ;;  %v11515_v11 = vld [vmem:[#allocation85_spill] sm:$0xff] }
 0x873   : > { %6439 = vpow2.f32 %v2310_v14  ;;  %v2301_v61 = vsub.f32 %v1881_v24, %v2294_v13  ;;  %v2322_v16 = vsub.f32 %v2287_v32, %v2294_v13  ;;  %v11500_v24 = vld [vmem:[#allocation80_spill] sm:$0xff]  ;;  %v11517_v17 = vld [vmem:[#allocation74_spill] sm:$0xff] }
 0x874   : > { %6441 = vpow2.f32 %v2331_v58  ;;  %v2254_v32 = vsel %vm1842_vm5, %v2247_v48, %v11500_v24  ;;  %v11501_v58 = vld [vmem:[#allocation48_spill] sm:$0xff]  ;;  %v11519_v29 = vld [vmem:[#allocation78_spill] sm:$0xff] }
 0x875   : > { %v2314_v6 = vmul.f32 1.442695, %v2301_v61  ;;  %v2335_v18 = vmul.f32 1.442695, %v2322_v16  ;;  %v1876_v13 = vsel %vm1874_vm9, %v1868_v28, %v11501_v58  ;;  %v11502_v61 = vld [vmem:[#allocation55_spill] sm:$0xff]  ;;  %v2261_v7 = vsel %vm1850_vm6, %v2254_v32, %v11504_v41  ;;  %v11518_v48 = vld [vmem:[#allocation40_spill] sm:$0xff] }
 0x876   : > { %v1877_v16 = vsel %vm1874_vm9, %v1869_v35, %v11502_v61  ;;  %v2268_v8 = vsel %vm1858_vm7, %v2261_v7, %v7862_v12  ;;  %v2255_v12 = vsel %vm1842_vm5, %v2248_v34, %v11512_v63  ;;  %v2242_v43 = vsel %vm1826_vm3, %v11518_v48, %v11517_v17  ;;  %v11520_v61 = vld [vmem:[#allocation68_spill] sm:$0xff]  ;;  %v11522_v41 = vld [vmem:[#allocation41_spill] sm:$0xff] }
 0x877   : > { %6443 = vpow2.f32 %v2314_v6  ;;  %v11503_v6 = vld [vmem:[#allocation58_spill] sm:$0xff]  ;;  %v2275_v59 = vsel %vm1866_vm8, %v2268_v8, %v7887_v56  ;;  %v2262_v9 = vsel %vm1850_vm6, %v2255_v12, %v11515_v11  ;;  %v11326_v56 = vmov 6   ;;  %v11525_v8 = vld [vmem:[#allocation64_spill] sm:$0xff] }
 0x878   : > { %6445 = vpow2.f32 %v2335_v18  ;;  %v1846_v18 = vsel %vm1842_vm5, %v1838_v50, %v11503_v6  ;;  %6341 = vset.pattern.permute.xlu0 %v11326_v56  ;;  %v2269_v35 = vsel %vm1858_vm7, %v2262_v9, %v7864_v21  ;;  %v2249_v50 = vsel %vm1834_vm4, %v2242_v43, %v11519_v29  ;;  %v11533_v43 = vld [vmem:[#allocation92_spill] sm:$0xff] }
 0x879   : > { %v1854_v4 = vsel %vm1850_vm6, %v1846_v18, %v11505_v15  ;;  %v2276_v24 = vsel %vm1866_vm8, %v2269_v35, %v7889_v52  ;;  %v11521_v18 = vld [vmem:[#allocation75_spill] sm:$0xff]  ;;  %v11523_v15 = vld [vmem:[#allocation82_spill] sm:$0xff] }
 0x87a   : > { %v1862_v37 = vsel %vm1858_vm7, %v1854_v4, %v11508_v44  ;;  %v2244_v7 = vsel %vm1826_vm3, %v11522_v41, %v11521_v18  ;;  %v2256_v21 = vsel %vm1842_vm5, %v2249_v50, %v11523_v15 }
 0x87b   : > { %v1870_v60 = vsel %vm1866_vm8, %v1862_v37, %v11513_v42  ;;  %v2263_v25 = vsel %vm1850_vm6, %v2256_v21, %v11524_v51  ;;  %v11526_v37 = vld [vmem:[#allocation69_spill] sm:$0xff] }
 0x87c   : > { %v8035_v23 = vpop.eup %6435  ;;  %v1878_v44 = vsel %vm1874_vm9, %v1870_v60, %v11525_v8  ;;  %v2270_v26 = vsel %vm1858_vm7, %v2263_v25, %v7866_v10  ;;  %v11530_v10 = vld [vmem:[#allocation87_spill] sm:$0xff] }
 0x87d   : > { %v8040_v0 = vpop.eup %6437 }
 0x87e   : > { %v2337_v31 = vadd.f32 %v8040_v0, %v8035_v23 }
 0x880   : > { %v8057_v22 = vpop.eup %6439  ;;  %6447 = vrcp.f32 %v2337_v31  ;;  %v11509_v31 = vld [vmem:[#allocation65_spill] sm:$0xff] }
 0x881   : > { %v8066_v40 = vpop.eup %6441  ;;  %v1832_v3 = vsel %vm1826_vm3, %v11510_v36, %v11509_v31  ;;  %v11527_v36 = vld [vmem:[#allocation79_spill] sm:$0xff] }
 0x882   : > { %v2341_v14 = vadd.f32 %v8066_v40, %v8057_v22  ;;  %v1840_v28 = vsel %vm1834_vm4, %v1832_v3, %v11514_v45  ;;  %v2251_v3 = vsel %vm1834_vm4, %v2244_v7, %v11527_v36 }
 0x883   : > { %v1848_v1 = vsel %vm1842_vm5, %v1840_v28, %v11516_v62  ;;  %v11531_v62 = vld [vmem:[#allocation70_spill] sm:$0xff] }
 0x884   : > { %v8093_v49 = vpop.eup %6443  ;;  %6449 = vrcp.f32 %v2341_v14  ;;  %v1856_v6 = vsel %vm1850_vm6, %v1848_v1, %v11520_v61  ;;  %v11532_v1 = vld [vmem:[#allocation90_spill] sm:$0xff] }
 0x885   : > { %v8102_v5 = vpop.eup %6445  ;;  %v2223_v57 = vpop.xlane.xlu0 %2222  ;;  %v1864_v31 = vsel %vm1858_vm7, %v1856_v6, %v11526_v37 }
 0x886   : > { %v2343_v30 = vadd.f32 %v8102_v5, %v8093_v49  ;;  %v2282_v2 = vsel %vm1874_vm9, %v2275_v59, %v2223_v57  ;;  %v11528_v59 = vld [vmem:[#allocation91_spill] sm:$0xff] }
 0x887   : > { %v2289_v38 = vmax.f32 %v1876_v13, %v2282_v2  ;;  %v2277_v57 = vsel %vm1866_vm8, %v2270_v26, %v11528_v59 }
 0x888   : > { %6451 = vrcp.f32 %v2343_v30 }
 0x889   : > { %v2296_v32 = vsub.f32 %v1876_v13, %v2289_v38  ;;  %v2317_v14 = vsub.f32 %v2282_v2, %v2289_v38  ;;  %v2226_v58 = vpop.xlane.xlu0 %2225  ;;  %v11529_v2 = vld [vmem:[#allocation83_spill] sm:$0xff] }
 0x88a   : > { %v2283_v4 = vsel %vm1874_vm9, %v2276_v24, %v2226_v58  ;;  %v2258_v42 = vsel %vm1842_vm5, %v2251_v3, %v11529_v2  ;;  %v11534_v24 = vld [vmem:[#allocation71_spill] sm:$0xff] }
 0x88b   : > { %v2304_v53 = vmul.f32 1.442695, %v2296_v32  ;;  %v2325_v52 = vmul.f32 1.442695, %v2317_v14  ;;  %v2290_v13 = vmax.f32 %v1877_v16, %v2283_v4  ;;  %v2265_v28 = vsel %vm1850_vm6, %v2258_v42, %v11530_v10 }
 0x88c   : > { %v2272_v17 = vsel %vm1858_vm7, %v2265_v28, %v11532_v1 }
 0x88d   : > { %v8154_v34 = vpop.eup %6447  ;;  %6453 = vpow2.f32 %v2304_v53  ;;  %v2297_v63 = vsub.f32 %v1877_v16, %v2290_v13  ;;  %v2318_v12 = vsub.f32 %v2283_v4, %v2290_v13  ;;  %v2229_v30 = vpop.xlane.xlu0 %2228  ;;  %v1872_v16 = vsel %vm1866_vm8, %v1864_v31, %v11531_v62 }
 0x88e   : > { %v8162_v60 = vmul.f32 %v8154_v34, %v8040_v0  ;;  %6455 = vpow2.f32 %v2325_v52  ;;  %v2284_v45 = vsel %vm1874_vm9, %v2277_v57, %v2229_v30  ;;  %v2279_v0 = vsel %vm1866_vm8, %v2272_v17, %v11533_v43 }
 0x88f   : > { %v2306_v11 = vmul.f32 1.442695, %v2297_v63  ;;  %v2327_v9 = vmul.f32 1.442695, %v2318_v12  ;;  %v2291_v38 = vmax.f32 %v1878_v44, %v2284_v45  ;;  %v1880_v32 = vsel %vm1874_vm9, %v1872_v16, %v11534_v24 }
 0x891   : > { %v6450_v48 = vpop.eup %6449  ;;  %6457 = vpow2.f32 %v2306_v11  ;;  %v2298_v35 = vsub.f32 %v1878_v44, %v2291_v38  ;;  %v2319_v29 = vsub.f32 %v2284_v45, %v2291_v38  ;;  %v2235_v50 = vpop.xlane.xlu0 %2234 }
 0x892   : > { %v8176_v14 = vmul.f32 %v6450_v48, %v8066_v40  ;;  %6459 = vpow2.f32 %v2327_v9  ;;  %v2286_v58 = vsel %vm1874_vm9, %v2279_v0, %v2235_v50  ;;  %v8207_v1 = vmul.f32 %v6450_v48, %v8057_v22 }
 0x893   : > { %v2308_v61 = vmul.f32 1.442695, %v2298_v35  ;;  %v2329_v6 = vmul.f32 1.442695, %v2319_v29  ;;  %v2293_v18 = vmax.f32 %v1880_v32, %v2286_v58  ;;  %v11336_v35 = vmov 2  }
 0x894   : > { %v11332_v22 = vmov 3   ;;  %v11328_v48 = vmov 5   ;;  %v11334_v29 = vmov 7  }
 0x895   : > { %v6452_v41 = vpop.eup %6451  ;;  %6461 = vpow2.f32 %v2308_v61  ;;  %v2300_v7 = vsub.f32 %v1880_v32, %v2293_v18  ;;  %v2321_v15 = vsub.f32 %v2286_v58, %v2293_v18  ;;  %v8179_v21 = vpop.xlane.xlu0 %2960 }
 0x896   : > { %v8182_v4 = vmul.f32 %v6452_v41, %v8102_v5  ;;  %6463 = vpow2.f32 %v2329_v6  ;;  %v8216_v0 = vmul.f32 %v6452_v41, %v8093_v49  ;;  %v11330_v49 = vmov 4  }
 0x897   : > { %v2312_v51 = vmul.f32 1.442695, %v2300_v7  ;;  %v2333_v25 = vmul.f32 1.442695, %v2321_v15 }
 0x899   : > { %6465 = vpow2.f32 %v2312_v51  ;;  %v8184_v40 = vpop.xlane.xlu0 %2966 }
 0x89a   : > { %11535 = vst [vmem:[#allocation88_spill] sm:$0xff] %v8184_v40  ;;  %v6454_v53 = vpop.eup %6453  ;;  %6467 = vpow2.f32 %v2333_v25 }
 0x89b   : > { %v6456_v52 = vpop.eup %6455 }
 0x89c   : > { %v2338_v13 = vadd.f32 %v6456_v52, %v6454_v53 }
 0x89d   : > { %v8186_v8 = vpop.xlane.xlu0 %2969 }
 0x89e   : > { %11536 = vst [vmem:[#allocation61_spill] sm:$0xff] %v8186_v8  ;;  %v6458_v44 = vpop.eup %6457  ;;  %6469 = vrcp.f32 %v2338_v13 }
 0x89f   : > { %v6460_v37 = vpop.eup %6459 }
 0x8a0   : > { %v2339_v31 = vadd.f32 %v6460_v37, %v6458_v44 }
 0x8a1   : > { %v8188_v36 = vpop.xlane.xlu0 %2975 }
 0x8a2   : > { %11537 = vst [vmem:[#allocation89_spill] sm:$0xff] %v8188_v36  ;;  %v6462_v5 = vpop.eup %6461  ;;  %6471 = vrcp.f32 %v2339_v31 }
 0x8a3   : > { %v6464_v3 = vpop.eup %6463 }
 0x8a4   : > { %v2340_v26 = vadd.f32 %v6464_v3, %v6462_v5 }
 0x8a5   : > { %v2988_v59 = vpop.permute.xlu0 %2987 }
 0x8a6   : > { %v6466_v57 = vpop.eup %6465  ;;  %6473 = vrcp.f32 %v2340_v26  ;;  %v3008_v63 = vsel %vm1503_vm2, %v2988_v59, 0.0 }
 0x8a7   : > { %v6468_v12 = vpop.eup %6467  ;;  %3009 = vadd.xlane.f32.xlu0 %v3008_v63 }
 0x8a8   : > { %v2342_v30 = vadd.f32 %v6468_v12, %v6466_v57 }
 0x8aa   : > { %6475 = vrcp.f32 %v2342_v30 }
 0x8ab   : > { %v6470_v2 = vpop.eup %6469 }
 0x8ac   : > { %v8191_v42 = vmul.f32 %v6470_v2, %v6454_v53  ;;  %v8193_v45 = vmul.f32 %v6470_v2, %v6456_v52 }
 0x8ae   : > { %2365 = vperm.xlu1 %6327, %v8191_v42  }
 0x8af   : > { %v6472_v10 = vpop.eup %6471 }
 0x8b0   : > { %v8196_v28 = vmul.f32 %v6472_v10, %v6458_v44  ;;  %v8198_v11 = vmul.f32 %v6472_v10, %v6460_v37 }
 0x8b2   : > { %11538 = vst [vmem:[#allocation63_spill] sm:$0xff] %v8196_v28  ;;  %2370 = vperm.xlu1 %6327, %v8196_v28  }
 0x8b3   : > { %v6474_v9 = vpop.eup %6473 }
 0x8b4   : > { %v8201_v38 = vmul.f32 %v6474_v9, %v6462_v5  ;;  %v8203_v62 = vmul.f32 %v6474_v9, %v6464_v3 }
 0x8b6   : > { %11539 = vst [vmem:[#allocation42_spill] sm:$0xff] %v8203_v62  ;;  %2375 = vperm.xlu1 %6327, %v8201_v38  }
 0x8b7   : > { %v6476_v16 = vpop.eup %6475 }
 0x8b8   : > { %v8209_v17 = vmul.f32 %v6476_v16, %v6468_v12  ;;  %v8212_v43 = vmul.f32 %v6476_v16, %v6466_v57 }
 0x8ba   : > { %11540 = vst [vmem:[#allocation34_spill] sm:$0xff] %v8209_v17  ;;  %2380 = vperm.xlu1 %6327, %v8207_v1  }
 0x8be   : > { %2385 = vperm.xlu1 %6327, %v8212_v43  }
 0x8c2   : > { %2390 = vperm.xlu1 %6327, %v8216_v0  }
 0x8c6   : > { %6328 = vset.pattern.permute.xlu1 %v11336_v35 }
 0x8c7   : > { %2426 = vperm.xlu1 %6328, %v8191_v42  }
 0x8cb   : > { %2430 = vperm.xlu1 %6328, %v8196_v28  }
 0x8cf   : > { %2438 = vperm.xlu1 %6328, %v8207_v1  }
 0x8d3   : > { %2446 = vperm.xlu1 %6328, %v8216_v0  }
 0x8d7   : > { %6329 = vset.pattern.permute.xlu1 %v11332_v22 }
 0x8d8   : > { %2454 = vperm.xlu1 %6329, %v8191_v42  }
 0x8dc   : > { %2458 = vperm.xlu1 %6329, %v8196_v28  }
 0x8e0   : > { %2466 = vperm.xlu1 %6329, %v8207_v1  }
 0x8e4   : > { %2474 = vperm.xlu1 %6329, %v8216_v0  }
 0x8e8   : > { %6330 = vset.pattern.permute.xlu1 %v11330_v49 }
 0x8e9   : > { %2482 = vperm.xlu1 %6330, %v8191_v42  }
 0x8ed   : > { %2486 = vperm.xlu1 %6330, %v8196_v28  }
 0x8f1   : > { %2494 = vperm.xlu1 %6330, %v8207_v1  }
 0x8f5   : > { %2502 = vperm.xlu1 %6330, %v8216_v0  }
 0x8f9   : > { %6331 = vset.pattern.permute.xlu1 %v11328_v48 }
 0x8fa   : > { %2510 = vperm.xlu1 %6331, %v8191_v42  }
 0x8fe   : > { %2514 = vperm.xlu1 %6331, %v8196_v28  }
 0x902   : > { %2522 = vperm.xlu1 %6331, %v8207_v1  }
 0x906   : > { %2530 = vperm.xlu1 %6331, %v8216_v0  }
 0x90a   : > { %6332 = vset.pattern.permute.xlu1 %v11326_v56 }
 0x90b   : > { %2538 = vperm.xlu1 %6332, %v8191_v42  }
 0x90f   : > { %2542 = vperm.xlu1 %6332, %v8196_v28  }
 0x913   : > { %2550 = vperm.xlu1 %6332, %v8207_v1  }
 0x917   : > { %2558 = vperm.xlu1 %6332, %v8216_v0  }
 0x91b   : > { %6333 = vset.pattern.permute.xlu1 %v11334_v29 }
 0x91c   : > { %2566 = vperm.xlu1 %6333, %v8191_v42  }
 0x920   : > { %2570 = vperm.xlu1 %6333, %v8196_v28  }
 0x924   : > { %2578 = vperm.xlu1 %6333, %v8207_v1  }
 0x928   : > { %2586 = vperm.xlu1 %6333, %v8216_v0  }
 0x929   : > { %v8249_v50 = vpop.permute.xlu1 %2365 }
 0x92a   : > { %11541 = vst [vmem:[#allocation43_spill] sm:$0xff] %v8249_v50 }
 0x92c   : > { %6334 = vset.pattern.permute.xlu1 %v11338_v47  ;;  %v11576_v47 = vld [vmem:[#allocation24_spill] sm:$0xff] }
 0x92d   : > { %v8252_v24 = vpop.permute.xlu1 %2370  ;;  %2665 = vperm.xlu1 %6334, %v8193_v45  }
 0x92e   : > { %11542 = vst [vmem:[#allocation49_spill] sm:$0xff] %v8252_v24 }
 0x931   : > { %v8255_v32 = vpop.permute.xlu1 %2375  ;;  %2670 = vperm.xlu1 %6334, %v8198_v11  }
 0x932   : > { %11543 = vst [vmem:[#allocation35_spill] sm:$0xff] %v8255_v32 }
 0x935   : > { %v8258_v58 = vpop.permute.xlu1 %2380  ;;  %2680 = vperm.xlu1 %6334, %v8176_v14  }
 0x936   : > { %11544 = vst [vmem:[#allocation44_spill] sm:$0xff] %v8258_v58 }
 0x939   : > { %2690 = vperm.xlu1 %6334, %v8182_v4   ;;  %v8262_v61 = vpop.permute.xlu1 %2385 }
 0x93a   : > { %11545 = vst [vmem:[#allocation50_spill] sm:$0xff] %v8262_v61 }
 0x93d   : > { %6335 = vset.pattern.permute.xlu1 %v11336_v35  ;;  %v8265_v6 = vpop.permute.xlu1 %2390 }
 0x93e   : > { %11546 = vst [vmem:[#allocation45_spill] sm:$0xff] %v8265_v6  ;;  %2726 = vperm.xlu1 %6335, %v8193_v45  }
 0x942   : > { %2730 = vperm.xlu1 %6335, %v8198_v11   ;;  %v8269_v18 = vpop.permute.xlu1 %2426 }
 0x943   : > { %11547 = vst [vmem:[#allocation51_spill] sm:$0xff] %v8269_v18 }
 0x946   : > { %2738 = vperm.xlu1 %6335, %v8176_v14   ;;  %v8272_v41 = vpop.permute.xlu1 %2430 }
 0x947   : > { %11548 = vst [vmem:[#allocation46_spill] sm:$0xff] %v8272_v41 }
 0x94a   : > { %2746 = vperm.xlu1 %6335, %v8182_v4   ;;  %v8275_v7 = vpop.permute.xlu1 %2438 }
 0x94b   : > { %11549 = vst [vmem:[#allocation52_spill] sm:$0xff] %v8275_v7 }
 0x94e   : > { %6336 = vset.pattern.permute.xlu1 %v11332_v22  ;;  %v8278_v15 = vpop.permute.xlu1 %2446 }
 0x94f   : > { %11550 = vst [vmem:[#allocation72_spill] sm:$0xff] %v8278_v15  ;;  %2754 = vperm.xlu1 %6336, %v8193_v45   ;;  %v11580_v15 = vld [vmem:[#allocation23_spill] sm:$0xff] }
 0x953   : > { %2758 = vperm.xlu1 %6336, %v8198_v11   ;;  %v8282_v51 = vpop.permute.xlu1 %2454 }
 0x954   : > { %11551 = vst [vmem:[#allocation38_spill] sm:$0xff] %v8282_v51 }
 0x957   : > { %2766 = vperm.xlu1 %6336, %v8176_v14   ;;  %v8285_v25 = vpop.permute.xlu1 %2458 }
 0x958   : > { %11552 = vst [vmem:[#allocation47_spill] sm:$0xff] %v8285_v25 }
 0x95b   : > { %2774 = vperm.xlu1 %6336, %v8182_v4   ;;  %v8288_v53 = vpop.permute.xlu1 %2466 }
 0x95c   : > { %11553 = vst [vmem:[#allocation53_spill] sm:$0xff] %v8288_v53 }
 0x95f   : > { %6337 = vset.pattern.permute.xlu1 %v11330_v49  ;;  %v8291_v52 = vpop.permute.xlu1 %2474 }
 0x960   : > { %11554 = vst [vmem:[#allocation56_spill] sm:$0xff] %v8291_v52  ;;  %2782 = vperm.xlu1 %6337, %v8193_v45  }
 0x964   : > { %2786 = vperm.xlu1 %6337, %v8198_v11   ;;  %v8295_v13 = vpop.permute.xlu1 %2482 }
 0x965   : > { %11555 = vst [vmem:[#allocation36_spill] sm:$0xff] %v8295_v13 }
 0x968   : > { %2794 = vperm.xlu1 %6337, %v8176_v14   ;;  %v8298_v44 = vpop.permute.xlu1 %2486 }
 0x969   : > { %11556 = vst [vmem:[#allocation76_spill] sm:$0xff] %v8298_v44 }
 0x96c   : > { %2802 = vperm.xlu1 %6337, %v8182_v4   ;;  %v8301_v37 = vpop.permute.xlu1 %2494 }
 0x96d   : > { %11557 = vst [vmem:[#allocation54_spill] sm:$0xff] %v8301_v37 }
 0x970   : > { %6338 = vset.pattern.permute.xlu1 %v11328_v48  ;;  %v8304_v31 = vpop.permute.xlu1 %2502 }
 0x971   : > { %11558 = vst [vmem:[#allocation57_spill] sm:$0xff] %v8304_v31  ;;  %2810 = vperm.xlu1 %6338, %v8193_v45  }
 0x975   : > { %2814 = vperm.xlu1 %6338, %v8198_v11   ;;  %v8308_v5 = vpop.permute.xlu1 %2510 }
 0x976   : > { %11559 = vst [vmem:[#allocation80_spill] sm:$0xff] %v8308_v5 }
 0x979   : > { %2822 = vperm.xlu1 %6338, %v8176_v14   ;;  %v8311_v3 = vpop.permute.xlu1 %2514 }
 0x97a   : > { %11560 = vst [vmem:[#allocation48_spill] sm:$0xff] %v8311_v3 }
 0x97d   : > { %2830 = vperm.xlu1 %6338, %v8182_v4   ;;  %v8314_v26 = vpop.permute.xlu1 %2522 }
 0x97e   : > { %11561 = vst [vmem:[#allocation55_spill] sm:$0xff] %v8314_v26 }
 0x981   : > { %6339 = vset.pattern.permute.xlu1 %v11326_v56  ;;  %v8317_v59 = vpop.permute.xlu1 %2530 }
 0x982   : > { %11562 = vst [vmem:[#allocation58_spill] sm:$0xff] %v8317_v59  ;;  %2838 = vperm.xlu1 %6339, %v8193_v45   ;;  %v11578_v59 = vld [vmem:[#allocation20_spill] sm:$0xff] }
 0x983   : > { %v8362_v32 = vmul.f32 0.35355338, %v11578_v59 }
 0x986   : > { %2842 = vperm.xlu1 %6339, %v8198_v11   ;;  %v8321_v57 = vpop.permute.xlu1 %2538 }
 0x987   : > { %11563 = vst [vmem:[#allocation84_spill] sm:$0xff] %v8321_v57 }
 0x98a   : > { %2850 = vperm.xlu1 %6339, %v8176_v14   ;;  %v8324_v63 = vpop.permute.xlu1 %2542 }
 0x98b   : > { %11564 = vst [vmem:[#allocation59_spill] sm:$0xff] %v8324_v63 }
 0x98e   : > { %2858 = vperm.xlu1 %6339, %v8182_v4   ;;  %v8327_v12 = vpop.permute.xlu1 %2550 }
 0x98f   : > { %11565 = vst [vmem:[#allocation73_spill] sm:$0xff] %v8327_v12 }
 0x992   : > { %6340 = vset.pattern.permute.xlu1 %v11334_v29  ;;  %v8330_v30 = vpop.permute.xlu1 %2558  ;;  %v11575_v29 = vld [vmem:[#allocation16_spill] sm:$0xff] }
 0x993   : > { %11566 = vst [vmem:[#allocation39_spill] sm:$0xff] %v8330_v30  ;;  %2866 = vperm.xlu1 %6340, %v8193_v45   ;;  %v8353_v35 = vmul.f32 0.35355338, %v11575_v29  ;;  %v8371_v29 = vmul.f32 0.35355338, %v11580_v15 }
 0x995   : > { %v8357_v30 = vmul.f32 %v11576_v47, %v8353_v35  ;;  %v11582_v47 = vld [vmem:[#allocation26_spill] sm:$0xff] }
 0x997   : > { %2870 = vperm.xlu1 %6340, %v8198_v11   ;;  %v8334_v2 = vpop.permute.xlu1 %2566  ;;  %v2962_v52 = vsel %vm1503_vm2, %v8357_v30, 0.0 }
 0x998   : > { %11567 = vst [vmem:[#allocation60_spill] sm:$0xff] %v8334_v2 }
 0x99b   : > { %2878 = vperm.xlu1 %6340, %v8176_v14   ;;  %v8337_v10 = vpop.permute.xlu1 %2570 }
 0x99c   : > { %11568 = vst [vmem:[#allocation65_spill] sm:$0xff] %v8337_v10 }
 0x99f   : > { %2886 = vperm.xlu1 %6340, %v8182_v4   ;;  %v8340_v9 = vpop.permute.xlu1 %2578 }
 0x9a0   : > { %11569 = vst [vmem:[#allocation37_spill] sm:$0xff] %v8340_v9 }
 0x9a3   : > { %v8342_v16 = vpop.permute.xlu1 %2586 }
 0x9a4   : > { %11570 = vst [vmem:[#allocation77_spill] sm:$0xff] %v8342_v16  ;;  %v11579_v16 = vld [vmem:[#allocation25_spill] sm:$0xff] }
 0x9a5   : > { %v8366_v31 = vmul.f32 %v11579_v16, %v8362_v32 }
 0x9a7   : > { %v2971_v59 = vsel %vm1503_vm2, %v8366_v31, 0.0 }
 0x9a8   : > { %v8344_v56 = vpop.permute.xlu1 %2665 }
 0x9a9   : > { %11571 = vst [vmem:[#allocation81_spill] sm:$0xff] %v8344_v56 }
 0x9ac   : > { %v8346_v48 = vpop.permute.xlu1 %2670 }
 0x9ad   : > { %11572 = vst [vmem:[#allocation62_spill] sm:$0xff] %v8346_v48 }
 0x9b0   : > { %v8348_v49 = vpop.permute.xlu1 %2680 }
 0x9b1   : > { %11573 = vst [vmem:[#allocation66_spill] sm:$0xff] %v8348_v49 }
 0x9b4   : > { %v8350_v22 = vpop.permute.xlu1 %2690 }
 0x9b5   : > { %11574 = vst [vmem:[#allocation85_spill] sm:$0xff] %v8350_v22  ;;  %v8377_v22 = vmul.f32 %v11582_v47, %v8371_v29 }
 0x9b7   : > { %v2977_v16 = vsel %vm1503_vm2, %v8377_v22, 0.0 }
 0x9b9   : > { %v8359_v61 = vpop.permute.xlu1 %2726 }
 0x9ba   : > { %11577 = vst [vmem:[#allocation67_spill] sm:$0xff] %v8359_v61 }
 0x9bd   : > { %v8373_v6 = vpop.permute.xlu1 %2730 }
 0x9be   : > { %11581 = vst [vmem:[#allocation74_spill] sm:$0xff] %v8373_v6 }
 0x9c1   : > { %v8381_v10 = vpop.permute.xlu1 %2738 }
 0x9c2   : > { %11583 = vst [vmem:[#allocation40_spill] sm:$0xff] %v8381_v10 }
 0x9c3   : > { %2963 = vadd.xlane.f32.xlu1 %v2962_v52 }
 0x9c5   : > { %v8385_v52 = vpop.permute.xlu1 %2746 }
 0x9c6   : > { %11584 = vst [vmem:[#allocation78_spill] sm:$0xff] %v8385_v52 }
 0x9c7   : > { %2972 = vadd.xlane.f32.xlu1 %v2971_v59 }
 0x9ca   : > { %v8387_v15 = vpop.permute.xlu1 %2754 }
 0x9cb   : > { %2978 = vadd.xlane.f32.xlu1 %v2977_v16  ;;  %11585 = vst [vmem:[#allocation68_spill] sm:$0xff] %v8387_v15 }
 0x9ce   : > { %v8389_v63 = vpop.permute.xlu1 %2758 }
 0x9cf   : > { %11586 = vst [vmem:[#allocation75_spill] sm:$0xff] %v8389_v63 }
 0x9d2   : > { %v8395_v47 = vpop.permute.xlu1 %2766 }
 0x9d3   : > { %11587 = vst [vmem:[#allocation41_spill] sm:$0xff] %v8395_v47 }
 0x9d6   : > { %v8399_v59 = vpop.permute.xlu1 %2774 }
 0x9d7   : > { %11588 = vst [vmem:[#allocation82_spill] sm:$0xff] %v8399_v59 }
 0x9db   : > { %v8403_v16 = vpop.permute.xlu1 %2782 }
 0x9dc   : > { %2989 = vrot.lane.b32.xlu1 %v8357_v30, %s6660_s19  ;;  %11589 = vst [vmem:[#allocation86_spill] sm:$0xff] %v8403_v16 }
 0x9df   : > { %v8405_v52 = vpop.permute.xlu1 %2786 }
 0x9e0   : > { %2991 = vrot.lane.b32.xlu1 %v7918_v54, %s6660_s19  ;;  %11590 = vst [vmem:[#allocation64_spill] sm:$0xff] %v8405_v52 }
 0x9e3   : > { %v8407_v3 = vpop.permute.xlu1 %2794 }
 0x9e4   : > { %2995 = vrot.lane.b32.xlu1 %v8366_v31, %s6660_s19  ;;  %11591 = vst [vmem:[#allocation69_spill] sm:$0xff] %v8407_v3 }
 0x9e7   : > { %v8409_v44 = vpop.permute.xlu1 %2802 }
 0x9e8   : > { %2999 = vrot.lane.b32.xlu1 %v8377_v22, %s6660_s19  ;;  %11592 = vst [vmem:[#allocation79_spill] sm:$0xff] %v8409_v44 }
 0x9ec   : > { %v8411_v25 = vpop.permute.xlu1 %2810 }
 0x9ed   : > { %11593 = vst [vmem:[#allocation91_spill] sm:$0xff] %v8411_v25 }
 0x9f0   : > { %v8413_v41 = vpop.permute.xlu1 %2814 }
 0x9f1   : > { %11594 = vst [vmem:[#allocation83_spill] sm:$0xff] %v8413_v41 }
 0x9f4   : > { %v8415_v24 = vpop.permute.xlu1 %2822 }
 0x9f5   : > { %11595 = vst [vmem:[#allocation87_spill] sm:$0xff] %v8415_v24 }
 0x9f8   : > { %v8417_v63 = vpop.permute.xlu1 %2830 }
 0x9f9   : > { %11596 = vst [vmem:[#allocation70_spill] sm:$0xff] %v8417_v63 }
 0x9fd   : > { %v8419_v59 = vpop.permute.xlu1 %2838 }
 0x9fe   : > { %11597 = vst [vmem:[#allocation90_spill] sm:$0xff] %v8419_v59 }
 0xa01   : > { %v8421_v6 = vpop.permute.xlu1 %2842 }
 0xa02   : > { %11598 = vst [vmem:[#allocation92_spill] sm:$0xff] %v8421_v6 }
 0xa05   : > { %v8423_v48 = vpop.permute.xlu1 %2850 }
 0xa06   : > { %11599 = vst [vmem:[#allocation71_spill] sm:$0xff] %v8423_v48  ;;  %v2994_v48 = vpop.permute.xlu0 %2993 }
 0xa09   : > { %v8425_v28 = vpop.permute.xlu1 %2858 }
 0xa0a   : > { %11600 = vst [vmem:[#allocation16_spill] sm:$0xff] %v8425_v28  ;;  %v2998_v10 = vpop.permute.xlu0 %2997 }
 0xa0b   : > { %v3023_v49 = vsel %vm1503_vm2, %v2998_v10, 0.0 }
 0xa0e   : > { %v8427_v52 = vpop.permute.xlu1 %2866 }
 0xa0f   : > { %11601 = vst [vmem:[#allocation24_spill] sm:$0xff] %v8427_v52 }
 0xa12   : > { %v8429_v9 = vpop.permute.xlu1 %2870 }
 0xa13   : > { %11602 = vst [vmem:[#allocation20_spill] sm:$0xff] %v8429_v9 }
 0xa16   : > { %v8431_v44 = vpop.permute.xlu1 %2878 }
 0xa17   : > { %11603 = vst [vmem:[#allocation25_spill] sm:$0xff] %v8431_v44 }
 0xa1a   : > { %v8433_v3 = vpop.permute.xlu1 %2886 }
 0xa1b   : > { %11604 = vst [vmem:[#allocation23_spill] sm:$0xff] %v8433_v3  ;;  %v3017_v3 = vsel %vm1503_vm2, %v2994_v48, 0.0 }
 0xa4c   : > { %v8435_v41 = vpop.xlane.xlu1 %2963 }
 0xa50   : > { %v8437_v24 = vpop.xlane.xlu1 %2972 }
 0xa51   : > { %11605 = vst [vmem:[#allocation26_spill] sm:$0xff] %v8437_v24 }
 0xa54   : > { %v8439_v63 = vpop.xlane.xlu1 %2978 }
 0xa55   : > { %11606 = vst [vmem:[#allocation93_spill] sm:$0xff] %v8439_v63 }
 0xa58   : > { %v2990_v47 = vpop.permute.xlu1 %2989 }
 0xa59   : > { %v3011_v6 = vsel %vm1503_vm2, %v2990_v47, 0.0 }
 0xa5a   : > { %3012 = vadd.xlane.f32.xlu1 %v3011_v6 }
 0xa5c   : > { %v2992_v28 = vpop.permute.xlu1 %2991 }
 0xa5d   : > { %v3014_v12 = vsel %vm1503_vm2, %v2992_v28, 0.0  ;;  %v8461_v28 = vpop.xlane.xlu0 %3009 }
 0xa5e   : > { %3015 = vadd.xlane.f32.xlu0 %v3014_v12 }
 0xa60   : > { %v2996_v9 = vpop.permute.xlu1 %2995 }
 0xa61   : > { %v3020_v44 = vsel %vm1503_vm2, %v2996_v9, 0.0 }
 0xa62   : > { %3021 = vadd.xlane.f32.xlu1 %v3020_v44  ;;  %3018 = vadd.xlane.f32.xlu0 %v3017_v3 }
 0xa64   : > { %v3000_v24 = vpop.permute.xlu1 %2999 }
 0xa65   : > { %v3026_v63 = vsel %vm1503_vm2, %v3000_v24, 0.0 }
 0xa66   : > { %3027 = vadd.xlane.f32.xlu1 %v3026_v63  ;;  %3024 = vadd.xlane.f32.xlu0 %v3023_v49 }
 0xa77   : > { %3031 = vrot.lane.b32.xlu1 %v8357_v30, %s6661_s20 }
 0xa7b   : > { %3033 = vrot.lane.b32.xlu1 %v7918_v54, %s6661_s20 }
 0xa7c   : > { %3029 = vrot.lane.b32.xlu0 %v7910_v33, %s6661_s20 }
 0xa7f   : > { %3037 = vrot.lane.b32.xlu1 %v8366_v31, %s6661_s20 }
 0xa80   : > { %3035 = vrot.lane.b32.xlu0 %v7927_v46, %s6661_s20 }
 0xa83   : > { %3041 = vrot.lane.b32.xlu1 %v8377_v22, %s6661_s20 }
 0xa84   : > { %3039 = vrot.lane.b32.xlu0 %v7936_v39, %s6661_s20 }
 0xae3   : > { %v8463_v49 = vpop.xlane.xlu1 %3012 }
 0xae7   : > { %v8465_v48 = vpop.xlane.xlu0 %3015 }
 0xae8   : > { %11607 = vst [vmem:[#allocation94_spill] sm:$0xff] %v8465_v48 }
 0xaeb   : > { %v8467_v24 = vpop.xlane.xlu1 %3021  ;;  %v8469_v6 = vpop.xlane.xlu0 %3018 }
 0xaec   : > { %11608 = vst [vmem:[#allocation95_spill] sm:$0xff] %v8467_v24  ;;  %11609 = vst [vmem:[#allocation96_spill] sm:$0xff] %v8469_v6 }
 0xaef   : > { %v8471_v44 = vpop.xlane.xlu1 %3027  ;;  %v8473_v3 = vpop.xlane.xlu0 %3024 }
 0xaf0   : > { %11610 = vst [vmem:[#allocation97_spill] sm:$0xff] %v8471_v44  ;;  %11611 = vst [vmem:[#allocation98_spill] sm:$0xff] %v8473_v3 }
 0xaf3   : > { %v3032_v63 = vpop.permute.xlu1 %3031  ;;  %v3030_v12 = vpop.permute.xlu0 %3029 }
 0xaf4   : > { %v3053_v10 = vsel %vm1503_vm2, %v3032_v63, 0.0  ;;  %v3050_v9 = vsel %vm1503_vm2, %v3030_v12, 0.0 }
 0xaf5   : > { %3054 = vadd.xlane.f32.xlu1 %v3053_v10  ;;  %3051 = vadd.xlane.f32.xlu0 %v3050_v9 }
 0xaf7   : > { %v3034_v47 = vpop.permute.xlu1 %3033  ;;  %v3036_v52 = vpop.permute.xlu0 %3035 }
 0xaf8   : > { %v3056_v26 = vsel %vm1503_vm2, %v3034_v47, 0.0  ;;  %v3059_v44 = vsel %vm1503_vm2, %v3036_v52, 0.0 }
 0xaf9   : > { %3057 = vadd.xlane.f32.xlu0 %v3056_v26 }
 0xafb   : > { %v3038_v24 = vpop.permute.xlu1 %3037  ;;  %v3040_v2 = vpop.permute.xlu0 %3039 }
 0xafc   : > { %v3062_v59 = vsel %vm1503_vm2, %v3038_v24, 0.0  ;;  %v3065_v12 = vsel %vm1503_vm2, %v3040_v2, 0.0 }
 0xafd   : > { %3063 = vadd.xlane.f32.xlu1 %v3062_v59  ;;  %3060 = vadd.xlane.f32.xlu0 %v3059_v44 }
 0xaff   : > { %v3042_v25 = vpop.permute.xlu1 %3041 }
 0xb00   : > { %v3068_v63 = vsel %vm1503_vm2, %v3042_v25, 0.0 }
 0xb01   : > { %3069 = vadd.xlane.f32.xlu1 %v3068_v63  ;;  %3066 = vadd.xlane.f32.xlu0 %v3065_v12 }
 0xb12   : > { %3073 = vrot.lane.b32.xlu1 %v8357_v30, %s6662_s14 }
 0xb16   : > { %3075 = vrot.lane.b32.xlu1 %v7918_v54, %s6662_s14 }
 0xb17   : > { %3071 = vrot.lane.b32.xlu0 %v7910_v33, %s6662_s14 }
 0xb1a   : > { %3079 = vrot.lane.b32.xlu1 %v8366_v31, %s6662_s14 }
 0xb1b   : > { %3077 = vrot.lane.b32.xlu0 %v7927_v46, %s6662_s14 }
 0xb1e   : > { %3083 = vrot.lane.b32.xlu1 %v8377_v22, %s6662_s14 }
 0xb1f   : > { %3081 = vrot.lane.b32.xlu0 %v7936_v39, %s6662_s14 }
 0xb7e   : > { %v8496_v25 = vpop.xlane.xlu0 %3051  ;;  %v8498_v26 = vpop.xlane.xlu1 %3054 }
 0xb82   : > { %v8500_v2 = vpop.xlane.xlu0 %3057 }
 0xb83   : > { %11612 = vst [vmem:[#allocation99_spill] sm:$0xff] %v8500_v2 }
 0xb86   : > { %v8502_v52 = vpop.xlane.xlu1 %3063  ;;  %v8504_v59 = vpop.xlane.xlu0 %3060 }
 0xb87   : > { %11613 = vst [vmem:[#allocation100_spill] sm:$0xff] %v8502_v52  ;;  %11614 = vst [vmem:[#allocation101_spill] sm:$0xff] %v8504_v59 }
 0xb8a   : > { %v8506_v24 = vpop.xlane.xlu1 %3069  ;;  %v8508_v44 = vpop.xlane.xlu0 %3066 }
 0xb8b   : > { %11615 = vst [vmem:[#allocation102_spill] sm:$0xff] %v8506_v24  ;;  %11616 = vst [vmem:[#allocation103_spill] sm:$0xff] %v8508_v44 }
 0xb8e   : > { %v3074_v10 = vpop.permute.xlu1 %3073  ;;  %v3072_v9 = vpop.permute.xlu0 %3071 }
 0xb8f   : > { %v3095_v47 = vsel %vm1503_vm2, %v3074_v10, 0.0  ;;  %v3092_v63 = vsel %vm1503_vm2, %v3072_v9, 0.0 }
 0xb90   : > { %3096 = vadd.xlane.f32.xlu1 %v3095_v47  ;;  %3093 = vadd.xlane.f32.xlu0 %v3092_v63 }
 0xb92   : > { %v3076_v12 = vpop.permute.xlu1 %3075  ;;  %v3078_v16 = vpop.permute.xlu0 %3077 }
 0xb93   : > { %v3098_v37 = vsel %vm1503_vm2, %v3076_v12, 0.0  ;;  %v3101_v24 = vsel %vm1503_vm2, %v3078_v16, 0.0 }
 0xb94   : > { %3099 = vadd.xlane.f32.xlu0 %v3098_v37 }
 0xb96   : > { %v3080_v52 = vpop.permute.xlu1 %3079  ;;  %v3082_v57 = vpop.permute.xlu0 %3081 }
 0xb97   : > { %v3104_v15 = vsel %vm1503_vm2, %v3080_v52, 0.0  ;;  %v3107_v9 = vsel %vm1503_vm2, %v3082_v57, 0.0 }
 0xb98   : > { %3105 = vadd.xlane.f32.xlu1 %v3104_v15  ;;  %3102 = vadd.xlane.f32.xlu0 %v3101_v24  ;;  %v11619_v15 = vld [vmem:[#allocation29_spill] sm:$0xff] }
 0xb99   : > { %v8561_v16 = vmul.f32 %v11619_v15, %v7914_v55  ;;  %v11620_v55 = vld [vmem:[#allocation31_spill] sm:$0xff] }
 0xb9a   : > { %v3084_v61 = vpop.permute.xlu1 %3083 }
 0xb9b   : > { %v3110_v10 = vsel %vm1503_vm2, %v3084_v61, 0.0  ;;  %v11617_v61 = vld [vmem:[#allocation27_spill] sm:$0xff] }
 0xb9c   : > { %3111 = vadd.xlane.f32.xlu1 %v3110_v10  ;;  %3108 = vadd.xlane.f32.xlu0 %v3107_v9  ;;  %v8533_v37 = vmul.f32 %v11617_v61, %v7906_v19  ;;  %v11618_v19 = vld [vmem:[#allocation28_spill] sm:$0xff] }
 0xb9d   : > { %v8555_v57 = vmul.f32 %v11618_v19, %v8353_v35  ;;  %v8587_v35 = vmul.f32 %v11620_v55, %v8362_v32  ;;  %v11622_v32 = vld [vmem:[#allocation30_spill] sm:$0xff] }
 0xb9e   : > { %v8605_v47 = vmul.f32 %v11622_v32, %v7923_v20 }
 0xbad   : > { %3115 = vrot.lane.b32.xlu1 %v8357_v30, %s6663_s13 }
 0xbb1   : > { %3117 = vrot.lane.b32.xlu1 %v7918_v54, %s6663_s13 }
 0xbb2   : > { %3113 = vrot.lane.b32.xlu0 %v7910_v33, %s6663_s13 }
 0xbb5   : > { %3121 = vrot.lane.b32.xlu1 %v8366_v31, %s6663_s13 }
 0xbb6   : > { %3119 = vrot.lane.b32.xlu0 %v7927_v46, %s6663_s13 }
 0xbb9   : > { %3125 = vrot.lane.b32.xlu1 %v8377_v22, %s6663_s13 }
 0xbba   : > { %3123 = vrot.lane.b32.xlu0 %v7936_v39, %s6663_s13 }
 0xbbd   : > { %3365 = vrot.lane.b32.xlu1 %v8533_v37, %s6660_s19 }
 0xbc1   : > { %3407 = vrot.lane.b32.xlu1 %v8533_v37, %s6661_s20 }
 0xbc5   : > { %3449 = vrot.lane.b32.xlu1 %v8533_v37, %s6662_s14 }
 0xbc9   : > { %3491 = vrot.lane.b32.xlu1 %v8533_v37, %s6663_s13 }
 0xbcd   : > { %3155 = vrot.lane.b32.xlu1 %v7910_v33, %s6664_s1 }
 0xbd1   : > { %3533 = vrot.lane.b32.xlu1 %v8533_v37, %s6664_s1 }
 0xbd5   : > { %3197 = vrot.lane.b32.xlu1 %v7910_v33, %s6665_s15 }
 0xbd9   : > { %3575 = vrot.lane.b32.xlu1 %v8533_v37, %s6665_s15 }
 0xbdd   : > { %3617 = vrot.lane.b32.xlu1 %v8533_v37, %s6666_s7 }
 0xbe1   : > { %3367 = vrot.lane.b32.xlu1 %v8555_v57, %s6660_s19 }
 0xbe5   : > { %3369 = vrot.lane.b32.xlu1 %v8561_v16, %s6660_s19 }
 0xbe9   : > { %3409 = vrot.lane.b32.xlu1 %v8555_v57, %s6661_s20 }
 0xbed   : > { %3411 = vrot.lane.b32.xlu1 %v8561_v16, %s6661_s20 }
 0xbf1   : > { %3453 = vrot.lane.b32.xlu1 %v8561_v16, %s6662_s14 }
 0xbf5   : > { %3157 = vrot.lane.b32.xlu1 %v8357_v30, %s6664_s1 }
 0xbf9   : > { %3535 = vrot.lane.b32.xlu1 %v8555_v57, %s6664_s1 }
 0xbfd   : > { %3199 = vrot.lane.b32.xlu1 %v8357_v30, %s6665_s15 }
 0xc01   : > { %3577 = vrot.lane.b32.xlu1 %v8555_v57, %s6665_s15 }
 0xc05   : > { %3241 = vrot.lane.b32.xlu1 %v8357_v30, %s6666_s7 }
 0xc09   : > { %3619 = vrot.lane.b32.xlu1 %v8555_v57, %s6666_s7 }
 0xc0d   : > { %3621 = vrot.lane.b32.xlu1 %v8561_v16, %s6666_s7 }
 0xc11   : > { %3373 = vrot.lane.b32.xlu1 %v8587_v35, %s6660_s19 }
 0xc15   : > { %3415 = vrot.lane.b32.xlu1 %v8587_v35, %s6661_s20 }
 0xc19   : > { %3457 = vrot.lane.b32.xlu1 %v8587_v35, %s6662_s14  ;;  %v8595_v30 = vpop.xlane.xlu0 %3093  ;;  %v8597_v52 = vpop.xlane.xlu1 %3096 }
 0xc1d   : > { %3161 = vrot.lane.b32.xlu1 %v7927_v46, %s6664_s1  ;;  %v8601_v24 = vpop.xlane.xlu0 %3099 }
 0xc1e   : > { %11621 = vst [vmem:[#allocation27_spill] sm:$0xff] %v8601_v24 }
 0xc21   : > { %3539 = vrot.lane.b32.xlu1 %v8605_v47, %s6664_s1  ;;  %v8609_v63 = vpop.xlane.xlu1 %3105  ;;  %v8611_v12 = vpop.xlane.xlu0 %3102 }
 0xc22   : > { %11623 = vst [vmem:[#allocation28_spill] sm:$0xff] %v8609_v63  ;;  %11624 = vst [vmem:[#allocation29_spill] sm:$0xff] %v8611_v12 }
 0xc25   : > { %3203 = vrot.lane.b32.xlu1 %v7927_v46, %s6665_s15  ;;  %v8615_v10 = vpop.xlane.xlu1 %3111  ;;  %v8617_v9 = vpop.xlane.xlu0 %3108 }
 0xc26   : > { %11625 = vst [vmem:[#allocation31_spill] sm:$0xff] %v8615_v10  ;;  %11626 = vst [vmem:[#allocation30_spill] sm:$0xff] %v8617_v9  ;;  %v11627_v10 = vld [vmem:[#allocation33_spill] sm:$0xff] }
 0xc27   : > { %v8638_v63 = vmul.f32 %v11627_v10, %v8371_v29  ;;  %v11628_v10 = vld [vmem:[#allocation32_spill] sm:$0xff] }
 0xc28   : > { %v8658_v56 = vmul.f32 %v11628_v10, %v7932_v27 }
 0xc29   : > { %3581 = vrot.lane.b32.xlu1 %v8605_v47, %s6665_s15  ;;  %v8621_v61 = vpop.permute.xlu1 %3115  ;;  %v3114_v20 = vpop.permute.xlu0 %3113 }
 0xc2a   : > { %v3134_v19 = vsel %vm1503_vm2, %v3114_v20, 0.0 }
 0xc2b   : > { %3135 = vadd.xlane.f32.xlu0 %v3134_v19 }
 0xc2d   : > { %3245 = vrot.lane.b32.xlu1 %v7927_v46, %s6666_s7  ;;  %v8626_v15 = vpop.permute.xlu1 %3117 }
 0xc31   : > { %3623 = vrot.lane.b32.xlu1 %v8605_v47, %s6666_s7  ;;  %v8630_v55 = vpop.permute.xlu1 %3121 }
 0xc35   : > { %3625 = vrot.lane.b32.xlu1 %v8587_v35, %s6666_s7  ;;  %v8634_v32 = vpop.permute.xlu1 %3125 }
 0xc39   : > { %3377 = vrot.lane.b32.xlu1 %v8638_v63, %s6660_s19  ;;  %v3366_v46 = vpop.permute.xlu1 %3365 }
 0xc3a   : > { %v3386_v13 = vsel %vm1503_vm2, %v3366_v46, 0.0 }
 0xc3d   : > { %3419 = vrot.lane.b32.xlu1 %v8638_v63, %s6661_s20  ;;  %v8644_v20 = vpop.permute.xlu1 %3407 }
 0xc41   : > { %3461 = vrot.lane.b32.xlu1 %v8638_v63, %s6662_s14  ;;  %v8648_v19 = vpop.permute.xlu1 %3449  ;;  %3239 = vrot.lane.b32.xlu0 %v7910_v33, %s6666_s7 }
 0xc45   : > { %3165 = vrot.lane.b32.xlu1 %v7936_v39, %s6664_s1  ;;  %v3492_v29 = vpop.permute.xlu1 %3491  ;;  %3451 = vrot.lane.b32.xlu0 %v8555_v57, %s6662_s14 }
 0xc46   : > { %v3512_v51 = vsel %vm1503_vm2, %v3492_v29, 0.0 }
 0xc49   : > { %3543 = vrot.lane.b32.xlu1 %v8658_v56, %s6664_s1  ;;  %v8662_v53 = vpop.permute.xlu1 %3155  ;;  %3493 = vrot.lane.b32.xlu0 %v8555_v57, %s6663_s13 }
 0xc4d   : > { %3207 = vrot.lane.b32.xlu1 %v7936_v39, %s6665_s15  ;;  %v3534_v33 = vpop.permute.xlu1 %3533  ;;  %3495 = vrot.lane.b32.xlu0 %v8561_v16, %s6663_s13 }
 0xc4e   : > { %v3554_v18 = vsel %vm1503_vm2, %v3534_v33, 0.0 }
 0xc51   : > { %3585 = vrot.lane.b32.xlu1 %v8658_v56, %s6665_s15  ;;  %v8672_v27 = vpop.permute.xlu1 %3197  ;;  %3159 = vrot.lane.b32.xlu0 %v7918_v54, %s6664_s1 }
 0xc55   : > { %3249 = vrot.lane.b32.xlu1 %v7936_v39, %s6666_s7  ;;  %v3576_v10 = vpop.permute.xlu1 %3575  ;;  %3537 = vrot.lane.b32.xlu0 %v8561_v16, %s6664_s1 }
 0xc56   : > { %v3596_v46 = vsel %vm1503_vm2, %v3576_v10, 0.0 }
 0xc59   : > { %3627 = vrot.lane.b32.xlu1 %v8658_v56, %s6666_s7  ;;  %v3618_v5 = vpop.permute.xlu1 %3617  ;;  %3201 = vrot.lane.b32.xlu0 %v7918_v54, %s6665_s15 }
 0xc5a   : > { %v3638_v29 = vsel %vm1503_vm2, %v3618_v5, 0.0 }
 0xc5d   : > { %3629 = vrot.lane.b32.xlu1 %v8638_v63, %s6666_s7  ;;  %v3368_v9 = vpop.permute.xlu1 %3367  ;;  %3579 = vrot.lane.b32.xlu0 %v8561_v16, %s6665_s15 }
 0xc61   : > { %v3370_v7 = vpop.permute.xlu1 %3369  ;;  %3243 = vrot.lane.b32.xlu0 %v7918_v54, %s6666_s7 }
 0xc65   : > { %v8690_v39 = vpop.permute.xlu1 %3409  ;;  %3371 = vrot.lane.b32.xlu0 %v8605_v47, %s6660_s19 }
 0xc69   : > { %3413 = vrot.lane.b32.xlu0 %v8605_v47, %s6661_s20  ;;  %v3412_v44 = vpop.permute.xlu1 %3411 }
 0xc6a   : > { %v3434_v5 = vsel %vm1503_vm2, %v3412_v44, 0.0  ;;  %v8744_v44 = vpop.permute.xlu0 %3119 }
 0xc6d   : > { %3455 = vrot.lane.b32.xlu0 %v8605_v47, %s6662_s14  ;;  %v8698_v36 = vpop.permute.xlu1 %3453 }
 0xc71   : > { %3497 = vrot.lane.b32.xlu0 %v8605_v47, %s6663_s13  ;;  %v3158_v54 = vpop.permute.xlu1 %3157 }
 0xc75   : > { %3499 = vrot.lane.b32.xlu0 %v8587_v35, %s6663_s13  ;;  %v3536_v3 = vpop.permute.xlu1 %3535 }
 0xc76   : > { %v3557_v40 = vsel %vm1503_vm2, %v3536_v3, 0.0  ;;  %v3428_v3 = vsel %vm1503_vm2, %v8644_v20, 0.0  ;;  %v3176_v20 = vsel %vm1503_vm2, %v8662_v53, 0.0 }
 0xc79   : > { %3163 = vrot.lane.b32.xlu0 %v8366_v31, %s6664_s1  ;;  %v3200_v58 = vpop.permute.xlu1 %3199 }
 0xc7a   : > { %v3221_v62 = vsel %vm1503_vm2, %v3200_v58, 0.0 }
 0xc7d   : > { %3541 = vrot.lane.b32.xlu0 %v8587_v35, %s6664_s1  ;;  %v3578_v50 = vpop.permute.xlu1 %3577 }
 0xc81   : > { %3387 = vadd.xlane.f32.xlu1 %v3386_v13  ;;  %3205 = vrot.lane.b32.xlu0 %v8366_v31, %s6665_s15  ;;  %v3242_v13 = vpop.permute.xlu1 %3241 }
 0xc85   : > { %3513 = vadd.xlane.f32.xlu1 %v3512_v51  ;;  %3583 = vrot.lane.b32.xlu0 %v8587_v35, %s6665_s15  ;;  %v3389_v51 = vsel %vm1503_vm2, %v3368_v9, 0.0  ;;  %v3620_v33 = vpop.permute.xlu1 %3619  ;;  %v3137_v9 = vsel %vm1503_vm2, %v8621_v61, 0.0  ;;  %v8750_v61 = vpop.permute.xlu0 %3123 }
 0xc89   : > { %3555 = vadd.xlane.f32.xlu1 %v3554_v18  ;;  %3247 = vrot.lane.b32.xlu0 %v8366_v31, %s6666_s7  ;;  %v3392_v18 = vsel %vm1503_vm2, %v3370_v7, 0.0  ;;  %v3622_v31 = vpop.permute.xlu1 %3621 }
 0xc8d   : > { %3597 = vadd.xlane.f32.xlu1 %v3596_v46  ;;  %3375 = vrot.lane.b32.xlu0 %v8658_v56, %s6660_s19  ;;  %v8734_v10 = vpop.permute.xlu1 %3373 }
 0xc91   : > { %3639 = vadd.xlane.f32.xlu1 %v3638_v29  ;;  %3417 = vrot.lane.b32.xlu0 %v8658_v56, %s6661_s20  ;;  %v8740_v7 = vpop.permute.xlu1 %3415 }
 0xc95   : > { %3390 = vadd.xlane.f32.xlu1 %v3389_v51  ;;  %3459 = vrot.lane.b32.xlu0 %v8658_v56, %s6662_s14  ;;  %v8746_v46 = vpop.permute.xlu1 %3457 }
 0xc99   : > { %3393 = vadd.xlane.f32.xlu1 %v3392_v18  ;;  %3501 = vrot.lane.b32.xlu0 %v8658_v56, %s6663_s13  ;;  %v8754_v29 = vpop.permute.xlu1 %3161 }
 0xc9d   : > { %3435 = vadd.xlane.f32.xlu1 %v3434_v5  ;;  %3503 = vrot.lane.b32.xlu0 %v8638_v63, %s6663_s13  ;;  %v8758_v5 = vpop.permute.xlu1 %3539 }
 0xca1   : > { %3138 = vadd.xlane.f32.xlu1 %v3137_v9  ;;  %3167 = vrot.lane.b32.xlu0 %v8377_v22, %s6664_s1  ;;  %v8762_v12 = vpop.permute.xlu1 %3203 }
 0xca5   : > { %3545 = vrot.lane.b32.xlu0 %v8638_v63, %s6664_s1  ;;  %v8767_v24 = vpop.permute.xlu1 %3581 }
 0xca9   : > { %3209 = vrot.lane.b32.xlu0 %v8377_v22, %s6665_s15  ;;  %v8773_v48 = vpop.permute.xlu1 %3245 }
 0xcad   : > { %3587 = vrot.lane.b32.xlu0 %v8638_v63, %s6665_s15 }
 0xcb1   : > { %3251 = vrot.lane.b32.xlu0 %v8377_v22, %s6666_s7  ;;  %v3179_v22 = vsel %vm1503_vm2, %v3158_v54, 0.0 }
 0xcb4   : > { %v8756_v51 = vpop.xlane.xlu0 %3135 }
 0xcb8   : > { %v3240_v18 = vpop.permute.xlu0 %3239 }
 0xcb9   : > { %v3260_v53 = vsel %vm1503_vm2, %v3240_v18, 0.0  ;;  %v3343_v18 = vsel %vm1503_vm2, %v8561_v16, 0.0 }
 0xcbc   : > { %v8760_v9 = vpop.permute.xlu0 %3451 }
 0xcbd   : > { %v3473_v16 = vsel %vm1503_vm2, %v8760_v9, 0.0 }
 0xcc0   : > { %v3494_v59 = vpop.permute.xlu0 %3493 }
 0xcc1   : > { %v3515_v8 = vsel %vm1503_vm2, %v3494_v59, 0.0  ;;  %v11343_v59 = vmov 1  }
 0xcc2   : > { %3516 = vadd.xlane.f32.xlu1 %v3515_v8  ;;  %v3337_v8 = vsel %vm1503_vm2, %v8533_v37, 0.0  ;;  %v3470_v37 = vsel %vm1503_vm2, %v8648_v19, 0.0 }
 0xcc3   : > { %6342 = vset.pattern.permute.xlu1 %v11343_v59  ;;  %v3263_v59 = vsel %vm1503_vm2, %v3242_v13, 0.0  ;;  %v3644_v13 = vsel %vm1503_vm2, %v3622_v31, 0.0  ;;  %v3398_v31 = vsel %vm1503_vm2, %v8734_v10, 0.0  ;;  %v3143_v10 = vsel %vm1503_vm2, %v8744_v44, 0.0 }
 0xcc4   : > { %v8765_v6 = vpop.permute.xlu0 %3495  ;;  %v3185_v44 = vsel %vm1503_vm2, %v8754_v29, 0.0  ;;  %v3227_v29 = vsel %vm1503_vm2, %v8762_v12, 0.0 }
 0xcc6   : > { %3180 = vadd.xlane.f32.xlu1 %v3179_v22  ;;  %v8783_v22 = vpop.permute.xlu1 %3623 }
 0xcc8   : > { %v8770_v2 = vpop.permute.xlu0 %3159 }
 0xcca   : > { %3558 = vadd.xlane.f32.xlu1 %v3557_v40  ;;  %v3599_v40 = vsel %vm1503_vm2, %v3578_v50, 0.0  ;;  %v3641_v50 = vsel %vm1503_vm2, %v3620_v33, 0.0 }
 0xccc   : > { %v8775_v17 = vpop.permute.xlu0 %3537 }
 0xcce   : > { %3222 = vadd.xlane.f32.xlu1 %v3221_v62  ;;  %v8791_v62 = vpop.permute.xlu1 %3625 }
 0xcd0   : > { %3338 = vadd.xlane.f32.xlu0 %v3337_v8  ;;  %v8781_v54 = vpop.permute.xlu0 %3201 }
 0xcd2   : > { %3600 = vadd.xlane.f32.xlu1 %v3599_v40 }
 0xcd4   : > { %3429 = vadd.xlane.f32.xlu0 %v3428_v3  ;;  %v8788_v58 = vpop.permute.xlu0 %3579  ;;  %v8800_v3 = vpop.permute.xlu1 %3377 }
 0xcd6   : > { %3264 = vadd.xlane.f32.xlu1 %v3263_v59  ;;  %v3218_v59 = vsel %vm1503_vm2, %v8672_v27, 0.0  ;;  %v3340_v27 = vsel %vm1503_vm2, %v8555_v57, 0.0  ;;  %v3431_v57 = vsel %vm1503_vm2, %v8690_v39, 0.0  ;;  %v3476_v39 = vsel %vm1503_vm2, %v8698_v36, 0.0 }
 0xcd7   : > { %v3518_v36 = vsel %vm1503_vm2, %v8765_v6, 0.0  ;;  %v3560_v6 = vsel %vm1503_vm2, %v8775_v17, 0.0 }
 0xcd8   : > { %3471 = vadd.xlane.f32.xlu0 %v3470_v37  ;;  %v8795_v8 = vpop.permute.xlu0 %3243  ;;  %v8808_v33 = vpop.permute.xlu1 %3419 }
 0xcda   : > { %3642 = vadd.xlane.f32.xlu1 %v3641_v50 }
 0xcdc   : > { %3177 = vadd.xlane.f32.xlu0 %v3176_v20  ;;  %v3372_v40 = vpop.permute.xlu0 %3371 }
 0xcdd   : > { %v3395_v37 = vsel %vm1503_vm2, %v3372_v40, 0.0  ;;  %v3440_v40 = vsel %vm1503_vm2, %v8740_v7, 0.0 }
 0xcde   : > { %3645 = vadd.xlane.f32.xlu1 %v3644_v13  ;;  %v8817_v13 = vpop.permute.xlu1 %3461 }
 0xce0   : > { %3219 = vadd.xlane.f32.xlu0 %v3218_v59  ;;  %v8805_v19 = vpop.permute.xlu0 %3413 }
 0xce2   : > { %3396 = vadd.xlane.f32.xlu1 %v3395_v37  ;;  %v8827_v37 = vpop.permute.xlu1 %3165 }
 0xce4   : > { %3261 = vadd.xlane.f32.xlu0 %v3260_v53  ;;  %v8811_v50 = vpop.permute.xlu0 %3455 }
 0xce6   : > { %3399 = vadd.xlane.f32.xlu1 %v3398_v31 }
 0xce8   : > { %3341 = vadd.xlane.f32.xlu0 %v3340_v27  ;;  %v3498_v20 = vpop.permute.xlu0 %3497  ;;  %v8838_v27 = vpop.permute.xlu1 %3543 }
 0xce9   : > { %v3521_v7 = vsel %vm1503_vm2, %v3498_v20, 0.0  ;;  %v3563_v20 = vsel %vm1503_vm2, %v8758_v5, 0.0 }
 0xcea   : > { %3441 = vadd.xlane.f32.xlu1 %v3440_v40 }
 0xcec   : > { %3344 = vadd.xlane.f32.xlu0 %v3343_v18  ;;  %v8823_v59 = vpop.permute.xlu0 %3499  ;;  %v8848_v9 = vpop.permute.xlu1 %3207  ;;  %v3140_v18 = vsel %vm1503_vm2, %v8626_v15, 0.0  ;;  %v3269_v15 = vsel %vm1503_vm2, %v8773_v48, 0.0  ;;  %v3650_v48 = vsel %vm1503_vm2, %v8791_v62, 0.0 }
 0xcee   : > { %3144 = vadd.xlane.f32.xlu1 %v3143_v10 }
 0xcf0   : > { %3432 = vadd.xlane.f32.xlu0 %v3431_v57  ;;  %v8831_v53 = vpop.permute.xlu0 %3163  ;;  %v3586_v5 = vpop.permute.xlu1 %3585  ;;  %v3605_v57 = vsel %vm1503_vm2, %v8767_v24, 0.0  ;;  %v3224_v24 = vsel %vm1503_vm2, %v8781_v54, 0.0  ;;  %v3266_v54 = vsel %vm1503_vm2, %v8795_v8, 0.0  ;;  %v3349_v8 = vsel %vm1503_vm2, %v8587_v35, 0.0 }
 0xcf1   : > { %v3479_v35 = vsel %vm1503_vm2, %v8811_v50, 0.0  ;;  %v3233_v50 = vsel %vm1503_vm2, %v8848_v9, 0.0 }
 0xcf2   : > { %3522 = vadd.xlane.f32.xlu1 %v3521_v7  ;;  %v3182_v7 = vsel %vm1503_vm2, %v8770_v2, 0.0 }
 0xcf4   : > { %3474 = vadd.xlane.f32.xlu0 %v3473_v16  ;;  %v8836_v31 = vpop.permute.xlu0 %3541  ;;  %v3250_v16 = vpop.permute.xlu1 %3249 }
 0xcf6   : > { %3186 = vadd.xlane.f32.xlu1 %v3185_v44  ;;  %v3647_v44 = vsel %vm1503_vm2, %v8783_v22, 0.0 }
 0xcf8   : > { %3477 = vadd.xlane.f32.xlu0 %v3476_v39  ;;  %v8846_v40 = vpop.permute.xlu0 %3205  ;;  %v3628_v39 = vpop.permute.xlu1 %3627 }
 0xcfa   : > { %3564 = vadd.xlane.f32.xlu1 %v3563_v20  ;;  %v3602_v20 = vsel %vm1503_vm2, %v8788_v58, 0.0  ;;  %v3346_v58 = vsel %vm1503_vm2, %v8605_v47, 0.0  ;;  %v3437_v47 = vsel %vm1503_vm2, %v8805_v19, 0.0  ;;  %v3569_v19 = vsel %vm1503_vm2, %v8838_v27, 0.0 }
 0xcfb   : > { %v3188_v27 = vsel %vm1503_vm2, %v8831_v53, 0.0 }
 0xcfc   : > { %3141 = vadd.xlane.f32.xlu0 %v3140_v18  ;;  %v8856_v10 = vpop.permute.xlu0 %3583  ;;  %v3630_v22 = vpop.permute.xlu1 %3629 }
 0xcfe   : > { %3228 = vadd.xlane.f32.xlu1 %v3227_v29  ;;  %v3404_v29 = vsel %vm1503_vm2, %v8800_v3, 0.0  ;;  %v3149_v3 = vsel %vm1503_vm2, %v8750_v61, 0.0  ;;  %v3482_v61 = vsel %vm1503_vm2, %v8746_v46, 0.0  ;;  %v3524_v46 = vsel %vm1503_vm2, %v8823_v59, 0.0 }
 0xcff   : > { %v3653_v59 = vsel %vm1503_vm2, %v3628_v39, 0.0 }
 0xd00   : > { %3519 = vadd.xlane.f32.xlu0 %v3518_v36  ;;  %v8864_v12 = vpop.permute.xlu0 %3247 }
 0xd01   : > { %v3272_v39 = vsel %vm1503_vm2, %v8864_v12, 0.0 }
 0xd02   : > { %3606 = vadd.xlane.f32.xlu1 %v3605_v57  ;;  %v3446_v57 = vsel %vm1503_vm2, %v8808_v33, 0.0 }
 0xd04   : > { %3183 = vadd.xlane.f32.xlu0 %v3182_v7  ;;  %v3376_v2 = vpop.permute.xlu0 %3375 }
 0xd05   : > { %v3401_v17 = vsel %vm1503_vm2, %v3376_v2, 0.0  ;;  %v3146_v2 = vsel %vm1503_vm2, %v8630_v55, 0.0  ;;  %v3275_v55 = vsel %vm1503_vm2, %v3250_v16, 0.0  ;;  %v3608_v16 = vsel %vm1503_vm2, %v8856_v10, 0.0 }
 0xd06   : > { %3270 = vadd.xlane.f32.xlu1 %v3269_v15  ;;  %v3355_v10 = vsel %vm1503_vm2, %v8638_v63, 0.0 }
 0xd08   : > { %3561 = vadd.xlane.f32.xlu0 %v3560_v6  ;;  %v8877_v18 = vpop.permute.xlu0 %3417 }
 0xd0a   : > { %3648 = vadd.xlane.f32.xlu1 %v3647_v44  ;;  %v8883_v62 = vpop.xlane.xlu1 %3387  ;;  %v3191_v44 = vsel %vm1503_vm2, %v8827_v37, 0.0 }
 0xd0c   : > { %3225 = vadd.xlane.f32.xlu0 %v3224_v24  ;;  %v8887_v36 = vpop.permute.xlu0 %3459 }
 0xd0d   : > { %v3485_v63 = vsel %vm1503_vm2, %v8887_v36, 0.0 }
 0xd0e   : > { %3651 = vadd.xlane.f32.xlu1 %v3650_v48  ;;  %v8893_v7 = vpop.xlane.xlu1 %3513  ;;  %v3611_v48 = vsel %vm1503_vm2, %v3586_v5, 0.0  ;;  %v3230_v5 = vsel %vm1503_vm2, %v8846_v40, 0.0  ;;  %v3352_v40 = vsel %vm1503_vm2, %v8658_v56, 0.0  ;;  %v3443_v56 = vsel %vm1503_vm2, %v8877_v18, 0.0 }
 0xd10   : > { %3603 = vadd.xlane.f32.xlu0 %v3602_v20  ;;  %v3502_v15 = vpop.permute.xlu0 %3501 }
 0xd11   : > { %v3527_v6 = vsel %vm1503_vm2, %v3502_v15, 0.0 }
 0xd12   : > { %3402 = vadd.xlane.f32.xlu1 %v3401_v17  ;;  %v8900_v33 = vpop.xlane.xlu1 %3555  ;;  %v3566_v17 = vsel %vm1503_vm2, %v8836_v31, 0.0 }
 0xd14   : > { %3267 = vadd.xlane.f32.xlu0 %v3266_v54  ;;  %v3504_v9 = vpop.permute.xlu0 %3503 }
 0xd16   : > { %3405 = vadd.xlane.f32.xlu1 %v3404_v29  ;;  %v8908_v24 = vpop.xlane.xlu1 %3597  ;;  %v3656_v29 = vsel %vm1503_vm2, %v3630_v22, 0.0 }
 0xd18   : > { %3347 = vadd.xlane.f32.xlu0 %v3346_v58  ;;  %v3168_v53 = vpop.permute.xlu0 %3167 }
 0xd1a   : > { %3447 = vadd.xlane.f32.xlu1 %v3446_v57  ;;  %v8916_v37 = vpop.xlane.xlu1 %3639 }
 0xd1c   : > { %3350 = vadd.xlane.f32.xlu0 %v3349_v8  ;;  %v3546_v31 = vpop.permute.xlu0 %3545 }
 0xd1e   : > { %3150 = vadd.xlane.f32.xlu1 %v3149_v3  ;;  %v8923_v20 = vpop.xlane.xlu1 %3390  ;;  %v8950_v3 = vmul.f32 %v8154_v34, %v8035_v23  ;;  %v3488_v34 = vsel %vm1503_vm2, %v8817_v13, 0.0 }
 0xd20   : > { %3438 = vadd.xlane.f32.xlu0 %v3437_v47  ;;  %v3210_v8 = vpop.permute.xlu0 %3209 }
 0xd22   : > { %3528 = vadd.xlane.f32.xlu1 %v3527_v6  ;;  %v8929_v54 = vpop.xlane.xlu1 %3393 }
 0xd24   : > { %3480 = vadd.xlane.f32.xlu0 %v3479_v35  ;;  %v3588_v15 = vpop.permute.xlu0 %3587 }
 0xd26   : > { %3192 = vadd.xlane.f32.xlu1 %v3191_v44  ;;  %v8936_v58 = vpop.xlane.xlu1 %3435 }
 0xd28   : > { %3483 = vadd.xlane.f32.xlu0 %v3482_v61  ;;  %v3252_v6 = vpop.permute.xlu0 %3251  ;;  %v3530_v61 = vsel %vm1503_vm2, %v3504_v9, 0.0 }
 0xd2a   : > { %3570 = vadd.xlane.f32.xlu1 %v3569_v19  ;;  %v8940_v57 = vpop.xlane.xlu1 %3138 }
 0xd2c   : > { %3147 = vadd.xlane.f32.xlu0 %v3146_v2 }
 0xd2e   : > { %3234 = vadd.xlane.f32.xlu1 %v3233_v50 }
 0xd30   : > { %3525 = vadd.xlane.f32.xlu0 %v3524_v46 }
 0xd32   : > { %3612 = vadd.xlane.f32.xlu1 %v3611_v48 }
 0xd34   : > { %3189 = vadd.xlane.f32.xlu0 %v3188_v27  ;;  %v3281_v27 = vsel %vm1826_vm3, %v8179_v21, %v8461_v28  ;;  %v3236_v21 = vsel %vm1503_vm2, %v3210_v8, 0.0  ;;  %v3278_v8 = vsel %vm1503_vm2, %v3252_v6, 0.0 }
 0xd36   : > { %3276 = vadd.xlane.f32.xlu1 %v3275_v55  ;;  %v3288_v55 = vsel %vm1834_vm4, %v3281_v27, %v8496_v25 }
 0xd38   : > { %3567 = vadd.xlane.f32.xlu0 %v3566_v17 }
 0xd3a   : > { %3654 = vadd.xlane.f32.xlu1 %v3653_v59 }
 0xd3c   : > { %3231 = vadd.xlane.f32.xlu0 %v3230_v5 }
 0xd3e   : > { %3657 = vadd.xlane.f32.xlu1 %v3656_v29 }
 0xd40   : > { %3609 = vadd.xlane.f32.xlu0 %v3608_v16 }
 0xd44   : > { %3273 = vadd.xlane.f32.xlu0 %v3272_v39 }
 0xd48   : > { %3353 = vadd.xlane.f32.xlu0 %v3352_v40 }
 0xd4b   : > { %v8944_v22 = vpop.xlane.xlu1 %3516 }
 0xd4c   : > { %3356 = vadd.xlane.f32.xlu0 %v3355_v10 }
 0xd4f   : > { %v8952_v12 = vpop.xlane.xlu1 %3180  ;;  %2394 = vperm.xlu1 %6342, %v8950_v3  }
 0xd50   : > { %3444 = vadd.xlane.f32.xlu0 %v3443_v56 }
 0xd53   : > { %v8957_v47 = vpop.xlane.xlu1 %3558  ;;  %2398 = vperm.xlu1 %6342, %v8191_v42   ;;  %v3152_v42 = vsel %vm1503_vm2, %v8634_v32, 0.0  ;;  %v3194_v32 = vsel %vm1503_vm2, %v3168_v53, 0.0 }
 0xd54   : > { %3486 = vadd.xlane.f32.xlu0 %v3485_v63 }
 0xd57   : > { %v8962_v23 = vpop.xlane.xlu1 %3222  ;;  %2406 = vperm.xlu1 %6342, %v8201_v38  }
 0xd58   : > { %3489 = vadd.xlane.f32.xlu0 %v3488_v34 }
 0xd59   : > { %v3339_v35 = vpop.xlane.xlu0 %3338 }
 0xd5a   : > { %v3659_v13 = vsel %vm1826_vm3, %v3339_v35, %v8883_v62  ;;  %v3572_v62 = vsel %vm1503_vm2, %v3546_v31, 0.0 }
 0xd5b   : > { %v8967_v18 = vpop.xlane.xlu1 %3600  ;;  %2410 = vperm.xlu1 %6342, %v8207_v1  }
 0xd5c   : > { %3153 = vadd.xlane.f32.xlu0 %v3152_v42 }
 0xd5d   : > { %v3430_v36 = vpop.xlane.xlu0 %3429 }
 0xd5e   : > { %v3666_v19 = vsel %vm1834_vm4, %v3659_v13, %v3430_v36 }
 0xd5f   : > { %v8972_v44 = vpop.xlane.xlu1 %3264  ;;  %2418 = vperm.xlu1 %6342, %v8216_v0  }
 0xd60   : > { %3531 = vadd.xlane.f32.xlu0 %v3530_v61 }
 0xd61   : > { %v3472_v2 = vpop.xlane.xlu0 %3471 }
 0xd62   : > { %v3673_v1 = vsel %vm1842_vm5, %v3666_v19, %v3472_v2 }
 0xd63   : > { %v8980_v50 = vpop.xlane.xlu1 %3642  ;;  %2698 = vperm.xlu1 %6342, %v8193_v45   ;;  %v3680_v0 = vsel %vm1850_vm6, %v3673_v1, %v8893_v7  ;;  %v3295_v7 = vsel %vm1842_vm5, %v3288_v55, %v8595_v30 }
 0xd64   : > { %3195 = vadd.xlane.f32.xlu0 %v3194_v32  ;;  %v3687_v45 = vsel %vm1858_vm7, %v3680_v0, %v8900_v33  ;;  %v3282_v0 = vsel %vm1826_vm3, %v8435_v41, %v8463_v49 }
 0xd65   : > { %v3178_v46 = vpop.xlane.xlu0 %3177  ;;  %v3694_v28 = vsel %vm1866_vm8, %v3687_v45, %v8908_v24 }
 0xd66   : > { %v3701_v30 = vsel %vm1874_vm9, %v3694_v28, %v8916_v37 }
 0xd67   : > { %v8986_v48 = vpop.xlane.xlu1 %3645  ;;  %2702 = vperm.xlu1 %6342, %v8198_v11   ;;  %v3302_v11 = vsel %vm1850_vm6, %v3295_v7, %v8756_v51 }
 0xd68   : > { %3573 = vadd.xlane.f32.xlu0 %v3572_v62  ;;  %v3309_v33 = vsel %vm1858_vm7, %v3302_v11, %v3178_v46  ;;  %v3289_v62 = vsel %vm1834_vm4, %v3282_v0, %v8498_v26 }
 0xd69   : > { %v3220_v9 = vpop.xlane.xlu0 %3219 }
 0xd6a   : > { %v3316_v25 = vsel %vm1866_vm8, %v3309_v33, %v3220_v9 }
 0xd6b   : > { %v9001_v17 = vpop.xlane.xlu1 %3396  ;;  %2710 = vperm.xlu1 %6342, %v8176_v14   ;;  %v3614_v14 = vsel %vm1503_vm2, %v3588_v15, 0.0 }
 0xd6c   : > { %3237 = vadd.xlane.f32.xlu0 %v3236_v21 }
 0xd6d   : > { %v3262_v59 = vpop.xlane.xlu0 %3261 }
 0xd6e   : > { %v3323_v51 = vsel %vm1874_vm9, %v3316_v25, %v3262_v59 }
 0xd6f   : > { %v3708_v5 = vmax.f32 %v3323_v51, %v3701_v30  ;;  %v9012_v53 = vpop.xlane.xlu1 %3399  ;;  %2718 = vperm.xlu1 %6342, %v8182_v4  }
 0xd70   : > { %3615 = vadd.xlane.f32.xlu0 %v3614_v14 }
 0xd71   : > { %v3715_v24 = vsub.f32 %v3323_v51, %v3708_v5  ;;  %v3736_v29 = vsub.f32 %v3701_v30, %v3708_v5  ;;  %v3342_v16 = vpop.xlane.xlu0 %3341  ;;  %v11630_v30 = vmov 0   ;;  %v11631_v51 = vld [vmem:[#allocation42_spill] sm:$0xff] }
 0xd72   : > { %v3660_v63 = vsel %vm1826_vm3, %v3342_v16, %v8923_v20  ;;  %v11633_v16 = vmov 1  }
 0xd73   : > { %v3722_v31 = vmul.f32 1.442695, %v3715_v24  ;;  %v3743_v39 = vmul.f32 1.442695, %v3736_v29  ;;  %v9016_v40 = vpop.xlane.xlu1 %3441  ;;  %v11632_v24 = vld [vmem:[#allocation34_spill] sm:$0xff] }
 0xd74   : > { %3279 = vadd.xlane.f32.xlu0 %v3278_v8  ;;  %v11635_v8 = vld [vmem:[#allocation88_spill] sm:$0xff] }
 0xd75   : > { %6477 = vpow2.f32 %v3722_v31  ;;  %v3345_v37 = vpop.xlane.xlu0 %3344 }
 0xd76   : > { %6479 = vpow2.f32 %v3743_v39  ;;  %v3661_v29 = vsel %vm1826_vm3, %v3345_v37, %v8929_v54  ;;  %v11634_v39 = vld [vmem:[#allocation94_spill] sm:$0xff]  ;;  %v11637_v54 = vld [vmem:[#allocation27_spill] sm:$0xff] }
 0xd77   : > { %v9019_v10 = vpop.xlane.xlu1 %3144 }
 0xd79   : > { %v3433_v56 = vpop.xlane.xlu0 %3432 }
 0xd7a   : > { %v3667_v35 = vsel %vm1834_vm4, %v3660_v63, %v3433_v56  ;;  %v3283_v56 = vsel %vm1826_vm3, %v11635_v8, %v11634_v39  ;;  %v11636_v63 = vld [vmem:[#allocation99_spill] sm:$0xff] }
 0xd7b   : > { %v9021_v4 = vpop.xlane.xlu1 %3522 }
 0xd7d   : > { %v3475_v15 = vpop.xlane.xlu0 %3474 }
 0xd7e   : > { %v3674_v42 = vsel %vm1842_vm5, %v3667_v35, %v3475_v15  ;;  %v3290_v35 = vsel %vm1834_vm4, %v3283_v56, %v11636_v63 }
 0xd7f   : > { %v9025_v34 = vpop.xlane.xlu1 %3186  ;;  %v3681_v2 = vsel %vm1850_vm6, %v3674_v42, %v8944_v22  ;;  %v3296_v22 = vsel %vm1842_vm5, %v3289_v62, %v8597_v52  ;;  %v3668_v42 = vsel %vm1834_vm4, %v3661_v29, %v8936_v58  ;;  %v3297_v37 = vsel %vm1842_vm5, %v3290_v35, %v11637_v54 }
 0xd80   : > { %v3688_v20 = vsel %vm1858_vm7, %v3681_v2, %v8957_v47  ;;  %v3303_v47 = vsel %vm1850_vm6, %v3296_v22, %v8940_v57  ;;  %v11639_v22 = vmov 7  }
 0xd81   : > { %v3478_v6 = vpop.xlane.xlu0 %3477  ;;  %v3695_v27 = vsel %vm1866_vm8, %v3688_v20, %v8967_v18  ;;  %v3310_v41 = vsel %vm1858_vm7, %v3303_v47, %v8952_v12  ;;  %v11638_v20 = vmov 2  }
 0xd82   : > { %v6478_v36 = vpop.eup %6477  ;;  %v3702_v49 = vsel %vm1874_vm9, %v3695_v27, %v8980_v50  ;;  %v3317_v18 = vsel %vm1866_vm8, %v3310_v41, %v8962_v23 }
 0xd83   : > { %v6480_v61 = vpop.eup %6479  ;;  %v9029_v13 = vpop.xlane.xlu1 %3564  ;;  %v3324_v52 = vsel %vm1874_vm9, %v3317_v18, %v8972_v44 }
 0xd84   : > { %v3757_v19 = vadd.f32 %v6480_v61, %v6478_v36  ;;  %v3709_v9 = vmax.f32 %v3324_v52, %v3702_v49 }
 0xd85   : > { %v3142_v1 = vpop.xlane.xlu0 %3141 }
 0xd86   : > { %6481 = vrcp.f32 %v3757_v19  ;;  %v3716_v50 = vsub.f32 %v3324_v52, %v3709_v9  ;;  %v3737_v21 = vsub.f32 %v3702_v49, %v3709_v9  ;;  %v3304_v19 = vsel %vm1850_vm6, %v3297_v37, %v3142_v1  ;;  %v11640_v9 = vld [vmem:[#allocation96_spill] sm:$0xff] }
 0xd87   : > { %v9035_v32 = vpop.xlane.xlu1 %3228 }
 0xd88   : > { %v3724_v44 = vmul.f32 1.442695, %v3716_v50  ;;  %v3745_v25 = vmul.f32 1.442695, %v3737_v21  ;;  %v11642_v21 = vld [vmem:[#allocation101_spill] sm:$0xff] }
 0xd89   : > { %v3520_v46 = vpop.xlane.xlu0 %3519 }
 0xd8a   : > { %2534 = vperm.xlu0 %6341, %v8950_v3   ;;  %6483 = vpow2.f32 %v3724_v44 }
 0xd8b   : > { %v9047_v45 = vpop.xlane.xlu1 %3606  ;;  %6485 = vpow2.f32 %v3745_v25  ;;  %v11643_v25 = vmov 3  }
 0xd8d   : > { %v3184_v26 = vpop.xlane.xlu0 %3183 }
 0xd8e   : > { %2546 = vperm.xlu0 %6341, %v8201_v38   ;;  %v3311_v0 = vsel %vm1858_vm7, %v3304_v19, %v3184_v26 }
 0xd8f   : > { %v9060_v55 = vpop.xlane.xlu1 %3270 }
 0xd91   : > { %v3562_v7 = vpop.xlane.xlu0 %3561 }
 0xd92   : > { %2554 = vperm.xlu0 %6341, %v8212_v43  }
 0xd93   : > { %v6482_v57 = vpop.eup %6481  ;;  %v9063_v12 = vpop.xlane.xlu1 %3648 }
 0xd94   : > { %v9065_v11 = vmul.f32 %v6482_v57, %v6478_v36  ;;  %v9071_v33 = vmul.f32 %v6482_v57, %v6480_v61  ;;  %v3675_v36 = vsel %vm1842_vm5, %v3668_v42, %v3478_v6 }
 0xd95   : > { %v3226_v28 = vpop.xlane.xlu0 %3225  ;;  %v3682_v2 = vsel %vm1850_vm6, %v3675_v36, %v3520_v46 }
 0xd96   : > { %3814 = vperm.xlu1 %6342, %v9065_v11   ;;  %2834 = vperm.xlu0 %6341, %v8162_v60   ;;  %11629 = vst [vmem:[#allocation33_spill] sm:$0xff] %v9071_v33  ;;  %v3689_v62 = vsel %vm1858_vm7, %v3682_v2, %v3562_v7  ;;  %v3318_v27 = vsel %vm1866_vm8, %v3311_v0, %v3226_v28  ;;  %v11641_v7 = vld [vmem:[#allocation61_spill] sm:$0xff] }
 0xd97   : > { %v9069_v23 = vpop.xlane.xlu1 %3651  ;;  %v9113_v46 = vpop.eup %6483  ;;  %v3284_v57 = vsel %vm1826_vm3, %v11641_v7, %v11640_v9 }
 0xd98   : > { %v6486_v26 = vpop.eup %6485  ;;  %v3291_v28 = vsel %vm1834_vm4, %v3284_v57, %v11642_v21 }
 0xd99   : > { %v3604_v59 = vpop.xlane.xlu0 %3603 }
 0xd9a   : > { %6343 = vset.pattern.permute.xlu1 %v11630_v30  ;;  %2846 = vperm.xlu0 %6341, %v11631_v51   ;;  %v3696_v6 = vsel %vm1866_vm8, %v3689_v62, %v3604_v59  ;;  %v11645_v62 = vmov 4  }
 0xd9b   : > { %4074 = vperm.xlu1 %6343, %v9071_v33   ;;  %v9076_v5 = vpop.xlane.xlu1 %3402  ;;  %v3703_v41 = vsel %vm1874_vm9, %v3696_v6, %v8986_v48  ;;  %v3758_v48 = vadd.f32 %v6486_v26, %v9113_v46 }
 0xd9d   : > { %v3268_v14 = vpop.xlane.xlu0 %3267  ;;  %6487 = vrcp.f32 %v3758_v48  ;;  %v11647_v48 = vmov 6  }
 0xd9e   : > { %2854 = vperm.xlu0 %6341, %v11632_v24   ;;  %v3325_v1 = vsel %vm1874_vm9, %v3318_v27, %v3268_v14  ;;  %v11644_v14 = vld [vmem:[#allocation29_spill] sm:$0xff] }
 0xd9f   : > { %6344 = vset.pattern.permute.xlu1 %v11633_v16  ;;  %v9082_v31 = vpop.xlane.xlu1 %3405  ;;  %v3710_v18 = vmax.f32 %v3325_v1, %v3703_v41  ;;  %v3298_v29 = vsel %vm1842_vm5, %v3291_v28, %v11644_v14 }
 0xda0   : > { %4108 = vperm.xlu1 %6344, %v9071_v33  }
 0xda1   : > { %v3348_v15 = vpop.xlane.xlu0 %3347  ;;  %v3717_v39 = vsub.f32 %v3325_v1, %v3710_v18  ;;  %v3738_v56 = vsub.f32 %v3703_v41, %v3710_v18  ;;  %v11646_v1 = vmov 5  }
 0xda2   : > { %3954 = vperm.xlu0 %6341, %v9065_v11   ;;  %v3662_v50 = vsel %vm1826_vm3, %v3348_v15, %v9001_v17  ;;  %v3305_v17 = vsel %vm1850_vm6, %v3298_v29, %v9019_v10 }
 0xda3   : > { %v9096_v61 = vpop.xlane.xlu1 %3447  ;;  %v3312_v35 = vsel %vm1858_vm7, %v3305_v17, %v9025_v34  ;;  %v3726_v36 = vmul.f32 1.442695, %v3717_v39  ;;  %v3747_v34 = vmul.f32 1.442695, %v3738_v56 }
 0xda4   : > { %6345 = vset.pattern.permute.xlu1 %v11638_v20  ;;  %v3319_v54 = vsel %vm1866_vm8, %v3312_v35, %v9035_v32 }
 0xda5   : > { %3842 = vperm.xlu1 %6345, %v9065_v11   ;;  %v9104_v58 = vpop.xlane.xlu0 %3350  ;;  %6489 = vpow2.f32 %v3726_v36 }
 0xda6   : > { %6349 = vset.pattern.permute.xlu0 %v11639_v22  ;;  %6491 = vpow2.f32 %v3747_v34 }
 0xda7   : > { %v9110_v47 = vpop.xlane.xlu1 %3150  ;;  %2562 = vperm.xlu0 %6349, %v8950_v3  }
 0xda9   : > { %4136 = vperm.xlu1 %6345, %v9071_v33   ;;  %v3439_v49 = vpop.xlane.xlu0 %3438 }
 0xdaa   : > { %v3669_v44 = vsel %vm1834_vm4, %v3662_v50, %v3439_v49  ;;  %v6488_v18 = vpop.eup %6487 }
 0xdab   : > { %v9118_v52 = vpop.xlane.xlu1 %3528  ;;  %2574 = vperm.xlu0 %6349, %v8201_v38   ;;  %v9180_v7 = vmul.f32 %v6488_v18, %v6486_v26  ;;  %v9206_v56 = vmul.f32 %v6488_v18, %v9113_v46  ;;  %v11652_v46 = vld [vmem:[#allocation51_spill] sm:$0xff] }
 0xdad   : > { %6346 = vset.pattern.permute.xlu1 %v11643_v25  ;;  %v3481_v59 = vpop.xlane.xlu0 %3480 }
 0xdae   : > { %3870 = vperm.xlu1 %6346, %v9065_v11   ;;  %v3676_v8 = vsel %vm1842_vm5, %v3669_v44, %v3481_v59 }
 0xdaf   : > { %v3683_v15 = vsel %vm1850_vm6, %v3676_v8, %v9021_v4  ;;  %v9139_v63 = vpop.xlane.xlu1 %3192  ;;  %2582 = vperm.xlu0 %6349, %v8212_v43   ;;  %v3326_v4 = vsel %vm1874_vm9, %v3319_v54, %v9060_v55  ;;  %v11650_v54 = vld [vmem:[#allocation43_spill] sm:$0xff] }
 0xdb0   : > { %v3690_v42 = vsel %vm1858_vm7, %v3683_v15, %v9029_v13 }
 0xdb1   : > { %v3697_v10 = vsel %vm1866_vm8, %v3690_v42, %v9047_v45  ;;  %v9150_v37 = vpop.xlane.xlu0 %3483 }
 0xdb2   : > { %v3704_v19 = vsel %vm1874_vm9, %v3697_v10, %v9063_v12  ;;  %4164 = vperm.xlu1 %6346, %v9071_v33   ;;  %v6490_v50 = vpop.eup %6489 }
 0xdb3   : > { %v3711_v13 = vmax.f32 %v3326_v4, %v3704_v19  ;;  %v9157_v2 = vpop.xlane.xlu1 %3570  ;;  %2862 = vperm.xlu0 %6349, %v8162_v60   ;;  %v9187_v28 = vpop.eup %6491 }
 0xdb4   : > { %v3759_v26 = vadd.f32 %v9187_v28, %v6490_v50 }
 0xdb5   : > { %v3718_v32 = vsub.f32 %v3326_v4, %v3711_v13  ;;  %v3739_v0 = vsub.f32 %v3704_v19, %v3711_v13  ;;  %v9160_v45 = vpop.xlane.xlu0 %3147 }
 0xdb6   : > { %6347 = vset.pattern.permute.xlu1 %v11645_v62 }
 0xdb7   : > { %v3728_v55 = vmul.f32 1.442695, %v3718_v32  ;;  %v3749_v27 = vmul.f32 1.442695, %v3739_v0  ;;  %3898 = vperm.xlu1 %6347, %v9065_v11   ;;  %v9164_v12 = vpop.xlane.xlu1 %3234  ;;  %2874 = vperm.xlu0 %6349, %v11631_v51  }
 0xdb9   : > { %6493 = vpow2.f32 %v3728_v55  ;;  %v9167_v6 = vpop.xlane.xlu0 %3525  ;;  %v11653_v55 = vld [vmem:[#allocation38_spill] sm:$0xff] }
 0xdba   : > { %6495 = vpow2.f32 %v3749_v27 }
 0xdbb   : > { %6348 = vset.pattern.permute.xlu1 %v11646_v1  ;;  %v9170_v41 = vpop.xlane.xlu1 %3612  ;;  %2882 = vperm.xlu0 %6349, %v11632_v24  }
 0xdbc   : > { %3926 = vperm.xlu1 %6348, %v9065_v11  }
 0xdbd   : > { %v9174_v49 = vpop.xlane.xlu0 %3189 }
 0xdbf   : > { %v9176_v9 = vpop.xlane.xlu1 %3276  ;;  %4276 = vperm.xlu0 %6349, %v9071_v33  }
 0xdc0   : > { %4220 = vperm.xlu1 %6348, %v9071_v33  }
 0xdc1   : > { %v9182_v57 = vpop.xlane.xlu0 %3567 }
 0xdc3   : > { %v9184_v21 = vpop.xlane.xlu1 %3654  ;;  %4280 = vperm.xlu0 %6349, %v9180_v7  }
 0xdc4   : > { %6350 = vset.pattern.permute.xlu1 %v11647_v48 }
 0xdc5   : > { %4248 = vperm.xlu1 %6350, %v9071_v33   ;;  %v9191_v44 = vpop.xlane.xlu0 %3231  ;;  %v11661_v33 = vld [vmem:[#allocation52_spill] sm:$0xff] }
 0xdc6   : > { %v9193_v59 = vpop.eup %6493 }
 0xdc7   : > { %v6496_v14 = vpop.eup %6495  ;;  %v9196_v29 = vpop.xlane.xlu1 %3657 }
 0xdc8   : > { %11648 = vst [vmem:[#allocation32_spill] sm:$0xff] %v9196_v29  ;;  %v3760_v39 = vadd.f32 %v6496_v14, %v9193_v59 }
 0xdc9   : > { %6351 = vset.pattern.permute.xlu1 %v11639_v22  ;;  %v9200_v8 = vpop.xlane.xlu0 %3609 }
 0xdca   : > { %6497 = vrcp.f32 %v3760_v39  ;;  %3982 = vperm.xlu1 %6351, %v9065_v11  }
 0xdcb   : > { %6499 = vrcp.f32 %v3759_v26  ;;  %v9203_v17 = vpop.permute.xlu1 %2394  ;;  %v11654_v26 = vld [vmem:[#allocation44_spill] sm:$0xff] }
 0xdcc   : > { %11649 = vst [vmem:[#allocation42_spill] sm:$0xff] %v9203_v17  ;;  %v11660_v17 = vld [vmem:[#allocation103_spill] sm:$0xff] }
 0xdcd   : > { %v9208_v15 = vpop.xlane.xlu0 %3273 }
 0xdce   : > { %6352 = vset.pattern.permute.xlu1 %v11630_v30 }
 0xdcf   : > { %3785 = vperm.xlu1 %6352, %v9206_v56   ;;  %v2399_v35 = vpop.permute.xlu1 %2398 }
 0xdd0   : > { %v2590_v10 = vsel %vm1503_vm2, %v11650_v54, %v2399_v35  ;;  %v11655_v54 = vld [vmem:[#allocation36_spill] sm:$0xff] }
 0xdd1   : > { %v3354_v42 = vpop.xlane.xlu0 %3353  ;;  %v2598_v36 = vsel %vm2596_vm10, %v2590_v10, %v11652_v46  ;;  %v11657_v46 = vld [vmem:[#allocation98_spill] sm:$0xff] }
 0xdd2   : > { %v2606_v27 = vsel %vm2604_vm11, %v2598_v36, %v11653_v55  ;;  %v3664_v55 = vsel %vm1826_vm3, %v3354_v42, %v9076_v5 }
 0xdd3   : > { %6353 = vset.pattern.permute.xlu1 %v11633_v16  ;;  %v9215_v4 = vpop.permute.xlu1 %2406  ;;  %v2614_v10 = vsel %vm2612_vm12, %v2606_v27, %v11655_v54 }
 0xdd4   : > { %11651 = vst [vmem:[#allocation34_spill] sm:$0xff] %v9215_v4  ;;  %3818 = vperm.xlu1 %6353, %v9206_v56   ;;  %v11658_v4 = vld [vmem:[#allocation89_spill] sm:$0xff] }
 0xdd5   : > { %v9220_v19 = vpop.xlane.xlu0 %3356  ;;  %v3286_v36 = vsel %vm1826_vm3, %v11658_v4, %v11657_v46  ;;  %v11663_v46 = vld [vmem:[#allocation80_spill] sm:$0xff] }
 0xdd6   : > { %v2622_v5 = vsel %vm2620_vm13, %v2614_v10, %v11663_v46  ;;  %v11664_v10 = vld [vmem:[#allocation53_spill] sm:$0xff] }
 0xdd7   : > { %v9222_v34 = vpop.eup %6497  ;;  %v2411_v13 = vpop.permute.xlu1 %2410 }
 0xdd8   : > { %v6500_v32 = vpop.eup %6499  ;;  %v9225_v0 = vmul.f32 %v9222_v34, %v6496_v14  ;;  %4112 = vperm.xlu1 %6353, %v9180_v7   ;;  %v2593_v39 = vsel %vm1503_vm2, %v11654_v26, %v2411_v13  ;;  %v11659_v13 = vld [vmem:[#allocation6_spill] sm:$0xff] }
 0xdd9   : > { %v3445_v18 = vpop.xlane.xlu0 %3444  ;;  %v9233_v35 = vmul.f32 %v6500_v32, %v6490_v50  ;;  %v11346_v26 = vsub.s32 1, %v11659_v13  ;;  %v3293_v50 = vsel %vm1834_vm4, %v3286_v36, %v11660_v17  ;;  %v2601_v29 = vsel %vm2596_vm10, %v2593_v39, %v11661_v33 }
 0xdda   : > { %4288 = vperm.xlu0 %6349, %v9225_v0   ;;  %v3671_v27 = vsel %vm1834_vm4, %v3664_v55, %v3445_v18  ;;  %v11665_v55 = vld [vmem:[#allocation81_spill] sm:$0xff] }
 0xddb   : > { %v9237_v14 = vpop.permute.xlu1 %2418 }
 0xddc   : > { %11656 = vst [vmem:[#allocation94_spill] sm:$0xff] %v9237_v14  ;;  %6354 = vset.pattern.permute.xlu1 %v11630_v30  ;;  %v11662_v14 = vld [vmem:[#allocation30_spill] sm:$0xff] }
 0xddd   : > { %3790 = vperm.xlu1 %6354, %v9233_v35   ;;  %v3487_v54 = vpop.xlane.xlu0 %3486  ;;  %v3300_v4 = vsel %vm1842_vm5, %v3293_v50, %v11662_v14  ;;  %v2609_v14 = vsel %vm2604_vm11, %v2601_v29, %v11664_v10  ;;  %v11667_v29 = vld [vmem:[#allocation84_spill] sm:$0xff] }
 0xdde   : > { %6383 = vset.pattern.permute.xlu0 %v11630_v30  ;;  %v3678_v42 = vsel %vm1842_vm5, %v3671_v27, %v3487_v54  ;;  %v3307_v33 = vsel %vm1850_vm6, %v3300_v4, %v9110_v47  ;;  %v11666_v27 = vld [vmem:[#allocation67_spill] sm:$0xff]  ;;  %v2630_v4 = vsel %vm2628_vm14, %v2622_v5, %v11667_v29 }
 0xddf   : > { %v3685_v17 = vsel %vm1850_vm6, %v3678_v42, %v9118_v52  ;;  %2360 = vperm.xlu0 %6383, %v8950_v3   ;;  %v2699_v18 = vpop.permute.xlu1 %2698  ;;  %v3314_v39 = vsel %vm1858_vm7, %v3307_v33, %v9139_v63  ;;  %v11668_v42 = vld [vmem:[#allocation68_spill] sm:$0xff] }
 0xde0   : > { %v3692_v36 = vsel %vm1858_vm7, %v3685_v17, %v9157_v2  ;;  %v2890_v50 = vsel %vm1503_vm2, %v11665_v55, %v2699_v18  ;;  %v3321_v47 = vsel %vm1866_vm8, %v3314_v39, %v9164_v12  ;;  %v6603_v2 = vld [vmem:[%s11388_s0] sm:$0x3] }
 0xde1   : > { %v3699_v52 = vsel %vm1866_vm8, %v3692_v36, %v9170_v41  ;;  %v2897_v54 = vsel %vm2596_vm10, %v2890_v50, %v11666_v27  ;;  %6355 = vset.pattern.permute.xlu1 %v11638_v20  ;;  %v9278_v63 = vpop.xlane.xlu0 %3489  ;;  %v9285_v46 = vrot.slane %v6603_v2, %v11346_v26  ;;  %v3328_v12 = vsel %vm1874_vm9, %v3321_v47, %v9176_v9  ;;  %v11669_v17 = vld [vmem:[#allocation54_spill] sm:$0xff]  ;;  %v11671_v9 = vld [vmem:[#allocation9_spill] sm:$0xff]  ;;  %v11675_v47 = vld [vmem:[#allocation91_spill] sm:$0xff] }
 0xde2   : > { %v3706_v41 = vsel %vm1874_vm9, %v3699_v52, %v9184_v21  ;;  %v2904_v33 = vsel %vm2604_vm11, %v2897_v54, %v11668_v42  ;;  %3846 = vperm.xlu1 %6355, %v9206_v56   ;;  %v2617_v18 = vsel %vm2612_vm12, %v2609_v14, %v11669_v17  ;;  %v11670_v39 = vld [vmem:[#allocation86_spill] sm:$0xff]  ;;  %v11673_v21 = vld [vmem:[#allocation17_spill] sm:$0xff]  ;;  %v11676_v14 = vld [vmem:[#allocation60_spill] sm:$0xff]  ;;  %v9314_v54 = vmul.f32 %v6500_v32, %v9187_v28 }
 0xde3   : > { %v3713_v5 = vmax.f32 %v3328_v12, %v3706_v41  ;;  %v2911_v10 = vsel %vm2612_vm12, %v2904_v33, %v11670_v39  ;;  %2660 = vperm.xlu0 %6383, %v8162_v60   ;;  %v9299_v36 = vpop.permute.xlu1 %2702  ;;  %v9303_v55 = vadd.f32 %v11671_v9, %v9285_v46  ;;  %v9307_v50 = vadd.f32 %v11673_v21, %v9285_v46  ;;  %v11677_v33 = vld [vmem:[#allocation90_spill] sm:$0xff]  ;;  %v11678_v39 = vld [vmem:[#allocation55_spill] sm:$0xff]  ;;  %v11679_v21 = vld [vmem:[#allocation24_spill] sm:$0xff] }
 0xde4   : > { %v2918_v52 = vsel %vm2620_vm13, %v2911_v10, %v11675_v47  ;;  %v2638_v27 = vsel %vm2636_vm15, %v2630_v4, %v11676_v14  ;;  %v2625_v9 = vsel %vm2620_vm13, %v2617_v18, %v11678_v39  ;;  %v11681_v18 = vld [vmem:[#allocation40_spill] sm:$0xff]  ;;  %v11685_v39 = vld [vmem:[#allocation69_spill] sm:$0xff] }
 0xde5   : > { %11672 = vst [vmem:[#allocation88_spill] sm:$0xff] %v9303_v55  ;;  %11674 = vst [vmem:[#allocation99_spill] sm:$0xff] %v9307_v50  ;;  %v3720_v29 = vsub.f32 %v3328_v12, %v3713_v5  ;;  %v3741_v2 = vsub.f32 %v3706_v41, %v3713_v5  ;;  %v9316_v42 = vpop.xlane.xlu0 %3153  ;;  %v2925_v17 = vsel %vm2628_vm14, %v2918_v52, %v11677_v33  ;;  %v11680_v41 = vld [vmem:[#allocation66_spill] sm:$0xff] }
 0xde6   : > { %6356 = vset.pattern.permute.xlu1 %v11630_v30  ;;  %v2932_v10 = vsel %vm2636_vm15, %v2925_v17, %v11679_v21  ;;  %v2645_v32 = vmul.f32 %v2638_v27, %v9303_v55  ;;  %v11684_v17 = vld [vmem:[#allocation41_spill] sm:$0xff] }
 0xde7   : > { %v3732_v47 = vmul.f32 1.442695, %v3720_v29  ;;  %v3753_v4 = vmul.f32 1.442695, %v3741_v2  ;;  %4084 = vperm.xlu1 %6356, %v9314_v54   ;;  %2675 = vperm.xlu0 %6383, %v11631_v51   ;;  %v2711_v28 = vpop.permute.xlu1 %2710  ;;  %v2939_v12 = vmul.f32 %v2932_v10, %v9307_v50  ;;  %v11683_v2 = vld [vmem:[#allocation73_spill] sm:$0xff]  ;;  %v11686_v10 = vld [vmem:[#allocation87_spill] sm:$0xff] }
 0xde8   : > { %v2893_v5 = vsel %vm1503_vm2, %v11680_v41, %v2711_v28  ;;  %v2633_v33 = vsel %vm2628_vm14, %v2625_v9, %v11683_v2  ;;  %v11687_v28 = vld [vmem:[#allocation37_spill] sm:$0xff]  ;;  %v11688_v9 = vld [vmem:[#allocation12_spill] sm:$0xff] }
 0xde9   : > { %6501 = vpow2.f32 %v3732_v47  ;;  %v2900_v52 = vsel %vm2596_vm10, %v2893_v5, %v11681_v18  ;;  %v9333_v14 = vpop.xlane.xlu0 %3531  ;;  %v9335_v29 = vadd.f32 %v2939_v12, %v2645_v32  ;;  %v2641_v32 = vsel %vm2636_vm15, %v2633_v33, %v11687_v28  ;;  %v11690_v12 = vld [vmem:[#allocation21_spill] sm:$0xff]  ;;  %v11692_v18 = vld [vmem:[#allocation71_spill] sm:$0xff] }
 0xdea   : > { %6503 = vpow2.f32 %v3753_v4  ;;  %v2907_v27 = vsel %vm2604_vm11, %v2900_v52, %v11684_v17  ;;  %v9352_v4 = vadd.f32 %v11688_v9, %v9285_v46  ;;  %v9356_v41 = vadd.f32 %v11690_v12, %v9285_v46  ;;  %v11693_v2 = vld [vmem:[#allocation25_spill] sm:$0xff]  ;;  %v11696_v12 = vld [vmem:[#allocation26_spill] sm:$0xff] }
 0xdeb   : > { %11682 = vst [vmem:[#allocation27_spill] sm:$0xff] %v9335_v29  ;;  %v2914_v21 = vsel %vm2612_vm12, %v2907_v27, %v11685_v39  ;;  %6357 = vset.pattern.permute.xlu1 %v11638_v20  ;;  %2685 = vperm.xlu0 %6383, %v11632_v24  }
 0xdec   : > { %v2921_v47 = vsel %vm2620_vm13, %v2914_v21, %v11686_v10  ;;  %4140 = vperm.xlu1 %6357, %v9180_v7   ;;  %11689 = vst [vmem:[#allocation96_spill] sm:$0xff] %v9352_v4  ;;  %11691 = vst [vmem:[#allocation61_spill] sm:$0xff] %v9356_v41  ;;  %v2648_v33 = vmul.f32 %v2641_v32, %v9352_v4  ;;  %v9376_v10 = vmul.f32 %v9222_v34, %v9193_v59  ;;  %v11695_v34 = vld [vmem:[#allocation95_spill] sm:$0xff] }
 0xded   : > { %v9358_v5 = vpop.xlane.xlu0 %3195  ;;  %v2928_v52 = vsel %vm2628_vm14, %v2921_v47, %v11692_v18  ;;  %v3663_v59 = vsel %vm1826_vm3, %v9104_v58, %v9012_v53  ;;  %v3285_v18 = vsel %vm1826_vm3, %v11696_v12, %v11695_v34 }
 0xdee   : > { %v2935_v17 = vsel %vm2636_vm15, %v2928_v52, %v11693_v2  ;;  %v11697_v2 = vld [vmem:[#allocation100_spill] sm:$0xff] }
 0xdef   : > { %3780 = vperm.xlu0 %6383, %v9065_v11   ;;  %v2942_v27 = vmul.f32 %v2935_v17, %v9356_v41  ;;  %v3292_v17 = vsel %vm1834_vm4, %v3285_v18, %v11697_v2 }
 0xdf0   : > { %6358 = vset.pattern.permute.xlu1 %v11643_v25 }
 0xdf1   : > { %3874 = vperm.xlu1 %6358, %v9206_v56   ;;  %v9369_v39 = vpop.xlane.xlu0 %3573  ;;  %v9371_v21 = vadd.f32 %v2942_v27, %v2648_v33  ;;  %v3670_v33 = vsel %vm1834_vm4, %v3663_v59, %v9016_v40  ;;  %v11698_v27 = vld [vmem:[#allocation28_spill] sm:$0xff] }
 0xdf2   : > { %v3677_v53 = vsel %vm1842_vm5, %v3670_v33, %v9150_v37 }
 0xdf3   : > { %11694 = vst [vmem:[#allocation101_spill] sm:$0xff] %v9371_v21  ;;  %4079 = vperm.xlu0 %6383, %v9180_v7   ;;  %v3684_v34 = vsel %vm1850_vm6, %v3677_v53, %v9167_v6 }
 0xdf4   : > { %v3691_v40 = vsel %vm1858_vm7, %v3684_v34, %v9182_v57 }
 0xdf5   : > { %6359 = vset.pattern.permute.xlu1 %v11638_v20  ;;  %v9379_v11 = vpop.xlane.xlu0 %3237  ;;  %v3698_v37 = vsel %vm1866_vm8, %v3691_v40, %v9200_v8 }
 0xdf6   : > { %v6502_v47 = vpop.eup %6501  ;;  %4144 = vperm.xlu1 %6359, %v9314_v54  }
 0xdf7   : > { %v9382_v28 = vpop.eup %6503  ;;  %3795 = vperm.xlu0 %6383, %v9376_v10  }
 0xdf8   : > { %v3762_v32 = vadd.f32 %v9382_v28, %v6502_v47 }
 0xdf9   : > { %v9387_v9 = vpop.xlane.xlu0 %3615 }
 0xdfa   : > { %6505 = vrcp.f32 %v3762_v32  ;;  %6360 = vset.pattern.permute.xlu1 %v11643_v25  ;;  %v3299_v32 = vsel %vm1842_vm5, %v3292_v17, %v11698_v27 }
 0xdfb   : > { %3878 = vperm.xlu1 %6360, %v9233_v35   ;;  %v3306_v58 = vsel %vm1850_vm6, %v3299_v32, %v9160_v45 }
 0xdfc   : > { %v3313_v12 = vsel %vm1858_vm7, %v3306_v58, %v9174_v49  ;;  %v3705_v49 = vsel %vm1874_vm9, %v3698_v37, %v9069_v23  ;;  %v11701_v23 = vld [vmem:[#allocation63_spill] sm:$0xff] }
 0xdfd   : > { %v9398_v52 = vpop.xlane.xlu0 %3279  ;;  %v3320_v18 = vsel %vm1866_vm8, %v3313_v12, %v9191_v44  ;;  %v9434_v44 = vpop.permute.xlu1 %2718 }
 0xdfe   : > { %v3327_v6 = vsel %vm1874_vm9, %v3320_v18, %v9208_v15 }
 0xdff   : > { %6361 = vset.pattern.permute.xlu1 %v11645_v62  ;;  %v3712_v17 = vmax.f32 %v3327_v6, %v3705_v49 }
 0xe00   : > { %3902 = vperm.xlu1 %6361, %v9206_v56  }
 0xe01   : > { %v3719_v15 = vsub.f32 %v3327_v6, %v3712_v17 }
 0xe03   : > { %v3730_v32 = vmul.f32 1.442695, %v3719_v15 }
 0xe04   : > { %4196 = vperm.xlu1 %6361, %v9180_v7  }
 0xe05   : > { %v9417_v59 = vpop.permute.xlu0 %2534  ;;  %6507 = vpow2.f32 %v3730_v32 }
 0xe07   : > { %v6506_v45 = vpop.eup %6505 }
 0xe08   : > { %v9425_v2 = vmul.f32 %v6506_v45, %v6502_v47  ;;  %6362 = vset.pattern.permute.xlu1 %v11646_v1  ;;  %v3740_v47 = vsub.f32 %v3705_v49, %v3712_v17 }
 0xe09   : > { %3930 = vperm.xlu1 %6362, %v9206_v56   ;;  %v9431_v57 = vpop.permute.xlu0 %2546 }
 0xe0a   : > { %11699 = vst [vmem:[#allocation29_spill] sm:$0xff] %v9431_v57  ;;  %3805 = vperm.xlu0 %6383, %v9425_v2   ;;  %v3751_v53 = vmul.f32 1.442695, %v3740_v47 }
 0xe0c   : > { %6509 = vpow2.f32 %v3751_v53 }
 0xe0d   : > { %6363 = vset.pattern.permute.xlu1 %v11645_v62  ;;  %v9437_v8 = vpop.permute.xlu0 %2554 }
 0xe0e   : > { %11700 = vst [vmem:[#allocation43_spill] sm:$0xff] %v9437_v8  ;;  %4200 = vperm.xlu1 %6363, %v9314_v54   ;;  %6385 = vset.pattern.permute.xlu0 %v11633_v16  ;;  %v11715_v8 = vld [vmem:[#allocation93_spill] sm:$0xff] }
 0xe0f   : > { %2402 = vperm.xlu0 %6385, %v11701_v23  }
 0xe11   : > { %v9442_v33 = vpop.permute.xlu1 %3814  ;;  %v9444_v27 = vpop.permute.xlu0 %2834 }
 0xe12   : > { %11702 = vst [vmem:[#allocation51_spill] sm:$0xff] %v9444_v27  ;;  %6364 = vset.pattern.permute.xlu1 %v11646_v1  ;;  %v6508_v37 = vpop.eup %6507  ;;  %v11717_v27 = vld [vmem:[#allocation31_spill] sm:$0xff] }
 0xe13   : > { %3934 = vperm.xlu1 %6364, %v9233_v35   ;;  %2414 = vperm.xlu0 %6385, %v8212_v43  }
 0xe15   : > { %v9451_v34 = vpop.permute.xlu0 %2846 }
 0xe16   : > { %v9449_v58 = vpop.permute.xlu1 %4074  ;;  %11703 = vst [vmem:[#allocation38_spill] sm:$0xff] %v9451_v34  ;;  %v11714_v34 = vld [vmem:[#allocation97_spill] sm:$0xff] }
 0xe17   : > { %6365 = vset.pattern.permute.xlu1 %v11647_v48  ;;  %2694 = vperm.xlu0 %6385, %v8162_v60  }
 0xe18   : > { %3958 = vperm.xlu1 %6365, %v9206_v56  }
 0xe19   : > { %v9460_v40 = vpop.permute.xlu0 %2854  ;;  %v6510_v49 = vpop.eup %6509 }
 0xe1a   : > { %11704 = vst [vmem:[#allocation44_spill] sm:$0xff] %v9460_v40  ;;  %v3761_v15 = vadd.f32 %v6510_v49, %v6508_v37 }
 0xe1b   : > { %v9456_v12 = vpop.permute.xlu1 %4108  ;;  %2706 = vperm.xlu0 %6385, %v11631_v51  }
 0xe1c   : > { %4252 = vperm.xlu1 %6365, %v9180_v7   ;;  %6511 = vrcp.f32 %v3761_v15 }
 0xe1d   : > { %v9467_v6 = vpop.permute.xlu0 %3954 }
 0xe1f   : > { %2714 = vperm.xlu0 %6385, %v11632_v24  }
 0xe20   : > { %v9463_v18 = vpop.permute.xlu1 %3842  ;;  %6366 = vset.pattern.permute.xlu1 %v11639_v22 }
 0xe21   : > { %3986 = vperm.xlu1 %6366, %v9206_v56   ;;  %v9483_v56 = vmul.f32 %v6506_v45, %v9382_v28 }
 0xe22   : > { %v9475_v47 = vpop.permute.xlu0 %2562 }
 0xe23   : > { %3822 = vperm.xlu0 %6385, %v9233_v35  }
 0xe24   : > { %v9470_v17 = vpop.permute.xlu1 %4136 }
 0xe25   : > { %6367 = vset.pattern.permute.xlu1 %v11647_v48 }
 0xe26   : > { %4256 = vperm.xlu1 %6367, %v9314_v54   ;;  %v9487_v53 = vpop.permute.xlu0 %2574 }
 0xe27   : > { %4116 = vperm.xlu0 %6385, %v9314_v54   ;;  %11705 = vst [vmem:[#allocation36_spill] sm:$0xff] %v9487_v53  ;;  %v3287_v53 = vsel %vm1826_vm3, %v11715_v8, %v11714_v34 }
 0xe29   : > { %v9477_v23 = vpop.permute.xlu1 %3870  ;;  %v6512_v15 = vpop.eup %6511 }
 0xe2a   : > { %6368 = vset.pattern.permute.xlu1 %v11639_v22  ;;  %v9497_v28 = vpop.permute.xlu0 %2582  ;;  %v9504_v13 = vmul.f32 %v6512_v15, %v6508_v37  ;;  %v9520_v37 = vmul.f32 %v6512_v15, %v6510_v49 }
 0xe2b   : > { %3990 = vperm.xlu1 %6368, %v9233_v35   ;;  %4120 = vperm.xlu0 %6385, %v9225_v0   ;;  %11706 = vst [vmem:[#allocation98_spill] sm:$0xff] %v9497_v28 }
 0xe2d   : > { %v9485_v32 = vpop.permute.xlu1 %4164 }
 0xe2e   : > { %v9506_v4 = vpop.permute.xlu0 %2862 }
 0xe2f   : > { %4284 = vperm.xlu1 %6368, %v9314_v54   ;;  %4128 = vperm.xlu0 %6385, %v9483_v56   ;;  %11707 = vst [vmem:[#allocation89_spill] sm:$0xff] %v9506_v4  ;;  %v11716_v4 = vld [vmem:[#allocation102_spill] sm:$0xff] }
 0xe32   : > { %v9491_v26 = vpop.permute.xlu1 %3898  ;;  %v9515_v55 = vpop.permute.xlu0 %2874 }
 0xe33   : > { %6369 = vset.pattern.permute.xlu1 %v11633_v16  ;;  %6388 = vset.pattern.permute.xlu0 %v11638_v20  ;;  %11708 = vst [vmem:[#allocation103_spill] sm:$0xff] %v9515_v55 }
 0xe34   : > { %3826 = vperm.xlu1 %6369, %v9376_v10   ;;  %2422 = vperm.xlu0 %6388, %v8950_v3  }
 0xe36   : > { %v9525_v40 = vpop.permute.xlu0 %2882 }
 0xe37   : > { %v9499_v45 = vpop.permute.xlu1 %3926  ;;  %11709 = vst [vmem:[#allocation52_spill] sm:$0xff] %v9525_v40  ;;  %v3665_v40 = vsel %vm1826_vm3, %v9220_v19, %v9082_v31 }
 0xe38   : > { %6370 = vset.pattern.permute.xlu1 %v11630_v30  ;;  %2434 = vperm.xlu0 %6388, %v8201_v38  }
 0xe39   : > { %4089 = vperm.xlu1 %6370, %v9225_v0  }
 0xe3a   : > { %v9534_v49 = vpop.permute.xlu0 %4276 }
 0xe3b   : > { %v9508_v41 = vpop.permute.xlu1 %4220 }
 0xe3c   : > { %2442 = vperm.xlu0 %6388, %v8212_v43  }
 0xe3d   : > { %3800 = vperm.xlu1 %6370, %v9504_v13  }
 0xe3e   : > { %v9544_v28 = vpop.permute.xlu0 %4280 }
 0xe3f   : > { %11712 = vst [vmem:[#allocation53_spill] sm:$0xff] %v9544_v28 }
 0xe40   : > { %v9512_v50 = vpop.permute.xlu1 %4248  ;;  %2722 = vperm.xlu0 %6388, %v8162_v60  }
 0xe41   : > { %6371 = vset.pattern.permute.xlu1 %v11633_v16 }
 0xe42   : > { %3830 = vperm.xlu1 %6371, %v9504_v13  }
 0xe44   : > { %2734 = vperm.xlu0 %6388, %v11631_v51  }
 0xe45   : > { %v9522_v21 = vpop.permute.xlu1 %3982 }
 0xe46   : > { %6372 = vset.pattern.permute.xlu1 %v11630_v30 }
 0xe47   : > { %4094 = vperm.xlu1 %6372, %v9520_v37  }
 0xe48   : > { %2742 = vperm.xlu0 %6388, %v11632_v24  }
 0xe4a   : > { %v9529_v29 = vpop.permute.xlu1 %3785 }
 0xe4b   : > { %11710 = vst [vmem:[#allocation30_spill] sm:$0xff] %v9529_v29  ;;  %6373 = vset.pattern.permute.xlu1 %v11633_v16  ;;  %v3294_v29 = vsel %vm1834_vm4, %v3287_v53, %v11716_v4  ;;  %v11720_v4 = vld [vmem:[#allocation32_spill] sm:$0xff] }
 0xe4c   : > { %4124 = vperm.xlu1 %6373, %v9520_v37   ;;  %3850 = vperm.xlu0 %6388, %v9233_v35   ;;  %v3301_v31 = vsel %vm1842_vm5, %v3294_v29, %v11717_v27 }
 0xe4f   : > { %v9536_v15 = vpop.permute.xlu1 %3818 }
 0xe50   : > { %11711 = vst [vmem:[#allocation80_spill] sm:$0xff] %v9536_v15  ;;  %6374 = vset.pattern.permute.xlu1 %v11638_v20  ;;  %3854 = vperm.xlu0 %6388, %v9376_v10   ;;  %v3672_v15 = vsel %vm1834_vm4, %v3665_v40, %v9096_v61 }
 0xe51   : > { %3858 = vperm.xlu1 %6374, %v9504_v13   ;;  %v3679_v19 = vsel %vm1842_vm5, %v3672_v15, %v9278_v63 }
 0xe52   : > { %v3686_v8 = vsel %vm1850_vm6, %v3679_v19, %v9333_v14 }
 0xe53   : > { %v9546_v55 = vpop.permute.xlu1 %4112  ;;  %v3693_v29 = vsel %vm1858_vm7, %v3686_v8, %v9369_v39 }
 0xe54   : > { %11713 = vst [vmem:[#allocation81_spill] sm:$0xff] %v9546_v55  ;;  %4148 = vperm.xlu0 %6388, %v9225_v0   ;;  %v3308_v55 = vsel %vm1850_vm6, %v3301_v31, %v9316_v42  ;;  %v3700_v42 = vsel %vm1866_vm8, %v3693_v29, %v9387_v9 }
 0xe55   : > { %4152 = vperm.xlu1 %6374, %v9520_v37   ;;  %v9561_v28 = vpop.permute.xlu0 %4288  ;;  %v3315_v61 = vsel %vm1858_vm7, %v3308_v55, %v9358_v5  ;;  %v3707_v55 = vsel %vm1874_vm9, %v3700_v42, %v11720_v4 }
 0xe56   : > { %11718 = vst [vmem:[#allocation67_spill] sm:$0xff] %v9561_v28  ;;  %v3322_v63 = vsel %vm1866_vm8, %v3315_v61, %v9379_v11 }
 0xe57   : > { %v3329_v14 = vsel %vm1874_vm9, %v3322_v63, %v9398_v52 }
 0xe58   : > { %v9567_v34 = vpop.permute.xlu1 %3790  ;;  %3862 = vperm.xlu0 %6388, %v9425_v2   ;;  %v3714_v27 = vmax.f32 %v3329_v14, %v3707_v55 }
 0xe59   : > { %11719 = vst [vmem:[#allocation84_spill] sm:$0xff] %v9567_v34  ;;  %6375 = vset.pattern.permute.xlu1 %v11643_v25 }
 0xe5a   : > { %4176 = vperm.xlu1 %6375, %v9225_v0   ;;  %v9585_v5 = vpop.permute.xlu0 %2360  ;;  %v3721_v11 = vsub.f32 %v3329_v14, %v3714_v27  ;;  %v3742_v52 = vsub.f32 %v3707_v55, %v3714_v27 }
 0xe5c   : > { %4156 = vperm.xlu0 %6388, %v9483_v56   ;;  %v3734_v53 = vmul.f32 1.442695, %v3721_v11  ;;  %v3755_v15 = vmul.f32 1.442695, %v3742_v52  ;;  %v11730_v52 = vld [vmem:[#allocation62_spill] sm:$0xff] }
 0xe5d   : > { %v9587_v39 = vpop.permute.xlu1 %3846 }
 0xe5e   : > { %11721 = vst [vmem:[#allocation68_spill] sm:$0xff] %v9587_v39  ;;  %6376 = vset.pattern.permute.xlu1 %v11645_v62  ;;  %v9595_v40 = vpop.permute.xlu0 %2660  ;;  %6513 = vpow2.f32 %v3734_v53  ;;  %v2891_v53 = vsel %vm1503_vm2, %v11730_v52, %v9299_v36 }
 0xe5f   : > { %3910 = vperm.xlu1 %6376, %v9376_v10   ;;  %6515 = vpow2.f32 %v3755_v15 }
 0xe60   : > { %6392 = vset.pattern.permute.xlu0 %v11643_v25 }
 0xe61   : > { %2450 = vperm.xlu0 %6392, %v8950_v3  }
 0xe62   : > { %v9593_v9 = vpop.permute.xlu1 %4084  ;;  %v9603_v19 = vpop.permute.xlu0 %2675 }
 0xe63   : > { %11722 = vst [vmem:[#allocation54_spill] sm:$0xff] %v9593_v9  ;;  %4204 = vperm.xlu1 %6376, %v9225_v0  }
 0xe65   : > { %2462 = vperm.xlu0 %6392, %v8201_v38  }
 0xe66   : > { %v9611_v61 = vpop.permute.xlu0 %2685 }
 0xe67   : > { %v9599_v31 = vpop.permute.xlu1 %4140  ;;  %6377 = vset.pattern.permute.xlu1 %v11646_v1  ;;  %11725 = vst [vmem:[#allocation17_spill] sm:$0xff] %v9611_v61 }
 0xe68   : > { %11723 = vst [vmem:[#allocation86_spill] sm:$0xff] %v9599_v31  ;;  %3938 = vperm.xlu1 %6377, %v9376_v10   ;;  %v11739_v31 = vld [vmem:[#allocation46_spill] sm:$0xff] }
 0xe69   : > { %2470 = vperm.xlu0 %6392, %v8212_v43  }
 0xe6a   : > { %v9618_v63 = vpop.permute.xlu0 %3780 }
 0xe6b   : > { %v6514_v14 = vpop.eup %6513 }
 0xe6c   : > { %v9606_v8 = vpop.permute.xlu1 %3874  ;;  %6378 = vset.pattern.permute.xlu1 %v11645_v62  ;;  %v6516_v4 = vpop.eup %6515 }
 0xe6d   : > { %11724 = vst [vmem:[#allocation9_spill] sm:$0xff] %v9606_v8  ;;  %4208 = vperm.xlu1 %6378, %v9520_v37   ;;  %2750 = vperm.xlu0 %6392, %v8162_v60   ;;  %v3763_v55 = vadd.f32 %v6516_v4, %v6514_v14 }
 0xe6e   : > { %v9626_v27 = vpop.permute.xlu0 %4079 }
 0xe6f   : > { %11728 = vst [vmem:[#allocation90_spill] sm:$0xff] %v9626_v27  ;;  %6517 = vrcp.f32 %v3763_v55 }
 0xe71   : > { %v9613_v29 = vpop.permute.xlu1 %4144  ;;  %6379 = vset.pattern.permute.xlu1 %v11646_v1  ;;  %2762 = vperm.xlu0 %6392, %v11631_v51  }
 0xe72   : > { %11726 = vst [vmem:[#allocation91_spill] sm:$0xff] %v9613_v29  ;;  %3942 = vperm.xlu1 %6379, %v9504_v13   ;;  %v9641_v28 = vpop.permute.xlu0 %3795  ;;  %v11733_v29 = vld [vmem:[#allocation75_spill] sm:$0xff] }
 0xe75   : > { %2770 = vperm.xlu0 %6392, %v11632_v24  }
 0xe76   : > { %v9621_v42 = vpop.permute.xlu1 %3878  ;;  %6380 = vset.pattern.permute.xlu1 %v11647_v48 }
 0xe77   : > { %11727 = vst [vmem:[#allocation60_spill] sm:$0xff] %v9621_v42  ;;  %3966 = vperm.xlu1 %6380, %v9376_v10   ;;  %v11732_v42 = vld [vmem:[#allocation74_spill] sm:$0xff] }
 0xe78   : > { %v2898_v34 = vsel %vm2596_vm10, %v2891_v53, %v11732_v42  ;;  %v11735_v42 = vld [vmem:[#allocation64_spill] sm:$0xff]  ;;  %v11736_v53 = vld [vmem:[#allocation83_spill] sm:$0xff] }
 0xe79   : > { %4168 = vperm.xlu0 %6392, %v9180_v7   ;;  %v2905_v9 = vsel %vm2604_vm11, %v2898_v34, %v11733_v29  ;;  %v11738_v29 = vld [vmem:[#allocation49_spill] sm:$0xff] }
 0xe7a   : > { %v2912_v52 = vsel %vm2612_vm12, %v2905_v9, %v11735_v42  ;;  %v11740_v9 = vld [vmem:[#allocation92_spill] sm:$0xff] }
 0xe7b   : > { %v9628_v11 = vpop.permute.xlu1 %3902  ;;  %4260 = vperm.xlu1 %6380, %v9225_v0  }
 0xe7c   : > { %11729 = vst [vmem:[#allocation55_spill] sm:$0xff] %v9628_v11  ;;  %v6518_v11 = vpop.eup %6517 }
 0xe7d   : > { %4172 = vperm.xlu0 %6392, %v9314_v54  }
 0xe7f   : > { %v9635_v15 = vpop.permute.xlu1 %4196  ;;  %6381 = vset.pattern.permute.xlu1 %v11639_v22 }
 0xe80   : > { %11731 = vst [vmem:[#allocation24_spill] sm:$0xff] %v9635_v15  ;;  %3994 = vperm.xlu1 %6381, %v9376_v10   ;;  %v2919_v15 = vsel %vm2620_vm13, %v2912_v52, %v11736_v53  ;;  %v11741_v52 = vld [vmem:[#allocation47_spill] sm:$0xff] }
 0xe81   : > { %3882 = vperm.xlu0 %6392, %v9376_v10   ;;  %v2926_v42 = vsel %vm2628_vm14, %v2919_v15, %v11740_v9  ;;  %v11745_v15 = vld [vmem:[#allocation20_spill] sm:$0xff] }
 0xe82   : > { %v2933_v9 = vsel %vm2636_vm15, %v2926_v42, %v11745_v15  ;;  %v9702_v15 = vmul.f32 %v6518_v11, %v6516_v4 }
 0xe84   : > { %v9646_v36 = vpop.permute.xlu1 %3930  ;;  %6382 = vset.pattern.permute.xlu1 %v11647_v48 }
 0xe85   : > { %11734 = vst [vmem:[#allocation66_spill] sm:$0xff] %v9646_v36  ;;  %4264 = vperm.xlu1 %6382, %v9520_v37   ;;  %3886 = vperm.xlu0 %6392, %v9504_v13   ;;  %v9651_v55 = vpop.permute.xlu0 %3805 }
 0xe89   : > { %v9657_v10 = vpop.permute.xlu1 %4200  ;;  %6384 = vset.pattern.permute.xlu1 %v11639_v22  ;;  %4180 = vperm.xlu0 %6392, %v9520_v37  }
 0xe8a   : > { %11737 = vst [vmem:[#allocation40_spill] sm:$0xff] %v9657_v10  ;;  %3998 = vperm.xlu1 %6384, %v9504_v13   ;;  %v2403_v34 = vpop.permute.xlu0 %2402  ;;  %v11742_v10 = vld [vmem:[#allocation76_spill] sm:$0xff] }
 0xe8b   : > { %v2591_v36 = vsel %vm1503_vm2, %v11738_v29, %v2403_v34  ;;  %v9678_v29 = vmul.f32 %v6518_v11, %v6514_v14  ;;  %v11751_v14 = vld [vmem:[#allocation65_spill] sm:$0xff] }
 0xe8c   : > { %v2599_v8 = vsel %vm2596_vm10, %v2591_v36, %v11739_v31  ;;  %v11744_v31 = vld [vmem:[#allocation48_spill] sm:$0xff] }
 0xe8d   : > { %v2607_v53 = vsel %vm2604_vm11, %v2599_v8, %v11741_v52  ;;  %3890 = vperm.xlu0 %6392, %v9425_v2   ;;  %v11746_v8 = vld [vmem:[#allocation10_spill] sm:$0xff] }
 0xe8e   : > { %v2615_v61 = vsel %vm2612_vm12, %v2607_v53, %v11742_v10  ;;  %v9673_v39 = vpop.permute.xlu1 %3934  ;;  %4292 = vperm.xlu1 %6384, %v9520_v37   ;;  %v9676_v34 = vpop.permute.xlu0 %2414  ;;  %v9686_v52 = vadd.f32 %v11746_v8, %v9285_v46  ;;  %v11748_v10 = vld [vmem:[#allocation18_spill] sm:$0xff] }
 0xe8f   : > { %11743 = vst [vmem:[#allocation73_spill] sm:$0xff] %v9673_v39  ;;  %v2623_v36 = vsel %vm2620_vm13, %v2615_v61, %v11744_v31  ;;  %v9690_v53 = vadd.f32 %v11748_v10, %v9285_v46  ;;  %v11750_v39 = vld [vmem:[#allocation59_spill] sm:$0xff] }
 0xe90   : > { %11747 = vst [vmem:[#allocation41_spill] sm:$0xff] %v9686_v52  ;;  %v2631_v27 = vsel %vm2628_vm14, %v2623_v36, %v11750_v39 }
 0xe91   : > { %11749 = vst [vmem:[#allocation69_spill] sm:$0xff] %v9690_v53  ;;  %3894 = vperm.xlu0 %6392, %v9678_v29   ;;  %v2639_v57 = vsel %vm2636_vm15, %v2631_v27, %v11751_v14  ;;  %v2940_v31 = vmul.f32 %v2933_v9, %v9690_v53 }
 0xe92   : > { %6386 = vset.pattern.permute.xlu1 %v11633_v16  ;;  %v9698_v61 = vpop.permute.xlu0 %2694  ;;  %v2646_v42 = vmul.f32 %v2639_v57, %v9686_v52 }
 0xe93   : > { %v9704_v8 = vpop.permute.xlu1 %3958  ;;  %3834 = vperm.xlu1 %6386, %v9425_v2  }
 0xe94   : > { %11752 = vst [vmem:[#allocation87_spill] sm:$0xff] %v9704_v8  ;;  %v9707_v39 = vadd.f32 %v2940_v31, %v2646_v42  ;;  %v971_v8 = vld [vmem:[%s6839_s16 + $0x30] sm:$0xff] }
 0xe95   : > { %4188 = vperm.xlu0 %6392, %v9702_v15  }
 0xe96   : > { %11753 = vst [vmem:[#allocation37_spill] sm:$0xff] %v9707_v39  ;;  %v9710_v36 = vpop.permute.xlu0 %2706  ;;  %v970_v39 = vld [vmem:[%s6839_s16 + $0x28] sm:$0xff] }
 0xe97   : > { %v9712_v27 = vpop.permute.xlu1 %4252  ;;  %6387 = vset.pattern.permute.xlu1 %v11630_v30 }
 0xe98   : > { %11754 = vst [vmem:[#allocation12_spill] sm:$0xff] %v9712_v27  ;;  %4099 = vperm.xlu1 %6387, %v9483_v56  }
 0xe99   : > { %6396 = vset.pattern.permute.xlu0 %v11645_v62 }
 0xe9a   : > { %2478 = vperm.xlu0 %6396, %v8950_v3   ;;  %v9718_v57 = vpop.permute.xlu0 %2714 }
 0xe9b   : > { %11755 = vst [vmem:[#allocation21_spill] sm:$0xff] %v9718_v57 }
 0xe9c   : > { %v9720_v4 = vpop.permute.xlu1 %3986  ;;  %3810 = vperm.xlu1 %6387, %v9678_v29  }
 0xe9d   : > { %11756 = vst [vmem:[#allocation71_spill] sm:$0xff] %v9720_v4 }
 0xe9e   : > { %2490 = vperm.xlu0 %6396, %v8201_v38   ;;  %v9724_v11 = vpop.permute.xlu0 %3822 }
 0xe9f   : > { %11757 = vst [vmem:[#allocation25_spill] sm:$0xff] %v9724_v11  ;;  %v11763_v11 = vld [vmem:[#allocation33_spill] sm:$0xff] }
 0xea0   : > { %6389 = vset.pattern.permute.xlu1 %v11633_v16 }
 0xea1   : > { %v9727_v9 = vpop.permute.xlu1 %4256  ;;  %3838 = vperm.xlu1 %6389, %v9678_v29  }
 0xea2   : > { %11758 = vst [vmem:[#allocation95_spill] sm:$0xff] %v9727_v9  ;;  %2498 = vperm.xlu0 %6396, %v8212_v43   ;;  %v9731_v10 = vpop.permute.xlu0 %4116 }
 0xea3   : > { %11759 = vst [vmem:[#allocation26_spill] sm:$0xff] %v9731_v10 }
 0xea5   : > { %6390 = vset.pattern.permute.xlu1 %v11630_v30 }
 0xea6   : > { %v9734_v14 = vpop.permute.xlu1 %3990  ;;  %4104 = vperm.xlu1 %6390, %v9702_v15   ;;  %2778 = vperm.xlu0 %6396, %v8162_v60   ;;  %v9738_v42 = vpop.permute.xlu0 %4120 }
 0xea7   : > { %11760 = vst [vmem:[#allocation100_spill] sm:$0xff] %v9734_v14 }
 0xeaa   : > { %v9740_v31 = vpop.permute.xlu1 %4284  ;;  %6391 = vset.pattern.permute.xlu1 %v11633_v16  ;;  %2790 = vperm.xlu0 %6396, %v11631_v51   ;;  %v9744_v52 = vpop.permute.xlu0 %4128 }
 0xeab   : > { %11761 = vst [vmem:[#allocation28_spill] sm:$0xff] %v9740_v31  ;;  %11762 = vst [vmem:[#allocation63_spill] sm:$0xff] %v9744_v52  ;;  %4132 = vperm.xlu1 %6391, %v9702_v15  }
 0xeae   : > { %2798 = vperm.xlu0 %6396, %v11632_v24  }
 0xeaf   : > { %v9748_v30 = vpop.permute.xlu1 %3826  ;;  %6393 = vset.pattern.permute.xlu1 %v11638_v20  ;;  %v9751_v14 = vpop.permute.xlu0 %2422 }
 0xeb0   : > { %3866 = vperm.xlu1 %6393, %v9678_v29  }
 0xeb2   : > { %4192 = vperm.xlu0 %6396, %v11763_v11  }
 0xeb3   : > { %v9755_v53 = vpop.permute.xlu0 %2434 }
 0xeb4   : > { %v9757_v16 = vpop.permute.xlu1 %4089  ;;  %4160 = vperm.xlu1 %6393, %v9702_v15  }
 0xeb6   : > { %3906 = vperm.xlu0 %6396, %v9233_v35  }
 0xeb7   : > { %v9761_v52 = vpop.permute.xlu0 %2442 }
 0xeb8   : > { %v9763_v31 = vpop.permute.xlu1 %3800  ;;  %6394 = vset.pattern.permute.xlu1 %v11643_v25  ;;  %v972_v25 = vld [vmem:[%s6839_s16 + $0x38] sm:$0xff] }
 0xeb9   : > { %4184 = vperm.xlu1 %6394, %v9483_v56   ;;  %6205 = vmatprep.subr.mxu1 %v972_v25 }
 0xeba   : > { %3914 = vperm.xlu0 %6396, %v9504_v13   ;;  %6206 = vmatpush3.msra.mxu1 %v972_v25  ;;  %v968_v25 = vld [vmem:[%s6839_s16 + $0x18] sm:$0xff] }
 0xebb   : > { %v9768_v20 = vpop.permute.xlu0 %2722  ;;  %6207 = vmatprep.subr.mxu1 %v971_v8 }
 0xebc   : > { %6208 = vmatpush3.msra.mxu1 %v971_v8 }
 0xebd   : > { %v9770_v11 = vpop.permute.xlu1 %3830  ;;  %6395 = vset.pattern.permute.xlu1 %v11645_v62  ;;  %6209 = vmatprep.subr.mxu1 %v970_v39 }
 0xebe   : > { %3918 = vperm.xlu1 %6395, %v9425_v2   ;;  %3922 = vperm.xlu0 %6396, %v9678_v29  }
 0xebf   : > { %v9775_v9 = vpop.permute.xlu0 %2734  ;;  %6210 = vmatpush3.msra.mxu1 %v970_v39 }
 0xec0   : > { %11764 = vst [vmem:[#allocation97_spill] sm:$0xff] %v9775_v9 }
 0xec2   : > { %v4095_v27 = vpop.permute.xlu1 %4094  ;;  %4212 = vperm.xlu1 %6395, %v9483_v56   ;;  %6397 = vset.pattern.permute.xlu0 %v11646_v1 }
 0xec3   : > { %2506 = vperm.xlu0 %6397, %v8950_v3   ;;  %v9781_v4 = vpop.permute.xlu0 %2742 }
 0xec4   : > { %11765 = vst [vmem:[#allocation93_spill] sm:$0xff] %v9781_v4  ;;  %v969_v4 = vld [vmem:[%s6839_s16 + $0x20] sm:$0xff] }
 0xec5   : > { %6211 = vmatprep.subr.mxu1 %v969_v4 }
 0xec6   : > { %6398 = vset.pattern.permute.xlu1 %v11646_v1  ;;  %6212 = vmatpush3.msra.mxu1 %v969_v4 }
 0xec7   : > { %v4125_v10 = vpop.permute.xlu1 %4124  ;;  %3946 = vperm.xlu1 %6398, %v9425_v2   ;;  %2518 = vperm.xlu0 %6397, %v8201_v38   ;;  %v9788_v57 = vpop.permute.xlu0 %3850  ;;  %v967_v38 = vld [vmem:[%s6839_s16 + $0x10] sm:$0xff] }
 0xec8   : > { %11766 = vst [vmem:[#allocation102_spill] sm:$0xff] %v9788_v57  ;;  %v4307_v3 = vsel %vm1503_vm2, %v4095_v27, %v4125_v10  ;;  %6213 = vmatprep.subr.mxu1 %v968_v25  ;;  %v966_v27 = vld [vmem:[%s6839_s16 + $0x8] sm:$0xff] }
 0xec9   : > { %6214 = vmatpush3.msra.mxu1 %v968_v25  ;;  %v11769_v57 = vld [vmem:[#allocation11_spill] sm:$0xff] }
 0xeca   : > { %6215 = vmatprep.subr.mxu1 %v967_v38 }
 0xecb   : > { %6399 = vset.pattern.permute.xlu1 %v11645_v62  ;;  %2526 = vperm.xlu0 %6397, %v8212_v43   ;;  %v9795_v8 = vpop.permute.xlu0 %3854  ;;  %v965_v43 = vld [vmem:[%s6839_s16] sm:$0xff] }
 0xecc   : > { %v9797_v9 = vpop.permute.xlu1 %3858  ;;  %4216 = vperm.xlu1 %6399, %v9702_v15   ;;  %6216 = vmatpush3.msra.mxu1 %v967_v38 }
 0xecd   : > { %6217 = vmatprep.subr.mxu1 %v966_v27 }
 0xece   : > { %6218 = vmatpush3.msra.mxu1 %v966_v27 }
 0xecf   : > { %2806 = vperm.xlu0 %6397, %v8162_v60   ;;  %v4149_v39 = vpop.permute.xlu0 %4148  ;;  %6219 = vmatprep.subr.mxu1 %v965_v43 }
 0xed0   : > { %v4153_v10 = vpop.permute.xlu1 %4152  ;;  %6400 = vset.pattern.permute.xlu1 %v11646_v1  ;;  %6220 = vmatpush3.msra.mxu1 %v965_v43 }
 0xed1   : > { %v9806_v62 = vsel %vm2596_vm10, %v4307_v3, %v4153_v10  ;;  %3950 = vperm.xlu1 %6400, %v9678_v29  }
 0xed3   : > { %2818 = vperm.xlu0 %6397, %v11631_v51   ;;  %v9810_v4 = vpop.permute.xlu0 %3862  ;;  %v4306_v51 = vsel %vm1503_vm2, %v9757_v16, %v9738_v42 }
 0xed4   : > { %v4313_v38 = vsel %vm2596_vm10, %v4306_v51, %v4149_v39 }
 0xed5   : > { %v4177_v60 = vpop.permute.xlu1 %4176  ;;  %6401 = vset.pattern.permute.xlu1 %v11647_v48 }
 0xed6   : > { %3974 = vperm.xlu1 %6401, %v9425_v2   ;;  %v4320_v27 = vsel %vm2604_vm11, %v4313_v38, %v4177_v60 }
 0xed7   : > { %2826 = vperm.xlu0 %6397, %v11632_v24   ;;  %v9815_v1 = vpop.permute.xlu0 %4156 }
 0xed8   : > { %11767 = vst [vmem:[#allocation31_spill] sm:$0xff] %v9815_v1 }
 0xeda   : > { %v3911_v3 = vpop.permute.xlu1 %3910  ;;  %4268 = vperm.xlu1 %6401, %v9483_v56  }
 0xedb   : > { %4224 = vperm.xlu0 %6397, %v9180_v7  }
 0xedc   : > { %v9822_v25 = vpop.permute.xlu0 %2450 }
 0xede   : > { %v4205_v10 = vpop.permute.xlu1 %4204  ;;  %6403 = vset.pattern.permute.xlu1 %v11639_v22 }
 0xedf   : > { %v9828_v24 = vsel %vm2612_vm12, %v4320_v27, %v4205_v10  ;;  %4002 = vperm.xlu1 %6403, %v9425_v2   ;;  %4228 = vperm.xlu0 %6397, %v9314_v54   ;;  %v4012_v27 = vsel %vm1503_vm2, %v9641_v28, %v9748_v30  ;;  %v9876_v28 = vadd.f32 %v11769_v57, %v9285_v46 }
 0xee0   : > { %v9832_v7 = vpop.permute.xlu0 %2462  ;;  %v4019_v10 = vsel %vm2596_vm10, %v4012_v27, %v9795_v8 }
 0xee3   : > { %v3939_v43 = vpop.permute.xlu1 %3938  ;;  %6404 = vset.pattern.permute.xlu1 %v11647_v48  ;;  %4232 = vperm.xlu0 %6397, %v9225_v0  }
 0xee4   : > { %4272 = vperm.xlu1 %6404, %v9702_v15   ;;  %v9837_v42 = vpop.permute.xlu0 %2470 }
 0xee7   : > { %4236 = vperm.xlu0 %6397, %v9520_v37  }
 0xee8   : > { %v4209_v16 = vpop.permute.xlu1 %4208  ;;  %6406 = vset.pattern.permute.xlu1 %v11639_v22  ;;  %v9841_v39 = vpop.permute.xlu0 %2750 }
 0xee9   : > { %4006 = vperm.xlu1 %6406, %v9678_v29  }
 0xeeb   : > { %4240 = vperm.xlu0 %6397, %v9483_v56  }
 0xeec   : > { %v9845_v54 = vpop.permute.xlu0 %2762 }
 0xeed   : > { %v9847_v2 = vpop.permute.xlu1 %3942  ;;  %4300 = vperm.xlu1 %6406, %v9702_v15  }
 0xeee   : > { %11768 = vst [vmem:[#allocation32_spill] sm:$0xff] %v9847_v2 }
 0xeef   : > { %4244 = vperm.xlu0 %6397, %v9702_v15  }
 0xef0   : > { %v9851_v0 = vpop.permute.xlu0 %2770 }
 0xef2   : > { %v3967_v37 = vpop.permute.xlu1 %3966 }
 0xef3   : > { %6402 = vset.pattern.permute.xlu0 %v11647_v48 }
 0xef4   : > { %3962 = vperm.xlu0 %6402, %v9233_v35   ;;  %v9855_v60 = vpop.permute.xlu0 %4168 }
 0xef6   : > { %v9857_v51 = vpop.permute.xlu1 %4260 }
 0xef8   : > { %3970 = vperm.xlu0 %6402, %v9504_v13   ;;  %v9860_v38 = vpop.permute.xlu0 %4172  ;;  %v4013_v13 = vsel %vm1503_vm2, %v9763_v31, %v9770_v11 }
 0xef9   : > { %v4020_v30 = vsel %vm2596_vm10, %v4013_v13, %v9797_v9 }
 0xefb   : > { %v3995_v15 = vpop.permute.xlu1 %3994 }
 0xefc   : > { %3978 = vperm.xlu0 %6402, %v9678_v29   ;;  %v3883_v48 = vpop.permute.xlu0 %3882 }
 0xefd   : > { %v4026_v35 = vsel %vm2604_vm11, %v4019_v10, %v3883_v48 }
 0xefe   : > { %v4033_v1 = vsel %vm2612_vm12, %v4026_v35, %v3911_v3 }
 0xeff   : > { %v4040_v2 = vsel %vm2620_vm13, %v4033_v1, %v3939_v43 }
 0xf00   : > { %v4047_v29 = vsel %vm2628_vm14, %v4040_v2, %v3967_v37  ;;  %v9881_v8 = vpop.permute.xlu1 %4264  ;;  %6405 = vset.pattern.permute.xlu0 %v11639_v22  ;;  %v3887_v3 = vpop.permute.xlu0 %3886 }
 0xf01   : > { %v9885_v27 = vsel %vm2604_vm11, %v4020_v30, %v3887_v3  ;;  %4296 = vperm.xlu0 %6405, %v9483_v56   ;;  %v4054_v31 = vsel %vm2636_vm15, %v4047_v29, %v3995_v15  ;;  %v4009_v3 = vsel %vm1503_vm2, %v9618_v63, %v9442_v33 }
 0xf02   : > { %v9890_v57 = vmul.f32 %v4054_v31, %v9876_v28 }
 0xf04   : > { %v4181_v11 = vpop.permute.xlu0 %4180 }
 0xf05   : > { %v4321_v9 = vsel %vm2604_vm11, %v9806_v62, %v4181_v11  ;;  %v9894_v1 = vpop.permute.xlu1 %3998 }
 0xf06   : > { %11770 = vst [vmem:[#allocation62_spill] sm:$0xff] %v9894_v1  ;;  %v9897_v43 = vsel %vm2612_vm12, %v4321_v9, %v4209_v16  ;;  %v11783_v1 = vld [vmem:[#allocation42_spill] sm:$0xff] }
 0xf08   : > { %v3891_v22 = vpop.permute.xlu0 %3890 }
 0xf09   : > { %v9899_v2 = vpop.permute.xlu1 %4292 }
 0xf0c   : > { %v3895_v37 = vpop.permute.xlu0 %3894 }
 0xf0e   : > { %v3835_v10 = vpop.permute.xlu1 %3834 }
 0xf0f   : > { %v4014_v56 = vsel %vm1503_vm2, %v9651_v55, %v3835_v10 }
 0xf10   : > { %v4021_v15 = vsel %vm2596_vm10, %v4014_v56, %v9810_v4  ;;  %v9905_v48 = vpop.permute.xlu0 %4188  ;;  %v4016_v4 = vsel %vm2596_vm10, %v4009_v3, %v9463_v18  ;;  %v4303_v18 = vsel %vm1503_vm2, %v9449_v58, %v9456_v12  ;;  %v11771_v12 = vld [vmem:[#allocation8_spill] sm:$0xff] }
 0xf11   : > { %v9908_v62 = vsel %vm2604_vm11, %v4021_v15, %v3891_v22  ;;  %v4023_v9 = vsel %vm2604_vm11, %v4016_v4, %v9477_v23  ;;  %v4310_v23 = vsel %vm2596_vm10, %v4303_v18, %v9470_v17  ;;  %v9955_v17 = vadd.f32 %v11771_v12, %v9285_v46 }
 0xf12   : > { %v4030_v10 = vsel %vm2612_vm12, %v4023_v9, %v9491_v26  ;;  %v4317_v26 = vsel %vm2604_vm11, %v4310_v23, %v9485_v32 }
 0xf13   : > { %v9910_v35 = vpop.permute.xlu1 %4099  ;;  %v4037_v33 = vsel %vm2620_vm13, %v4030_v10, %v9499_v45 }
 0xf14   : > { %v4044_v3 = vsel %vm2628_vm14, %v4037_v33, %v9467_v6  ;;  %v11772_v6 = vld [vmem:[#allocation15_spill] sm:$0xff] }
 0xf15   : > { %v2479_v16 = vpop.permute.xlu0 %2478  ;;  %v4051_v58 = vsel %vm2636_vm15, %v4044_v3, %v9522_v21  ;;  %v9959_v33 = vadd.f32 %v11772_v6, %v9285_v46 }
 0xf16   : > { %v4058_v23 = vmul.f32 %v4051_v58, %v9955_v17 }
 0xf17   : > { %v3811_v13 = vpop.permute.xlu1 %3810 }
 0xf19   : > { %v9912_v30 = vpop.permute.xlu0 %2490 }
 0xf1c   : > { %v3839_v29 = vpop.permute.xlu1 %3838 }
 0xf1d   : > { %v9917_v55 = vpop.permute.xlu0 %2498 }
 0xf21   : > { %v9921_v31 = vpop.permute.xlu1 %4104  ;;  %v9923_v11 = vpop.permute.xlu0 %2778 }
 0xf25   : > { %v9927_v22 = vpop.permute.xlu0 %2790 }
 0xf26   : > { %v9931_v56 = vpop.permute.xlu1 %4132 }
 0xf29   : > { %v9935_v63 = vpop.permute.xlu0 %2798 }
 0xf2b   : > { %v3867_v15 = vpop.permute.xlu1 %3866 }
 0xf2d   : > { %v4193_v4 = vpop.permute.xlu0 %4192 }
 0xf2e   : > { %v4324_v9 = vsel %vm2612_vm12, %v4317_v26, %v4193_v4  ;;  %v4015_v4 = vsel %vm1503_vm2, %v3811_v13, %v3839_v29  ;;  %v11778_v29 = vld [vmem:[#allocation78_spill] sm:$0xff] }
 0xf2f   : > { %v4331_v45 = vsel %vm2620_vm13, %v4324_v9, %v9508_v41  ;;  %v9949_v10 = vpop.permute.xlu1 %4160  ;;  %v4022_v12 = vsel %vm2596_vm10, %v4015_v4, %v3867_v15  ;;  %v11779_v4 = vld [vmem:[#allocation72_spill] sm:$0xff] }
 0xf30   : > { %v4338_v32 = vsel %vm2628_vm14, %v4331_v45, %v9512_v50  ;;  %v11774_v50 = vld [vmem:[#allocation85_spill] sm:$0xff]  ;;  %v4029_v58 = vsel %vm2604_vm11, %v4022_v12, %v3895_v37  ;;  %v11781_v12 = vld [vmem:[#allocation56_spill] sm:$0xff] }
 0xf31   : > { %v4345_v18 = vsel %vm2636_vm15, %v4338_v32, %v9534_v49  ;;  %v9965_v41 = vpop.permute.xlu0 %3906  ;;  %v2895_v49 = vsel %vm1503_vm2, %v11774_v50, %v9434_v44  ;;  %v11780_v50 = vld [vmem:[#allocation82_spill] sm:$0xff] }
 0xf32   : > { %v4352_v21 = vmul.f32 %v4345_v18, %v9959_v33  ;;  %v11776_v18 = vld [vmem:[#allocation94_spill] sm:$0xff] }
 0xf34   : > { %v9969_v3 = vpop.permute.xlu1 %4184  ;;  %v9971_v26 = vadd.f32 %v4352_v21, %v4058_v23  ;;  %v11777_v23 = vld [vmem:[#allocation45_spill] sm:$0xff]  ;;  %v2902_v21 = vsel %vm2596_vm10, %v2895_v49, %v11778_v29 }
 0xf35   : > { %11773 = vst [vmem:[#allocation74_spill] sm:$0xff] %v9969_v3  ;;  %v9974_v9 = vpop.permute.xlu0 %3914  ;;  %v2595_v13 = vsel %vm1503_vm2, %v11777_v23, %v11776_v18  ;;  %v2909_v3 = vsel %vm2604_vm11, %v2902_v21, %v11780_v50  ;;  %v2589_v18 = vsel %vm1503_vm2, %v9585_v5, %v11783_v1  ;;  %v11784_v21 = vld [vmem:[#allocation57_spill] sm:$0xff] }
 0xf36   : > { %v2603_v44 = vsel %vm2596_vm10, %v2595_v13, %v11779_v4  ;;  %v2597_v49 = vsel %vm2596_vm10, %v2589_v18, %v9751_v14  ;;  %v11788_v1 = vld [vmem:[#allocation13_spill] sm:$0xff] }
 0xf37   : > { %v2605_v29 = vsel %vm2604_vm11, %v2597_v49, %v9822_v25  ;;  %v10021_v18 = vadd.f32 %v11788_v1, %v9285_v46  ;;  %v11789_v25 = vld [vmem:[#allocation19_spill] sm:$0xff]  ;;  %v11792_v1 = vld [vmem:[#allocation22_spill] sm:$0xff] }
 0xf38   : > { %v10025_v49 = vadd.f32 %v11789_v25, %v9285_v46  ;;  %v10042_v25 = vadd.f32 %v11792_v1, %v9285_v46  ;;  %v11798_v1 = vld [vmem:[#allocation51_spill] sm:$0xff] }
 0xf39   : > { %v9980_v45 = vpop.permute.xlu1 %3918  ;;  %v3923_v6 = vpop.permute.xlu0 %3922 }
 0xf3a   : > { %v9984_v32 = vsel %vm2612_vm12, %v4029_v58, %v3923_v6  ;;  %v2611_v58 = vsel %vm2604_vm11, %v2603_v44, %v11781_v12  ;;  %v11782_v6 = vld [vmem:[#allocation79_spill] sm:$0xff]  ;;  %v11785_v44 = vld [vmem:[#allocation70_spill] sm:$0xff] }
 0xf3b   : > { %11775 = vst [vmem:[#allocation75_spill] sm:$0xff] %v9984_v32  ;;  %v2916_v32 = vsel %vm2612_vm12, %v2909_v3, %v11782_v6  ;;  %v2619_v4 = vsel %vm2612_vm12, %v2611_v58, %v11784_v21  ;;  %v2613_v3 = vsel %vm2612_vm12, %v2605_v29, %v2479_v16  ;;  %v11786_v12 = vld [vmem:[#allocation34_spill] sm:$0xff]  ;;  %v11787_v6 = vld [vmem:[#allocation35_spill] sm:$0xff]  ;;  %v1451_v58 = vpop.f32.mrf.mxu0 }
 0xf3c   : > { %v2923_v50 = vsel %vm2620_vm13, %v2916_v32, %v11785_v44  ;;  %v2592_v5 = vsel %vm1503_vm2, %v11787_v6, %v11786_v12  ;;  %v11790_v16 = vld [vmem:[#allocation58_spill] sm:$0xff]  ;;  %v11791_v12 = vld [vmem:[#allocation16_spill] sm:$0xff] }
 0xf3d   : > { %v9991_v15 = vpop.permute.xlu1 %4212  ;;  %v2600_v32 = vsel %vm2596_vm10, %v2592_v5, %v9755_v53  ;;  %v2627_v29 = vsel %vm2620_vm13, %v2619_v4, %v11790_v16  ;;  %v2930_v6 = vsel %vm2628_vm14, %v2923_v50, %v11791_v12  ;;  %v11797_v12 = vld [vmem:[#allocation29_spill] sm:$0xff] }
 0xf3e   : > { %v2507_v37 = vpop.permute.xlu0 %2506  ;;  %v2608_v44 = vsel %vm2604_vm11, %v2600_v32, %v9832_v7  ;;  %v11793_v7 = vld [vmem:[#allocation50_spill] sm:$0xff] }
 0xf3f   : > { %v2621_v14 = vsel %vm2620_vm13, %v2613_v3, %v2507_v37  ;;  %v2889_v37 = vsel %vm1503_vm2, %v9595_v40, %v9698_v61  ;;  %v2616_v4 = vsel %vm2612_vm12, %v2608_v44, %v9912_v30  ;;  %v10051_v61 = vadd.f32 %v1451_v58, %v9285_v46  ;;  %v11795_v58 = vld [vmem:[#allocation23_spill] sm:$0xff] }
 0xf40   : > { %v2896_v53 = vsel %vm2596_vm10, %v2889_v37, %v9768_v20  ;;  %v2629_v40 = vsel %vm2628_vm14, %v2621_v14, %v9417_v59  ;;  %v2594_v50 = vsel %vm1503_vm2, %v11793_v7, %v9676_v34  ;;  %v11794_v59 = vld [vmem:[#allocation39_spill] sm:$0xff]  ;;  %v2937_v37 = vsel %vm2636_vm15, %v2930_v6, %v11795_v58  ;;  %v11801_v7 = vld [vmem:[#allocation89_spill] sm:$0xff]  ;;  %v11804_v58 = vld [vmem:[#allocation68_spill] sm:$0xff] }
 0xf41   : > { %v2903_v5 = vsel %vm2604_vm11, %v2896_v53, %v9841_v39  ;;  %v2602_v20 = vsel %vm2596_vm10, %v2594_v50, %v9761_v52  ;;  %v2635_v14 = vsel %vm2628_vm14, %v2627_v29, %v11794_v59  ;;  %v2892_v34 = vsel %vm1503_vm2, %v9603_v19, %v9710_v36  ;;  %v11800_v53 = vld [vmem:[#allocation30_spill] sm:$0xff]  ;;  %v11802_v50 = vld [vmem:[#allocation81_spill] sm:$0xff] }
 0xf42   : > { %v10006_v23 = vpop.permute.xlu1 %3946  ;;  %v2519_v13 = vpop.permute.xlu0 %2518  ;;  %v2910_v30 = vsel %vm2612_vm12, %v2903_v5, %v9923_v11  ;;  %v2610_v39 = vsel %vm2604_vm11, %v2602_v20, %v9837_v42  ;;  %v2637_v52 = vsel %vm2636_vm15, %v2629_v40, %v9475_v47  ;;  %v11796_v11 = vld [vmem:[#allocation97_spill] sm:$0xff]  ;;  %v11799_v42 = vld [vmem:[#allocation80_spill] sm:$0xff]  ;;  %v11803_v5 = vld [vmem:[#allocation90_spill] sm:$0xff] }
 0xf43   : > { %v2624_v32 = vsel %vm2620_vm13, %v2616_v4, %v2519_v13  ;;  %v2899_v44 = vsel %vm2596_vm10, %v2892_v34, %v11796_v11  ;;  %v2618_v29 = vsel %vm2612_vm12, %v2610_v39, %v9917_v55  ;;  %v4010_v4 = vsel %vm1503_vm2, %v11800_v53, %v11799_v42  ;;  %v11805_v34 = vld [vmem:[#allocation21_spill] sm:$0xff] }
 0xf44   : > { %v2632_v6 = vsel %vm2628_vm14, %v2624_v32, %v11797_v12  ;;  %v2906_v47 = vsel %vm2604_vm11, %v2899_v44, %v9845_v54  ;;  %v4304_v32 = vsel %vm1503_vm2, %v11803_v5, %v11802_v50  ;;  %v4017_v54 = vsel %vm2596_vm10, %v4010_v4, %v11804_v58  ;;  %v11809_v12 = vld [vmem:[#allocation43_spill] sm:$0xff]  ;;  %v11812_v4 = vld [vmem:[#allocation86_spill] sm:$0xff] }
 0xf45   : > { %v2913_v20 = vsel %vm2612_vm12, %v2906_v47, %v9927_v22  ;;  %v11813_v47 = vld [vmem:[#allocation103_spill] sm:$0xff] }
 0xf46   : > { %v2527_v21 = vpop.permute.xlu0 %2526  ;;  %v11814_v50 = vld [vmem:[#allocation55_spill] sm:$0xff] }
 0xf47   : > { %v10036_v3 = vpop.permute.xlu1 %4216  ;;  %v2626_v40 = vsel %vm2620_vm13, %v2618_v29, %v2527_v21  ;;  %v11806_v21 = vld [vmem:[#allocation17_spill] sm:$0xff] }
 0xf48   : > { %v2894_v39 = vsel %vm1503_vm2, %v11806_v21, %v11805_v34  ;;  %v11808_v29 = vld [vmem:[#allocation93_spill] sm:$0xff] }
 0xf49   : > { %v2901_v22 = vsel %vm2596_vm10, %v2894_v39, %v11808_v29 }
 0xf4a   : > { %v2807_v16 = vpop.permute.xlu0 %2806  ;;  %v2908_v53 = vsel %vm2604_vm11, %v2901_v22, %v9851_v0  ;;  %v11822_v22 = vld [vmem:[#allocation77_spill] sm:$0xff] }
 0xf4b   : > { %v2917_v13 = vsel %vm2620_vm13, %v2910_v30, %v2807_v16  ;;  %v2644_v16 = vmul.f32 %v2637_v52, %v9955_v17  ;;  %v2634_v17 = vsel %vm2628_vm14, %v2626_v40, %v11809_v12  ;;  %v11810_v52 = vld [vmem:[#allocation38_spill] sm:$0xff]  ;;  %v2915_v5 = vsel %vm2612_vm12, %v2908_v53, %v9935_v63  ;;  %v11818_v63 = vld [vmem:[#allocation27_spill] sm:$0xff] }
 0xf4c   : > { %v2924_v19 = vsel %vm2628_vm14, %v2917_v13, %v11798_v1  ;;  %v10083_v36 = vpop.permute.xlu1 %3950  ;;  %v11807_v13 = vld [vmem:[#allocation36_spill] sm:$0xff]  ;;  %v11823_v12 = vld [vmem:[#allocation14_spill] sm:$0xff]  ;;  %v2944_v53 = vmul.f32 %v2937_v37, %v10051_v61 }
 0xf4d   : > { %v2931_v55 = vsel %vm2636_vm15, %v2924_v19, %v11801_v7  ;;  %v2640_v11 = vsel %vm2636_vm15, %v2632_v6, %v11807_v13  ;;  %v11811_v19 = vld [vmem:[#allocation9_spill] sm:$0xff]  ;;  %v4311_v6 = vsel %vm2596_vm10, %v4304_v32, %v11812_v4  ;;  %v11820_v13 = vld [vmem:[#allocation44_spill] sm:$0xff]  ;;  %v11826_v4 = vld [vmem:[#allocation91_spill] sm:$0xff] }
 0xf4e   : > { %v2819_v30 = vpop.permute.xlu0 %2818  ;;  %v2938_v59 = vmul.f32 %v2931_v55, %v9959_v33  ;;  %v4024_v42 = vsel %vm2604_vm11, %v4017_v54, %v11811_v19  ;;  %v4318_v58 = vsel %vm2604_vm11, %v4311_v6, %v9855_v60  ;;  %v11817_v54 = vld [vmem:[#allocation98_spill] sm:$0xff]  ;;  %v2643_v60 = vsel %vm2636_vm15, %v2635_v14, %v11822_v22 }
 0xf4f   : > { %v2920_v44 = vsel %vm2620_vm13, %v2913_v20, %v2819_v30  ;;  %v4031_v40 = vsel %vm2612_vm12, %v4024_v42, %v11814_v50  ;;  %v2647_v20 = vmul.f32 %v2640_v11, %v9876_v28  ;;  %v2642_v34 = vsel %vm2636_vm15, %v2634_v17, %v11817_v54  ;;  %v11819_v28 = vld [vmem:[#allocation66_spill] sm:$0xff]  ;;  %v11831_v54 = vld [vmem:[#allocation53_spill] sm:$0xff] }
 0xf50   : > { %v2927_v33 = vsel %vm2628_vm14, %v2920_v44, %v11810_v52  ;;  %v2945_v1 = vadd.f32 %v2938_v59, %v2644_v16  ;;  %v11815_v16 = vld [vmem:[#allocation26_spill] sm:$0xff]  ;;  %v4038_v39 = vsel %vm2620_vm13, %v4031_v40, %v11819_v28  ;;  %v11821_v44 = vld [vmem:[#allocation37_spill] sm:$0xff]  ;;  %v10149_v17 = vadd.f32 %v11823_v12, %v9285_v46  ;;  %v11824_v52 = vld [vmem:[#allocation87_spill] sm:$0xff] }
 0xf51   : > { %v2934_v7 = vsel %vm2636_vm15, %v2927_v33, %v11813_v47  ;;  %v3975_v55 = vpop.permute.xlu1 %3974  ;;  %v11816_v59 = vld [vmem:[#allocation54_spill] sm:$0xff]  ;;  %v4045_v33 = vsel %vm2628_vm14, %v4038_v39, %v11824_v52  ;;  %v2649_v47 = vmul.f32 %v2642_v34, %v10021_v18  ;;  %v11828_v40 = vld [vmem:[#allocation71_spill] sm:$0xff] }
 0xf52   : > { %v2941_v30 = vmul.f32 %v2934_v7, %v10025_v49  ;;  %6221 = vmatprep.mubr.msk.f32.mxu1 %vm1028_vm1, %v2945_v1  ;;  %v2827_v0 = vpop.permute.xlu0 %2826  ;;  %v4305_v32 = vsel %vm1503_vm2, %v11816_v59, %v11815_v16  ;;  %v11825_v1 = vld [vmem:[#allocation52_spill] sm:$0xff]  ;;  %v2650_v37 = vmul.f32 %v2643_v60, %v10149_v17  ;;  %v11835_v12 = vld [vmem:[#allocation95_spill] sm:$0xff] }
 0xf53   : > { %v2922_v21 = vsel %vm2620_vm13, %v2915_v5, %v2827_v0  ;;  %6222 = vmatmul.mubr.msk.f32.vlgmr.msra.gmra.mxu1 %vm1028_vm1, %v11818_v63  ;;  %v4312_v6 = vsel %vm2596_vm10, %v4305_v32, %v11826_v4  ;;  %v11827_v7 = vld [vmem:[#allocation24_spill] sm:$0xff]  ;;  %v4052_v5 = vsel %vm2636_vm15, %v4045_v33, %v11828_v40  ;;  %v4035_v0 = vsel %vm2612_vm12, %v9908_v62, %v9980_v45  ;;  %v11830_v32 = vld [vmem:[#allocation101_spill] sm:$0xff] }
 0xf54   : > { %v2929_v11 = vsel %vm2628_vm14, %v2922_v21, %v11820_v13  ;;  %6224 = vmatprep.mubr.msk.f32.mxu1 %vm1028_vm1, %v11821_v44  ;;  %v2948_v29 = vadd.f32 %v2941_v30, %v2647_v20  ;;  %v4325_v46 = vsel %vm2612_vm12, %v4318_v58, %v11827_v7  ;;  %v4319_v20 = vsel %vm2604_vm11, %v4312_v6, %v9860_v38  ;;  %v11829_v16 = vld [vmem:[#allocation12_spill] sm:$0xff]  ;;  %v11833_v13 = vld [vmem:[#allocation99_spill] sm:$0xff] }
 0xf55   : > { %v2936_v19 = vsel %vm2636_vm15, %v2929_v11, %v11825_v1  ;;  %v10155_v42 = vpop.permute.xlu1 %4268  ;;  %v4042_v38 = vsel %vm2620_vm13, %v4035_v0, %v10006_v23  ;;  %v2951_v21 = vadd.f32 %v2944_v53, %v2650_v37  ;;  %v11832_v63 = vld [vmem:[#allocation88_spill] sm:$0xff] }
 0xf56   : > { %v2943_v14 = vmul.f32 %v2936_v19, %v10042_v25  ;;  %v4225_v50 = vpop.permute.xlu0 %4224  ;;  %v4059_v28 = vmul.f32 %v4052_v5, %v11832_v63  ;;  %v4049_v39 = vsel %vm2628_vm14, %v4042_v38, %v3975_v55  ;;  %v11834_v11 = vld [vmem:[#allocation40_spill] sm:$0xff]  ;;  %v11837_v19 = vld [vmem:[#allocation69_spill] sm:$0xff] }
 0xf57   : > { %v4332_v30 = vsel %vm2620_vm13, %v4325_v46, %v4225_v50  ;;  %6225 = vmatmul.mubr.msk.f32.gmra.mxu1 %vm1028_vm1, %v2948_v29  ;;  %v4326_v44 = vsel %vm2612_vm12, %v4319_v20, %v11834_v11  ;;  %v11836_v33 = vld [vmem:[#allocation28_spill] sm:$0xff] }
 0xf58   : > { %v4339_v59 = vsel %vm2628_vm14, %v4332_v30, %v11829_v16  ;;  %6227 = vmatprep.mubr.msk.f32.mxu1 %vm1028_vm1, %v11830_v32  ;;  %v2950_v58 = vadd.f32 %v2943_v14, %v2649_v47  ;;  %v11838_v47 = vld [vmem:[#allocation67_spill] sm:$0xff]  ;;  %v11840_v30 = vld [vmem:[#allocation25_spill] sm:$0xff]  ;;  %v11841_v37 = vld [vmem:[#allocation84_spill] sm:$0xff] }
 0xf59   : > { %v4346_v34 = vsel %vm2636_vm15, %v4339_v59, %v11831_v54  ;;  %v4011_v0 = vsel %vm1503_vm2, %v11841_v37, %v11840_v30  ;;  %v11844_v54 = vld [vmem:[#allocation73_spill] sm:$0xff]  ;;  %v11848_v11 = vld [vmem:[#allocation32_spill] sm:$0xff] }
 0xf5a   : > { %v4353_v62 = vmul.f32 %v4346_v34, %v11833_v13  ;;  %v4003_v45 = vpop.permute.xlu1 %4002  ;;  %v4229_v29 = vpop.permute.xlu0 %4228 }
 0xf5b   : > { %v4056_v22 = vsel %vm2636_vm15, %v4049_v39, %v4003_v45  ;;  %v4333_v60 = vsel %vm2620_vm13, %v4326_v44, %v4229_v29  ;;  %6228 = vmatmul.mubr.msk.f32.gmra.mxu1 %vm1028_vm1, %v2950_v58 }
 0xf5c   : > { %v10191_v23 = vmul.f32 %v4056_v22, %v10021_v18  ;;  %v4340_v52 = vsel %vm2628_vm14, %v4333_v60, %v11835_v12  ;;  %6230 = vmatprep.mubr.msk.f32.mxu1 %vm1028_vm1, %v2951_v21  ;;  %v4360_v55 = vadd.f32 %v4353_v62, %v4059_v28  ;;  %v11847_v62 = vld [vmem:[#allocation63_spill] sm:$0xff]  ;;  %v11849_v22 = vld [vmem:[#allocation62_spill] sm:$0xff] }
 0xf5d   : > { %v4347_v1 = vsel %vm2636_vm15, %v4340_v52, %v11836_v33  ;;  %v4308_v45 = vsel %vm1503_vm2, %v9910_v35, %v11847_v62  ;;  %v11850_v12 = vld [vmem:[#allocation31_spill] sm:$0xff]  ;;  %v11851_v33 = vld [vmem:[#allocation96_spill] sm:$0xff]  ;;  %v11852_v35 = vld [vmem:[#allocation74_spill] sm:$0xff] }
 0xf5e   : > { %v4354_v53 = vmul.f32 %v4347_v1, %v11837_v19  ;;  %v4233_v4 = vpop.permute.xlu0 %4232  ;;  %v4315_v52 = vsel %vm2596_vm10, %v4308_v45, %v11850_v12  ;;  %v6609_v62 = vld [vmem:[%s11300_s23 + $0x28] sm:$0xff] }
 0xf5f   : > { %v4334_v6 = vsel %vm2620_vm13, %v9828_v24, %v4233_v4  ;;  %6231 = vmatmul.mubr.msk.f32.gmra.mxu1 %vm1028_vm1, %v9971_v26  ;;  %v4273_v59 = vpop.permute.xlu1 %4272  ;;  %v4322_v19 = vsel %vm2604_vm11, %v4315_v52, %v11852_v35  ;;  %v11853_v4 = vld [vmem:[#allocation75_spill] sm:$0xff] }
 0xf60   : > { %v4341_v18 = vsel %vm2628_vm14, %v4334_v6, %v9857_v51  ;;  %6233 = vmatprep.mubr.msk.f32.mxu1 %vm1028_vm1, %v4360_v55  ;;  %v11839_v51 = vld [vmem:[#allocation61_spill] sm:$0xff]  ;;  %v6612_v35 = vld [vmem:[%s11300_s23 + $0x48] sm:$0xff] }
 0xf61   : > { %v4348_v14 = vsel %vm2636_vm15, %v4341_v18, %v11838_v47  ;;  %v4329_v47 = vsel %vm2612_vm12, %v4322_v19, %v9991_v15 }
 0xf62   : > { %v4355_v7 = vmul.f32 %v4348_v14, %v10025_v49  ;;  %v4237_v46 = vpop.permute.xlu0 %4236  ;;  %v11842_v49 = vld [vmem:[#allocation102_spill] sm:$0xff] }
 0xf63   : > { %v4335_v50 = vsel %vm2620_vm13, %v9897_v43, %v4237_v46  ;;  %v4018_v16 = vsel %vm2596_vm10, %v4011_v0, %v11842_v49 }
 0xf64   : > { %v4342_v24 = vsel %vm2628_vm14, %v4335_v50, %v9881_v8  ;;  %v4362_v40 = vadd.f32 %v4355_v7, %v9890_v57  ;;  %v4309_v8 = vsel %vm1503_vm2, %v9921_v31, %v9931_v56  ;;  %v11843_v57 = vld [vmem:[#allocation60_spill] sm:$0xff]  ;;  %v4034_v31 = vsel %vm2612_vm12, %v9885_v27, %v9974_v9  ;;  %v4007_v63 = vpop.permute.xlu1 %4006 }
 0xf65   : > { %v4349_v26 = vsel %vm2636_vm15, %v4342_v24, %v9899_v2  ;;  %v4025_v32 = vsel %vm2604_vm11, %v4018_v16, %v11843_v57  ;;  %v4316_v2 = vsel %vm2596_vm10, %v4309_v8, %v9949_v10  ;;  %v4041_v27 = vsel %vm2620_vm13, %v4034_v31, %v11848_v11  ;;  %v6605_v16 = vld [vmem:[%s11300_s23] sm:$0xff] }
 0xf66   : > { %v4356_v5 = vmul.f32 %v4349_v26, %v11839_v51  ;;  %v4241_v20 = vpop.permute.xlu0 %4240  ;;  %v4032_v58 = vsel %vm2612_vm12, %v4025_v32, %v9965_v41  ;;  %v4323_v38 = vsel %vm2604_vm11, %v4316_v2, %v9905_v48  ;;  %v11845_v41 = vld [vmem:[#allocation100_spill] sm:$0xff]  ;;  %v11846_v48 = vld [vmem:[#allocation41_spill] sm:$0xff] }
 0xf67   : > { %v4039_v34 = vsel %vm2620_vm13, %v4032_v58, %v11844_v54  ;;  %v4330_v56 = vsel %vm2612_vm12, %v4323_v38, %v10036_v3  ;;  %v4336_v46 = vsel %vm2620_vm13, %v4329_v47, %v4241_v20  ;;  %v6606_v38 = vld [vmem:[%s11300_s23 + $0x10] sm:$0xff] }
 0xf68   : > { %v4301_v55 = vpop.permute.xlu1 %4300 }
 0xf6a   : > { %v4245_v43 = vpop.permute.xlu0 %4244 }
 0xf6b   : > { %v4337_v28 = vsel %vm2620_vm13, %v4330_v56, %v4245_v43 }
 0xf6c   : > { %v4344_v3 = vsel %vm2628_vm14, %v4337_v28, %v4273_v59 }
 0xf6d   : > { %v4351_v6 = vsel %vm2636_vm15, %v4344_v3, %v4301_v55  ;;  %v6610_v3 = vld [vmem:[%s11300_s23 + $0x30] sm:$0xff] }
 0xf6e   : > { %v4358_v24 = vmul.f32 %v4351_v6, %v10051_v61  ;;  %v11854_v61 = vmov 0.0   ;;  %v6613_v6 = vld [vmem:[%s11300_s23 + $0x40] sm:$0xff] }
 0xf6f   : > { %v3963_v21 = vpop.permute.xlu0 %3962 }
 0xf70   : > { %v4046_v10 = vsel %vm2628_vm14, %v4039_v34, %v3963_v21  ;;  %v6607_v34 = vld [vmem:[%s11300_s23 + $0x18] sm:$0xff] }
 0xf71   : > { %v4053_v39 = vsel %vm2636_vm15, %v4046_v10, %v11845_v41  ;;  %v6608_v41 = vld [vmem:[%s11300_s23 + $0x20] sm:$0xff] }
 0xf72   : > { %v4060_v13 = vmul.f32 %v4053_v39, %v11846_v48 }
 0xf73   : > { %v3971_v9 = vpop.permute.xlu0 %3970 }
 0xf74   : > { %v4361_v44 = vadd.f32 %v4354_v53, %v4060_v13  ;;  %v4048_v29 = vsel %vm2628_vm14, %v4041_v27, %v3971_v9  ;;  %v4043_v53 = vsel %vm2620_vm13, %v11853_v4, %v10083_v36 }
 0xf75   : > { %v4055_v60 = vsel %vm2636_vm15, %v4048_v29, %v11849_v22  ;;  %v6611_v29 = vld [vmem:[%s11300_s23 + $0x38] sm:$0xff] }
 0xf76   : > { %v4062_v1 = vmul.f32 %v4055_v60, %v11851_v33  ;;  %6234 = vmatmul.mubr.msk.f32.gmra.mxu1 %vm1028_vm1, %v4361_v44 }
 0xf77   : > { %6236 = vmatprep.mubr.msk.f32.mxu1 %vm1028_vm1, %v4362_v40  ;;  %v3979_v18 = vpop.permute.xlu0 %3978  ;;  %v4343_v40 = vsel %vm2628_vm14, %v4336_v46, %v10155_v42  ;;  %v6614_v46 = vld [vmem:[%s11300_s23 + $0x58] sm:$0xff] }
 0xf78   : > { %v4363_v14 = vadd.f32 %v4356_v5, %v4062_v1  ;;  %v4050_v7 = vsel %vm2628_vm14, %v4043_v53, %v3979_v18 }
 0xf79   : > { %v4057_v50 = vsel %vm2636_vm15, %v4050_v7, %v4007_v63 }
 0xf7a   : > { %v4064_v36 = vmul.f32 %v4057_v50, %v10149_v17  ;;  %6237 = vmatmul.mubr.msk.f32.gmra.mxu1 %vm1028_vm1, %v4363_v14  ;;  %v10286_v17 = vld [vmem:[%s11856_s2] ss:$0 sm:$0xff] }
 0xf7c   : > { %v4365_v26 = vadd.f32 %v4358_v24, %v4064_v36  ;;  %v4297_v51 = vpop.permute.xlu0 %4296 }
 0xf7d   : > { %v4350_v15 = vsel %vm2636_vm15, %v4343_v40, %v4297_v51 }
 0xf7e   : > { %v4357_v5 = vmul.f32 %v4350_v15, %v10042_v25  ;;  %v6604_v25 = vld [vmem:[%s11300_s23 + $0x8] sm:$0xff] }
 0xf80   : > { %v4364_v30 = vadd.f32 %v4357_v5, %v10191_v23 }
 0xf82   : > { %6239 = vmatprep.mubr.msk.f32.mxu1 %vm1028_vm1, %v4364_v30 }
 0xf83   : > { %6240 = vmatmul.mubr.msk.f32.gmra.mxu1 %vm1028_vm1, %v4365_v26  ;;  %v6615_v26 = vld [vmem:[%s11300_s23 + $0x50] sm:$0xff] }
 0xf84   : > { %4902 = vmatprep.mubr.f32.mxu1 %v11854_v61 }
0x1013   : > { %v6223_v42 = vpop.f32.mrf.mxu1 }
0x1014   : > { %v4486_v20 = vadd.f32 %v6223_v42, %v10286_v17 }
0x1015   : > { %v4480_v37 = vpop.f32.mrf.mxu1 }
0x1016   : > { %v10292_v23 = vadd.f32 %v6604_v25, %v4486_v20  ;;  %v4481_v0 = vadd.f32 %v10286_v17, %v4480_v37  ;;  %v6616_v20 = vld [vmem:[%s11300_s23 + $0x68] sm:$0xff] }
0x1017   : > { %v6226_v49 = vpop.f32.mrf.mxu1 }
0x1018   : > { %v10298_v59 = vadd.f32 %v6605_v16, %v4481_v0  ;;  %v4566_v43 = vsel %vm1028_vm1, %v10292_v23, 0.0  ;;  %v4496_v8 = vadd.f32 %v6226_v49, %v10286_v17  ;;  %v6617_v0 = vld [vmem:[%s11300_s23 + $0x60] sm:$0xff] }
0x1019   : > { %4567 = vadd.xlane.f32.xlu1 %v4566_v43  ;;  %v4490_v57 = vpop.f32.mrf.mxu1 }
0x101a   : > { %v4491_v32 = vadd.f32 %v10286_v17, %v4490_v57  ;;  %v4563_v2 = vsel %vm1028_vm1, %v10298_v59, 0.0  ;;  %v10314_v21 = vadd.f32 %v6607_v34, %v4496_v8 }
0x101b   : > { %4564 = vadd.xlane.f32.xlu0 %v4563_v2  ;;  %v6229_v58 = vpop.f32.mrf.mxu1 }
0x101c   : > { %v10309_v54 = vadd.f32 %v6606_v38, %v4491_v32  ;;  %v4506_v56 = vadd.f32 %v6229_v58, %v10286_v17  ;;  %v4572_v13 = vsel %vm1028_vm1, %v10314_v21, 0.0 }
0x101d   : > { %v4500_v31 = vpop.f32.mrf.mxu1 }
0x101e   : > { %v4501_v63 = vadd.f32 %v10286_v17, %v4500_v31  ;;  %v4569_v10 = vsel %vm1028_vm1, %v10309_v54, 0.0  ;;  %v10330_v45 = vadd.f32 %v6609_v62, %v4506_v56 }
0x101f   : > { %4570 = vadd.xlane.f32.xlu0 %v4569_v10  ;;  %v6232_v28 = vpop.f32.mrf.mxu1 }
0x1020   : > { %v10323_v39 = vadd.f32 %v6608_v41, %v4501_v63  ;;  %v4516_v11 = vadd.f32 %v6232_v28, %v10286_v17  ;;  %v4578_v60 = vsel %vm1028_vm1, %v10330_v45, 0.0 }
0x1021   : > { %v4510_v48 = vpop.f32.mrf.mxu1 }
0x1022   : > { %v4511_v27 = vadd.f32 %v10286_v17, %v4510_v48  ;;  %v4575_v9 = vsel %vm1028_vm1, %v10323_v39, 0.0  ;;  %v10344_v22 = vadd.f32 %v6611_v29, %v4516_v11 }
0x1023   : > { %4573 = vadd.xlane.f32.xlu0 %v4572_v13  ;;  %4576 = vadd.xlane.f32.xlu1 %v4575_v9 }
0x1024   : > { %v10339_v44 = vadd.f32 %v6610_v3, %v4511_v27  ;;  %v4584_v52 = vsel %vm1028_vm1, %v10344_v22, 0.0 }
0x1026   : > { %v4581_v12 = vsel %vm1028_vm1, %v10339_v44, 0.0 }
0x1027   : > { %4579 = vadd.xlane.f32.xlu0 %v4578_v60  ;;  %4582 = vadd.xlane.f32.xlu1 %v4581_v12 }
0x102b   : > { %4585 = vadd.xlane.f32.xlu0 %v4584_v52 }
0x1036   : > { %v6235_v55 = vpop.f32.mrf.mxu1 }
0x1037   : > { %v4526_v33 = vadd.f32 %v6235_v55, %v10286_v17 }
0x1038   : > { %v4520_v1 = vpop.f32.mrf.mxu1 }
0x1039   : > { %v10356_v19 = vadd.f32 %v6612_v35, %v4526_v33  ;;  %v4521_v4 = vadd.f32 %v10286_v17, %v4520_v1 }
0x103a   : > { %v6238_v53 = vpop.f32.mrf.mxu1 }
0x103b   : > { %v10362_v18 = vadd.f32 %v6613_v6, %v4521_v4  ;;  %v4536_v47 = vadd.f32 %v6238_v53, %v10286_v17  ;;  %v4590_v14 = vsel %vm1028_vm1, %v10356_v19, 0.0 }
0x103c   : > { %4591 = vadd.xlane.f32.xlu0 %v4590_v14  ;;  %v4530_v7 = vpop.f32.mrf.mxu1 }
0x103d   : > { %v10370_v50 = vadd.f32 %v6614_v46, %v4536_v47  ;;  %v4531_v24 = vadd.f32 %v10286_v17, %v4530_v7  ;;  %v4587_v36 = vsel %vm1028_vm1, %v10362_v18, 0.0 }
0x103e   : > { %4588 = vadd.xlane.f32.xlu1 %v4587_v36 }
0x103f   : > { %v10378_v40 = vadd.f32 %v6615_v26, %v4531_v24  ;;  %v4596_v51 = vsel %vm1028_vm1, %v10370_v50, 0.0  ;;  %v993_v26 = vld [vmem:[%s6860_s18 + $0x78] sm:$0xff] }
0x1040   : > { %4597 = vadd.xlane.f32.xlu0 %v4596_v51  ;;  %v992_v51 = vld [vmem:[%s6860_s18 + $0x70] sm:$0xff]  ;;  %4854 = vmatprep.subr.mxu1 %v993_v26 }
0x1041   : > { %v4593_v15 = vsel %vm1028_vm1, %v10378_v40, 0.0  ;;  %4855 = vmatpush1.msra.mxu1 %v992_v51 }
0x1042   : > { %4594 = vadd.xlane.f32.xlu1 %v4593_v15 }
0x1043   : > { %v6241_v5 = vpop.f32.mrf.mxu1 }
0x1044   : > { %v4546_v30 = vadd.f32 %v6241_v5, %v10286_v17 }
0x1045   : > { %v4540_v42 = vpop.f32.mrf.mxu1 }
0x1046   : > { %v10388_v37 = vadd.f32 %v6616_v20, %v4546_v30  ;;  %v4541_v25 = vadd.f32 %v10286_v17, %v4540_v42  ;;  %v991_v30 = vld [vmem:[%s6860_s18 + $0x68] sm:$0xff]  ;;  %v990_v42 = vld [vmem:[%s6860_s18 + $0x60] sm:$0xff]  ;;  %v989_v20 = vld [vmem:[%s6860_s18 + $0x58] sm:$0xff] }
0x1047   : > { %4856 = vmatprep.subr.mxu1 %v991_v30 }
0x1048   : > { %v10394_v49 = vadd.f32 %v6617_v0, %v4541_v25  ;;  %v4602_v16 = vsel %vm1028_vm1, %v10388_v37, 0.0  ;;  %4857 = vmatpush1.msra.mxu1 %v990_v42  ;;  %v988_v25 = vld [vmem:[%s6860_s18 + $0x50] sm:$0xff]  ;;  %v987_v0 = vld [vmem:[%s6860_s18 + $0x48] sm:$0xff] }
0x1049   : > { %4603 = vadd.xlane.f32.xlu0 %v4602_v16  ;;  %4858 = vmatprep.subr.mxu1 %v989_v20 }
0x104a   : > { %v4599_v43 = vsel %vm1028_vm1, %v10394_v49, 0.0  ;;  %4859 = vmatpush1.msra.mxu1 %v988_v25  ;;  %v1026_v25 = vld [vmem:[%s6871_s29 + $0xf8] sm:$0xff] }
0x104b   : > { %4600 = vadd.xlane.f32.xlu1 %v4599_v43  ;;  %4860 = vmatprep.subr.mxu1 %v987_v0  ;;  %v986_v43 = vld [vmem:[%s6860_s18 + $0x40] sm:$0xff]  ;;  %v1010_v0 = vld [vmem:[%s6871_s29 + $0x78] sm:$0xff] }
0x104c   : > { %4861 = vmatpush1.msra.mxu1 %v986_v43  ;;  %6119 = vmatprep.subr.mxu0 %v1026_v25  ;;  %v1009_v43 = vld [vmem:[%s6871_s29 + $0x70] sm:$0xff] }
0x104d   : > { %6120 = vmatpush3.msra.mxu0 %v1010_v0 }
0x10a2   : > { %v4568_v8 = vpop.xlane.xlu1 %4567 }
0x10a3   : > { %v4606_v57 = vmul.f32 0.015625, %v4568_v8 }
0x10a4   : > { %v4565_v32 = vpop.xlane.xlu0 %4564 }
0x10a5   : > { %v10401_v2 = vsub.f32 %v10292_v23, %v4606_v57  ;;  %v4605_v17 = vmul.f32 0.015625, %v4565_v32  ;;  %v985_v57 = vld [vmem:[%s6860_s18 + $0x38] sm:$0xff] }
0x10a6   : > { %4862 = vmatprep.subr.mxu1 %v985_v57 }
0x10a7   : > { %v10404_v58 = vsub.f32 %v10298_v59, %v4605_v17  ;;  %v4634_v38 = vmul.f32 %v10401_v2, %v10401_v2  ;;  %v984_v17 = vld [vmem:[%s6860_s18 + $0x30] sm:$0xff] }
0x10a8   : > { %v4571_v34 = vpop.xlane.xlu0 %4570  ;;  %4863 = vmatpush1.msra.mxu1 %v984_v17 }
0x10a9   : > { %v4607_v31 = vmul.f32 0.015625, %v4571_v34  ;;  %v4650_v56 = vsel %vm1028_vm1, %v4634_v38, 0.0  ;;  %v4633_v63 = vmul.f32 %v10404_v58, %v10404_v58 }
0x10aa   : > { %4651 = vadd.xlane.f32.xlu0 %v4650_v56 }
0x10ab   : > { %v10412_v10 = vsub.f32 %v10309_v54, %v4607_v31  ;;  %v4647_v28 = vsel %vm1028_vm1, %v4633_v63, 0.0  ;;  %v983_v31 = vld [vmem:[%s6860_s18 + $0x28] sm:$0xff]  ;;  %v982_v63 = vld [vmem:[%s6860_s18 + $0x20] sm:$0xff] }
0x10ac   : > { %v4577_v41 = vpop.xlane.xlu1 %4576  ;;  %4648 = vadd.xlane.f32.xlu1 %v4647_v28  ;;  %v4574_v48 = vpop.xlane.xlu0 %4573  ;;  %4864 = vmatprep.subr.mxu1 %v983_v31 }
0x10ad   : > { %v4609_v13 = vmul.f32 0.015625, %v4577_v41  ;;  %v4608_v62 = vmul.f32 0.015625, %v4574_v48  ;;  %v4635_v11 = vmul.f32 %v10412_v10, %v10412_v10  ;;  %4865 = vmatpush1.msra.mxu1 %v982_v63 }
0x10af   : > { %v10418_v27 = vsub.f32 %v10323_v39, %v4609_v13  ;;  %v10421_v9 = vsub.f32 %v10314_v21, %v4608_v62  ;;  %v4653_v3 = vsel %vm1028_vm1, %v4635_v11, 0.0  ;;  %v981_v13 = vld [vmem:[%s6860_s18 + $0x18] sm:$0xff]  ;;  %v980_v62 = vld [vmem:[%s6860_s18 + $0x10] sm:$0xff]  ;;  %v979_v11 = vld [vmem:[%s6860_s18 + $0x8] sm:$0xff] }
0x10b0   : > { %v4583_v29 = vpop.xlane.xlu1 %4582  ;;  %4654 = vadd.xlane.f32.xlu1 %v4653_v3  ;;  %v4580_v60 = vpop.xlane.xlu0 %4579  ;;  %4866 = vmatprep.subr.mxu1 %v981_v13 }
0x10b1   : > { %v4611_v12 = vmul.f32 0.015625, %v4583_v29  ;;  %v4610_v52 = vmul.f32 0.015625, %v4580_v60  ;;  %v4637_v55 = vmul.f32 %v10418_v27, %v10418_v27  ;;  %v4636_v33 = vmul.f32 %v10421_v9, %v10421_v9  ;;  %v978_v29 = vld [vmem:[%s6860_s18] sm:$0xff]  ;;  %4867 = vmatpush1.msra.mxu1 %v980_v62 }
0x10b2   : > { %4868 = vmatprep.subr.mxu1 %v979_v11 }
0x10b3   : > { %v10429_v1 = vsub.f32 %v10339_v44, %v4611_v12  ;;  %v10432_v35 = vsub.f32 %v10330_v45, %v4610_v52  ;;  %v4659_v4 = vsel %vm1028_vm1, %v4637_v55, 0.0  ;;  %v4656_v53 = vsel %vm1028_vm1, %v4636_v33, 0.0  ;;  %4869 = vmatpush1.msra.mxu1 %v978_v29 }
0x10b4   : > { %4660 = vadd.xlane.f32.xlu1 %v4659_v4  ;;  %4657 = vadd.xlane.f32.xlu0 %v4656_v53  ;;  %v4586_v6 = vpop.xlane.xlu0 %4585 }
0x10b5   : > { %v4612_v47 = vmul.f32 0.015625, %v4586_v6  ;;  %v4639_v14 = vmul.f32 %v10429_v1, %v10429_v1  ;;  %v4638_v7 = vmul.f32 %v10432_v35, %v10432_v35  ;;  %6268 = vmatprep.subr.mxu1 %v1026_v25 }
0x10b7   : > { %v10441_v46 = vsub.f32 %v10344_v22, %v4612_v47  ;;  %v4665_v24 = vsel %vm1028_vm1, %v4639_v14, 0.0  ;;  %v4662_v36 = vsel %vm1028_vm1, %v4638_v7, 0.0 }
0x10b8   : > { %4666 = vadd.xlane.f32.xlu1 %v4665_v24  ;;  %4663 = vadd.xlane.f32.xlu0 %v4662_v36 }
0x10b9   : > { %v4640_v15 = vmul.f32 %v10441_v46, %v10441_v46 }
0x10bb   : > { %v4668_v5 = vsel %vm1028_vm1, %v4640_v15, 0.0 }
0x10bc   : > { %4669 = vadd.xlane.f32.xlu0 %v4668_v5 }
0x10c5   : > { %v4592_v16 = vpop.xlane.xlu0 %4591 }
0x10c6   : > { %v4614_v8 = vmul.f32 0.015625, %v4592_v16  ;;  %v1025_v16 = vld [vmem:[%s6871_s29 + $0xf0] sm:$0xff] }
0x10c7   : > { %v4589_v32 = vpop.xlane.xlu1 %4588  ;;  %6121 = vmatprep.subr.mxu0 %v1025_v16 }
0x10c8   : > { %v10459_v38 = vsub.f32 %v10356_v19, %v4614_v8  ;;  %v4613_v34 = vmul.f32 0.015625, %v4589_v32  ;;  %6122 = vmatpush3.msra.mxu0 %v1009_v43 }
0x10c9   : > { %v4598_v56 = vpop.xlane.xlu0 %4597 }
0x10ca   : > { %v10464_v28 = vsub.f32 %v10362_v18, %v4613_v34  ;;  %v4616_v41 = vmul.f32 0.015625, %v4598_v56  ;;  %v4642_v48 = vmul.f32 %v10459_v38, %v10459_v38 }
0x10cb   : > { %v4595_v3 = vpop.xlane.xlu1 %4594 }
0x10cc   : > { %v10473_v60 = vsub.f32 %v10370_v50, %v4616_v41  ;;  %v4615_v12 = vmul.f32 0.015625, %v4595_v3  ;;  %v4674_v52 = vsel %vm1028_vm1, %v4642_v48, 0.0  ;;  %v4641_v55 = vmul.f32 %v10464_v28, %v10464_v28 }
0x10cd   : > { %4675 = vadd.xlane.f32.xlu0 %v4674_v52 }
0x10ce   : > { %v10479_v33 = vsub.f32 %v10378_v40, %v4615_v12  ;;  %v4671_v4 = vsel %vm1028_vm1, %v4641_v55, 0.0  ;;  %v4644_v53 = vmul.f32 %v10473_v60, %v10473_v60 }
0x10cf   : > { %4672 = vadd.xlane.f32.xlu1 %v4671_v4 }
0x10d0   : > { %v4680_v6 = vsel %vm1028_vm1, %v4644_v53, 0.0  ;;  %v4643_v47 = vmul.f32 %v10479_v33, %v10479_v33 }
0x10d1   : > { %4681 = vadd.xlane.f32.xlu0 %v4680_v6 }
0x10d2   : > { %v4604_v14 = vpop.xlane.xlu0 %4603  ;;  %v4677_v7 = vsel %vm1028_vm1, %v4643_v47, 0.0 }
0x10d3   : > { %v4618_v24 = vmul.f32 0.015625, %v4604_v14  ;;  %4678 = vadd.xlane.f32.xlu1 %v4677_v7 }
0x10d4   : > { %v4601_v36 = vpop.xlane.xlu1 %4600 }
0x10d5   : > { %v10489_v26 = vsub.f32 %v10388_v37, %v4618_v24  ;;  %v4617_v51 = vmul.f32 0.015625, %v4601_v36 }
0x10d7   : > { %v10492_v15 = vsub.f32 %v10394_v49, %v4617_v51  ;;  %v4646_v5 = vmul.f32 %v10489_v26, %v10489_v26 }
0x10d9   : > { %v4686_v30 = vsel %vm1028_vm1, %v4646_v5, 0.0  ;;  %v4645_v42 = vmul.f32 %v10492_v15, %v10492_v15  ;;  %v10511_v5 = vld [vmem:[%s880_s4] ss:$0 sm:$0xff] }
0x10da   : > { %4687 = vadd.xlane.f32.xlu0 %v4686_v30 }
0x10db   : > { %v4683_v20 = vsel %vm1028_vm1, %v4645_v42, 0.0 }
0x10dc   : > { %4684 = vadd.xlane.f32.xlu1 %v4683_v20  ;;  %v10519_v20 = vld [vmem:[%s883_s26] ss:$0 sm:$0xff] }
0x1133   : > { %v4652_v8 = vpop.xlane.xlu0 %4651 }
0x1134   : > { %v4690_v57 = vmul.f32 0.015625, %v4652_v8 }
0x1135   : > { %v4649_v32 = vpop.xlane.xlu1 %4648 }
0x1136   : > { %v4704_v17 = vadd.f32 1e-05, %v4690_v57  ;;  %v4689_v34 = vmul.f32 0.015625, %v4649_v32 }
0x1138   : > { %6519 = vrsqrt.f32 %v4704_v17  ;;  %v4703_v31 = vadd.f32 1e-05, %v4689_v34 }
0x1139   : > { %v4655_v56 = vpop.xlane.xlu1 %4654 }
0x113a   : > { %6521 = vrsqrt.f32 %v4703_v31  ;;  %v4691_v63 = vmul.f32 0.015625, %v4655_v56 }
0x113c   : > { %v4705_v41 = vadd.f32 1e-05, %v4691_v63 }
0x113d   : > { %v4661_v48 = vpop.xlane.xlu1 %4660  ;;  %v4658_v13 = vpop.xlane.xlu0 %4657 }
0x113e   : > { %6523 = vrsqrt.f32 %v4705_v41  ;;  %v4693_v62 = vmul.f32 0.015625, %v4661_v48  ;;  %v4692_v11 = vmul.f32 0.015625, %v4658_v13 }
0x1140   : > { %v4707_v3 = vadd.f32 1e-05, %v4693_v62  ;;  %v4706_v29 = vadd.f32 1e-05, %v4692_v11 }
0x1141   : > { %v4667_v12 = vpop.xlane.xlu1 %4666  ;;  %v4664_v52 = vpop.xlane.xlu0 %4663 }
0x1142   : > { %v4694_v55 = vmul.f32 0.015625, %v4664_v52  ;;  %6525 = vrsqrt.f32 %v4706_v29  ;;  %v4695_v4 = vmul.f32 0.015625, %v4667_v12 }
0x1143   : > { %6527 = vrsqrt.f32 %v4707_v3 }
0x1144   : > { %v4708_v53 = vadd.f32 1e-05, %v4694_v55  ;;  %v4709_v7 = vadd.f32 1e-05, %v4695_v4 }
0x1145   : > { %v6520_v6 = vpop.eup %6519  ;;  %v4670_v47 = vpop.xlane.xlu0 %4669 }
0x1146   : > { %6529 = vrsqrt.f32 %v4708_v53  ;;  %v4696_v36 = vmul.f32 0.015625, %v4670_v47  ;;  %v4732_v51 = vmul.f32 %v6520_v6, %v10401_v2 }
0x1147   : > { %v6522_v14 = vpop.eup %6521  ;;  %6531 = vrsqrt.f32 %v4709_v7 }
0x1148   : > { %v4731_v24 = vmul.f32 %v6522_v14, %v10404_v58  ;;  %v4710_v58 = vadd.f32 1e-05, %v4696_v36  ;;  %v4752_v2 = vmul.f32 %v10511_v5, %v4732_v51 }
0x114a   : > { %v4751_v30 = vmul.f32 %v10511_v5, %v4731_v24  ;;  %6533 = vrsqrt.f32 %v4710_v58  ;;  %v4772_v32 = vadd.f32 %v10519_v20, %v4752_v2 }
0x114b   : > { %v6524_v42 = vpop.eup %6523 }
0x114c   : > { %v4771_v25 = vadd.f32 %v10519_v20, %v4751_v30  ;;  %v4733_v8 = vmul.f32 %v6524_v42, %v10412_v10 }
0x114e   : > { %6065 = vmatmul.mubr.msk.f32.vlgmr.msra.gmra.mxu1 %vm1028_vm1, %v4771_v25  ;;  %v4753_v17 = vmul.f32 %v10511_v5, %v4733_v8 }
0x114f   : > { %4908 = vmatprep.mubr.f32.mxu1 %v11854_v61  ;;  %6284 = vmatpush3.msra.mxu1 %v1010_v0  ;;  %v6526_v57 = vpop.eup %6525 }
0x1150   : > { %6269 = vmatprep.subr.mxu1 %v1025_v16  ;;  %v6528_v34 = vpop.eup %6527  ;;  %v4734_v31 = vmul.f32 %v6526_v57, %v10421_v9  ;;  %v4773_v10 = vadd.f32 %v10519_v20, %v4753_v17 }
0x1151   : > { %6285 = vmatpush3.msra.mxu1 %v1009_v43  ;;  %v4735_v0 = vmul.f32 %v6528_v34, %v10418_v27 }
0x1152   : > { %6066 = vmatmul.mubr.msk.f32.gmra.mxu1 %vm1028_vm1, %v4772_v32  ;;  %v4754_v56 = vmul.f32 %v10511_v5, %v4734_v31 }
0x1153   : > { %4914 = vmatprep.mubr.f32.mxu1 %v11854_v61  ;;  %v6530_v63 = vpop.eup %6529  ;;  %v4755_v13 = vmul.f32 %v10511_v5, %v4735_v0 }
0x1154   : > { %v6532_v16 = vpop.eup %6531  ;;  %v4774_v43 = vadd.f32 %v10519_v20, %v4754_v56  ;;  %v4736_v62 = vmul.f32 %v6530_v63, %v10432_v35 }
0x1155   : > { %v4775_v55 = vadd.f32 %v10519_v20, %v4755_v13  ;;  %v4737_v53 = vmul.f32 %v6532_v16, %v10429_v1 }
0x1156   : > { %6067 = vmatmul.mubr.msk.f32.gmra.mxu1 %vm1028_vm1, %v4773_v10  ;;  %v4676_v41 = vpop.xlane.xlu0 %4675  ;;  %v4756_v4 = vmul.f32 %v10511_v5, %v4736_v62 }
0x1157   : > { %v4698_v48 = vmul.f32 0.015625, %v4676_v41  ;;  %4920 = vmatprep.mubr.f32.mxu1 %v11854_v61  ;;  %v6534_v6 = vpop.eup %6533  ;;  %v4757_v24 = vmul.f32 %v10511_v5, %v4737_v53  ;;  %v1004_v53 = vld [vmem:[%s6871_s29 + $0x48] sm:$0xff] }
0x1158   : > { %v4673_v9 = vpop.xlane.xlu1 %4672  ;;  %v4776_v7 = vadd.f32 %v10519_v20, %v4756_v4  ;;  %v4738_v36 = vmul.f32 %v6534_v6, %v10441_v46  ;;  %v1020_v4 = vld [vmem:[%s6871_s29 + $0xc8] sm:$0xff]  ;;  %v1019_v6 = vld [vmem:[%s6871_s29 + $0xc0] sm:$0xff] }
0x1159   : > { %v4712_v11 = vadd.f32 1e-05, %v4698_v48  ;;  %v4697_v3 = vmul.f32 0.015625, %v4673_v9  ;;  %v4777_v30 = vadd.f32 %v10519_v20, %v4757_v24  ;;  %v1001_v24 = vld [vmem:[%s6871_s29 + $0x30] sm:$0xff] }
0x115a   : > { %6068 = vmatmul.mubr.msk.f32.gmra.mxu1 %vm1028_vm1, %v4774_v43  ;;  %v4682_v27 = vpop.xlane.xlu0 %4681  ;;  %v4758_v42 = vmul.f32 %v10511_v5, %v4738_v36  ;;  %v1016_v36 = vld [vmem:[%s6871_s29 + $0xa8] sm:$0xff] }
0x115b   : > { %6535 = vrsqrt.f32 %v4712_v11  ;;  %v4711_v29 = vadd.f32 1e-05, %v4697_v3  ;;  %v4700_v12 = vmul.f32 0.015625, %v4682_v27  ;;  %4926 = vmatprep.mubr.f32.mxu1 %v11854_v61 }
0x115c   : > { %v4679_v52 = vpop.xlane.xlu1 %4678  ;;  %v4778_v57 = vadd.f32 %v10519_v20, %v4758_v42  ;;  %v1014_v42 = vld [vmem:[%s6871_s29 + $0x98] sm:$0xff] }
0x115d   : > { %6537 = vrsqrt.f32 %v4711_v29  ;;  %v4699_v35 = vmul.f32 0.015625, %v4679_v52  ;;  %v4714_v47 = vadd.f32 1e-05, %v4700_v12  ;;  %v1008_v29 = vld [vmem:[%s6871_s29 + $0x68] sm:$0xff]  ;;  %v1023_v12 = vld [vmem:[%s6871_s29 + $0xe0] sm:$0xff]  ;;  %v1021_v52 = vld [vmem:[%s6871_s29 + $0xd0] sm:$0xff] }
0x115e   : > { %6069 = vmatmul.mubr.msk.f32.gmra.mxu1 %vm1028_vm1, %v4775_v55  ;;  %v1005_v55 = vld [vmem:[%s6871_s29 + $0x50] sm:$0xff] }
0x115f   : > { %v4713_v14 = vadd.f32 1e-05, %v4699_v35  ;;  %4932 = vmatprep.mubr.f32.mxu1 %v11854_v61  ;;  %v1003_v35 = vld [vmem:[%s6871_s29 + $0x40] sm:$0xff] }
0x1161   : > { %6539 = vrsqrt.f32 %v4713_v14  ;;  %v1002_v14 = vld [vmem:[%s6871_s29 + $0x38] sm:$0xff] }
0x1162   : > { %6070 = vmatmul.mubr.msk.f32.gmra.mxu1 %vm1028_vm1, %v4776_v7  ;;  %6541 = vrsqrt.f32 %v4714_v47  ;;  %v1018_v47 = vld [vmem:[%s6871_s29 + $0xb8] sm:$0xff]  ;;  %v1017_v7 = vld [vmem:[%s6871_s29 + $0xb0] sm:$0xff] }
0x1163   : > { %v4688_v1 = vpop.xlane.xlu0 %4687  ;;  %4938 = vmatprep.mubr.f32.mxu1 %v11854_v61 }
0x1164   : > { %v4702_v51 = vmul.f32 0.015625, %v4688_v1  ;;  %v1000_v1 = vld [vmem:[%s6871_s29 + $0x28] sm:$0xff] }
0x1165   : > { %v4685_v58 = vpop.xlane.xlu1 %4684 }
0x1166   : > { %v4701_v25 = vmul.f32 0.015625, %v4685_v58  ;;  %6071 = vmatmul.mubr.msk.f32.gmra.mxu1 %vm1028_vm1, %v4777_v30  ;;  %v4716_v2 = vadd.f32 1e-05, %v4702_v51  ;;  %v1015_v51 = vld [vmem:[%s6871_s29 + $0xa0] sm:$0xff]  ;;  %v998_v58 = vld [vmem:[%s6871_s29 + $0x18] sm:$0xff] }
0x1167   : > { %4944 = vmatprep.mubr.f32.mxu1 %v11854_v61  ;;  %v999_v30 = vld [vmem:[%s6871_s29 + $0x20] sm:$0xff] }
0x1168   : > { %v6536_v46 = vpop.eup %6535  ;;  %v4715_v8 = vadd.f32 1e-05, %v4701_v25  ;;  %v1013_v25 = vld [vmem:[%s6871_s29 + $0x90] sm:$0xff] }
0x1169   : > { %v4740_v34 = vmul.f32 %v6536_v46, %v10459_v38  ;;  %v1012_v46 = vld [vmem:[%s6871_s29 + $0x88] sm:$0xff] }
0x116a   : > { %v6538_v32 = vpop.eup %6537  ;;  %6543 = vrsqrt.f32 %v4715_v8  ;;  %6072 = vmatmul.mubr.msk.f32.gmra.mxu1 %vm1028_vm1, %v4778_v57  ;;  %v996_v8 = vld [vmem:[%s6871_s29 + $0x8] sm:$0xff]  ;;  %v1011_v57 = vld [vmem:[%s6871_s29 + $0x80] sm:$0xff] }
0x116b   : > { %6545 = vrsqrt.f32 %v4716_v2  ;;  %4950 = vmatprep.mubr.f32.mxu1 %v11854_v61  ;;  %v4739_v17 = vmul.f32 %v6538_v32, %v10464_v28  ;;  %v4760_v0 = vmul.f32 %v10511_v5, %v4740_v34  ;;  %v997_v2 = vld [vmem:[%s6871_s29 + $0x10] sm:$0xff]  ;;  %v995_v32 = vld [vmem:[%s6871_s29] sm:$0xff] }
0x116c   : > { %v11859_v34 = vld [vmem:[#allocation7_spill] sm:$0xff] }
0x116d   : > { %v4759_v31 = vmul.f32 %v10511_v5, %v4739_v17  ;;  %v4780_v48 = vadd.f32 %v10519_v20, %v4760_v0  ;;  %v994_v17 = vld [vmem:[%s6865_s21] sm:$0x3] }
0x116e   : > { %v6540_v10 = vpop.eup %6539 }
0x116f   : > { %v4779_v56 = vadd.f32 %v10519_v20, %v4759_v31  ;;  %v4741_v63 = vmul.f32 %v6540_v10, %v10479_v33  ;;  %v6542_v41 = vpop.eup %6541  ;;  %v10617_v31 = vrot.slane %v994_v17, %v11859_v34  ;;  %v11860_v10 = vld [vmem:[#allocation6_spill] sm:$0xff] }
0x1170   : > { %v4742_v38 = vmul.f32 %v6542_v41, %v10473_v60 }
0x1171   : > { %6073 = vmatmul.mubr.msk.f32.gmra.mxu1 %vm1028_vm1, %v4779_v56  ;;  %v4761_v28 = vmul.f32 %v10511_v5, %v4741_v63  ;;  %v11861_v56 = vsub.s32 1, %v11860_v10 }
0x1172   : > { %4956 = vmatprep.mubr.f32.mxu1 %v11854_v61  ;;  %v4762_v33 = vmul.f32 %v10511_v5, %v4742_v38 }
0x1173   : > { %v4781_v9 = vadd.f32 %v10519_v20, %v4761_v28  ;;  %v10621_v0 = vrot.slane %v994_v17, %v11861_v56 }
0x1174   : > { %v4782_v60 = vadd.f32 %v10519_v20, %v4762_v33 }
0x1175   : > { %6074 = vmatmul.mubr.msk.f32.gmra.mxu1 %vm1028_vm1, %v4780_v48 }
0x1176   : > { %4962 = vmatprep.mubr.f32.mxu1 %v11854_v61 }
0x1177   : > { %v6544_v16 = vpop.eup %6543 }
0x1178   : > { %v6546_v43 = vpop.eup %6545  ;;  %v4743_v13 = vmul.f32 %v6544_v16, %v10492_v15 }
0x1179   : > { %6075 = vmatmul.mubr.msk.f32.gmra.mxu1 %vm1028_vm1, %v4781_v9  ;;  %v4744_v11 = vmul.f32 %v6546_v43, %v10489_v26  ;;  %v1024_v26 = vld [vmem:[%s6871_s29 + $0xe8] sm:$0xff] }
0x117a   : > { %4968 = vmatprep.mubr.f32.mxu1 %v11854_v61  ;;  %v4763_v62 = vmul.f32 %v10511_v5, %v4743_v13  ;;  %6123 = vmatprep.subr.mxu0 %v1024_v26 }
0x117b   : > { %v4764_v15 = vmul.f32 %v10511_v5, %v4744_v11  ;;  %6270 = vmatprep.subr.mxu1 %v1024_v26  ;;  %6124 = vmatpush3.msra.mxu0 %v1008_v29  ;;  %v1007_v5 = vld [vmem:[%s6871_s29 + $0x60] sm:$0xff] }
0x117c   : > { %v4783_v3 = vadd.f32 %v10519_v20, %v4763_v62  ;;  %6286 = vmatpush3.msra.mxu1 %v1008_v29  ;;  %6125 = vmatprep.subr.mxu0 %v1023_v12 }
0x117d   : > { %6076 = vmatmul.mubr.msk.f32.gmra.mxu1 %vm1028_vm1, %v4782_v60  ;;  %v4784_v27 = vadd.f32 %v10519_v20, %v4764_v15  ;;  %6271 = vmatprep.subr.mxu1 %v1023_v12  ;;  %v1006_v20 = vld [vmem:[%s6871_s29 + $0x58] sm:$0xff] }
0x117e   : > { %4974 = vmatprep.mubr.f32.mxu1 %v11854_v61  ;;  %6126 = vmatpush3.msra.mxu0 %v1007_v5 }
0x117f   : > { %6287 = vmatpush3.msra.mxu1 %v1007_v5 }
0x1181   : > { %6077 = vmatmul.mubr.msk.f32.gmra.mxu1 %vm1028_vm1, %v4783_v3 }
0x1182   : > { %4980 = vmatprep.mubr.f32.mxu1 %v11854_v61  ;;  %v1022_v61 = vld [vmem:[%s6871_s29 + $0xd8] sm:$0xff] }
0x1183   : > { %6127 = vmatprep.subr.mxu0 %v1022_v61  ;;  %6272 = vmatprep.subr.mxu1 %v1022_v61 }
0x1184   : > { %6128 = vmatpush3.msra.mxu0 %v1006_v20  ;;  %6288 = vmatpush3.msra.mxu1 %v1006_v20 }
0x1185   : > { %6078 = vmatmul.mubr.msk.f32.gmra.mxu1 %vm1028_vm1, %v4784_v27  ;;  %6129 = vmatprep.subr.mxu0 %v1021_v52 }
0x1186   : > { %6273 = vmatprep.subr.mxu1 %v1021_v52  ;;  %6130 = vmatpush3.msra.mxu0 %v1005_v55 }
0x1187   : > { %6289 = vmatpush3.msra.mxu1 %v1005_v55  ;;  %6131 = vmatprep.subr.mxu0 %v1020_v4 }
0x1188   : > { %6274 = vmatprep.subr.mxu1 %v1020_v4  ;;  %6132 = vmatpush3.msra.mxu0 %v1004_v53 }
0x1189   : > { %6290 = vmatpush3.msra.mxu1 %v1004_v53  ;;  %6133 = vmatprep.subr.mxu0 %v1019_v6 }
0x118a   : > { %6275 = vmatprep.subr.mxu1 %v1019_v6  ;;  %6134 = vmatpush3.msra.mxu0 %v1003_v35 }
0x118b   : > { %6291 = vmatpush3.msra.mxu1 %v1003_v35  ;;  %6135 = vmatprep.subr.mxu0 %v1018_v47 }
0x118c   : > { %6276 = vmatprep.subr.mxu1 %v1018_v47  ;;  %6136 = vmatpush3.msra.mxu0 %v1002_v14 }
0x118d   : > { %6292 = vmatpush3.msra.mxu1 %v1002_v14  ;;  %6137 = vmatprep.subr.mxu0 %v1017_v7 }
0x118e   : > { %6277 = vmatprep.subr.mxu1 %v1017_v7  ;;  %6138 = vmatpush3.msra.mxu0 %v1001_v24 }
0x118f   : > { %6293 = vmatpush3.msra.mxu1 %v1001_v24  ;;  %6139 = vmatprep.subr.mxu0 %v1016_v36 }
0x1190   : > { %6278 = vmatprep.subr.mxu1 %v1016_v36  ;;  %6140 = vmatpush3.msra.mxu0 %v1000_v1 }
0x1191   : > { %6294 = vmatpush3.msra.mxu1 %v1000_v1  ;;  %6141 = vmatprep.subr.mxu0 %v1015_v51 }
0x1192   : > { %6279 = vmatprep.subr.mxu1 %v1015_v51  ;;  %6142 = vmatpush3.msra.mxu0 %v999_v30 }
0x1193   : > { %6295 = vmatpush3.msra.mxu1 %v999_v30  ;;  %6143 = vmatprep.subr.mxu0 %v1014_v42 }
0x1194   : > { %6280 = vmatprep.subr.mxu1 %v1014_v42  ;;  %6144 = vmatpush3.msra.mxu0 %v998_v58 }
0x1195   : > { %6296 = vmatpush3.msra.mxu1 %v998_v58  ;;  %6145 = vmatprep.subr.mxu0 %v1013_v25 }
0x1196   : > { %6281 = vmatprep.subr.mxu1 %v1013_v25  ;;  %6146 = vmatpush3.msra.mxu0 %v997_v2 }
0x1197   : > { %6297 = vmatpush3.msra.mxu1 %v997_v2  ;;  %6147 = vmatprep.subr.mxu0 %v1012_v46 }
0x1198   : > { %6282 = vmatprep.subr.mxu1 %v1012_v46  ;;  %6148 = vmatpush3.msra.mxu0 %v996_v8 }
0x1199   : > { %6298 = vmatpush3.msra.mxu1 %v996_v8  ;;  %6149 = vmatprep.subr.mxu0 %v1011_v57 }
0x119a   : > { %6283 = vmatprep.subr.mxu1 %v1011_v57  ;;  %6150 = vmatpush3.msra.mxu0 %v995_v32 }
0x119b   : > { %6299 = vmatpush3.msra.mxu1 %v995_v32 }
0x120e   : > { %v4904_v63 = vpop.f32.mrf.mxu1 }
0x120f   : > { %v10624_v41 = vadd.f32 %v4904_v63, %v10617_v31 }
0x1210   : > { %v4906_v48 = vpop.f32.mrf.mxu1 }
0x1211   : > { %v4987_v28 = vmul.f32 %v10624_v41, %v10624_v41  ;;  %v10629_v38 = vadd.f32 %v4906_v48, %v10621_v0 }
0x1212   : > { %v4910_v16 = vpop.f32.mrf.mxu1 }
0x1213   : > { %v5015_v9 = vmul.f32 %v4987_v28, %v10624_v41  ;;  %v4988_v33 = vmul.f32 %v10629_v38, %v10629_v38  ;;  %v10635_v43 = vadd.f32 %v4910_v16, %v10617_v31 }
0x1214   : > { %v4912_v13 = vpop.f32.mrf.mxu1 }
0x1215   : > { %v5043_v60 = vmul.f32 0.044715, %v5015_v9  ;;  %v5016_v62 = vmul.f32 %v4988_v33, %v10629_v38  ;;  %v4989_v11 = vmul.f32 %v10635_v43, %v10635_v43  ;;  %v10641_v3 = vadd.f32 %v4912_v13, %v10621_v0 }
0x1216   : > { %v4916_v15 = vpop.f32.mrf.mxu1 }
0x1217   : > { %v5071_v27 = vadd.f32 %v5043_v60, %v10624_v41  ;;  %v5044_v26 = vmul.f32 0.044715, %v5016_v62  ;;  %v5017_v29 = vmul.f32 %v4989_v11, %v10635_v43  ;;  %v4990_v12 = vmul.f32 %v10641_v3, %v10641_v3 }
0x1218   : > { %v10648_v5 = vadd.f32 %v4916_v15, %v10617_v31  ;;  %v4918_v61 = vpop.f32.mrf.mxu1 }
0x1219   : > { %v5099_v20 = vmul.f32 0.7978846, %v5071_v27  ;;  %v5072_v52 = vadd.f32 %v5044_v26, %v10629_v38  ;;  %v5045_v55 = vmul.f32 0.044715, %v5017_v29  ;;  %v5018_v4 = vmul.f32 %v4990_v12, %v10641_v3 }
0x121a   : > { %v4991_v53 = vmul.f32 %v10648_v5, %v10648_v5  ;;  %v10655_v6 = vadd.f32 %v4918_v61, %v10621_v0  ;;  %v4922_v35 = vpop.f32.mrf.mxu1 }
0x121b   : > { %6547 = vtanh.f32 %v5099_v20  ;;  %v5100_v47 = vmul.f32 0.7978846, %v5072_v52  ;;  %v5073_v14 = vadd.f32 %v5045_v55, %v10635_v43  ;;  %v5046_v7 = vmul.f32 0.044715, %v5018_v4 }
0x121c   : > { %v5019_v24 = vmul.f32 %v4991_v53, %v10648_v5  ;;  %v4992_v36 = vmul.f32 %v10655_v6, %v10655_v6  ;;  %v10662_v1 = vadd.f32 %v4922_v35, %v10617_v31  ;;  %v4924_v51 = vpop.f32.mrf.mxu1 }
0x121d   : > { %v5074_v30 = vadd.f32 %v5046_v7, %v10641_v3  ;;  %v10666_v42 = vadd.f32 %v4924_v51, %v10621_v0  ;;  %v5101_v58 = vmul.f32 0.7978846, %v5073_v14  ;;  %6549 = vtanh.f32 %v5100_v47 }
0x121e   : > { %v5047_v25 = vmul.f32 0.044715, %v5019_v24  ;;  %v5020_v2 = vmul.f32 %v4992_v36, %v10655_v6  ;;  %v4993_v46 = vmul.f32 %v10662_v1, %v10662_v1  ;;  %v4928_v8 = vpop.f32.mrf.mxu1 }
0x121f   : > { %v5102_v57 = vmul.f32 0.7978846, %v5074_v30  ;;  %v4994_v32 = vmul.f32 %v10666_v42, %v10666_v42  ;;  %v10674_v17 = vadd.f32 %v4928_v8, %v10617_v31 }
0x1220   : > { %v5075_v34 = vadd.f32 %v5047_v25, %v10648_v5  ;;  %v5048_v10 = vmul.f32 0.044715, %v5020_v2  ;;  %v5021_v56 = vmul.f32 %v4993_v46, %v10662_v1  ;;  %v4930_v63 = vpop.f32.mrf.mxu1 }
0x1221   : > { %6551 = vtanh.f32 %v5102_v57  ;;  %v5022_v48 = vmul.f32 %v4994_v32, %v10666_v42  ;;  %v4995_v28 = vmul.f32 %v10674_v17, %v10674_v17  ;;  %v10682_v16 = vadd.f32 %v4930_v63, %v10621_v0 }
0x1222   : > { %6553 = vtanh.f32 %v5101_v58  ;;  %v5103_v9 = vmul.f32 0.7978846, %v5075_v34  ;;  %v5076_v33 = vadd.f32 %v5048_v10, %v10655_v6  ;;  %v5049_v13 = vmul.f32 0.044715, %v5021_v56  ;;  %v4934_v60 = vpop.f32.mrf.mxu1 }
0x1223   : > { %v5050_v62 = vmul.f32 0.044715, %v5022_v48  ;;  %v5023_v11 = vmul.f32 %v4995_v28, %v10674_v17  ;;  %v4996_v15 = vmul.f32 %v10682_v16, %v10682_v16  ;;  %v10689_v27 = vadd.f32 %v4934_v60, %v10617_v31 }
0x1224   : > { %6555 = vtanh.f32 %v5103_v9  ;;  %v5104_v26 = vmul.f32 0.7978846, %v5076_v33  ;;  %v5077_v29 = vadd.f32 %v5049_v13, %v10662_v1  ;;  %v4936_v12 = vpop.f32.mrf.mxu1 }
0x1225   : > { %v5078_v61 = vadd.f32 %v5050_v62, %v10666_v42  ;;  %v5051_v20 = vmul.f32 0.044715, %v5023_v11  ;;  %v5024_v52 = vmul.f32 %v4996_v15, %v10682_v16  ;;  %v4997_v55 = vmul.f32 %v10689_v27, %v10689_v27 }
0x1226   : > { %6557 = vtanh.f32 %v5104_v26  ;;  %v5105_v4 = vmul.f32 0.7978846, %v5077_v29  ;;  %v10697_v53 = vadd.f32 %v4936_v12, %v10621_v0  ;;  %v4940_v35 = vpop.f32.mrf.mxu1 }
0x1227   : > { %v5106_v47 = vmul.f32 0.7978846, %v5078_v61  ;;  %v5079_v14 = vadd.f32 %v5051_v20, %v10674_v17  ;;  %v5052_v7 = vmul.f32 0.044715, %v5024_v52  ;;  %v5025_v24 = vmul.f32 %v4997_v55, %v10689_v27 }
0x1228   : > { %v6548_v36 = vpop.eup %6547  ;;  %6559 = vtanh.f32 %v5105_v4  ;;  %v4998_v51 = vmul.f32 %v10697_v53, %v10697_v53  ;;  %v10704_v30 = vadd.f32 %v4940_v35, %v10617_v31  ;;  %v4942_v58 = vpop.f32.mrf.mxu1 }
0x1229   : > { %v5155_v25 = vadd.f32 1.0, %v6548_v36  ;;  %6561 = vtanh.f32 %v5106_v47  ;;  %v5107_v2 = vmul.f32 0.7978846, %v5079_v14  ;;  %v5080_v46 = vadd.f32 %v5052_v7, %v10682_v16 }
0x122a   : > { %v5053_v8 = vmul.f32 0.044715, %v5025_v24  ;;  %v5026_v57 = vmul.f32 %v4998_v51, %v10697_v53  ;;  %v4999_v32 = vmul.f32 %v10704_v30, %v10704_v30  ;;  %v10711_v34 = vadd.f32 %v4942_v58, %v10621_v0  ;;  %v4946_v10 = vpop.f32.mrf.mxu1  ;;  %v6550_v28 = vpop.eup %6549 }
0x122b   : > { %v5183_v56 = vmul.f32 0.5, %v5155_v25  ;;  %6563 = vtanh.f32 %v5107_v2  ;;  %v5108_v63 = vmul.f32 0.7978846, %v5080_v46  ;;  %v10714_v48 = vadd.f32 %v4946_v10, %v10617_v31 }
0x122c   : > { %v5081_v9 = vadd.f32 %v5053_v8, %v10689_v27  ;;  %v5054_v33 = vmul.f32 0.044715, %v5026_v57  ;;  %v5027_v13 = vmul.f32 %v4999_v32, %v10704_v30  ;;  %v5000_v60 = vmul.f32 %v10711_v34, %v10711_v34  ;;  %v4948_v62 = vpop.f32.mrf.mxu1 }
0x122d   : > { %v5211_v11 = vmul.f32 %v5183_v56, %v10624_v41  ;;  %6565 = vtanh.f32 %v5108_v63  ;;  %v5001_v15 = vmul.f32 %v10714_v48, %v10714_v48  ;;  %v10724_v26 = vadd.f32 %v4948_v62, %v10621_v0 }
0x122e   : > { %v6552_v29 = vpop.eup %6551  ;;  %v5109_v12 = vmul.f32 0.7978846, %v5081_v9  ;;  %v5082_v61 = vadd.f32 %v5054_v33, %v10697_v53  ;;  %v5055_v20 = vmul.f32 0.044715, %v5027_v13  ;;  %v5028_v52 = vmul.f32 %v5000_v60, %v10711_v34 }
0x122f   : > { %v6554_v55 = vpop.eup %6553  ;;  %v5029_v4 = vmul.f32 %v5001_v15, %v10714_v48  ;;  %v5002_v41 = vmul.f32 %v10724_v26, %v10724_v26  ;;  %v5156_v35 = vadd.f32 1.0, %v6550_v28  ;;  %v5158_v47 = vadd.f32 1.0, %v6552_v29 }
0x1230   : > { %6567 = vtanh.f32 %v5109_v12  ;;  %v5110_v14 = vmul.f32 0.7978846, %v5082_v61  ;;  %v5083_v7 = vadd.f32 %v5055_v20, %v10704_v30  ;;  %v5056_v24 = vmul.f32 0.044715, %v5028_v52 }
0x1231   : > { %v6556_v36 = vpop.eup %6555  ;;  %v5057_v51 = vmul.f32 0.044715, %v5029_v4  ;;  %v5030_v58 = vmul.f32 %v5002_v41, %v10724_v26  ;;  %v4952_v25 = vpop.f32.mrf.mxu1  ;;  %v5184_v2 = vmul.f32 0.5, %v5156_v35  ;;  %v5186_v46 = vmul.f32 0.5, %v5158_v47 }
0x1232   : > { %6569 = vtanh.f32 %v5110_v14  ;;  %v5111_v8 = vmul.f32 0.7978846, %v5083_v7  ;;  %v5084_v57 = vadd.f32 %v5056_v24, %v10711_v34  ;;  %v10735_v32 = vadd.f32 %v4952_v25, %v10617_v31 }
0x1233   : > { %v6558_v10 = vpop.eup %6557  ;;  %v5085_v56 = vadd.f32 %v5057_v51, %v10714_v48  ;;  %v5058_v63 = vmul.f32 0.044715, %v5030_v58  ;;  %v5212_v28 = vmul.f32 %v5184_v2, %v10629_v38  ;;  %v4954_v9 = vpop.f32.mrf.mxu1  ;;  %v5214_v33 = vmul.f32 %v5186_v46, %v10641_v3 }
0x1234   : > { %6571 = vtanh.f32 %v5111_v8  ;;  %v5112_v13 = vmul.f32 0.7978846, %v5084_v57  ;;  %v5003_v60 = vmul.f32 %v10735_v32, %v10735_v32  ;;  %v10743_v62 = vadd.f32 %v4954_v9, %v10621_v0 }
0x1235   : > { %v6560_v15 = vpop.eup %6559  ;;  %v5113_v29 = vmul.f32 0.7978846, %v5085_v56  ;;  %v5086_v12 = vadd.f32 %v5058_v63, %v10724_v26  ;;  %5309 = vmatprep.mubr.f32.mxu0 %v5212_v28  ;;  %v4958_v61 = vpop.f32.mrf.mxu1  ;;  %v5157_v20 = vadd.f32 1.0, %v6554_v55  ;;  %v5160_v52 = vadd.f32 1.0, %v6558_v10 }
0x1236   : > { %v6562_v38 = vpop.eup %6561  ;;  %6573 = vtanh.f32 %v5112_v13  ;;  %v5031_v3 = vmul.f32 %v5003_v60, %v10735_v32  ;;  %5310 = vmatmul.mubr.f32.vlgmr.msra.gmra.mxu0 %v5211_v11  ;;  %v5004_v4 = vmul.f32 %v10743_v62, %v10743_v62  ;;  %v10750_v41 = vadd.f32 %v4958_v61, %v10617_v31 }
0x1237   : > { %6575 = vtanh.f32 %v5113_v29  ;;  %v5114_v35 = vmul.f32 0.7978846, %v5086_v12  ;;  %5314 = vmatprep.mubr.f32.mxu0 %v5214_v33  ;;  %v5185_v47 = vmul.f32 0.5, %v5157_v20  ;;  %v4960_v14 = vpop.f32.mrf.mxu1  ;;  %v5188_v7 = vmul.f32 0.5, %v5160_v52 }
0x1238   : > { %v10752_v24 = vpop.eup %6563  ;;  %v5059_v55 = vmul.f32 0.044715, %v5031_v3  ;;  %v5032_v51 = vmul.f32 %v5004_v4, %v10743_v62  ;;  %v5005_v11 = vmul.f32 %v10750_v41, %v10750_v41  ;;  %v10758_v58 = vadd.f32 %v4960_v14, %v10621_v0 }
0x1239   : > { %6577 = vtanh.f32 %v5114_v35  ;;  %v5213_v25 = vmul.f32 %v5185_v47, %v10635_v43  ;;  %v4964_v2 = vpop.f32.mrf.mxu1  ;;  %v5216_v46 = vmul.f32 %v5188_v7, %v10655_v6  ;;  %v5159_v8 = vadd.f32 1.0, %v6556_v36 }
0x123a   : > { %v6566_v57 = vpop.eup %6565  ;;  %v5087_v10 = vadd.f32 %v5059_v55, %v10735_v32  ;;  %v5060_v56 = vmul.f32 0.044715, %v5032_v51  ;;  %v5033_v63 = vmul.f32 %v5005_v11, %v10750_v41  ;;  %v5006_v28 = vmul.f32 %v10758_v58, %v10758_v58 }
0x123b   : > { %5315 = vmatmul.mubr.f32.gmra.mxu0 %v5213_v25  ;;  %v10767_v9 = vadd.f32 %v4964_v2, %v10617_v31  ;;  %v5187_v33 = vmul.f32 0.5, %v5159_v8  ;;  %v4966_v13 = vpop.f32.mrf.mxu1  ;;  %v5162_v43 = vadd.f32 1.0, %v6562_v38  ;;  %v5161_v60 = vadd.f32 1.0, %v6560_v15 }
0x123c   : > { %v5115_v29 = vmul.f32 0.7978846, %v5087_v10  ;;  %v5088_v6 = vadd.f32 %v5060_v56, %v10743_v62  ;;  %v5061_v36 = vmul.f32 0.044715, %v5033_v63  ;;  %v5034_v12 = vmul.f32 %v5006_v28, %v10758_v58  ;;  %5319 = vmatprep.mubr.f32.mxu0 %v5216_v46 }
0x123d   : > { %v10771_v61 = vpop.eup %6567  ;;  %v5007_v20 = vmul.f32 %v10767_v9, %v10767_v9  ;;  %v5215_v52 = vmul.f32 %v5187_v33, %v10648_v5  ;;  %v10777_v3 = vadd.f32 %v4966_v13, %v10621_v0  ;;  %v4970_v4 = vpop.f32.mrf.mxu1  ;;  %v5190_v38 = vmul.f32 0.5, %v5162_v43 }
0x123e   : > { %6579 = vtanh.f32 %v5115_v29  ;;  %v5116_v15 = vmul.f32 0.7978846, %v5088_v6  ;;  %v5089_v35 = vadd.f32 %v5061_v36, %v10750_v41  ;;  %v5062_v47 = vmul.f32 0.044715, %v5034_v12 }
0x123f   : > { %v6570_v14 = vpop.eup %6569  ;;  %v5035_v7 = vmul.f32 %v5007_v20, %v10767_v9  ;;  %5320 = vmatmul.mubr.f32.gmra.mxu0 %v5215_v52  ;;  %v5008_v55 = vmul.f32 %v10777_v3, %v10777_v3  ;;  %v10784_v51 = vadd.f32 %v4970_v4, %v10617_v31  ;;  %v5218_v5 = vmul.f32 %v5190_v38, %v10666_v42  ;;  %v4972_v11 = vpop.f32.mrf.mxu1 }
0x1240   : > { %6581 = vtanh.f32 %v5116_v15  ;;  %v5117_v25 = vmul.f32 0.7978846, %v5089_v35  ;;  %v5090_v2 = vadd.f32 %v5062_v47, %v10758_v58  ;;  %v5189_v46 = vmul.f32 0.5, %v5161_v60 }
0x1241   : > { %v10788_v8 = vpop.eup %6571  ;;  %v5063_v10 = vmul.f32 0.044715, %v5035_v7  ;;  %v5036_v56 = vmul.f32 %v5008_v55, %v10777_v3  ;;  %v5009_v63 = vmul.f32 %v10784_v51, %v10784_v51  ;;  %5324 = vmatprep.mubr.f32.mxu0 %v5218_v5  ;;  %v10794_v28 = vadd.f32 %v4972_v11, %v10621_v0  ;;  %v4976_v33 = vpop.f32.mrf.mxu1 }
0x1242   : > { %6583 = vtanh.f32 %v5117_v25  ;;  %v5118_v42 = vmul.f32 0.7978846, %v5090_v2  ;;  %v5217_v13 = vmul.f32 %v5189_v46, %v10662_v1  ;;  %v10798_v43 = vadd.f32 %v4976_v33, %v10617_v31 }
0x1243   : > { %v6574_v60 = vpop.eup %6573  ;;  %v5091_v29 = vadd.f32 %v5063_v10, %v10767_v9  ;;  %v5064_v6 = vmul.f32 0.044715, %v5036_v56  ;;  %v5037_v36 = vmul.f32 %v5009_v63, %v10784_v51  ;;  %v5010_v12 = vmul.f32 %v10794_v28, %v10794_v28  ;;  %v4978_v20 = vpop.f32.mrf.mxu1 }
0x1244   : > { %v6576_v52 = vpop.eup %6575  ;;  %6585 = vtanh.f32 %v5118_v42  ;;  %5325 = vmatmul.mubr.f32.gmra.mxu0 %v5217_v13  ;;  %v5011_v4 = vmul.f32 %v10798_v43, %v10798_v43  ;;  %v5164_v1 = vadd.f32 1.0, %v6566_v57  ;;  %v5163_v38 = vadd.f32 1.0, %v10752_v24 }
0x1245   : > { %v5119_v15 = vmul.f32 0.7978846, %v5091_v29  ;;  %v5092_v35 = vadd.f32 %v5064_v6, %v10777_v3  ;;  %v5065_v47 = vmul.f32 0.044715, %v5037_v36  ;;  %v5038_v7 = vmul.f32 %v5010_v12, %v10794_v28  ;;  %v4982_v55 = vpop.f32.mrf.mxu1 }
0x1246   : > { %v6578_v5 = vpop.eup %6577  ;;  %v5039_v11 = vmul.f32 %v5011_v4, %v10798_v43  ;;  %v5192_v25 = vmul.f32 0.5, %v5164_v1  ;;  %v5191_v2 = vmul.f32 0.5, %v5163_v38  ;;  %v10811_v46 = vadd.f32 %v4978_v20, %v10621_v0 }
0x1247   : > { %6587 = vtanh.f32 %v5119_v15  ;;  %v5120_v10 = vmul.f32 0.7978846, %v5092_v35  ;;  %v5093_v57 = vadd.f32 %v5065_v47, %v10784_v51  ;;  %v5066_v24 = vmul.f32 0.044715, %v5038_v7  ;;  %v4984_v13 = vpop.f32.mrf.mxu1 }
0x1248   : > { %v5067_v56 = vmul.f32 0.044715, %v5039_v11  ;;  %v5220_v63 = vmul.f32 %v5192_v25, %v10682_v16  ;;  %v5219_v33 = vmul.f32 %v5191_v2, %v10674_v17  ;;  %v5012_v42 = vmul.f32 %v10811_v46, %v10811_v46 }
0x1249   : > { %6589 = vtanh.f32 %v5120_v10  ;;  %v5121_v29 = vmul.f32 0.7978846, %v5093_v57  ;;  %v5094_v6 = vadd.f32 %v5066_v24, %v10794_v28  ;;  %v10820_v36 = vadd.f32 %v4982_v55, %v10617_v31 }
0x124a   : > { %v5095_v12 = vadd.f32 %v5067_v56, %v10798_v43  ;;  %5329 = vmatprep.mubr.f32.mxu0 %v5220_v63  ;;  %v5040_v20 = vmul.f32 %v5012_v42, %v10811_v46  ;;  %v5166_v4 = vadd.f32 1.0, %v6570_v14  ;;  %v5165_v16 = vadd.f32 1.0, %v10771_v61 }
0x124b   : > { %v6580_v17 = vpop.eup %6579  ;;  %6591 = vtanh.f32 %v5121_v29  ;;  %v5122_v1 = vmul.f32 0.7978846, %v5094_v6  ;;  %5330 = vmatmul.mubr.f32.gmra.mxu0 %v5219_v33  ;;  %v5013_v38 = vmul.f32 %v10820_v36, %v10820_v36  ;;  %v10828_v15 = vadd.f32 %v4984_v13, %v10621_v0 }
0x124c   : > { %v5123_v31 = vmul.f32 0.7978846, %v5095_v12  ;;  %v5068_v35 = vmul.f32 0.044715, %v5040_v20  ;;  %v5194_v47 = vmul.f32 0.5, %v5166_v4  ;;  %v5193_v7 = vmul.f32 0.5, %v5165_v16 }
0x124d   : > { %v6582_v55 = vpop.eup %6581  ;;  %6593 = vtanh.f32 %v5122_v1  ;;  %v5041_v14 = vmul.f32 %v5013_v38, %v10820_v36  ;;  %v5014_v61 = vmul.f32 %v10828_v15, %v10828_v15  ;;  %v5168_v11 = vadd.f32 1.0, %v6574_v60 }
0x124e   : > { %6595 = vtanh.f32 %v5123_v31  ;;  %v5096_v25 = vadd.f32 %v5068_v35, %v10811_v46  ;;  %v5222_v2 = vmul.f32 %v5194_v47, %v10697_v53  ;;  %v5221_v0 = vmul.f32 %v5193_v7, %v10689_v27 }
0x124f   : > { %v6584_v10 = vpop.eup %6583  ;;  %v5069_v57 = vmul.f32 0.044715, %v5041_v14  ;;  %v5042_v24 = vmul.f32 %v5014_v61, %v10828_v15  ;;  %v5196_v56 = vmul.f32 0.5, %v5168_v11  ;;  %v5167_v63 = vadd.f32 1.0, %v10788_v8 }
0x1250   : > { %v5124_v33 = vmul.f32 0.7978846, %v5096_v25  ;;  %5334 = vmatprep.mubr.f32.mxu0 %v5222_v2  ;;  %v5170_v42 = vadd.f32 1.0, %v6578_v5  ;;  %v5169_v13 = vadd.f32 1.0, %v6576_v52  ;;  %v5172_v29 = vadd.f32 1.0, %v6582_v55 }
0x1251   : > { %v6586_v60 = vpop.eup %6585  ;;  %v5097_v6 = vadd.f32 %v5069_v57, %v10820_v36  ;;  %5335 = vmatmul.mubr.f32.gmra.mxu0 %v5221_v0  ;;  %v5070_v12 = vmul.f32 0.044715, %v5042_v24  ;;  %v5224_v53 = vmul.f32 %v5196_v56, %v10711_v34  ;;  %v5195_v27 = vmul.f32 0.5, %v5167_v63 }
0x1252   : > { %6597 = vtanh.f32 %v5124_v33  ;;  %v5198_v20 = vmul.f32 0.5, %v5170_v42  ;;  %v5197_v4 = vmul.f32 0.5, %v5169_v13  ;;  %v5200_v16 = vmul.f32 0.5, %v5172_v29 }
0x1253   : > { %v5125_v1 = vmul.f32 0.7978846, %v5097_v6  ;;  %v5098_v8 = vadd.f32 %v5070_v12, %v10828_v15  ;;  %5339 = vmatprep.mubr.f32.mxu0 %v5224_v53  ;;  %v5223_v5 = vmul.f32 %v5195_v27, %v10704_v30  ;;  %v5171_v52 = vadd.f32 1.0, %v6580_v17 }
0x1254   : > { %v6588_v38 = vpop.eup %6587  ;;  %v5226_v31 = vmul.f32 %v5198_v20, %v10724_v26  ;;  %v5174_v35 = vadd.f32 1.0, %v6586_v60  ;;  %v5225_v7 = vmul.f32 %v5197_v4, %v10714_v48  ;;  %v5228_v55 = vmul.f32 %v5200_v16, %v10743_v62 }
0x1255   : > { %6599 = vtanh.f32 %v5125_v1  ;;  %v5126_v47 = vmul.f32 0.7978846, %v5098_v8  ;;  %5340 = vmatmul.mubr.f32.gmra.mxu0 %v5223_v5  ;;  %v5199_v61 = vmul.f32 0.5, %v5171_v52  ;;  %v5173_v11 = vadd.f32 1.0, %v6584_v10 }
0x1256   : > { %v6590_v34 = vpop.eup %6589  ;;  %5344 = vmatprep.mubr.f32.mxu0 %v5226_v31  ;;  %v5202_v14 = vmul.f32 0.5, %v5174_v35  ;;  %v5175_v48 = vadd.f32 1.0, %v6588_v38 }
0x1257   : > { %6601 = vtanh.f32 %v5126_v47  ;;  %v5176_v25 = vadd.f32 1.0, %v6590_v34  ;;  %v5227_v24 = vmul.f32 %v5199_v61, %v10735_v32  ;;  %v5201_v56 = vmul.f32 0.5, %v5173_v11 }
0x1258   : > { %v6592_v30 = vpop.eup %6591  ;;  %v5230_v26 = vmul.f32 %v5202_v14, %v10758_v58  ;;  %v5203_v60 = vmul.f32 0.5, %v5175_v48 }
0x1259   : > { %v5177_v17 = vadd.f32 1.0, %v6592_v30  ;;  %5345 = vmatmul.mubr.f32.gmra.mxu0 %v5225_v7  ;;  %v5204_v0 = vmul.f32 0.5, %v5176_v25  ;;  %v5229_v29 = vmul.f32 %v5201_v56, %v10750_v41 }
0x125a   : > { %v6594_v2 = vpop.eup %6593  ;;  %5349 = vmatprep.mubr.f32.mxu0 %v5228_v55  ;;  %v5231_v20 = vmul.f32 %v5203_v60, %v10767_v9 }
0x125b   : > { %v6596_v57 = vpop.eup %6595  ;;  %v5178_v63 = vadd.f32 1.0, %v6594_v2  ;;  %v5205_v62 = vmul.f32 0.5, %v5177_v17  ;;  %v5232_v10 = vmul.f32 %v5204_v0, %v10777_v3 }
0x125c   : > { %v5179_v42 = vadd.f32 1.0, %v6596_v57 }
0x125d   : > { %5350 = vmatmul.mubr.f32.gmra.mxu0 %v5227_v24  ;;  %v5206_v33 = vmul.f32 0.5, %v5178_v63  ;;  %v5233_v6 = vmul.f32 %v5205_v62, %v10784_v51 }
0x125e   : > { %5354 = vmatprep.mubr.f32.mxu0 %v5230_v26  ;;  %v5207_v32 = vmul.f32 0.5, %v5179_v42 }
0x125f   : > { %v6598_v13 = vpop.eup %6597  ;;  %v5234_v58 = vmul.f32 %v5206_v33, %v10794_v28 }
0x1260   : > { %v5180_v12 = vadd.f32 1.0, %v6598_v13  ;;  %v5235_v28 = vmul.f32 %v5207_v32, %v10798_v43 }
0x1261   : > { %5355 = vmatmul.mubr.f32.gmra.mxu0 %v5229_v29  ;;  %5364 = vmatprep.mubr.f32.mxu1 %v5234_v58 }
0x1262   : > { %v6600_v53 = vpop.eup %6599  ;;  %5359 = vmatprep.mubr.f32.mxu0 %v5232_v10  ;;  %5365 = vmatmul.mubr.f32.vlgmr.msra.gmra.mxu1 %v5233_v6  ;;  %v5208_v27 = vmul.f32 0.5, %v5180_v12 }
0x1263   : > { %v5181_v3 = vadd.f32 1.0, %v6600_v53 }
0x1264   : > { %v6602_v4 = vpop.eup %6601  ;;  %v5236_v41 = vmul.f32 %v5208_v27, %v10811_v46  ;;  %v10861_v46 = vld [vmem:[%s900_s30] ss:$0 sm:$0xff] }
0x1265   : > { %5360 = vmatmul.mubr.f32.gmra.mxu0 %v5231_v20  ;;  %v5182_v16 = vadd.f32 1.0, %v6602_v4  ;;  %v5209_v51 = vmul.f32 0.5, %v5181_v3 }
0x1266   : > { %5369 = vmatprep.mubr.f32.mxu1 %v5236_v41 }
0x1267   : > { %5370 = vmatmul.mubr.f32.gmra.mxu1 %v5235_v28  ;;  %v5210_v1 = vmul.f32 0.5, %v5182_v16  ;;  %v5237_v5 = vmul.f32 %v5209_v51, %v10820_v36 }
0x1269   : > { %v5238_v8 = vmul.f32 %v5210_v1, %v10828_v15 }
0x126b   : > { %5374 = vmatprep.mubr.f32.mxu1 %v5238_v8 }
0x126c   : > { %5375 = vmatmul.mubr.f32.gmra.mxu1 %v5237_v5 }
0x12f6   : > { %v6151_v9 = vpop.f32.mrf.mxu0 }
0x12f8   : > { %v6152_v52 = vpop.f32.mrf.mxu0 }
0x12f9   : > { %v6153_v43 = vadd.f32 %v6152_v52, %v6151_v9 }
0x12fb   : > { %v5312_v38 = vadd.f32 %v6153_v43, %v10861_v46  ;;  %v6154_v31 = vpop.f32.mrf.mxu0 }
0x12fd   : > { %v10865_v35 = vadd.f32 %v5312_v38, %v10298_v59  ;;  %v6155_v15 = vpop.f32.mrf.mxu0 }
0x12fe   : > { %v6156_v47 = vadd.f32 %v6155_v15, %v6154_v31 }
0x12ff   : > { %v6157_v36 = vpop.f32.mrf.mxu0 }
0x1300   : > { %v5317_v34 = vadd.f32 %v6156_v47, %v10861_v46 }
0x1301   : > { %v6158_v7 = vpop.f32.mrf.mxu0 }
0x1302   : > { %v10869_v55 = vadd.f32 %v5317_v34, %v10292_v23  ;;  %v6159_v14 = vadd.f32 %v6158_v7, %v6157_v36 }
0x1304   : > { %v5322_v61 = vadd.f32 %v6159_v14, %v10861_v46  ;;  %v6160_v11 = vpop.f32.mrf.mxu0 }
0x1306   : > { %v10873_v25 = vadd.f32 %v5322_v61, %v10309_v54  ;;  %v6161_v30 = vpop.f32.mrf.mxu0 }
0x1307   : > { %v6162_v17 = vadd.f32 %v6161_v30, %v6160_v11 }
0x1309   : > { %v5327_v59 = vadd.f32 %v6162_v17, %v10861_v46 }
0x130b   : > { %v10877_v2 = vadd.f32 %v5327_v59, %v10314_v21  ;;  %v6163_v26 = vpop.f32.mrf.mxu0 }
0x130d   : > { %v6164_v0 = vpop.f32.mrf.mxu0 }
0x130e   : > { %v6165_v57 = vadd.f32 %v6164_v0, %v6163_v26 }
0x1310   : > { %v5332_v23 = vadd.f32 %v6165_v57, %v10861_v46 }
0x1311   : > { %v6166_v24 = vpop.f32.mrf.mxu0 }
0x1312   : > { %v10881_v56 = vadd.f32 %v5332_v23, %v10323_v39 }
0x1313   : > { %v6167_v48 = vpop.f32.mrf.mxu0 }
0x1314   : > { %v6168_v63 = vadd.f32 %v6167_v48, %v6166_v24 }
0x1315   : > { %v6169_v54 = vpop.f32.mrf.mxu0 }
0x1316   : > { %v5337_v62 = vadd.f32 %v6168_v63, %v10861_v46 }
0x1317   : > { %v6170_v33 = vpop.f32.mrf.mxu0 }
0x1318   : > { %v10885_v42 = vadd.f32 %v5337_v62, %v10330_v45  ;;  %v6171_v21 = vadd.f32 %v6170_v33, %v6169_v54 }
0x1319   : > { %v6172_v10 = vpop.f32.mrf.mxu0 }
0x131a   : > { %v5342_v13 = vadd.f32 %v6171_v21, %v10861_v46 }
0x131b   : > { %v6173_v29 = vpop.f32.mrf.mxu0 }
0x131c   : > { %v10889_v60 = vadd.f32 %v5342_v13, %v10339_v44  ;;  %v6174_v58 = vadd.f32 %v6173_v29, %v6172_v10 }
0x131d   : > { %v6175_v39 = vpop.f32.mrf.mxu0 }
0x131e   : > { %v5347_v6 = vadd.f32 %v6174_v58, %v10861_v46 }
0x131f   : > { %v6176_v12 = vpop.f32.mrf.mxu0 }
0x1320   : > { %v10893_v32 = vadd.f32 %v5347_v6, %v10344_v22  ;;  %v6177_v53 = vadd.f32 %v6176_v12, %v6175_v39 }
0x1321   : > { %v6178_v27 = vpop.f32.mrf.mxu0 }
0x1322   : > { %v5352_v45 = vadd.f32 %v6177_v53, %v10861_v46  ;;  %v6184_v20 = vpop.f32.mrf.mxu1 }
0x1323   : > { %v6179_v3 = vpop.f32.mrf.mxu0 }
0x1324   : > { %v10897_v4 = vadd.f32 %v5352_v45, %v10362_v18  ;;  %v6180_v41 = vadd.f32 %v6179_v3, %v6178_v27  ;;  %v6185_v44 = vpop.f32.mrf.mxu1 }
0x1325   : > { %v6181_v28 = vpop.f32.mrf.mxu0  ;;  %v6186_v16 = vadd.f32 %v6185_v44, %v6184_v20 }
0x1326   : > { %v5357_v51 = vadd.f32 %v6180_v41, %v10861_v46 }
0x1327   : > { %v6182_v1 = vpop.f32.mrf.mxu0  ;;  %v5367_v8 = vadd.f32 %v6186_v16, %v10861_v46  ;;  %v6187_v22 = vpop.f32.mrf.mxu1 }
0x1328   : > { %v10902_v5 = vadd.f32 %v5357_v51, %v10356_v19  ;;  %v6183_v9 = vadd.f32 %v6182_v1, %v6181_v28 }
0x1329   : > { %v10905_v52 = vadd.f32 %v5367_v8, %v10370_v50  ;;  %v6188_v43 = vpop.f32.mrf.mxu1 }
0x132a   : > { %v5362_v18 = vadd.f32 %v6183_v9, %v10861_v46  ;;  %v6189_v38 = vadd.f32 %v6188_v43, %v6187_v22 }
0x132c   : > { %v10909_v31 = vadd.f32 %v5362_v18, %v10378_v40  ;;  %v5372_v15 = vadd.f32 %v6189_v38, %v10861_v46  ;;  %v6190_v47 = vpop.f32.mrf.mxu1 }
0x132e   : > { %v10913_v36 = vadd.f32 %v5372_v15, %v10394_v49  ;;  %v6191_v34 = vpop.f32.mrf.mxu1 }
0x132f   : > { %v6192_v19 = vadd.f32 %v6191_v34, %v6190_v47  ;;  %5397 = sbr.rel (%p6080_p5) target bundleno = 4923 (0x133b), region = 120 }
0x1331   : > { %v5377_v7 = vadd.f32 %v6192_v19, %v10861_v46 }
0x1333   : > { %v10917_v50 = vadd.f32 %v5377_v7, %v10388_v37 }
0x1334   : > { %5398 = vst.msk [vmem:[%s11300_s23] sm:$0xff] %vm1028_vm1, %v10865_v35  ;;  %5399 = vst.msk [vmem:[%s11300_s23 + $0x8] sm:$0xff] %vm1028_vm1, %v10869_v55 }
0x1335   : > { %5400 = vst.msk [vmem:[%s11300_s23 + $0x10] sm:$0xff] %vm1028_vm1, %v10873_v25  ;;  %5401 = vst.msk [vmem:[%s11300_s23 + $0x18] sm:$0xff] %vm1028_vm1, %v10877_v2 }
0x1336   : > { %5402 = vst.msk [vmem:[%s11300_s23 + $0x20] sm:$0xff] %vm1028_vm1, %v10881_v56  ;;  %5403 = vst.msk [vmem:[%s11300_s23 + $0x28] sm:$0xff] %vm1028_vm1, %v10885_v42 }
0x1337   : > { %5404 = vst.msk [vmem:[%s11300_s23 + $0x30] sm:$0xff] %vm1028_vm1, %v10889_v60  ;;  %5405 = vst.msk [vmem:[%s11300_s23 + $0x38] sm:$0xff] %vm1028_vm1, %v10893_v32 }
0x1338   : > { %5406 = vst.msk [vmem:[%s11300_s23 + $0x40] sm:$0xff] %vm1028_vm1, %v10897_v4  ;;  %5407 = vst.msk [vmem:[%s11300_s23 + $0x48] sm:$0xff] %vm1028_vm1, %v10902_v5 }
0x1339   : > { %5408 = vst.msk [vmem:[%s11300_s23 + $0x50] sm:$0xff] %vm1028_vm1, %v10909_v31  ;;  %5409 = vst.msk [vmem:[%s11300_s23 + $0x58] sm:$0xff] %vm1028_vm1, %v10905_v52 }
0x133a   : > { %5410 = vst.msk [vmem:[%s11300_s23 + $0x60] sm:$0xff] %vm1028_vm1, %v10913_v36  ;;  %5411 = vst.msk [vmem:[%s11300_s23 + $0x68] sm:$0xff] %vm1028_vm1, %v10917_v50 }
0x133b PF: > { %p6081_p6 = scmp.ne.s32.totalorder %s6811_s28, 2 }
0x133c   : > { %s11862_s8 = sld [smem:[#allocation115_spill]] (!%p6081_p6) }
0x133d   : > { %5415 = sbr.rel (%p6081_p6) target bundleno = 5662 (0x161e), region = 124  ;;  %s11863_s4 = sld [smem:[#allocation113_spill]] (!%p6081_p6) }
0x133e   : > { %s11864_s21 = sld [smem:[#allocation114_spill]] (!%p6081_p6) }
0x133f   : > { %s11865_s17 = sld [smem:[#allocation121_spill]] (!%p6081_p6) }
0x1340   : > { %s11866_s13 = sld [smem:[#allocation120_spill]] (!%p6081_p6) }
0x1341   : > { %s11867_s15 = sld [smem:[#allocation116_spill]] (!%p6081_p6) }
0x1342   : > { %v5439_v40 = vsel %vm1028_vm1, %v10893_v32, 0.0  ;;  %v5418_v37 = vsel %vm1028_vm1, %v10865_v35, 0.0  ;;  %v5421_v49 = vsel %vm1028_vm1, %v10869_v55, 0.0  ;;  %v5427_v46 = vsel %vm1028_vm1, %v10877_v2, 0.0  ;;  %v5666_v10 = vld [vmem:[%s11862_s8 + $0x38] sm:$0xff]  ;;  %v5665_v29 = vld [vmem:[%s11862_s8 + $0x30] sm:$0xff] }
0x1343   : > { %5440 = vadd.xlane.f32.xlu0 %v5439_v40  ;;  %v5433_v14 = vsel %vm1028_vm1, %v10885_v42, 0.0  ;;  %v5442_v61 = vsel %vm1028_vm1, %v10897_v4, 0.0  ;;  %v5448_v11 = vsel %vm1028_vm1, %v10909_v31, 0.0  ;;  %v5454_v30 = vsel %vm1028_vm1, %v10913_v36, 0.0  ;;  %v5664_v39 = vld [vmem:[%s11862_s8 + $0x28] sm:$0xff]  ;;  %v5663_v6 = vld [vmem:[%s11862_s8 + $0x20] sm:$0xff] }
0x1344   : > { %v5424_v62 = vsel %vm1028_vm1, %v10873_v25, 0.0  ;;  %v5430_v33 = vsel %vm1028_vm1, %v10881_v56, 0.0  ;;  %v5445_v21 = vsel %vm1028_vm1, %v10902_v5, 0.0  ;;  %v6675_v13 = vmov 0.0   ;;  %v5661_v53 = vld [vmem:[%s11862_s8 + $0x10] sm:$0xff]  ;;  %v5660_v27 = vld [vmem:[%s11862_s8 + $0x8] sm:$0xff] }
0x1345   : > { %6242 = vmatprep.subr.mxu0 %v6675_v13  ;;  %vm6676_vm0 = vmmov 0   ;;  %v5451_v58 = vsel %vm1028_vm1, %v10905_v52, 0.0  ;;  %6261 = vmatprep.subr.mxu1 %v6675_v13  ;;  %v5457_v12 = vsel %vm1028_vm1, %v10917_v50, 0.0  ;;  %v5659_v45 = vld [vmem:[%s11862_s8] sm:$0xff]  ;;  %vm5657_vm2 = vcmask 1040384   ;;  %s11868_s24 = sld [smem:[#allocation119_spill]] }
0x1346   : > { %6258 = vmatprep.mubr.msk.f32.mxu0 %vm6676_vm0, %v6675_v13  ;;  %6243 = vmatpush3.msra.mxu0 %v5666_v10  ;;  %s11870_s26 = sld [smem:[#allocation117_spill]] }
0x1347   : > { %5419 = vadd.xlane.f32.xlu0 %v5418_v37  ;;  %6244 = vmatprep.subr.mxu0 %v6675_v13  ;;  %s11871_s29 = sld [smem:[#allocation118_spill]] }
0x1348   : > { %6245 = vmatpush3.msra.mxu0 %v5665_v29  ;;  %6265 = vmatprep.mubr.msk.f32.mxu1 %vm6676_vm0, %v6675_v13  ;;  %s11872_s2 = sld [smem:[#allocation122_spill]] }
0x1349   : > { %6246 = vmatprep.subr.mxu0 %v6675_v13 }
0x134a   : > { %6247 = vmatpush3.msra.mxu0 %v5664_v39 }
0x134b   : > { %5422 = vadd.xlane.f32.xlu0 %v5421_v49  ;;  %6248 = vmatprep.subr.mxu0 %v6675_v13 }
0x134c   : > { %6249 = vmatpush3.msra.mxu0 %v5663_v6 }
0x134d   : > { %6250 = vmatprep.subr.mxu0 %v6675_v13 }
0x134f   : > { %5428 = vadd.xlane.f32.xlu0 %v5427_v46 }
0x1353   : > { %5434 = vadd.xlane.f32.xlu0 %v5433_v14 }
0x1357   : > { %5443 = vadd.xlane.f32.xlu0 %v5442_v61 }
0x135b   : > { %5449 = vadd.xlane.f32.xlu0 %v5448_v11 }
0x135f   : > { %5455 = vadd.xlane.f32.xlu0 %v5454_v30 }
0x13cc   : > { %v5441_v17 = vpop.xlane.xlu0 %5440 }
0x13cd   : > { %v5467_v59 = vmul.f32 0.015625, %v5441_v17 }
0x13cf   : > { %v11008_v26 = vsub.f32 %v10893_v32, %v5467_v59  ;;  %v5662_v32 = vld [vmem:[%s11862_s8 + $0x18] sm:$0xff] }
0x13d0   : > { %v5420_v0 = vpop.xlane.xlu0 %5419  ;;  %6251 = vmatpush3.msra.mxu0 %v5662_v32 }
0x13d1   : > { %v5460_v57 = vmul.f32 0.015625, %v5420_v0  ;;  %v5495_v23 = vmul.f32 %v11008_v26, %v11008_v26  ;;  %6252 = vmatprep.subr.mxu0 %v6675_v13 }
0x13d2   : > { %6253 = vmatpush3.msra.mxu0 %v5661_v53 }
0x13d3   : > { %v11013_v24 = vsub.f32 %v10865_v35, %v5460_v57  ;;  %v5523_v48 = vsel %vm1028_vm1, %v5495_v23, 0.0  ;;  %v5436_v35 = vsel %vm1028_vm1, %v10889_v60, 0.0  ;;  %6254 = vmatprep.subr.mxu0 %v6675_v13 }
0x13d4   : > { %5524 = vadd.xlane.f32.xlu1 %v5523_v48  ;;  %6255 = vmatpush3.msra.mxu0 %v5660_v27  ;;  %v5423_v20 = vpop.xlane.xlu0 %5422 }
0x13d5   : > { %v5488_v63 = vmul.f32 %v11013_v24, %v11013_v24  ;;  %6256 = vmatprep.subr.mxu0 %v6675_v13  ;;  %v5461_v3 = vmul.f32 0.015625, %v5423_v20 }
0x13d6   : > { %6257 = vmatpush3.msra.mxu0 %v5659_v45 }
0x13d7   : > { %v5502_v54 = vsel %vm1028_vm1, %v5488_v63, 0.0  ;;  %v11067_v41 = vsub.f32 %v10869_v55, %v5461_v3 }
0x13d8   : > { %5503 = vadd.xlane.f32.xlu1 %v5502_v54  ;;  %v5429_v44 = vpop.xlane.xlu0 %5428 }
0x13d9   : > { %v5463_v28 = vmul.f32 0.015625, %v5429_v44  ;;  %v5489_v16 = vmul.f32 %v11067_v41, %v11067_v41 }
0x13db   : > { %v11072_v51 = vsub.f32 %v10877_v2, %v5463_v28  ;;  %v5505_v1 = vsel %vm1028_vm1, %v5489_v16, 0.0 }
0x13dc   : > { %5425 = vadd.xlane.f32.xlu1 %v5424_v62  ;;  %5506 = vadd.xlane.f32.xlu0 %v5505_v1  ;;  %v5435_v8 = vpop.xlane.xlu0 %5434 }
0x13dd   : > { %v5465_v22 = vmul.f32 0.015625, %v5435_v8  ;;  %v5491_v9 = vmul.f32 %v11072_v51, %v11072_v51 }
0x13df   : > { %v11078_v43 = vsub.f32 %v10885_v42, %v5465_v22  ;;  %v5511_v55 = vsel %vm1028_vm1, %v5491_v9, 0.0 }
0x13e0   : > { %5431 = vadd.xlane.f32.xlu1 %v5430_v33  ;;  %5512 = vadd.xlane.f32.xlu0 %v5511_v55  ;;  %v5444_v18 = vpop.xlane.xlu0 %5443 }
0x13e1   : > { %v5468_v38 = vmul.f32 0.015625, %v5444_v18  ;;  %v5493_v2 = vmul.f32 %v11078_v43, %v11078_v43 }
0x13e3   : > { %v11084_v15 = vsub.f32 %v10897_v4, %v5468_v38  ;;  %v5517_v47 = vsel %vm1028_vm1, %v5493_v2, 0.0 }
0x13e4   : > { %5437 = vadd.xlane.f32.xlu1 %v5436_v35  ;;  %5518 = vadd.xlane.f32.xlu0 %v5517_v47  ;;  %v5450_v34 = vpop.xlane.xlu0 %5449 }
0x13e5   : > { %v5470_v19 = vmul.f32 0.015625, %v5450_v34  ;;  %v5496_v42 = vmul.f32 %v11084_v15, %v11084_v15 }
0x13e7   : > { %v11090_v7 = vsub.f32 %v10909_v31, %v5470_v19  ;;  %v5526_v40 = vsel %vm1028_vm1, %v5496_v42, 0.0  ;;  %v5783_v42 = vld [vmem:[%s11865_s17 + $0x8] sm:$0xff] }
0x13e8   : > { %5446 = vadd.xlane.f32.xlu1 %v5445_v21  ;;  %5527 = vadd.xlane.f32.xlu0 %v5526_v40  ;;  %v5456_v37 = vpop.xlane.xlu0 %5455  ;;  %v5782_v40 = vld [vmem:[%s11865_s17] sm:$0xff] }
0x13e9   : > { %v5472_v49 = vmul.f32 0.015625, %v5456_v37  ;;  %v5498_v4 = vmul.f32 %v11090_v7, %v11090_v7  ;;  %6262 = vmatpush3.msra.mxu1 %v5783_v42 }
0x13ea   : > { %6263 = vmatprep.subr.mxu1 %v6675_v13 }
0x13eb   : > { %v11096_v46 = vsub.f32 %v10913_v36, %v5472_v49  ;;  %v5532_v14 = vsel %vm1028_vm1, %v5498_v4, 0.0  ;;  %6264 = vmatpush3.msra.mxu1 %v5782_v40 }
0x13ec   : > { %5452 = vadd.xlane.f32.xlu1 %v5451_v58  ;;  %5533 = vadd.xlane.f32.xlu0 %v5532_v14 }
0x13ed   : > { %v5500_v61 = vmul.f32 %v11096_v46, %v11096_v46 }
0x13ef   : > { %v5538_v31 = vsel %vm1028_vm1, %v5500_v61, 0.0 }
0x13f0   : > { %5458 = vadd.xlane.f32.xlu1 %v5457_v12  ;;  %5539 = vadd.xlane.f32.xlu0 %v5538_v31  ;;  %v11126_v12 = vld [vmem:[%s11864_s21] ss:$0 sm:$0xff] }
0x145d   : > { %v5525_v11 = vpop.xlane.xlu1 %5524 }
0x145e   : > { %v5551_v30 = vmul.f32 0.015625, %v5525_v11 }
0x1460   : > { %v5565_v17 = vadd.f32 1e-06, %v5551_v30 }
0x1461   : > { %v5504_v59 = vpop.xlane.xlu1 %5503 }
0x1462   : > { %6618 = vrsqrt.f32 %v5565_v17  ;;  %v5544_v0 = vmul.f32 0.015625, %v5504_v59 }
0x1464   : > { %v5558_v57 = vadd.f32 1e-06, %v5544_v0 }
0x1465   : > { %v5426_v23 = vpop.xlane.xlu1 %5425 }
0x1466   : > { %6620 = vrsqrt.f32 %v5558_v57  ;;  %v5462_v36 = vmul.f32 0.015625, %v5426_v23 }
0x1468   : > { %v11103_v48 = vsub.f32 %v10873_v25, %v5462_v36  ;;  %v11116_v25 = vld [vmem:[%s11863_s4] ss:$0 sm:$0xff] }
0x1469   : > { %v5432_v63 = vpop.xlane.xlu1 %5431 }
0x146a   : > { %v5464_v54 = vmul.f32 0.015625, %v5432_v63  ;;  %v5490_v62 = vmul.f32 %v11103_v48, %v11103_v48 }
0x146c   : > { %v11108_v33 = vsub.f32 %v10881_v56, %v5464_v54  ;;  %v5508_v35 = vsel %vm1028_vm1, %v5490_v62, 0.0 }
0x146d   : > { %5509 = vadd.xlane.f32.xlu1 %v5508_v35  ;;  %v5438_v21 = vpop.xlane.xlu1 %5437 }
0x146e   : > { %v5466_v10 = vmul.f32 0.015625, %v5438_v21  ;;  %v5492_v29 = vmul.f32 %v11108_v33, %v11108_v33 }
0x146f   : > { %v6619_v58 = vpop.eup %6618 }
0x1470   : > { %v5593_v39 = vmul.f32 %v6619_v58, %v11008_v26  ;;  %v11120_v6 = vsub.f32 %v10889_v60, %v5466_v10  ;;  %v5514_v56 = vsel %vm1028_vm1, %v5492_v29, 0.0 }
0x1471   : > { %5515 = vadd.xlane.f32.xlu1 %v5514_v56  ;;  %v5447_v32 = vpop.xlane.xlu1 %5446 }
0x1472   : > { %v5613_v53 = vmul.f32 %v11116_v25, %v5593_v39  ;;  %v5469_v27 = vmul.f32 0.015625, %v5447_v32  ;;  %v5494_v45 = vmul.f32 %v11120_v6, %v11120_v6 }
0x1473   : > { %v6621_v20 = vpop.eup %6620 }
0x1474   : > { %v5586_v26 = vmul.f32 %v6621_v20, %v11013_v24  ;;  %v5633_v60 = vadd.f32 %v11126_v12, %v5613_v53  ;;  %v11134_v3 = vsub.f32 %v10902_v5, %v5469_v27  ;;  %v5520_v44 = vsel %vm1028_vm1, %v5494_v45, 0.0 }
0x1475   : > { %5521 = vadd.xlane.f32.xlu1 %v5520_v44  ;;  %v5453_v28 = vpop.xlane.xlu1 %5452 }
0x1476   : > { %v5606_v16 = vmul.f32 %v11116_v25, %v5586_v26  ;;  %5647 = vst.msk [vmem:[%s11300_s23 + $0x38] sm:$0xff] %vm1028_vm1, %v5633_v60  ;;  %v5471_v1 = vmul.f32 0.015625, %v5453_v28  ;;  %v5497_v24 = vmul.f32 %v11134_v3, %v11134_v3  ;;  %v5655_v5 = vrot.slane %v5633_v60, 7 }
0x1478   : > { %v5626_v8 = vadd.f32 %v11126_v12, %v5606_v16  ;;  %v11146_v22 = vsub.f32 %v10905_v52, %v5471_v1  ;;  %v5529_v9 = vsel %vm1028_vm1, %v5497_v24, 0.0 }
0x1479   : > { %5530 = vadd.xlane.f32.xlu1 %v5529_v9  ;;  %v5459_v55 = vpop.xlane.xlu1 %5458 }
0x147a   : > { %5640 = vst.msk [vmem:[%s11300_s23] sm:$0xff] %vm1028_vm1, %v5626_v8  ;;  %v5658_v18 = vsel %vm5657_vm2, %v5626_v8, %v5655_v5  ;;  %v5473_v38 = vmul.f32 0.015625, %v5459_v55  ;;  %v5499_v2 = vmul.f32 %v11146_v22, %v11146_v22 }
0x147b   : > { %6259 = vmatmul.mubr.msk.f32.vlgmr.msra.gmra.mxu0 %vm1028_vm1, %v5658_v18 }
0x147c   : > { %v11157_v47 = vsub.f32 %v10917_v50, %v5473_v38  ;;  %v5535_v52 = vsel %vm1028_vm1, %v5499_v2, 0.0  ;;  %v5507_v50 = vpop.xlane.xlu0 %5506 }
0x147d   : > { %5536 = vadd.xlane.f32.xlu1 %v5535_v52  ;;  %v5545_v37 = vmul.f32 0.015625, %v5507_v50 }
0x147e   : > { %v5501_v34 = vmul.f32 %v11157_v47, %v11157_v47 }
0x147f   : > { %v5559_v49 = vadd.f32 1e-06, %v5545_v37 }
0x1480   : > { %v5541_v19 = vsel %vm1028_vm1, %v5501_v34, 0.0  ;;  %v5513_v4 = vpop.xlane.xlu0 %5512 }
0x1481   : > { %5542 = vadd.xlane.f32.xlu1 %v5541_v19  ;;  %6622 = vrsqrt.f32 %v5559_v49  ;;  %v5547_v14 = vmul.f32 0.015625, %v5513_v4 }
0x1483   : > { %v5561_v61 = vadd.f32 1e-06, %v5547_v14 }
0x1484   : > { %v5519_v31 = vpop.xlane.xlu0 %5518 }
0x1485   : > { %6624 = vrsqrt.f32 %v5561_v61  ;;  %v5549_v11 = vmul.f32 0.015625, %v5519_v31 }
0x1487   : > { %v5563_v30 = vadd.f32 1e-06, %v5549_v11 }
0x1488   : > { %v5528_v17 = vpop.xlane.xlu0 %5527 }
0x1489   : > { %6626 = vrsqrt.f32 %v5563_v30  ;;  %v5552_v59 = vmul.f32 0.015625, %v5528_v17 }
0x148b   : > { %v5566_v0 = vadd.f32 1e-06, %v5552_v59 }
0x148c   : > { %v5534_v57 = vpop.xlane.xlu0 %5533 }
0x148d   : > { %6628 = vrsqrt.f32 %v5566_v0  ;;  %v5554_v23 = vmul.f32 0.015625, %v5534_v57 }
0x148e   : > { %v6623_v13 = vpop.eup %6622 }
0x148f   : > { %v5587_v36 = vmul.f32 %v6623_v13, %v11067_v41  ;;  %v5568_v63 = vadd.f32 1e-06, %v5554_v23 }
0x1490   : > { %v5540_v54 = vpop.xlane.xlu0 %5539 }
0x1491   : > { %v5607_v62 = vmul.f32 %v11116_v25, %v5587_v36  ;;  %6630 = vrsqrt.f32 %v5568_v63  ;;  %v5556_v35 = vmul.f32 0.015625, %v5540_v54 }
0x1492   : > { %v6625_v21 = vpop.eup %6624 }
0x1493   : > { %v5627_v10 = vadd.f32 %v11126_v12, %v5607_v62  ;;  %v5589_v29 = vmul.f32 %v6625_v21, %v11072_v51  ;;  %v5570_v58 = vadd.f32 1e-06, %v5556_v35 }
0x1495   : > { %5641 = vst.msk [vmem:[%s11300_s23 + $0x8] sm:$0xff] %vm1028_vm1, %v5627_v10  ;;  %v5609_v39 = vmul.f32 %v11116_v25, %v5589_v29  ;;  %6632 = vrsqrt.f32 %v5570_v58  ;;  %v5755_v58 = vld [vmem:[%s11866_s13] sm:$0x1] }
0x1496   : > { %v6627_v41 = vpop.eup %6626 }
0x1497   : > { %v5629_v56 = vadd.f32 %v11126_v12, %v5609_v39  ;;  %v5591_v32 = vmul.f32 %v6627_v41, %v11078_v43  ;;  %v5756_v39 = vadd.f32 1e-05, %v5755_v58  ;;  %v6084_v41 = vld [vmem:[%s11867_s15] ss:$0 sm:$0xff] }
0x1499   : > { %5643 = vst.msk [vmem:[%s11300_s23 + $0x18] sm:$0xff] %vm1028_vm1, %v5629_v56  ;;  %v5611_v51 = vmul.f32 %v11116_v25, %v5591_v32  ;;  %v11869_v32 = vld [vmem:[#allocation7_spill] sm:$0xff] }
0x149a   : > { %v6629_v53 = vpop.eup %6628 }
0x149b   : > { %v5631_v27 = vadd.f32 %v11126_v12, %v5611_v51  ;;  %v5594_v45 = vmul.f32 %v6629_v53, %v11084_v15 }
0x149d   : > { %5645 = vst.msk [vmem:[%s11300_s23 + $0x28] sm:$0xff] %vm1028_vm1, %v5631_v27  ;;  %v5614_v20 = vmul.f32 %v11116_v25, %v5594_v45  ;;  %v6087_v45 = vld [vmem:[%s11870_s26] ss:$0 sm:$0xff] }
0x149e   : > { %v6631_v43 = vpop.eup %6630 }
0x149f   : > { %v5634_v26 = vadd.f32 %v11126_v12, %v5614_v20  ;;  %v5596_v60 = vmul.f32 %v6631_v43, %v11090_v7  ;;  %v6088_v43 = vld [vmem:[%s11871_s29] ss:$0 sm:$0xff] }
0x14a1   : > { %5648 = vst.msk [vmem:[%s11300_s23 + $0x40] sm:$0xff] %vm1028_vm1, %v5634_v26  ;;  %v5616_v44 = vmul.f32 %v11116_v25, %v5596_v60 }
0x14a2   : > { %v6633_v15 = vpop.eup %6632 }
0x14a3   : > { %v5636_v28 = vadd.f32 %v11126_v12, %v5616_v44  ;;  %v5598_v16 = vmul.f32 %v6633_v15, %v11096_v46  ;;  %v6089_v15 = vld [vmem:[#allocation2] ss:$0 sm:$0xff] }
0x14a5   : > { %5650 = vst.msk [vmem:[%s11300_s23 + $0x50] sm:$0xff] %vm1028_vm1, %v5636_v28  ;;  %v5618_v1 = vmul.f32 %v11116_v25, %v5598_v16 }
0x14a7   : > { %v5638_v7 = vadd.f32 %v11126_v12, %v5618_v1 }
0x14a9   : > { %5652 = vst.msk [vmem:[%s11300_s23 + $0x60] sm:$0xff] %vm1028_vm1, %v5638_v7 }
0x14f6   : > { %v5510_v24 = vpop.xlane.xlu1 %5509 }
0x14f7   : > { %v5546_v8 = vmul.f32 0.015625, %v5510_v24 }
0x14f9   : > { %v5560_v5 = vadd.f32 1e-06, %v5546_v8 }
0x14fa   : > { %v5516_v9 = vpop.xlane.xlu1 %5515 }
0x14fb   : > { %6634 = vrsqrt.f32 %v5560_v5  ;;  %v5548_v46 = vmul.f32 0.015625, %v5516_v9 }
0x14fd   : > { %v5562_v55 = vadd.f32 1e-06, %v5548_v46 }
0x14fe   : > { %v5522_v18 = vpop.xlane.xlu1 %5521 }
0x14ff   : > { %6636 = vrsqrt.f32 %v5562_v55  ;;  %v5550_v38 = vmul.f32 0.015625, %v5522_v18 }
0x1501   : > { %v5564_v2 = vadd.f32 1e-06, %v5550_v38 }
0x1502   : > { %v5531_v52 = vpop.xlane.xlu1 %5530 }
0x1503   : > { %6638 = vrsqrt.f32 %v5564_v2  ;;  %v5553_v34 = vmul.f32 0.015625, %v5531_v52 }
0x1505   : > { %v5567_v19 = vadd.f32 1e-06, %v5553_v34 }
0x1506   : > { %v5537_v42 = vpop.xlane.xlu1 %5536 }
0x1507   : > { %6640 = vrsqrt.f32 %v5567_v19  ;;  %v5555_v40 = vmul.f32 0.015625, %v5537_v42 }
0x1508   : > { %v6635_v50 = vpop.eup %6634 }
0x1509   : > { %v5588_v37 = vmul.f32 %v6635_v50, %v11103_v48  ;;  %v5569_v49 = vadd.f32 1e-06, %v5555_v40 }
0x150a   : > { %v5543_v4 = vpop.xlane.xlu1 %5542 }
0x150b   : > { %v5608_v14 = vmul.f32 %v11116_v25, %v5588_v37  ;;  %6642 = vrsqrt.f32 %v5569_v49  ;;  %v5557_v61 = vmul.f32 0.015625, %v5543_v4 }
0x150c   : > { %v6637_v31 = vpop.eup %6636 }
0x150d   : > { %v5628_v11 = vadd.f32 %v11126_v12, %v5608_v14  ;;  %v5590_v30 = vmul.f32 %v6637_v31, %v11108_v33  ;;  %v5571_v17 = vadd.f32 1e-06, %v5557_v61 }
0x150f   : > { %5642 = vst.msk [vmem:[%s11300_s23 + $0x10] sm:$0xff] %vm1028_vm1, %v5628_v11  ;;  %v5610_v59 = vmul.f32 %v11116_v25, %v5590_v30  ;;  %6644 = vrsqrt.f32 %v5571_v17 }
0x1510   : > { %v6639_v48 = vpop.eup %6638  ;;  %6646 = vrsqrt.f32 %v5756_v39 }
0x1511   : > { %v5630_v0 = vadd.f32 %v11126_v12, %v5610_v59  ;;  %v5592_v57 = vmul.f32 %v6639_v48, %v11120_v6 }
0x1513   : > { %5644 = vst.msk [vmem:[%s11300_s23 + $0x20] sm:$0xff] %vm1028_vm1, %v5630_v0  ;;  %v5612_v33 = vmul.f32 %v11116_v25, %v5592_v57 }
0x1514   : > { %v6641_v23 = vpop.eup %6640 }
0x1515   : > { %v5632_v13 = vadd.f32 %v11126_v12, %v5612_v33  ;;  %v5595_v36 = vmul.f32 %v6641_v23, %v11134_v3 }
0x1517   : > { %5646 = vst.msk [vmem:[%s11300_s23 + $0x30] sm:$0xff] %vm1028_vm1, %v5632_v13  ;;  %v5615_v63 = vmul.f32 %v11116_v25, %v5595_v36 }
0x1518   : > { %v6643_v6 = vpop.eup %6642 }
0x1519   : > { %v5635_v54 = vadd.f32 %v11126_v12, %v5615_v63  ;;  %v5597_v62 = vmul.f32 %v6643_v6, %v11146_v22 }
0x151b   : > { %5649 = vst.msk [vmem:[%s11300_s23 + $0x48] sm:$0xff] %vm1028_vm1, %v5635_v54  ;;  %v5617_v35 = vmul.f32 %v11116_v25, %v5597_v62 }
0x151c   : > { %v6645_v3 = vpop.eup %6644 }
0x151d   : > { %v5637_v21 = vadd.f32 %v11126_v12, %v5617_v35  ;;  %v5599_v10 = vmul.f32 %v6645_v3, %v11157_v47  ;;  %v6647_v47 = vpop.eup %6646 }
0x151e   : > { %v5762_v51 = vrot.slane %v6647_v47, %v11869_v32 }
0x151f   : > { %5651 = vst.msk [vmem:[%s11300_s23 + $0x58] sm:$0xff] %vm1028_vm1, %v5637_v21  ;;  %v5619_v29 = vmul.f32 %v11116_v25, %v5599_v10  ;;  %v6086_v25 = vld [vmem:[%s11868_s24] ss:$0 sm:$0xff] }
0x1521   : > { %v5639_v22 = vadd.f32 %v11126_v12, %v5619_v29 }
0x1523   : > { %5653 = vst.msk [vmem:[%s11300_s23 + $0x68] sm:$0xff] %vm1028_vm1, %v5639_v22  ;;  %vm5867_vm1 = vcmask 1024  }
0x153b   : > { %v5743_v56 = vpop.f32.mrf.mxu0 }
0x153c   : > { %v5744_v12 = vadd.f32 %v6084_v41, %v5743_v56 }
0x153d   : > { %v6260_v53 = vpop.f32.mrf.mxu0 }
0x153e   : > { %v5754_v27 = vsub.f32 %v5744_v12, %v6086_v25 }
0x1540   : > { %v5764_v20 = vmul.f32 %v5762_v51, %v5754_v27 }
0x1542   : > { %v5772_v26 = vmul.f32 %v6087_v45, %v5764_v20 }
0x1544   : > { %v5780_v60 = vadd.f32 %v6088_v43, %v5772_v26 }
0x1546   : > { %v5781_v44 = vmax.f32 %v5780_v60, 0.0 }
0x1548   : > { %6266 = vmatmul.mubr.msk.f32.vlgmr.msra.gmra.mxu1 %vm2596_vm10, %v5781_v44 }
0x1608   : > { %v5860_v28 = vpop.f32.mrf.mxu1 }
0x1609   : > { %v5861_v16 = vadd.f32 %v6089_v15, %v5860_v28 }
0x160a   : > { %v6267_v1 = vpop.f32.mrf.mxu1 }
0x160b   : > { %6648 = vtanh.f32 %v5861_v16 }
0x1618   : > { %v6649_v7 = vpop.eup %6648 }
0x1619   : > { %v5865_v24 = vadd.f32 1.0, %v6649_v7 }
0x161b   : > { %v5866_v8 = vmul.f32 0.5, %v5865_v24 }
0x161d   : > { %5868 = vst.msk [vmem:[%s11872_s2] sm:$0x3] %vm5867_vm1, %v5866_v8 }
0x161e PF: > { %s11873_s5 = sld [smem:[#allocation3_spill]] }
0x1624   : > { %s37_s27 = sadd.s32 1, %s11873_s5  }
0x1625   : > { %p34_p7 = scmp.ge.s32.totalorder %s37_s27, 5  }
0x1627   :  { %36 = sbr.rel (!%p34_p7) target bundleno = 20 (0x14), region = 191 }

</bundles_post_ra>
